<compile_context>
chip_gen: v6e
topology: v6e:2x2x1
jax: 0.10.0
libtpu: 0.0.40
codegen_flags: <defaults>
</compile_context>

<pallas_src>
import functools
import math

import jax
import jax.numpy as jnp
from jax.experimental import pallas as pl
from jax.experimental.pallas import tpu as pltpu

OUT_LANES = 128  # lane-dense padded head width (>= output_dim, multiple of 128)


# -----------------------------------------------------------------------------
# Parameter / eps helpers
# -----------------------------------------------------------------------------
def init_bayesian_layer(key, input_dim, output_dim):
    """Matches BayesianLayer.__init__: uniform(-sqrt(k), sqrt(k)) mus, -6.0 sigmas."""
    k = 1.0 / input_dim
    sk = math.sqrt(k)
    k_w, k_b = jax.random.split(key)
    W_mu = jax.random.uniform(k_w, (input_dim, output_dim), jnp.float32, -sk, sk)
    b_mu = jax.random.uniform(k_b, (output_dim,), jnp.float32, -sk, sk)
    W_sigma = jnp.full((input_dim, output_dim), -6.0, jnp.float32)
    b_sigma = jnp.full((output_dim,), -6.0, jnp.float32)
    return dict(W_mu=W_mu, W_sigma=W_sigma, b_mu=b_mu, b_sigma=b_sigma)


def _prep_layer(p, pad_to=None):
    """Precompute scale = exp(0.5*sigma) once (shared by all MC samples -> no EUP in the
    kernel).  Biases become [1, out].  Head padding is applied AFTER the exp so padded
    scale/mu columns are exactly 0 (padded outputs are exactly 0)."""
    W_mu = p["W_mu"]
    W_scale = jnp.exp(0.5 * p["W_sigma"])
    b_mu = p["b_mu"].reshape(1, -1)
    b_scale = jnp.exp(0.5 * p["b_sigma"]).reshape(1, -1)
    if pad_to is not None:
        pad = pad_to - W_mu.shape[1]
        if pad > 0:
            W_mu = jnp.pad(W_mu, ((0, 0), (0, pad)))
            W_scale = jnp.pad(W_scale, ((0, 0), (0, pad)))
            b_mu = jnp.pad(b_mu, ((0, 0), (0, pad)))
            b_scale = jnp.pad(b_scale, ((0, 0), (0, pad)))
    return W_mu, W_scale, b_mu, b_scale


def sample_eps(key, input_dim, hidden_dim, output_dim, num_samples):
    """Standard-normal eps for weight-space sampling (same role as torch.randn_like)."""
    ks = jax.random.split(key, 6)
    S = num_samples
    return {
        "W1": jax.random.normal(ks[0], (S, input_dim, hidden_dim), jnp.float32),
        "b1": jax.random.normal(ks[1], (S, 1, hidden_dim), jnp.float32),
        "W2": jax.random.normal(ks[2], (S, hidden_dim, hidden_dim), jnp.float32),
        "b2": jax.random.normal(ks[3], (S, 1, hidden_dim), jnp.float32),
        "W3": jax.random.normal(ks[4], (S, hidden_dim, output_dim), jnp.float32),
        "b3": jax.random.normal(ks[5], (S, 1, output_dim), jnp.float32),
    }


# -----------------------------------------------------------------------------
# Fused MC forward kernel.
#   grid = (num_blocks,), "parallel"; each step handles s_local samples with a
#   statically unrolled loop.  mu/scale inputs use constant index_maps (DMA'd once);
#   only the eps blocks and the output block change per grid step.
# -----------------------------------------------------------------------------
def _mc_forward_kernel(x_ref,
                       w1m_ref, w1s_ref, b1m_ref, b1s_ref,
                       w2m_ref, w2s_ref, b2m_ref, b2s_ref,
                       w3m_ref, w3s_ref, b3m_ref, b3s_ref,
                       ew1_ref, eb1_ref, ew2_ref, eb2_ref, ew3_ref, eb3_ref,
                       out_ref, w1_stack_ref, *, s_local, hd, batch):
    # ---- layer 1: stack the s_local sampled W1's and run ONE lane-dense MXU pass ----
    W1m, W1s = w1m_ref[...], w1s_ref[...]
    for s in range(s_local):
        c0, c1 = s * hd, (s + 1) * hd
        w1_stack_ref[:, c0:c1] = W1m + W1s * ew1_ref[:, c0:c1]   # pure VPU FMA
    z1_all = jnp.dot(x_ref[...], w1_stack_ref[...],
                     preferred_element_type=jnp.float32)          # [B, s_local*hd]

    b1m, b1s = b1m_ref[...], b1s_ref[...]
    W2m, W2s = w2m_ref[...], w2s_ref[...]
    b2m, b2s = b2m_ref[...], b2s_ref[...]
    W3m, W3s = w3m_ref[...], w3s_ref[...]
    b3m, b3s = b3m_ref[...], b3s_ref[...]

    # ---- layers 2 & 3 per sample (statically unrolled; slots overlap across samples) ----
    for s in range(s_local):
        c0, c1 = s * hd, (s + 1) * hd
        z1 = jnp.maximum(z1_all[:, c0:c1] + (b1m + b1s * eb1_ref[s]), 0.0)
        W2 = W2m + W2s * ew2_ref[s]
        z2 = jnp.maximum(jnp.dot(z1, W2, preferred_element_type=jnp.float32)
                         + (b2m + b2s * eb2_ref[s]), 0.0)
        W3 = W3m + W3s * ew3_ref[s]
        y = (jnp.dot(z2, W3, preferred_element_type=jnp.float32)
             + (b3m + b3s * eb3_ref[s]))
        out_ref[s * batch:(s + 1) * batch, :] = y.astype(out_ref.dtype)


# -----------------------------------------------------------------------------
# Wrappers
# -----------------------------------------------------------------------------
def discriminative_model_forward_mc(x_nchw, params, eps):
    """num_samples reparameterized forward passes with externally supplied eps.

    Returns y of shape [num_samples, B, output_dim]."""
    B = x_nchw.shape[0]
    x = x_nchw.reshape(B, -1)                 # same as torch .view(batch_size, -1)
    D_in = x.shape[1]
    Hd = params["encoder1"]["W_mu"].shape[1]
    out_dim = params["head"]["W_mu"].shape[1]
    S = eps["W1"].shape[0]

    e1 = _prep_layer(params["encoder1"])
    e2 = _prep_layer(params["encoder2"])
    head = _prep_layer(params["head"], pad_to=OUT_LANES)

    # Layer-1 eps laid out [D_in, S*Hd]: sample s lives in columns [s*Hd, (s+1)*Hd).
    ew1 = jnp.transpose(eps["W1"], (1, 0, 2)).reshape(D_in, S * Hd)
    eb1 = eps["b1"]
    ew2 = eps["W2"]
    eb2 = eps["b2"]
    pad = OUT_LANES - out_dim
    ew3 = jnp.pad(eps["W3"], ((0, 0), (0, 0), (0, pad)))   # pad cols multiply zero scale
    eb3 = jnp.pad(eps["b3"], ((0, 0), (0, 0), (0, pad)))

    # Grid: 1 step on single-TC chips (v5e/v6e); 2 "parallel" steps when the halves stay
    # (8,128)-tileable, so v7x can shard the two sample-halves across its TensorCores.
    num_blocks = 1
    if (S % 2 == 0
            and ((S // 2) * Hd) % 128 == 0
            and ((S // 2) * B) % 8 == 0):
        num_blocks = 2
    s_local = S // num_blocks

    def const2(shape):
        return pl.BlockSpec(shape, lambda g: (0, 0))   # fetched into VMEM once, reused

    in_specs = [
        const2((B, D_in)),
        const2((D_in, Hd)), const2((D_in, Hd)), const2((1, Hd)), const2((1, Hd)),
        const2((Hd, Hd)), const2((Hd, Hd)), const2((1, Hd)), const2((1, Hd)),
        const2((Hd, OUT_LANES)), const2((Hd, OUT_LANES)),
        const2((1, OUT_LANES)), const2((1, OUT_LANES)),
        pl.BlockSpec((D_in, s_local * Hd), lambda g: (0, g)),
        pl.BlockSpec((s_local, 1, Hd), lambda g: (g, 0, 0)),
        pl.BlockSpec((s_local, Hd, Hd), lambda g: (g, 0, 0)),
        pl.BlockSpec((s_local, 1, Hd), lambda g: (g, 0, 0)),
        pl.BlockSpec((s_local, Hd, OUT_LANES), lambda g: (g, 0, 0)),
        pl.BlockSpec((s_local, 1, OUT_LANES), lambda g: (g, 0, 0)),
    ]
    out_spec = pl.BlockSpec((s_local * B, OUT_LANES), lambda g: (g, 0))

    kernel = functools.partial(_mc_forward_kernel, s_local=s_local, hd=Hd, batch=B)

    y_pad = pl.pallas_call(
        kernel,
        out_shape=jax.ShapeDtypeStruct((S * B, OUT_LANES), jnp.float32),
        grid_spec=pltpu.PrefetchScalarGridSpec(
            num_scalar_prefetch=0,
            grid=(num_blocks,),
            in_specs=in_specs,
            out_specs=out_spec,
            scratch_shapes=[pltpu.VMEM((D_in, s_local * Hd), jnp.float32)],
        ),
        compiler_params=pltpu.CompilerParams(
            dimension_semantics=("parallel",),   # v7x: shard sample-halves across TCs
        ),
    )(x, *e1, *e2, *head, ew1, eb1, ew2, eb2, ew3, eb3)

    return y_pad.reshape(S, B, OUT_LANES)[:, :, :out_dim]


def discriminative_model_forward(x_nchw, params, key):
    """Single stochastic forward pass (== DiscriminativeModel.forward)."""
    B = x_nchw.shape[0]
    D_in = x_nchw.reshape(B, -1).shape[1]
    Hd = params["encoder1"]["W_mu"].shape[1]
    out_dim = params["head"]["W_mu"].shape[1]
    eps = sample_eps(key, D_in, Hd, out_dim, 1)
    return discriminative_model_forward_mc(x_nchw, params, eps)[0]


if __name__ == "__main__":
    # MNIST-like small shapes consistent with the module.
    B, C, H, W = 2, 4, 16, 16
    input_dim = C * H * W          # 1024
    hidden_dim = 32
    output_dim = 10
    num_mc_samples = 8

    key = jax.random.PRNGKey(0)
    kx, k1, k2, k3, ke, ks = jax.random.split(key, 6)

    x = jax.random.normal(kx, (B, C, H, W), jnp.float32)
    params = {
        "encoder1": init_bayesian_layer(k1, input_dim, hidden_dim),
        "encoder2": init_bayesian_layer(k2, hidden_dim, hidden_dim),
        "head": init_bayesian_layer(k3, hidden_dim, output_dim),
    }

    # ---- fused Monte-Carlo forward (8 samples, single/dual grid step) ------------
    eps = sample_eps(ke, input_dim, hidden_dim, output_dim, num_mc_samples)
    y_mc = discriminative_model_forward_mc(x, params, eps)
    jax.block_until_ready(y_mc)
    assert y_mc.shape == (num_mc_samples, B, output_dim)
    assert bool(jnp.all(jnp.isfinite(y_mc)))

    # ---- correctness vs pure-JAX reference using the SAME eps --------------------
    def ref_layer(z, p, eW, eb):
        Wm = p["W_mu"] + jnp.exp(0.5 * p["W_sigma"]) * eW
        bm = p["b_mu"] + jnp.exp(0.5 * p["b_sigma"]) * eb
        return z @ Wm + bm

    x2d = x.reshape(B, -1)
    y_ref = []
    for s in range(num_mc_samples):
        z = jax.nn.relu(ref_layer(x2d, params["encoder1"], eps["W1"][s], eps["b1"][s, 0]))
        z = jax.nn.relu(ref_layer(z, params["encoder2"], eps["W2"][s], eps["b2"][s, 0]))
        y_ref.append(ref_layer(z, params["head"], eps["W3"][s], eps["b3"][s, 0]))
    y_ref = jnp.stack(y_ref)
    assert jnp.allclose(y_mc, y_ref, atol=2e-3, rtol=2e-3), \
        float(jnp.max(jnp.abs(y_mc - y_ref)))

    # Different samples -> distinct draws; same eps -> deterministic result.
    assert float(jnp.max(jnp.abs(y_mc[0] - y_mc[1]))) > 0.0
    y_mc2 = discriminative_model_forward_mc(x, params, eps)
    jax.block_until_ready(y_mc2)
    assert jnp.allclose(y_mc, y_mc2)

    # ---- single-sample forward (the module's forward()) --------------------------
    y1 = discriminative_model_forward(x, params, ks)
    jax.block_until_ready(y1)
    assert y1.shape == (B, output_dim)
    assert bool(jnp.all(jnp.isfinite(y1)))

    print("KERNEL_OK")
</pallas_src>

<mosaic_0001>
module attributes {stable_mosaic.version = 11 : i64} {
  func.func @_mc_forward_kernel(%arg0: i32, %arg1: memref<2x1024xf32, #tpu.memory_space<vmem>>, %arg2: memref<1024x32xf32, #tpu.memory_space<vmem>>, %arg3: memref<1024x32xf32, #tpu.memory_space<vmem>>, %arg4: memref<1x32xf32, #tpu.memory_space<vmem>>, %arg5: memref<1x32xf32, #tpu.memory_space<vmem>>, %arg6: memref<32x32xf32, #tpu.memory_space<vmem>>, %arg7: memref<32x32xf32, #tpu.memory_space<vmem>>, %arg8: memref<1x32xf32, #tpu.memory_space<vmem>>, %arg9: memref<1x32xf32, #tpu.memory_space<vmem>>, %arg10: memref<32x128xf32, #tpu.memory_space<vmem>>, %arg11: memref<32x128xf32, #tpu.memory_space<vmem>>, %arg12: memref<1x128xf32, #tpu.memory_space<vmem>>, %arg13: memref<1x128xf32, #tpu.memory_space<vmem>>, %arg14: memref<1024x128xf32, #tpu.memory_space<vmem>>, %arg15: memref<4x1x32xf32, #tpu.memory_space<vmem>>, %arg16: memref<4x32x32xf32, #tpu.memory_space<vmem>>, %arg17: memref<4x1x32xf32, #tpu.memory_space<vmem>>, %arg18: memref<4x32x128xf32, #tpu.memory_space<vmem>>, %arg19: memref<4x1x128xf32, #tpu.memory_space<vmem>>, %arg20: memref<8x128xf32, #tpu.memory_space<vmem>>, %arg21: memref<1024x128xf32, #tpu.memory_space<vmem>>) attributes {dimension_semantics = [#tpu.dimension_semantics<parallel>], iteration_bounds = array<i64: 2>, scalar_prefetch = 0 : i64, scratch_operands = 1 : i64, tpu.core_type = #tpu.core_type<tc>, window_params = [{pipeline_mode = #tpu.pipeline_mode<synchronous>, transform_indices = @transform_0, window_bounds = array<i64: 2, 1024>}, {pipeline_mode = #tpu.pipeline_mode<synchronous>, transform_indices = @transform_1, window_bounds = array<i64: 1024, 32>}, {pipeline_mode = #tpu.pipeline_mode<synchronous>, transform_indices = @transform_2, window_bounds = array<i64: 1024, 32>}, {pipeline_mode = #tpu.pipeline_mode<synchronous>, transform_indices = @transform_3, window_bounds = array<i64: 1, 32>}, {pipeline_mode = #tpu.pipeline_mode<synchronous>, transform_indices = @transform_4, window_bounds = array<i64: 1, 32>}, {pipeline_mode = #tpu.pipeline_mode<synchronous>, transform_indices = @transform_5, window_bounds = array<i64: 32, 32>}, {pipeline_mode = #tpu.pipeline_mode<synchronous>, transform_indices = @transform_6, window_bounds = array<i64: 32, 32>}, {pipeline_mode = #tpu.pipeline_mode<synchronous>, transform_indices = @transform_7, window_bounds = array<i64: 1, 32>}, {pipeline_mode = #tpu.pipeline_mode<synchronous>, transform_indices = @transform_8, window_bounds = array<i64: 1, 32>}, {pipeline_mode = #tpu.pipeline_mode<synchronous>, transform_indices = @transform_9, window_bounds = array<i64: 32, 128>}, {pipeline_mode = #tpu.pipeline_mode<synchronous>, transform_indices = @transform_10, window_bounds = array<i64: 32, 128>}, {pipeline_mode = #tpu.pipeline_mode<synchronous>, transform_indices = @transform_11, window_bounds = array<i64: 1, 128>}, {pipeline_mode = #tpu.pipeline_mode<synchronous>, transform_indices = @transform_12, window_bounds = array<i64: 1, 128>}, {transform_indices = @transform_13, window_bounds = array<i64: 1024, 128>}, {transform_indices = @transform_14, window_bounds = array<i64: 4, 1, 32>}, {transform_indices = @transform_15, window_bounds = array<i64: 4, 32, 32>}, {transform_indices = @transform_16, window_bounds = array<i64: 4, 1, 32>}, {transform_indices = @transform_17, window_bounds = array<i64: 4, 32, 128>}, {transform_indices = @transform_18, window_bounds = array<i64: 4, 1, 128>}, {transform_indices = @transform_19, window_bounds = array<i64: 8, 128>}]} {
    %c0 = arith.constant 0 : index
    %c0_0 = arith.constant 0 : index
    %0 = vector.load %arg2[%c0, %c0_0] : memref<1024x32xf32, #tpu.memory_space<vmem>>, vector<1024x32xf32>
    %c0_1 = arith.constant 0 : index
    %c0_2 = arith.constant 0 : index
    %1 = vector.load %arg3[%c0_1, %c0_2] : memref<1024x32xf32, #tpu.memory_space<vmem>>, vector<1024x32xf32>
    %c0_3 = arith.constant 0 : index
    %c0_4 = arith.constant 0 : index
    %2 = vector.load %arg14[%c0_3, %c0_4] : memref<1024x128xf32, #tpu.memory_space<vmem>>, vector<1024x32xf32>
    %3 = arith.mulf %1, %2 : vector<1024x32xf32>
    %4 = arith.addf %0, %3 : vector<1024x32xf32>
    %c0_5 = arith.constant 0 : index
    %c0_6 = arith.constant 0 : index
    %5 = vector.load %arg21[%c0_5, %c0_6] : memref<1024x128xf32, #tpu.memory_space<vmem>>, vector<1024x32xf32>
    tpu.vector_store %arg21[%c0_5, %c0_6], %4 {strides = array<i32>} : memref<1024x128xf32, #tpu.memory_space<vmem>>, vector<1024x32xf32>,
    %c0_7 = arith.constant 0 : index
    %c32 = arith.constant 32 : index
    %6 = vector.load %arg14[%c0_7, %c32] : memref<1024x128xf32, #tpu.memory_space<vmem>>, vector<1024x32xf32>
    %7 = arith.mulf %1, %6 : vector<1024x32xf32>
    %8 = arith.addf %0, %7 : vector<1024x32xf32>
    %c0_8 = arith.constant 0 : index
    %c32_9 = arith.constant 32 : index
    %9 = vector.load %arg21[%c0_8, %c32_9] : memref<1024x128xf32, #tpu.memory_space<vmem>>, vector<1024x32xf32>
    tpu.vector_store %arg21[%c0_8, %c32_9], %8 {strides = array<i32>} : memref<1024x128xf32, #tpu.memory_space<vmem>>, vector<1024x32xf32>,
    %c0_10 = arith.constant 0 : index
    %c64 = arith.constant 64 : index
    %10 = vector.load %arg14[%c0_10, %c64] : memref<1024x128xf32, #tpu.memory_space<vmem>>, vector<1024x32xf32>
    %11 = arith.mulf %1, %10 : vector<1024x32xf32>
    %12 = arith.addf %0, %11 : vector<1024x32xf32>
    %c0_11 = arith.constant 0 : index
    %c64_12 = arith.constant 64 : index
    %13 = vector.load %arg21[%c0_11, %c64_12] : memref<1024x128xf32, #tpu.memory_space<vmem>>, vector<1024x32xf32>
    tpu.vector_store %arg21[%c0_11, %c64_12], %12 {strides = array<i32>} : memref<1024x128xf32, #tpu.memory_space<vmem>>, vector<1024x32xf32>,
    %c0_13 = arith.constant 0 : index
    %c96 = arith.constant 96 : index
    %14 = vector.load %arg14[%c0_13, %c96] : memref<1024x128xf32, #tpu.memory_space<vmem>>, vector<1024x32xf32>
    %15 = arith.mulf %1, %14 : vector<1024x32xf32>
    %16 = arith.addf %0, %15 : vector<1024x32xf32>
    %c0_14 = arith.constant 0 : index
    %c96_15 = arith.constant 96 : index
    %17 = vector.load %arg21[%c0_14, %c96_15] : memref<1024x128xf32, #tpu.memory_space<vmem>>, vector<1024x32xf32>
    tpu.vector_store %arg21[%c0_14, %c96_15], %16 {strides = array<i32>} : memref<1024x128xf32, #tpu.memory_space<vmem>>, vector<1024x32xf32>,
    %c0_16 = arith.constant 0 : index
    %c0_17 = arith.constant 0 : index
    %18 = vector.load %arg1[%c0_16, %c0_17] : memref<2x1024xf32, #tpu.memory_space<vmem>>, vector<2x1024xf32>
    %c0_18 = arith.constant 0 : index
    %c0_19 = arith.constant 0 : index
    %19 = vector.load %arg21[%c0_18, %c0_19] : memref<1024x128xf32, #tpu.memory_space<vmem>>, vector<1024x128xf32>
    %cst = arith.constant dense<0.000000e+00> : vector<2x128xf32>
    %20 = tpu.matmul %18, %19, %cst {dimension_numbers = #tpu.dot_dimension_numbers<[1], [0], [0], [1], [0, 0, 1, 1], [], []>} : vector<2x1024xf32>, vector<1024x128xf32>, vector<2x128xf32> -> vector<2x128xf32>
    %c0_20 = arith.constant 0 : index
    %c0_21 = arith.constant 0 : index
    %21 = vector.load %arg4[%c0_20, %c0_21] : memref<1x32xf32, #tpu.memory_space<vmem>>, vector<1x32xf32>
    %c0_22 = arith.constant 0 : index
    %c0_23 = arith.constant 0 : index
    %22 = vector.load %arg5[%c0_22, %c0_23] : memref<1x32xf32, #tpu.memory_space<vmem>>, vector<1x32xf32>
    %c0_24 = arith.constant 0 : index
    %c0_25 = arith.constant 0 : index
    %23 = vector.load %arg6[%c0_24, %c0_25] : memref<32x32xf32, #tpu.memory_space<vmem>>, vector<32x32xf32>
    %c0_26 = arith.constant 0 : index
    %c0_27 = arith.constant 0 : index
    %24 = vector.load %arg7[%c0_26, %c0_27] : memref<32x32xf32, #tpu.memory_space<vmem>>, vector<32x32xf32>
    %c0_28 = arith.constant 0 : index
    %c0_29 = arith.constant 0 : index
    %25 = vector.load %arg8[%c0_28, %c0_29] : memref<1x32xf32, #tpu.memory_space<vmem>>, vector<1x32xf32>
    %c0_30 = arith.constant 0 : index
    %c0_31 = arith.constant 0 : index
    %26 = vector.load %arg9[%c0_30, %c0_31] : memref<1x32xf32, #tpu.memory_space<vmem>>, vector<1x32xf32>
    %c0_32 = arith.constant 0 : index
    %c0_33 = arith.constant 0 : index
    %27 = vector.load %arg10[%c0_32, %c0_33] : memref<32x128xf32, #tpu.memory_space<vmem>>, vector<32x128xf32>
    %c0_34 = arith.constant 0 : index
    %c0_35 = arith.constant 0 : index
    %28 = vector.load %arg11[%c0_34, %c0_35] : memref<32x128xf32, #tpu.memory_space<vmem>>, vector<32x128xf32>
    %c0_36 = arith.constant 0 : index
    %c0_37 = arith.constant 0 : index
    %29 = vector.load %arg12[%c0_36, %c0_37] : memref<1x128xf32, #tpu.memory_space<vmem>>, vector<1x128xf32>
    %c0_38 = arith.constant 0 : index
    %c0_39 = arith.constant 0 : index
    %30 = vector.load %arg13[%c0_38, %c0_39] : memref<1x128xf32, #tpu.memory_space<vmem>>, vector<1x128xf32>
    %31 = vector.extract_strided_slice %20 {offsets = [0, 0], sizes = [2, 32], strides = [1, 1]} : vector<2x128xf32> to vector<2x32xf32>
    %c0_40 = arith.constant 0 : index
    %c0_41 = arith.constant 0 : index
    %c0_42 = arith.constant 0 : index
    %32 = vector.load %arg15[%c0_40, %c0_41, %c0_42] : memref<4x1x32xf32, #tpu.memory_space<vmem>>, vector<1x1x32xf32>
    %33 = vector.shape_cast %32 : vector<1x1x32xf32> to vector<1x32xf32>
    %34 = arith.mulf %22, %33 : vector<1x32xf32>
    %35 = arith.addf %21, %34 : vector<1x32xf32>
    %36 = vector.broadcast %35 : vector<1x32xf32> to vector<2x32xf32>
    %37 = arith.addf %31, %36 : vector<2x32xf32>
    %cst_43 = arith.constant 0.000000e+00 : f32
    %38 = vector.broadcast %cst_43 : f32 to vector<2x32xf32>
    %39 = arith.maximumf %37, %38 : vector<2x32xf32>
    %c0_44 = arith.constant 0 : index
    %c0_45 = arith.constant 0 : index
    %c0_46 = arith.constant 0 : index
    %40 = vector.load %arg16[%c0_44, %c0_45, %c0_46] : memref<4x32x32xf32, #tpu.memory_space<vmem>>, vector<1x32x32xf32>
    %41 = vector.shape_cast %40 : vector<1x32x32xf32> to vector<32x32xf32>
    %42 = arith.mulf %24, %41 : vector<32x32xf32>
    %43 = arith.addf %23, %42 : vector<32x32xf32>
    %cst_47 = arith.constant dense<0.000000e+00> : vector<2x32xf32>
    %44 = tpu.matmul %39, %43, %cst_47 {dimension_numbers = #tpu.dot_dimension_numbers<[1], [0], [0], [1], [0, 0, 1, 1], [], []>} : vector<2x32xf32>, vector<32x32xf32>, vector<2x32xf32> -> vector<2x32xf32>
    %c0_48 = arith.constant 0 : index
    %c0_49 = arith.constant 0 : index
    %c0_50 = arith.constant 0 : index
    %45 = vector.load %arg17[%c0_48, %c0_49, %c0_50] : memref<4x1x32xf32, #tpu.memory_space<vmem>>, vector<1x1x32xf32>
    %46 = vector.shape_cast %45 : vector<1x1x32xf32> to vector<1x32xf32>
    %47 = arith.mulf %26, %46 : vector<1x32xf32>
    %48 = arith.addf %25, %47 : vector<1x32xf32>
    %49 = vector.broadcast %48 : vector<1x32xf32> to vector<2x32xf32>
    %50 = arith.addf %44, %49 : vector<2x32xf32>
    %cst_51 = arith.constant 0.000000e+00 : f32
    %51 = vector.broadcast %cst_51 : f32 to vector<2x32xf32>
    %52 = arith.maximumf %50, %51 : vector<2x32xf32>
    %c0_52 = arith.constant 0 : index
    %c0_53 = arith.constant 0 : index
    %c0_54 = arith.constant 0 : index
    %53 = vector.load %arg18[%c0_52, %c0_53, %c0_54] : memref<4x32x128xf32, #tpu.memory_space<vmem>>, vector<1x32x128xf32>
    %54 = vector.shape_cast %53 : vector<1x32x128xf32> to vector<32x128xf32>
    %55 = arith.mulf %28, %54 : vector<32x128xf32>
    %56 = arith.addf %27, %55 : vector<32x128xf32>
    %cst_55 = arith.constant dense<0.000000e+00> : vector<2x128xf32>
    %57 = tpu.matmul %52, %56, %cst_55 {dimension_numbers = #tpu.dot_dimension_numbers<[1], [0], [0], [1], [0, 0, 1, 1], [], []>} : vector<2x32xf32>, vector<32x128xf32>, vector<2x128xf32> -> vector<2x128xf32>
    %c0_56 = arith.constant 0 : index
    %c0_57 = arith.constant 0 : index
    %c0_58 = arith.constant 0 : index
    %58 = vector.load %arg19[%c0_56, %c0_57, %c0_58] : memref<4x1x128xf32, #tpu.memory_space<vmem>>, vector<1x1x128xf32>
    %59 = vector.shape_cast %58 : vector<1x1x128xf32> to vector<1x128xf32>
    %60 = arith.mulf %30, %59 : vector<1x128xf32>
    %61 = arith.addf %29, %60 : vector<1x128xf32>
    %62 = vector.broadcast %61 : vector<1x128xf32> to vector<2x128xf32>
    %63 = arith.addf %57, %62 : vector<2x128xf32>
    %c0_59 = arith.constant 0 : index
    %c0_60 = arith.constant 0 : index
    %64 = vector.load %arg20[%c0_59, %c0_60] : memref<8x128xf32, #tpu.memory_space<vmem>>, vector<2x128xf32>
    tpu.vector_store %arg20[%c0_59, %c0_60], %63 {strides = array<i32>} : memref<8x128xf32, #tpu.memory_space<vmem>>, vector<2x128xf32>,
    %65 = vector.extract_strided_slice %20 {offsets = [0, 32], sizes = [2, 32], strides = [1, 1]} : vector<2x128xf32> to vector<2x32xf32>
    %c1 = arith.constant 1 : index
    %c0_61 = arith.constant 0 : index
    %c0_62 = arith.constant 0 : index
    %66 = vector.load %arg15[%c1, %c0_61, %c0_62] : memref<4x1x32xf32, #tpu.memory_space<vmem>>, vector<1x1x32xf32>
    %67 = vector.shape_cast %66 : vector<1x1x32xf32> to vector<1x32xf32>
    %68 = arith.mulf %22, %67 : vector<1x32xf32>
    %69 = arith.addf %21, %68 : vector<1x32xf32>
    %70 = vector.broadcast %69 : vector<1x32xf32> to vector<2x32xf32>
    %71 = arith.addf %65, %70 : vector<2x32xf32>
    %cst_63 = arith.constant 0.000000e+00 : f32
    %72 = vector.broadcast %cst_63 : f32 to vector<2x32xf32>
    %73 = arith.maximumf %71, %72 : vector<2x32xf32>
    %c1_64 = arith.constant 1 : index
    %c0_65 = arith.constant 0 : index
    %c0_66 = arith.constant 0 : index
    %74 = vector.load %arg16[%c1_64, %c0_65, %c0_66] : memref<4x32x32xf32, #tpu.memory_space<vmem>>, vector<1x32x32xf32>
    %75 = vector.shape_cast %74 : vector<1x32x32xf32> to vector<32x32xf32>
    %76 = arith.mulf %24, %75 : vector<32x32xf32>
    %77 = arith.addf %23, %76 : vector<32x32xf32>
    %cst_67 = arith.constant dense<0.000000e+00> : vector<2x32xf32>
    %78 = tpu.matmul %73, %77, %cst_67 {dimension_numbers = #tpu.dot_dimension_numbers<[1], [0], [0], [1], [0, 0, 1, 1], [], []>} : vector<2x32xf32>, vector<32x32xf32>, vector<2x32xf32> -> vector<2x32xf32>
    %c1_68 = arith.constant 1 : index
    %c0_69 = arith.constant 0 : index
    %c0_70 = arith.constant 0 : index
    %79 = vector.load %arg17[%c1_68, %c0_69, %c0_70] : memref<4x1x32xf32, #tpu.memory_space<vmem>>, vector<1x1x32xf32>
    %80 = vector.shape_cast %79 : vector<1x1x32xf32> to vector<1x32xf32>
    %81 = arith.mulf %26, %80 : vector<1x32xf32>
    %82 = arith.addf %25, %81 : vector<1x32xf32>
    %83 = vector.broadcast %82 : vector<1x32xf32> to vector<2x32xf32>
    %84 = arith.addf %78, %83 : vector<2x32xf32>
    %cst_71 = arith.constant 0.000000e+00 : f32
    %85 = vector.broadcast %cst_71 : f32 to vector<2x32xf32>
    %86 = arith.maximumf %84, %85 : vector<2x32xf32>
    %c1_72 = arith.constant 1 : index
    %c0_73 = arith.constant 0 : index
    %c0_74 = arith.constant 0 : index
    %87 = vector.load %arg18[%c1_72, %c0_73, %c0_74] : memref<4x32x128xf32, #tpu.memory_space<vmem>>, vector<1x32x128xf32>
    %88 = vector.shape_cast %87 : vector<1x32x128xf32> to vector<32x128xf32>
    %89 = arith.mulf %28, %88 : vector<32x128xf32>
    %90 = arith.addf %27, %89 : vector<32x128xf32>
    %cst_75 = arith.constant dense<0.000000e+00> : vector<2x128xf32>
    %91 = tpu.matmul %86, %90, %cst_75 {dimension_numbers = #tpu.dot_dimension_numbers<[1], [0], [0], [1], [0, 0, 1, 1], [], []>} : vector<2x32xf32>, vector<32x128xf32>, vector<2x128xf32> -> vector<2x128xf32>
    %c1_76 = arith.constant 1 : index
    %c0_77 = arith.constant 0 : index
    %c0_78 = arith.constant 0 : index
    %92 = vector.load %arg19[%c1_76, %c0_77, %c0_78] : memref<4x1x128xf32, #tpu.memory_space<vmem>>, vector<1x1x128xf32>
    %93 = vector.shape_cast %92 : vector<1x1x128xf32> to vector<1x128xf32>
    %94 = arith.mulf %30, %93 : vector<1x128xf32>
    %95 = arith.addf %29, %94 : vector<1x128xf32>
    %96 = vector.broadcast %95 : vector<1x128xf32> to vector<2x128xf32>
    %97 = arith.addf %91, %96 : vector<2x128xf32>
    %c2 = arith.constant 2 : index
    %c0_79 = arith.constant 0 : index
    %98 = vector.load %arg20[%c2, %c0_79] : memref<8x128xf32, #tpu.memory_space<vmem>>, vector<2x128xf32>
    tpu.vector_store %arg20[%c2, %c0_79], %97 {strides = array<i32>} : memref<8x128xf32, #tpu.memory_space<vmem>>, vector<2x128xf32>,
    %99 = vector.extract_strided_slice %20 {offsets = [0, 64], sizes = [2, 32], strides = [1, 1]} : vector<2x128xf32> to vector<2x32xf32>
    %c2_80 = arith.constant 2 : index
    %c0_81 = arith.constant 0 : index
    %c0_82 = arith.constant 0 : index
    %100 = vector.load %arg15[%c2_80, %c0_81, %c0_82] : memref<4x1x32xf32, #tpu.memory_space<vmem>>, vector<1x1x32xf32>
    %101 = vector.shape_cast %100 : vector<1x1x32xf32> to vector<1x32xf32>
    %102 = arith.mulf %22, %101 : vector<1x32xf32>
    %103 = arith.addf %21, %102 : vector<1x32xf32>
    %104 = vector.broadcast %103 : vector<1x32xf32> to vector<2x32xf32>
    %105 = arith.addf %99, %104 : vector<2x32xf32>
    %cst_83 = arith.constant 0.000000e+00 : f32
    %106 = vector.broadcast %cst_83 : f32 to vector<2x32xf32>
    %107 = arith.maximumf %105, %106 : vector<2x32xf32>
    %c2_84 = arith.constant 2 : index
    %c0_85 = arith.constant 0 : index
    %c0_86 = arith.constant 0 : index
    %108 = vector.load %arg16[%c2_84, %c0_85, %c0_86] : memref<4x32x32xf32, #tpu.memory_space<vmem>>, vector<1x32x32xf32>
    %109 = vector.shape_cast %108 : vector<1x32x32xf32> to vector<32x32xf32>
    %110 = arith.mulf %24, %109 : vector<32x32xf32>
    %111 = arith.addf %23, %110 : vector<32x32xf32>
    %cst_87 = arith.constant dense<0.000000e+00> : vector<2x32xf32>
    %112 = tpu.matmul %107, %111, %cst_87 {dimension_numbers = #tpu.dot_dimension_numbers<[1], [0], [0], [1], [0, 0, 1, 1], [], []>} : vector<2x32xf32>, vector<32x32xf32>, vector<2x32xf32> -> vector<2x32xf32>
    %c2_88 = arith.constant 2 : index
    %c0_89 = arith.constant 0 : index
    %c0_90 = arith.constant 0 : index
    %113 = vector.load %arg17[%c2_88, %c0_89, %c0_90] : memref<4x1x32xf32, #tpu.memory_space<vmem>>, vector<1x1x32xf32>
    %114 = vector.shape_cast %113 : vector<1x1x32xf32> to vector<1x32xf32>
    %115 = arith.mulf %26, %114 : vector<1x32xf32>
    %116 = arith.addf %25, %115 : vector<1x32xf32>
    %117 = vector.broadcast %116 : vector<1x32xf32> to vector<2x32xf32>
    %118 = arith.addf %112, %117 : vector<2x32xf32>
    %cst_91 = arith.constant 0.000000e+00 : f32
    %119 = vector.broadcast %cst_91 : f32 to vector<2x32xf32>
    %120 = arith.maximumf %118, %119 : vector<2x32xf32>
    %c2_92 = arith.constant 2 : index
    %c0_93 = arith.constant 0 : index
    %c0_94 = arith.constant 0 : index
    %121 = vector.load %arg18[%c2_92, %c0_93, %c0_94] : memref<4x32x128xf32, #tpu.memory_space<vmem>>, vector<1x32x128xf32>
    %122 = vector.shape_cast %121 : vector<1x32x128xf32> to vector<32x128xf32>
    %123 = arith.mulf %28, %122 : vector<32x128xf32>
    %124 = arith.addf %27, %123 : vector<32x128xf32>
    %cst_95 = arith.constant dense<0.000000e+00> : vector<2x128xf32>
    %125 = tpu.matmul %120, %124, %cst_95 {dimension_numbers = #tpu.dot_dimension_numbers<[1], [0], [0], [1], [0, 0, 1, 1], [], []>} : vector<2x32xf32>, vector<32x128xf32>, vector<2x128xf32> -> vector<2x128xf32>
    %c2_96 = arith.constant 2 : index
    %c0_97 = arith.constant 0 : index
    %c0_98 = arith.constant 0 : index
    %126 = vector.load %arg19[%c2_96, %c0_97, %c0_98] : memref<4x1x128xf32, #tpu.memory_space<vmem>>, vector<1x1x128xf32>
    %127 = vector.shape_cast %126 : vector<1x1x128xf32> to vector<1x128xf32>
    %128 = arith.mulf %30, %127 : vector<1x128xf32>
    %129 = arith.addf %29, %128 : vector<1x128xf32>
    %130 = vector.broadcast %129 : vector<1x128xf32> to vector<2x128xf32>
    %131 = arith.addf %125, %130 : vector<2x128xf32>
    %c4 = arith.constant 4 : index
    %c0_99 = arith.constant 0 : index
    %132 = vector.load %arg20[%c4, %c0_99] : memref<8x128xf32, #tpu.memory_space<vmem>>, vector<2x128xf32>
    tpu.vector_store %arg20[%c4, %c0_99], %131 {strides = array<i32>} : memref<8x128xf32, #tpu.memory_space<vmem>>, vector<2x128xf32>,
    %133 = vector.extract_strided_slice %20 {offsets = [0, 96], sizes = [2, 32], strides = [1, 1]} : vector<2x128xf32> to vector<2x32xf32>
    %c3 = arith.constant 3 : index
    %c0_100 = arith.constant 0 : index
    %c0_101 = arith.constant 0 : index
    %134 = vector.load %arg15[%c3, %c0_100, %c0_101] : memref<4x1x32xf32, #tpu.memory_space<vmem>>, vector<1x1x32xf32>
    %135 = vector.shape_cast %134 : vector<1x1x32xf32> to vector<1x32xf32>
    %136 = arith.mulf %22, %135 : vector<1x32xf32>
    %137 = arith.addf %21, %136 : vector<1x32xf32>
    %138 = vector.broadcast %137 : vector<1x32xf32> to vector<2x32xf32>
    %139 = arith.addf %133, %138 : vector<2x32xf32>
    %cst_102 = arith.constant 0.000000e+00 : f32
    %140 = vector.broadcast %cst_102 : f32 to vector<2x32xf32>
    %141 = arith.maximumf %139, %140 : vector<2x32xf32>
    %c3_103 = arith.constant 3 : index
    %c0_104 = arith.constant 0 : index
    %c0_105 = arith.constant 0 : index
    %142 = vector.load %arg16[%c3_103, %c0_104, %c0_105] : memref<4x32x32xf32, #tpu.memory_space<vmem>>, vector<1x32x32xf32>
    %143 = vector.shape_cast %142 : vector<1x32x32xf32> to vector<32x32xf32>
    %144 = arith.mulf %24, %143 : vector<32x32xf32>
    %145 = arith.addf %23, %144 : vector<32x32xf32>
    %cst_106 = arith.constant dense<0.000000e+00> : vector<2x32xf32>
    %146 = tpu.matmul %141, %145, %cst_106 {dimension_numbers = #tpu.dot_dimension_numbers<[1], [0], [0], [1], [0, 0, 1, 1], [], []>} : vector<2x32xf32>, vector<32x32xf32>, vector<2x32xf32> -> vector<2x32xf32>
    %c3_107 = arith.constant 3 : index
    %c0_108 = arith.constant 0 : index
    %c0_109 = arith.constant 0 : index
    %147 = vector.load %arg17[%c3_107, %c0_108, %c0_109] : memref<4x1x32xf32, #tpu.memory_space<vmem>>, vector<1x1x32xf32>
    %148 = vector.shape_cast %147 : vector<1x1x32xf32> to vector<1x32xf32>
    %149 = arith.mulf %26, %148 : vector<1x32xf32>
    %150 = arith.addf %25, %149 : vector<1x32xf32>
    %151 = vector.broadcast %150 : vector<1x32xf32> to vector<2x32xf32>
    %152 = arith.addf %146, %151 : vector<2x32xf32>
    %cst_110 = arith.constant 0.000000e+00 : f32
    %153 = vector.broadcast %cst_110 : f32 to vector<2x32xf32>
    %154 = arith.maximumf %152, %153 : vector<2x32xf32>
    %c3_111 = arith.constant 3 : index
    %c0_112 = arith.constant 0 : index
    %c0_113 = arith.constant 0 : index
    %155 = vector.load %arg18[%c3_111, %c0_112, %c0_113] : memref<4x32x128xf32, #tpu.memory_space<vmem>>, vector<1x32x128xf32>
    %156 = vector.shape_cast %155 : vector<1x32x128xf32> to vector<32x128xf32>
    %157 = arith.mulf %28, %156 : vector<32x128xf32>
    %158 = arith.addf %27, %157 : vector<32x128xf32>
    %cst_114 = arith.constant dense<0.000000e+00> : vector<2x128xf32>
    %159 = tpu.matmul %154, %158, %cst_114 {dimension_numbers = #tpu.dot_dimension_numbers<[1], [0], [0], [1], [0, 0, 1, 1], [], []>} : vector<2x32xf32>, vector<32x128xf32>, vector<2x128xf32> -> vector<2x128xf32>
    %c3_115 = arith.constant 3 : index
    %c0_116 = arith.constant 0 : index
    %c0_117 = arith.constant 0 : index
    %160 = vector.load %arg19[%c3_115, %c0_116, %c0_117] : memref<4x1x128xf32, #tpu.memory_space<vmem>>, vector<1x1x128xf32>
    %161 = vector.shape_cast %160 : vector<1x1x128xf32> to vector<1x128xf32>
    %162 = arith.mulf %30, %161 : vector<1x128xf32>
    %163 = arith.addf %29, %162 : vector<1x128xf32>
    %164 = vector.broadcast %163 : vector<1x128xf32> to vector<2x128xf32>
    %165 = arith.addf %159, %164 : vector<2x128xf32>
    %c6 = arith.constant 6 : index
    %c0_118 = arith.constant 0 : index
    %166 = vector.load %arg20[%c6, %c0_118] : memref<8x128xf32, #tpu.memory_space<vmem>>, vector<2x128xf32>
    tpu.vector_store %arg20[%c6, %c0_118], %165 {strides = array<i32>} : memref<8x128xf32, #tpu.memory_space<vmem>>, vector<2x128xf32>,
    return
  }
  func.func @transform_0(%arg0: i32) -> (i32, i32) {
    %c0_i32 = arith.constant 0 : i32
    %c0_i32_0 = arith.constant 0 : i32
    %c0_i32_1 = arith.constant 0 : i32
    return %c0_i32, %c0_i32_0 : i32, i32
  }
  func.func @transform_1(%arg0: i32) -> (i32, i32) {
    %c0_i32 = arith.constant 0 : i32
    %c0_i32_0 = arith.constant 0 : i32
    %c0_i32_1 = arith.constant 0 : i32
    return %c0_i32, %c0_i32_0 : i32, i32
  }
  func.func @transform_2(%arg0: i32) -> (i32, i32) {
    %c0_i32 = arith.constant 0 : i32
    %c0_i32_0 = arith.constant 0 : i32
    %c0_i32_1 = arith.constant 0 : i32
    return %c0_i32, %c0_i32_0 : i32, i32
  }
  func.func @transform_3(%arg0: i32) -> (i32, i32) {
    %c0_i32 = arith.constant 0 : i32
    %c0_i32_0 = arith.constant 0 : i32
    %c0_i32_1 = arith.constant 0 : i32
    return %c0_i32, %c0_i32_0 : i32, i32
  }
  func.func @transform_4(%arg0: i32) -> (i32, i32) {
    %c0_i32 = arith.constant 0 : i32
    %c0_i32_0 = arith.constant 0 : i32
    %c0_i32_1 = arith.constant 0 : i32
    return %c0_i32, %c0_i32_0 : i32, i32
  }
  func.func @transform_5(%arg0: i32) -> (i32, i32) {
    %c0_i32 = arith.constant 0 : i32
    %c0_i32_0 = arith.constant 0 : i32
    %c0_i32_1 = arith.constant 0 : i32
    return %c0_i32, %c0_i32_0 : i32, i32
  }
  func.func @transform_6(%arg0: i32) -> (i32, i32) {
    %c0_i32 = arith.constant 0 : i32
    %c0_i32_0 = arith.constant 0 : i32
    %c0_i32_1 = arith.constant 0 : i32
    return %c0_i32, %c0_i32_0 : i32, i32
  }
  func.func @transform_7(%arg0: i32) -> (i32, i32) {
    %c0_i32 = arith.constant 0 : i32
    %c0_i32_0 = arith.constant 0 : i32
    %c0_i32_1 = arith.constant 0 : i32
    return %c0_i32, %c0_i32_0 : i32, i32
  }
  func.func @transform_8(%arg0: i32) -> (i32, i32) {
    %c0_i32 = arith.constant 0 : i32
    %c0_i32_0 = arith.constant 0 : i32
    %c0_i32_1 = arith.constant 0 : i32
    return %c0_i32, %c0_i32_0 : i32, i32
  }
  func.func @transform_9(%arg0: i32) -> (i32, i32) {
    %c0_i32 = arith.constant 0 : i32
    %c0_i32_0 = arith.constant 0 : i32
    %c0_i32_1 = arith.constant 0 : i32
    return %c0_i32, %c0_i32_0 : i32, i32
  }
  func.func @transform_10(%arg0: i32) -> (i32, i32) {
    %c0_i32 = arith.constant 0 : i32
    %c0_i32_0 = arith.constant 0 : i32
    %c0_i32_1 = arith.constant 0 : i32
    return %c0_i32, %c0_i32_0 : i32, i32
  }
  func.func @transform_11(%arg0: i32) -> (i32, i32) {
    %c0_i32 = arith.constant 0 : i32
    %c0_i32_0 = arith.constant 0 : i32
    %c0_i32_1 = arith.constant 0 : i32
    return %c0_i32, %c0_i32_0 : i32, i32
  }
  func.func @transform_12(%arg0: i32) -> (i32, i32) {
    %c0_i32 = arith.constant 0 : i32
    %c0_i32_0 = arith.constant 0 : i32
    %c0_i32_1 = arith.constant 0 : i32
    return %c0_i32, %c0_i32_0 : i32, i32
  }
  func.func @transform_13(%arg0: i32) -> (i32, i32) {
    %c0_i32 = arith.constant 0 : i32
    %c0_i32_0 = arith.constant 0 : i32
    return %c0_i32, %arg0 : i32, i32
  }
  func.func @transform_14(%arg0: i32) -> (i32, i32, i32) {
    %c0_i32 = arith.constant 0 : i32
    %c0_i32_0 = arith.constant 0 : i32
    %c0_i32_1 = arith.constant 0 : i32
    return %arg0, %c0_i32, %c0_i32_0 : i32, i32, i32
  }
  func.func @transform_15(%arg0: i32) -> (i32, i32, i32) {
    %c0_i32 = arith.constant 0 : i32
    %c0_i32_0 = arith.constant 0 : i32
    %c0_i32_1 = arith.constant 0 : i32
    return %arg0, %c0_i32, %c0_i32_0 : i32, i32, i32
  }
  func.func @transform_16(%arg0: i32) -> (i32, i32, i32) {
    %c0_i32 = arith.constant 0 : i32
    %c0_i32_0 = arith.constant 0 : i32
    %c0_i32_1 = arith.constant 0 : i32
    return %arg0, %c0_i32, %c0_i32_0 : i32, i32, i32
  }
  func.func @transform_17(%arg0: i32) -> (i32, i32, i32) {
    %c0_i32 = arith.constant 0 : i32
    %c0_i32_0 = arith.constant 0 : i32
    %c0_i32_1 = arith.constant 0 : i32
    return %arg0, %c0_i32, %c0_i32_0 : i32, i32, i32
  }
  func.func @transform_18(%arg0: i32) -> (i32, i32, i32) {
    %c0_i32 = arith.constant 0 : i32
    %c0_i32_0 = arith.constant 0 : i32
    %c0_i32_1 = arith.constant 0 : i32
    return %arg0, %c0_i32, %c0_i32_0 : i32, i32, i32
  }
  func.func @transform_19(%arg0: i32) -> (i32, i32) {
    %c0_i32 = arith.constant 0 : i32
    %c0_i32_0 = arith.constant 0 : i32
    return %arg0, %c0_i32 : i32, i32
  }
}

</mosaic_0001>

<bundles_post_ra>
// kernel: tpu_custom_call.1
= control target key start
LH: loop header
LB: loop body
LE: loop exit
PB: predicated region body
PF: predicated region fallthrough
CT: control target
= control target key end

     0   :  { %s16498_s0 = inlined_call_operand.vmem [shape: f32[2,1024], index: 0, kind: input, shape index: {}]   ;;  %s16499_s1 = inlined_call_operand.vmem [shape: f32[1024,32], index: 1, kind: input, shape index: {}]   ;;  %s16500_s2 = inlined_call_operand.vmem [shape: f32[1024,32], index: 2, kind: input, shape index: {}]   ;;  %s16501_s3 = inlined_call_operand.vmem [shape: f32[1,32], index: 3, kind: input, shape index: {}]   ;;  %s16502_s4 = inlined_call_operand.vmem [shape: f32[1,32], index: 4, kind: input, shape index: {}]   ;;  %s16503_s5 = inlined_call_operand.hbm [shape: f32[32,32], index: 5, kind: input, shape index: {}]   ;;  %s16504_s6 = inlined_call_operand.hbm [shape: f32[32,32], index: 6, kind: input, shape index: {}]   ;;  %s16505_s7 = inlined_call_operand.vmem [shape: f32[1,32], index: 7, kind: input, shape index: {}]   ;;  %s16506_s8 = inlined_call_operand.hbm [shape: f32[1,32], index: 8, kind: input, shape index: {}]   ;;  %s16507_s9 = inlined_call_operand.hbm [shape: f32[32,128], index: 9, kind: input, shape index: {}]   ;;  %s16508_s10 = inlined_call_operand.hbm [shape: f32[32,128], index: 10, kind: input, shape index: {}]   ;;  %s16509_s11 = inlined_call_operand.hbm [shape: f32[1,128], index: 11, kind: input, shape index: {}]   ;;  %s16510_s12 = inlined_call_operand.hbm [shape: f32[1,128], index: 12, kind: input, shape index: {}]   ;;  %s16511_s13 = inlined_call_operand.vmem [shape: f32[1024,256], index: 13, kind: input, shape index: {}]   ;;  %s16512_s14 = inlined_call_operand.hbm [shape: f32[8,1,32], index: 14, kind: input, shape index: {}]   ;;  %s16513_s15 = inlined_call_operand.vmem [shape: f32[8,32,32], index: 15, kind: input, shape index: {}]   ;;  %s16514_s16 = inlined_call_operand.vmem [shape: f32[8,1,32], index: 16, kind: input, shape index: {}]   ;;  %s16515_s17 = inlined_call_operand.vmem [shape: f32[8,32,128], index: 17, kind: input, shape index: {}]   ;;  %s16516_s18 = inlined_call_operand.hbm [shape: f32[8,1,128], index: 18, kind: input, shape index: {}]   ;;  %s16517_s19 = inlined_call_operand.hbm [shape: f32[16,128], index: 19, kind: output, shape index: {}]  }
   0x1   :  { %16542 = sst [smem:[#allocation184_spill]] %s16498_s0 }
   0x2   :  { %16543 = sst [smem:[#allocation185_spill]] %s16499_s1 }
   0x3   :  { %16544 = sst [smem:[#allocation186_spill]] %s16500_s2 }
   0x4   :  { %16545 = sst [smem:[#allocation187_spill]] %s16501_s3 }
   0x5   :  { %16546 = sst [smem:[#allocation188_spill]] %s16503_s5 }
   0x6   :  { %16547 = sst [smem:[#allocation189_spill]] %s16504_s6 }
   0x7   :  { %16548 = sst [smem:[#allocation190_spill]] %s16505_s7 }
   0x8   :  { %16549 = sst [smem:[#allocation191_spill]] %s16506_s8 }
   0x9   :  { %16550 = sst [smem:[#allocation192_spill]] %s16514_s16 }
   0xa   :  { %16551 = sst [smem:[#allocation193_spill]] %s16515_s17 }
   0xb   :  { %16552 = sst [smem:[#allocation194_spill]] %s16517_s19 }
   0xc   :  { %24 = vsyncpa [#allocation4], 0 }
   0xd   :  { %25 = vsyncpa [#allocation7], 0 }
   0xe   :  { %26 = vsyncpa [#allocation10], 0 }
   0xf   :  { %27 = vsyncpa [#allocation13], 0 }
  0x10   :  { %28 = vsyncpa [#allocation17], 0 }
  0x11   :  { %30 = vsyncpa [#allocation17 + $0x1], 0 }
  0x12   :  { %31 = vsyncpa [#allocation5], 0 }
  0x13   :  { %33 = vsyncpa [#allocation5 + $0x1], 0  ;;  %s9726_s0 = smov 0   ;;  %s9728_s30 = smov 0  }
  0x14   :  { %s9730_s20 = smov 0   ;;  %s9732_s21 = smov 0  }
  0x15 LB: > { %16553 = sst [smem:[#allocation26_spill]] %s9592_s0  ;;  %s9747_s1 = sadd.s32 4294967295, %s9604_s21   ;;  %s9604_s21 = sphi %s9732_s21, %s17263_s21   ;;  %s9600_s20 = sphi %s9730_s20, %s17267_s20   ;;  %s9596_s30 = sphi %s9728_s30, %s17266_s30   ;;  %s9592_s0 = sphi %s9726_s0, %s17265_s0  }
  0x16   : > { %s8299_s22 = sadd.s32 4294967294, %s9604_s21   ;;  %s9751_s2 = sadd.s32 1, %s9604_s21  }
  0x17   : > { %16554 = sst [smem:[#allocation27_spill]] %s9751_s2  ;;  %s319_s23 = sadd.s32 1, %s9600_s20 }
  0x18   : > { %s316_s24 = ssub.s32 %s9604_s21, %s9751_s2  ;;  %p326_p0 = scmp.ne.s32.totalorder %s9600_s20, %s9596_s30 }
  0x19   : > { %p317_p1 = scmp.eq.s32.totalorder %s316_s24, 0  ;;  %p327_p2 = scmp.eq.s32.totalorder %s9604_s21, 0 }
  0x1a   : > { %p358_p3 = scmp.ne.s32.totalorder %s9596_s30, %s9592_s0  ;;  %p16525_p4 = scmp.eq.s32.totalorder %s9747_s1, 0 }
  0x1b   : > { %s9763_s25 = scalar_select %p317_p1, %s9600_s20, %s319_s23  }
  0x1c   : > { %p9765_p5 = por %p327_p2, %p326_p0  ;;  %p9771_p6 = por %p16525_p4, %p358_p3 }
  0x1d   : > { %16555 = sst [smem:[#allocation28_spill]] %s9763_s25  ;;  %p486_p7 = scmp.eq.s32.totalorder %s9747_s1, 1 }
  0x1e   : > { %s16556_s3 = scalar_select %p9765_p5, 1, 0 }
  0x1f   : > { %s16557_s26 = scalar_select %p9771_p6, 1, 0 }
  0x20   : > { %p492_p8 = scmp.eq.s32.totalorder %s8299_s22, 1  ;;  %p8300_p9 = scmp.ge.s32.totalorder %s9604_s21, 1 }
  0x21   : > { %p499_p10 = scmp.lt.s32.totalorder %s9604_s21, 3  ;;  %p9778_p11 = por %p486_p7, %p326_p0 }
  0x22   : > { %p9782_p12 = por %p492_p8, %p358_p3  ;;  %s9606_s23 = smov [#allocation6]  }
  0x23   : > { %s16558_s27 = scalar_select %p9778_p11, 1, 0 }
  0x24   : > { %s16560_s28 = scalar_select %p9782_p12, 1, 0 }
  0x25   : > { %16559 = sst [smem:[#allocation29_spill]] %s16558_s27  ;;  %p9786_p13 = pnand %p8300_p9, %p499_p10 }
  0x26   : > { %16561 = sst [smem:[#allocation30_spill]] %s16560_s28  ;;  %s539_s24 = sshll.u32 %s9606_s23, 4  ;;  %s540_s24 = int_to_ptr.vmem [resolvable:$true] %s539_s24 }
  0x27   : > { %s16562_s29 = scalar_select %p9786_p13, 1, 0 }
  0x28   : > { %p8687_p1 = pneg %p9786_p13  ;;  %s9607_s25 = smov [#allocation9]  }
  0x29   : > { %s566_s2 = sshll.u32 %s9607_s25, 4  ;;  %s9301_s0 = scalar_lea.vmem %s540_s24, 512  ;;  %s567_s2 = int_to_ptr.vmem [resolvable:$true] %s566_s2 }
  0x2a   : > { %p9794_p2 = pnand %p8687_p1, %p16525_p4  ;;  %p9302_p3 = scmp.ne.s32.totalorder %s540_s24, %s9301_s0 }
  0x2b   : > { %p9309_p9 = scmp.lt.s32.totalorder %s540_s24, %s540_s24  ;;  %p9310_p10 = scmp.lt.s32.totalorder %s9301_s0, %s9301_s0 }
  0x2c   : > { %p9800_p0 = pneg %p9794_p2 }
  0x2d   : > { %p9311_p1 = por %p9310_p10, %p9309_p9 }
  0x2e   : > { %p9304_p7 = pnand %p9302_p3, %p9800_p0 }
  0x30   : > { %p9305_p8 = pneg %p9304_p7 }
  0x32   : > { %p9312_p4 = pnand %p9311_p1, %p9305_p8 }
  0x34   : > { %9315 = shalt.err (!%p9312_p4)
}
  0x35   : > { %s9608_s23 = smov 128   ;;  %s9609_s25 = smov 8  }
  0x36   : > { %s16565_s6 = sld [smem:[#allocation189_spill]]  ;;  %s9327_s7 = scalar_lea.vmem %s567_s2, 512 }
  0x37   : > { %p9328_p3 = scmp.ne.s32.totalorder %s567_s2, %s9327_s7  ;;  %p9335_p9 = scmp.lt.s32.totalorder %s567_s2, %s567_s2 }
  0x38   : > { %p9336_p8 = scmp.lt.s32.totalorder %s9327_s7, %s9327_s7 }
  0x39   : > { %p9330_p7 = pnand %p9328_p3, %p9800_p0 }
  0x3a   : > { %p9337_p4 = por %p9336_p8, %p9335_p9 }
  0x3b   : > { %p9331_p12 = pneg %p9330_p7 }
  0x3c   : > { %8693 = dma.hbm_to_vmem [thread:$0]  (!%p9794_p2), %s16565_s6, 512, %s540_s24, [#allocation7], %s9608_s23, %s9608_s23, %s9609_s25  }
  0x3d   : > { %p9338_p10 = pnand %p9337_p4, %p9331_p12 }
  0x3f   : > { %9341 = shalt.err (!%p9338_p10)
}
  0x40   : > { %8699 = dma.hbm_to_vmem [thread:$0]  (!%p9794_p2), %s16507_s9, 512, %s567_s2, [#allocation10], %s9608_s23, %s9608_s23, %s9609_s25  }
  0x41   : > { %s9610_s19 = smov [#allocation12]   ;;  %s9611_s24 = smov [#allocation3]  }
  0x42   : > { %s593_s27 = sshll.u32 %s9610_s19, 4  ;;  %s526_s6 = sshll.u32 %s9611_s24, 4  ;;  %s594_s27 = int_to_ptr.vmem [resolvable:$true] %s593_s27  ;;  %s527_s6 = int_to_ptr.vmem [resolvable:$true] %s526_s6 }
  0x43   : > { %s9353_s17 = scalar_lea.vmem %s594_s27, 16  ;;  %s9360_s7 = scalar_lea.vmem %s594_s27, 32 }
  0x44   : > { %p9354_p1 = scmp.ne.s32.totalorder %s594_s27, %s9353_s17  ;;  %p9361_p7 = scmp.lt.s32.totalorder %s594_s27, %s594_s27 }
  0x45   : > { %p9362_p9 = scmp.lt.s32.totalorder %s9360_s7, %s9353_s17 }
  0x46   : > { %p9356_p12 = pnand %p9354_p1, %p9800_p0 }
  0x47   : > { %p9363_p8 = por %p9362_p9, %p9361_p7 }
  0x48   : > { %p9357_p3 = pneg %p9356_p12 }
  0x4a   : > { %p9364_p4 = pnand %p9363_p8, %p9357_p3 }
  0x4c   : > { %9367 = shalt.err (!%p9364_p4)
}
  0x4d   : > { %8705 = dma.hbm_to_vmem [thread:$0]  (!%p9794_p2), %s16509_s11, 16, %s594_s27, [#allocation13]  }
  0x4e   : > { %s9379_s0 = scalar_lea.vmem %s527_s6, 512  ;;  %p9387_p12 = scmp.lt.s32.totalorder %s527_s6, %s527_s6 }
  0x4f   : > { %p9380_p10 = scmp.ne.s32.totalorder %s527_s6, %s9379_s0  ;;  %p9388_p6 = scmp.lt.s32.totalorder %s9379_s0, %s9379_s0 }
  0x51   : > { %p9382_p11 = pnand %p9380_p10, %p9800_p0  ;;  %p9389_p13 = por %p9388_p6, %p9387_p12 }
  0x53   : > { %p9383_p1 = pneg %p9382_p11 }
  0x55   : > { %p9390_p5 = pnand %p9389_p13, %p9383_p1 }
  0x57   : > { %9393 = shalt.err (!%p9390_p5)
}
  0x58   : > { %s16566_s5 = sld [smem:[#allocation188_spill]]  ;;  %s9612_s27 = smov [#allocation8]  }
  0x59   : > { %s556_s24 = sshll.u32 %s9612_s27, 4  ;;  %s9613_s7 = smov [#allocation11]   ;;  %s557_s24 = int_to_ptr.vmem [resolvable:$true] %s556_s24 }
  0x5a   : > { %s579_s16 = sshll.u32 %s9613_s7, 4  ;;  %s9405_s2 = scalar_lea.vmem %s557_s24, 16  ;;  %s580_s16 = int_to_ptr.vmem [resolvable:$true] %s579_s16 }
  0x5b   : > { %p9406_p11 = scmp.ne.s32.totalorder %s557_s24, %s9405_s2  ;;  %s9412_s0 = scalar_lea.vmem %s557_s24, 32 }
  0x5c   : > { %p9413_p13 = scmp.lt.s32.totalorder %s557_s24, %s557_s24  ;;  %p9414_p3 = scmp.lt.s32.totalorder %s9412_s0, %s9405_s2 }
  0x5d   : > { %p9408_p6 = pnand %p9406_p11, %p9800_p0 }
  0x5e   : > { %8690 = dma.hbm_to_vmem [thread:$0]  (!%p9794_p2), %s16566_s5, 512, %s527_s6, [#allocation4], %s9608_s23, %s9608_s23, %s9609_s25  }
  0x5f   : > { %p9409_p5 = pneg %p9408_p6  ;;  %p9415_p7 = por %p9414_p3, %p9413_p13 }
  0x61   : > { %p9416_p9 = pnand %p9415_p7, %p9409_p5 }
  0x63   : > { %9419 = shalt.err (!%p9416_p9)
}
  0x64   : > { %s16567_s8 = sld [smem:[#allocation191_spill]]  ;;  %s9431_s19 = scalar_lea.vmem %s580_s16, 512 }
  0x65   : > { %p9432_p8 = scmp.ne.s32.totalorder %s580_s16, %s9431_s19  ;;  %p9439_p1 = scmp.lt.s32.totalorder %s580_s16, %s580_s16 }
  0x66   : > { %p9440_p12 = scmp.lt.s32.totalorder %s9431_s19, %s9431_s19 }
  0x67   : > { %p9434_p4 = pnand %p9432_p8, %p9800_p0 }
  0x68   : > { %p9441_p11 = por %p9440_p12, %p9439_p1 }
  0x69   : > { %p9435_p10 = pneg %p9434_p4 }
  0x6a   : > { %8696 = dma.hbm_to_vmem [thread:$0]  (!%p9794_p2), %s16567_s8, 16, %s557_s24, [#allocation7]  }
  0x6b   : > { %p9442_p6 = pnand %p9441_p11, %p9435_p10 }
  0x6d   : > { %9445 = shalt.err (!%p9442_p6)
}
  0x6e   : > { %8702 = dma.hbm_to_vmem [thread:$0]  (!%p9794_p2), %s16508_s10, 512, %s580_s16, [#allocation10], %s9608_s23, %s9608_s23, %s9609_s25  }
  0x6f   : > { %s9614_s24 = smov [#allocation14]  }
  0x70   : > { %s604_s2 = sshll.u32 %s9614_s24, 4  ;;  %s605_s2 = int_to_ptr.vmem [resolvable:$true] %s604_s2 }
  0x71   : > { %s9457_s0 = scalar_lea.vmem %s605_s2, 16  ;;  %s9464_s17 = scalar_lea.vmem %s605_s2, 32 }
  0x72   : > { %p9458_p5 = scmp.ne.s32.totalorder %s605_s2, %s9457_s0  ;;  %p9465_p7 = scmp.lt.s32.totalorder %s605_s2, %s605_s2 }
  0x73   : > { %p9466_p9 = scmp.lt.s32.totalorder %s9464_s17, %s9457_s0 }
  0x74   : > { %p9460_p13 = pnand %p9458_p5, %p9800_p0 }
  0x75   : > { %p9467_p8 = por %p9466_p9, %p9465_p7 }
  0x76   : > { %p9461_p3 = pneg %p9460_p13 }
  0x78   : > { %p9468_p4 = pnand %p9467_p8, %p9461_p3 }
  0x7a   : > { %9471 = shalt.err (!%p9468_p4)
}
  0x7b   : > { %8708 = dma.hbm_to_vmem [thread:$0]  (!%p9794_p2), %s16510_s12, 16, %s605_s2, [#allocation13]  }
  0x7c   : > { %p8308_p10 = scmp.ge.s32.totalorder %s9604_s21, 2 }
  0x7d   : > { %p16568_p0 = scmp.ne.s32.totalorder (!%p8308_p10), %s16556_s3, 0 }
  0x7e   : > { %611 = sbr.rel (%p8308_p10) target bundleno = 248 (0xf8), region = 68 }
  0x83   : > { %614 = sbr.rel (!%p16568_p0) target bundleno = 199 (0xc7), region = 72  ;;  %s616_s28 = sand.u32 (%p16568_p0), 1, %s9600_s20  }
  0x84   : > { %s8310_s23 = sshll.u32 (%p16568_p0), %s9604_s21, 3  ;;  %s8309_s25 = sshll.u32 (%p16568_p0), %s616_s28, 10 }
  0x85   : > { %s9875_s22 = scalar_lea.vmem (%p16568_p0), %s16511_s13, %s8310_s23  ;;  %s9880_s7 = scalar_lea.vmem (%p16568_p0), [#allocation15], %s8309_s25 }
  0x86   : > { %v903_v0 = vld [vmem:[%s9875_s22] sm:$0xff] (%p16568_p0)  ;;  %v905_v1 = vld [vmem:[%s9875_s22 + $0x10] sm:$0xff] (%p16568_p0) }
  0x87   : > { %v907_v2 = vld [vmem:[%s9875_s22 + $0x20] sm:$0xff] (%p16568_p0)  ;;  %904 = vst [vmem:[%s9880_s7] sm:$0xff] (%p16568_p0), %v903_v0  ;;  %906 = vst [vmem:[%s9880_s7 + $0x8] sm:$0xff] (%p16568_p0), %v905_v1  ;;  %v909_v3 = vld [vmem:[%s9875_s22 + $0x30] sm:$0xff] (%p16568_p0) }
  0x88   : > { %908 = vst [vmem:[%s9880_s7 + $0x10] sm:$0xff] %v907_v2  ;;  %v911_v4 = vld [vmem:[%s9875_s22 + $0x40] sm:$0xff]  ;;  %v913_v5 = vld [vmem:[%s9875_s22 + $0x50] sm:$0xff]  ;;  %910 = vst [vmem:[%s9880_s7 + $0x18] sm:$0xff] %v909_v3 }
  0x89   : > { %912 = vst [vmem:[%s9880_s7 + $0x20] sm:$0xff] %v911_v4  ;;  %914 = vst [vmem:[%s9880_s7 + $0x28] sm:$0xff] %v913_v5  ;;  %v915_v6 = vld [vmem:[%s9875_s22 + $0x60] sm:$0xff]  ;;  %v917_v7 = vld [vmem:[%s9875_s22 + $0x70] sm:$0xff] }
  0x8a   : > { %v919_v8 = vld [vmem:[%s9875_s22 + $0x80] sm:$0xff]  ;;  %916 = vst [vmem:[%s9880_s7 + $0x30] sm:$0xff] %v915_v6  ;;  %918 = vst [vmem:[%s9880_s7 + $0x38] sm:$0xff] %v917_v7  ;;  %v921_v9 = vld [vmem:[%s9875_s22 + $0x90] sm:$0xff] }
  0x8b   : > { %920 = vst [vmem:[%s9880_s7 + $0x40] sm:$0xff] %v919_v8  ;;  %v923_v10 = vld [vmem:[%s9875_s22 + $0xa0] sm:$0xff]  ;;  %v925_v11 = vld [vmem:[%s9875_s22 + $0xb0] sm:$0xff]  ;;  %922 = vst [vmem:[%s9880_s7 + $0x48] sm:$0xff] %v921_v9 }
  0x8c   : > { %924 = vst [vmem:[%s9880_s7 + $0x50] sm:$0xff] %v923_v10  ;;  %926 = vst [vmem:[%s9880_s7 + $0x58] sm:$0xff] %v925_v11  ;;  %v927_v12 = vld [vmem:[%s9875_s22 + $0xc0] sm:$0xff]  ;;  %v929_v13 = vld [vmem:[%s9875_s22 + $0xd0] sm:$0xff] }
  0x8d   : > { %v931_v14 = vld [vmem:[%s9875_s22 + $0xe0] sm:$0xff]  ;;  %928 = vst [vmem:[%s9880_s7 + $0x60] sm:$0xff] %v927_v12  ;;  %930 = vst [vmem:[%s9880_s7 + $0x68] sm:$0xff] %v929_v13  ;;  %v933_v15 = vld [vmem:[%s9875_s22 + $0xf0] sm:$0xff] }
  0x8e   : > { %932 = vst [vmem:[%s9880_s7 + $0x70] sm:$0xff] %v931_v14  ;;  %v935_v16 = vld [vmem:[%s9875_s22 + $0x100] sm:$0xff]  ;;  %v937_v17 = vld [vmem:[%s9875_s22 + $0x110] sm:$0xff]  ;;  %934 = vst [vmem:[%s9880_s7 + $0x78] sm:$0xff] %v933_v15 }
  0x8f   : > { %936 = vst [vmem:[%s9880_s7 + $0x80] sm:$0xff] %v935_v16  ;;  %938 = vst [vmem:[%s9880_s7 + $0x88] sm:$0xff] %v937_v17  ;;  %v939_v18 = vld [vmem:[%s9875_s22 + $0x120] sm:$0xff]  ;;  %v941_v19 = vld [vmem:[%s9875_s22 + $0x130] sm:$0xff] }
  0x90   : > { %v943_v20 = vld [vmem:[%s9875_s22 + $0x140] sm:$0xff]  ;;  %940 = vst [vmem:[%s9880_s7 + $0x90] sm:$0xff] %v939_v18  ;;  %942 = vst [vmem:[%s9880_s7 + $0x98] sm:$0xff] %v941_v19  ;;  %v945_v21 = vld [vmem:[%s9875_s22 + $0x150] sm:$0xff] }
  0x91   : > { %944 = vst [vmem:[%s9880_s7 + $0xa0] sm:$0xff] %v943_v20  ;;  %v947_v22 = vld [vmem:[%s9875_s22 + $0x160] sm:$0xff]  ;;  %v949_v23 = vld [vmem:[%s9875_s22 + $0x170] sm:$0xff]  ;;  %946 = vst [vmem:[%s9880_s7 + $0xa8] sm:$0xff] %v945_v21 }
  0x92   : > { %948 = vst [vmem:[%s9880_s7 + $0xb0] sm:$0xff] %v947_v22  ;;  %950 = vst [vmem:[%s9880_s7 + $0xb8] sm:$0xff] %v949_v23  ;;  %v951_v24 = vld [vmem:[%s9875_s22 + $0x180] sm:$0xff]  ;;  %v953_v25 = vld [vmem:[%s9875_s22 + $0x190] sm:$0xff] }
  0x93   : > { %v955_v26 = vld [vmem:[%s9875_s22 + $0x1a0] sm:$0xff]  ;;  %952 = vst [vmem:[%s9880_s7 + $0xc0] sm:$0xff] %v951_v24  ;;  %954 = vst [vmem:[%s9880_s7 + $0xc8] sm:$0xff] %v953_v25  ;;  %v957_v27 = vld [vmem:[%s9875_s22 + $0x1b0] sm:$0xff] }
  0x94   : > { %956 = vst [vmem:[%s9880_s7 + $0xd0] sm:$0xff] %v955_v26  ;;  %v959_v28 = vld [vmem:[%s9875_s22 + $0x1c0] sm:$0xff]  ;;  %v961_v29 = vld [vmem:[%s9875_s22 + $0x1d0] sm:$0xff]  ;;  %958 = vst [vmem:[%s9880_s7 + $0xd8] sm:$0xff] %v957_v27 }
  0x95   : > { %960 = vst [vmem:[%s9880_s7 + $0xe0] sm:$0xff] %v959_v28  ;;  %962 = vst [vmem:[%s9880_s7 + $0xe8] sm:$0xff] %v961_v29  ;;  %v963_v30 = vld [vmem:[%s9875_s22 + $0x1e0] sm:$0xff]  ;;  %v965_v31 = vld [vmem:[%s9875_s22 + $0x1f0] sm:$0xff] }
  0x96   : > { %v967_v32 = vld [vmem:[%s9875_s22 + $0x200] sm:$0xff]  ;;  %964 = vst [vmem:[%s9880_s7 + $0xf0] sm:$0xff] %v963_v30  ;;  %966 = vst [vmem:[%s9880_s7 + $0xf8] sm:$0xff] %v965_v31  ;;  %v969_v33 = vld [vmem:[%s9875_s22 + $0x210] sm:$0xff] }
  0x97   : > { %968 = vst [vmem:[%s9880_s7 + $0x100] sm:$0xff] %v967_v32  ;;  %v971_v34 = vld [vmem:[%s9875_s22 + $0x220] sm:$0xff]  ;;  %v973_v35 = vld [vmem:[%s9875_s22 + $0x230] sm:$0xff]  ;;  %970 = vst [vmem:[%s9880_s7 + $0x108] sm:$0xff] %v969_v33 }
  0x98   : > { %972 = vst [vmem:[%s9880_s7 + $0x110] sm:$0xff] %v971_v34  ;;  %974 = vst [vmem:[%s9880_s7 + $0x118] sm:$0xff] %v973_v35  ;;  %v975_v36 = vld [vmem:[%s9875_s22 + $0x240] sm:$0xff]  ;;  %v977_v37 = vld [vmem:[%s9875_s22 + $0x250] sm:$0xff] }
  0x99   : > { %v979_v38 = vld [vmem:[%s9875_s22 + $0x260] sm:$0xff]  ;;  %976 = vst [vmem:[%s9880_s7 + $0x120] sm:$0xff] %v975_v36  ;;  %978 = vst [vmem:[%s9880_s7 + $0x128] sm:$0xff] %v977_v37  ;;  %v981_v39 = vld [vmem:[%s9875_s22 + $0x270] sm:$0xff] }
  0x9a   : > { %980 = vst [vmem:[%s9880_s7 + $0x130] sm:$0xff] %v979_v38  ;;  %v983_v40 = vld [vmem:[%s9875_s22 + $0x280] sm:$0xff]  ;;  %v985_v41 = vld [vmem:[%s9875_s22 + $0x290] sm:$0xff]  ;;  %982 = vst [vmem:[%s9880_s7 + $0x138] sm:$0xff] %v981_v39 }
  0x9b   : > { %984 = vst [vmem:[%s9880_s7 + $0x140] sm:$0xff] %v983_v40  ;;  %986 = vst [vmem:[%s9880_s7 + $0x148] sm:$0xff] %v985_v41  ;;  %v987_v42 = vld [vmem:[%s9875_s22 + $0x2a0] sm:$0xff]  ;;  %v989_v43 = vld [vmem:[%s9875_s22 + $0x2b0] sm:$0xff] }
  0x9c   : > { %v991_v44 = vld [vmem:[%s9875_s22 + $0x2c0] sm:$0xff]  ;;  %988 = vst [vmem:[%s9880_s7 + $0x150] sm:$0xff] %v987_v42  ;;  %990 = vst [vmem:[%s9880_s7 + $0x158] sm:$0xff] %v989_v43  ;;  %v993_v45 = vld [vmem:[%s9875_s22 + $0x2d0] sm:$0xff] }
  0x9d   : > { %992 = vst [vmem:[%s9880_s7 + $0x160] sm:$0xff] %v991_v44  ;;  %v995_v46 = vld [vmem:[%s9875_s22 + $0x2e0] sm:$0xff]  ;;  %v997_v47 = vld [vmem:[%s9875_s22 + $0x2f0] sm:$0xff]  ;;  %994 = vst [vmem:[%s9880_s7 + $0x168] sm:$0xff] %v993_v45 }
  0x9e   : > { %996 = vst [vmem:[%s9880_s7 + $0x170] sm:$0xff] %v995_v46  ;;  %998 = vst [vmem:[%s9880_s7 + $0x178] sm:$0xff] %v997_v47  ;;  %v999_v48 = vld [vmem:[%s9875_s22 + $0x300] sm:$0xff]  ;;  %v1001_v49 = vld [vmem:[%s9875_s22 + $0x310] sm:$0xff] }
  0x9f   : > { %v1003_v50 = vld [vmem:[%s9875_s22 + $0x320] sm:$0xff]  ;;  %1000 = vst [vmem:[%s9880_s7 + $0x180] sm:$0xff] %v999_v48  ;;  %1002 = vst [vmem:[%s9880_s7 + $0x188] sm:$0xff] %v1001_v49  ;;  %v1005_v51 = vld [vmem:[%s9875_s22 + $0x330] sm:$0xff] }
  0xa0   : > { %1004 = vst [vmem:[%s9880_s7 + $0x190] sm:$0xff] %v1003_v50  ;;  %v1007_v52 = vld [vmem:[%s9875_s22 + $0x340] sm:$0xff]  ;;  %v1009_v53 = vld [vmem:[%s9875_s22 + $0x350] sm:$0xff]  ;;  %1006 = vst [vmem:[%s9880_s7 + $0x198] sm:$0xff] %v1005_v51 }
  0xa1   : > { %1008 = vst [vmem:[%s9880_s7 + $0x1a0] sm:$0xff] %v1007_v52  ;;  %1010 = vst [vmem:[%s9880_s7 + $0x1a8] sm:$0xff] %v1009_v53  ;;  %v1011_v54 = vld [vmem:[%s9875_s22 + $0x360] sm:$0xff]  ;;  %v1013_v55 = vld [vmem:[%s9875_s22 + $0x370] sm:$0xff] }
  0xa2   : > { %v1015_v56 = vld [vmem:[%s9875_s22 + $0x380] sm:$0xff]  ;;  %1012 = vst [vmem:[%s9880_s7 + $0x1b0] sm:$0xff] %v1011_v54  ;;  %1014 = vst [vmem:[%s9880_s7 + $0x1b8] sm:$0xff] %v1013_v55  ;;  %v1017_v57 = vld [vmem:[%s9875_s22 + $0x390] sm:$0xff] }
  0xa3   : > { %1016 = vst [vmem:[%s9880_s7 + $0x1c0] sm:$0xff] %v1015_v56  ;;  %v1019_v58 = vld [vmem:[%s9875_s22 + $0x3a0] sm:$0xff]  ;;  %v1021_v59 = vld [vmem:[%s9875_s22 + $0x3b0] sm:$0xff]  ;;  %1018 = vst [vmem:[%s9880_s7 + $0x1c8] sm:$0xff] %v1017_v57 }
  0xa4   : > { %1020 = vst [vmem:[%s9880_s7 + $0x1d0] sm:$0xff] %v1019_v58  ;;  %1022 = vst [vmem:[%s9880_s7 + $0x1d8] sm:$0xff] %v1021_v59  ;;  %v1023_v60 = vld [vmem:[%s9875_s22 + $0x3c0] sm:$0xff]  ;;  %v1025_v61 = vld [vmem:[%s9875_s22 + $0x3d0] sm:$0xff] }
  0xa5   : > { %v1027_v62 = vld [vmem:[%s9875_s22 + $0x3e0] sm:$0xff]  ;;  %1024 = vst [vmem:[%s9880_s7 + $0x1e0] sm:$0xff] %v1023_v60  ;;  %1026 = vst [vmem:[%s9880_s7 + $0x1e8] sm:$0xff] %v1025_v61  ;;  %v1029_v63 = vld [vmem:[%s9875_s22 + $0x3f0] sm:$0xff] }
  0xa6   : > { %1028 = vst [vmem:[%s9880_s7 + $0x1f0] sm:$0xff] %v1027_v62  ;;  %v1031_v0 = vld [vmem:[%s9875_s22 + $0x400] sm:$0xff]  ;;  %v1033_v1 = vld [vmem:[%s9875_s22 + $0x410] sm:$0xff]  ;;  %1030 = vst [vmem:[%s9880_s7 + $0x1f8] sm:$0xff] %v1029_v63 }
  0xa7   : > { %1032 = vst [vmem:[%s9880_s7 + $0x200] sm:$0xff] %v1031_v0  ;;  %1034 = vst [vmem:[%s9880_s7 + $0x208] sm:$0xff] %v1033_v1  ;;  %v1035_v2 = vld [vmem:[%s9875_s22 + $0x420] sm:$0xff]  ;;  %v1037_v3 = vld [vmem:[%s9875_s22 + $0x430] sm:$0xff] }
  0xa8   : > { %v1039_v4 = vld [vmem:[%s9875_s22 + $0x440] sm:$0xff]  ;;  %1036 = vst [vmem:[%s9880_s7 + $0x210] sm:$0xff] %v1035_v2  ;;  %1038 = vst [vmem:[%s9880_s7 + $0x218] sm:$0xff] %v1037_v3  ;;  %v1041_v5 = vld [vmem:[%s9875_s22 + $0x450] sm:$0xff] }
  0xa9   : > { %1040 = vst [vmem:[%s9880_s7 + $0x220] sm:$0xff] %v1039_v4  ;;  %v1043_v6 = vld [vmem:[%s9875_s22 + $0x460] sm:$0xff]  ;;  %v1045_v7 = vld [vmem:[%s9875_s22 + $0x470] sm:$0xff]  ;;  %1042 = vst [vmem:[%s9880_s7 + $0x228] sm:$0xff] %v1041_v5 }
  0xaa   : > { %1044 = vst [vmem:[%s9880_s7 + $0x230] sm:$0xff] %v1043_v6  ;;  %1046 = vst [vmem:[%s9880_s7 + $0x238] sm:$0xff] %v1045_v7  ;;  %v1047_v8 = vld [vmem:[%s9875_s22 + $0x480] sm:$0xff]  ;;  %v1049_v9 = vld [vmem:[%s9875_s22 + $0x490] sm:$0xff] }
  0xab   : > { %v1051_v10 = vld [vmem:[%s9875_s22 + $0x4a0] sm:$0xff]  ;;  %1048 = vst [vmem:[%s9880_s7 + $0x240] sm:$0xff] %v1047_v8  ;;  %1050 = vst [vmem:[%s9880_s7 + $0x248] sm:$0xff] %v1049_v9  ;;  %v1053_v11 = vld [vmem:[%s9875_s22 + $0x4b0] sm:$0xff] }
  0xac   : > { %1052 = vst [vmem:[%s9880_s7 + $0x250] sm:$0xff] %v1051_v10  ;;  %v1055_v12 = vld [vmem:[%s9875_s22 + $0x4c0] sm:$0xff]  ;;  %v1057_v13 = vld [vmem:[%s9875_s22 + $0x4d0] sm:$0xff]  ;;  %1054 = vst [vmem:[%s9880_s7 + $0x258] sm:$0xff] %v1053_v11 }
  0xad   : > { %1056 = vst [vmem:[%s9880_s7 + $0x260] sm:$0xff] %v1055_v12  ;;  %1058 = vst [vmem:[%s9880_s7 + $0x268] sm:$0xff] %v1057_v13  ;;  %v1059_v14 = vld [vmem:[%s9875_s22 + $0x4e0] sm:$0xff]  ;;  %v1061_v15 = vld [vmem:[%s9875_s22 + $0x4f0] sm:$0xff] }
  0xae   : > { %v1063_v16 = vld [vmem:[%s9875_s22 + $0x500] sm:$0xff]  ;;  %1060 = vst [vmem:[%s9880_s7 + $0x270] sm:$0xff] %v1059_v14  ;;  %1062 = vst [vmem:[%s9880_s7 + $0x278] sm:$0xff] %v1061_v15  ;;  %v1065_v17 = vld [vmem:[%s9875_s22 + $0x510] sm:$0xff] }
  0xaf   : > { %1064 = vst [vmem:[%s9880_s7 + $0x280] sm:$0xff] %v1063_v16  ;;  %v1067_v18 = vld [vmem:[%s9875_s22 + $0x520] sm:$0xff]  ;;  %v1069_v19 = vld [vmem:[%s9875_s22 + $0x530] sm:$0xff]  ;;  %1066 = vst [vmem:[%s9880_s7 + $0x288] sm:$0xff] %v1065_v17 }
  0xb0   : > { %1068 = vst [vmem:[%s9880_s7 + $0x290] sm:$0xff] %v1067_v18  ;;  %1070 = vst [vmem:[%s9880_s7 + $0x298] sm:$0xff] %v1069_v19  ;;  %v1071_v20 = vld [vmem:[%s9875_s22 + $0x540] sm:$0xff]  ;;  %v1073_v21 = vld [vmem:[%s9875_s22 + $0x550] sm:$0xff] }
  0xb1   : > { %v1075_v22 = vld [vmem:[%s9875_s22 + $0x560] sm:$0xff]  ;;  %1072 = vst [vmem:[%s9880_s7 + $0x2a0] sm:$0xff] %v1071_v20  ;;  %1074 = vst [vmem:[%s9880_s7 + $0x2a8] sm:$0xff] %v1073_v21  ;;  %v1077_v23 = vld [vmem:[%s9875_s22 + $0x570] sm:$0xff] }
  0xb2   : > { %1076 = vst [vmem:[%s9880_s7 + $0x2b0] sm:$0xff] %v1075_v22  ;;  %v1079_v24 = vld [vmem:[%s9875_s22 + $0x580] sm:$0xff]  ;;  %v1081_v25 = vld [vmem:[%s9875_s22 + $0x590] sm:$0xff]  ;;  %1078 = vst [vmem:[%s9880_s7 + $0x2b8] sm:$0xff] %v1077_v23 }
  0xb3   : > { %1080 = vst [vmem:[%s9880_s7 + $0x2c0] sm:$0xff] %v1079_v24  ;;  %1082 = vst [vmem:[%s9880_s7 + $0x2c8] sm:$0xff] %v1081_v25  ;;  %v1083_v26 = vld [vmem:[%s9875_s22 + $0x5a0] sm:$0xff]  ;;  %v1085_v27 = vld [vmem:[%s9875_s22 + $0x5b0] sm:$0xff] }
  0xb4   : > { %v1087_v28 = vld [vmem:[%s9875_s22 + $0x5c0] sm:$0xff]  ;;  %1084 = vst [vmem:[%s9880_s7 + $0x2d0] sm:$0xff] %v1083_v26  ;;  %1086 = vst [vmem:[%s9880_s7 + $0x2d8] sm:$0xff] %v1085_v27  ;;  %v1089_v29 = vld [vmem:[%s9875_s22 + $0x5d0] sm:$0xff] }
  0xb5   : > { %1088 = vst [vmem:[%s9880_s7 + $0x2e0] sm:$0xff] %v1087_v28  ;;  %v1091_v30 = vld [vmem:[%s9875_s22 + $0x5e0] sm:$0xff]  ;;  %v1093_v31 = vld [vmem:[%s9875_s22 + $0x5f0] sm:$0xff]  ;;  %1090 = vst [vmem:[%s9880_s7 + $0x2e8] sm:$0xff] %v1089_v29 }
  0xb6   : > { %1092 = vst [vmem:[%s9880_s7 + $0x2f0] sm:$0xff] %v1091_v30  ;;  %1094 = vst [vmem:[%s9880_s7 + $0x2f8] sm:$0xff] %v1093_v31  ;;  %v1095_v32 = vld [vmem:[%s9875_s22 + $0x600] sm:$0xff]  ;;  %v1097_v33 = vld [vmem:[%s9875_s22 + $0x610] sm:$0xff] }
  0xb7   : > { %v1099_v34 = vld [vmem:[%s9875_s22 + $0x620] sm:$0xff]  ;;  %1096 = vst [vmem:[%s9880_s7 + $0x300] sm:$0xff] %v1095_v32  ;;  %1098 = vst [vmem:[%s9880_s7 + $0x308] sm:$0xff] %v1097_v33  ;;  %v1101_v35 = vld [vmem:[%s9875_s22 + $0x630] sm:$0xff] }
  0xb8   : > { %1100 = vst [vmem:[%s9880_s7 + $0x310] sm:$0xff] %v1099_v34  ;;  %v1103_v36 = vld [vmem:[%s9875_s22 + $0x640] sm:$0xff]  ;;  %v1105_v37 = vld [vmem:[%s9875_s22 + $0x650] sm:$0xff]  ;;  %1102 = vst [vmem:[%s9880_s7 + $0x318] sm:$0xff] %v1101_v35 }
  0xb9   : > { %1104 = vst [vmem:[%s9880_s7 + $0x320] sm:$0xff] %v1103_v36  ;;  %1106 = vst [vmem:[%s9880_s7 + $0x328] sm:$0xff] %v1105_v37  ;;  %v1107_v38 = vld [vmem:[%s9875_s22 + $0x660] sm:$0xff]  ;;  %v1109_v39 = vld [vmem:[%s9875_s22 + $0x670] sm:$0xff] }
  0xba   : > { %v1111_v40 = vld [vmem:[%s9875_s22 + $0x680] sm:$0xff]  ;;  %1108 = vst [vmem:[%s9880_s7 + $0x330] sm:$0xff] %v1107_v38  ;;  %1110 = vst [vmem:[%s9880_s7 + $0x338] sm:$0xff] %v1109_v39  ;;  %v1113_v41 = vld [vmem:[%s9875_s22 + $0x690] sm:$0xff] }
  0xbb   : > { %1112 = vst [vmem:[%s9880_s7 + $0x340] sm:$0xff] %v1111_v40  ;;  %v1115_v42 = vld [vmem:[%s9875_s22 + $0x6a0] sm:$0xff]  ;;  %v1117_v43 = vld [vmem:[%s9875_s22 + $0x6b0] sm:$0xff]  ;;  %1114 = vst [vmem:[%s9880_s7 + $0x348] sm:$0xff] %v1113_v41 }
  0xbc   : > { %1116 = vst [vmem:[%s9880_s7 + $0x350] sm:$0xff] %v1115_v42  ;;  %1118 = vst [vmem:[%s9880_s7 + $0x358] sm:$0xff] %v1117_v43  ;;  %v1119_v44 = vld [vmem:[%s9875_s22 + $0x6c0] sm:$0xff]  ;;  %v1121_v45 = vld [vmem:[%s9875_s22 + $0x6d0] sm:$0xff] }
  0xbd   : > { %v1123_v46 = vld [vmem:[%s9875_s22 + $0x6e0] sm:$0xff]  ;;  %1120 = vst [vmem:[%s9880_s7 + $0x360] sm:$0xff] %v1119_v44  ;;  %1122 = vst [vmem:[%s9880_s7 + $0x368] sm:$0xff] %v1121_v45  ;;  %v1125_v47 = vld [vmem:[%s9875_s22 + $0x6f0] sm:$0xff] }
  0xbe   : > { %1124 = vst [vmem:[%s9880_s7 + $0x370] sm:$0xff] %v1123_v46  ;;  %v1127_v48 = vld [vmem:[%s9875_s22 + $0x700] sm:$0xff]  ;;  %v1129_v49 = vld [vmem:[%s9875_s22 + $0x710] sm:$0xff]  ;;  %1126 = vst [vmem:[%s9880_s7 + $0x378] sm:$0xff] %v1125_v47 }
  0xbf   : > { %1128 = vst [vmem:[%s9880_s7 + $0x380] sm:$0xff] %v1127_v48  ;;  %1130 = vst [vmem:[%s9880_s7 + $0x388] sm:$0xff] %v1129_v49  ;;  %v1131_v50 = vld [vmem:[%s9875_s22 + $0x720] sm:$0xff]  ;;  %v1133_v51 = vld [vmem:[%s9875_s22 + $0x730] sm:$0xff] }
  0xc0   : > { %v1135_v52 = vld [vmem:[%s9875_s22 + $0x740] sm:$0xff]  ;;  %1132 = vst [vmem:[%s9880_s7 + $0x390] sm:$0xff] %v1131_v50  ;;  %1134 = vst [vmem:[%s9880_s7 + $0x398] sm:$0xff] %v1133_v51  ;;  %v1137_v53 = vld [vmem:[%s9875_s22 + $0x750] sm:$0xff] }
  0xc1   : > { %1136 = vst [vmem:[%s9880_s7 + $0x3a0] sm:$0xff] %v1135_v52  ;;  %v1139_v54 = vld [vmem:[%s9875_s22 + $0x760] sm:$0xff]  ;;  %v1141_v55 = vld [vmem:[%s9875_s22 + $0x770] sm:$0xff]  ;;  %1138 = vst [vmem:[%s9880_s7 + $0x3a8] sm:$0xff] %v1137_v53 }
  0xc2   : > { %1140 = vst [vmem:[%s9880_s7 + $0x3b0] sm:$0xff] %v1139_v54  ;;  %1142 = vst [vmem:[%s9880_s7 + $0x3b8] sm:$0xff] %v1141_v55  ;;  %v1143_v56 = vld [vmem:[%s9875_s22 + $0x780] sm:$0xff]  ;;  %v1145_v57 = vld [vmem:[%s9875_s22 + $0x790] sm:$0xff] }
  0xc3   : > { %v1147_v58 = vld [vmem:[%s9875_s22 + $0x7a0] sm:$0xff]  ;;  %1144 = vst [vmem:[%s9880_s7 + $0x3c0] sm:$0xff] %v1143_v56  ;;  %1146 = vst [vmem:[%s9880_s7 + $0x3c8] sm:$0xff] %v1145_v57  ;;  %v1149_v59 = vld [vmem:[%s9875_s22 + $0x7b0] sm:$0xff] }
  0xc4   : > { %1148 = vst [vmem:[%s9880_s7 + $0x3d0] sm:$0xff] %v1147_v58  ;;  %v1151_v60 = vld [vmem:[%s9875_s22 + $0x7c0] sm:$0xff]  ;;  %v1153_v61 = vld [vmem:[%s9875_s22 + $0x7d0] sm:$0xff]  ;;  %1150 = vst [vmem:[%s9880_s7 + $0x3d8] sm:$0xff] %v1149_v59 }
  0xc5   : > { %1152 = vst [vmem:[%s9880_s7 + $0x3e0] sm:$0xff] %v1151_v60  ;;  %1154 = vst [vmem:[%s9880_s7 + $0x3e8] sm:$0xff] %v1153_v61  ;;  %v1155_v62 = vld [vmem:[%s9875_s22 + $0x7e0] sm:$0xff]  ;;  %v1157_v63 = vld [vmem:[%s9875_s22 + $0x7f0] sm:$0xff] }
  0xc6   : > { %1156 = vst [vmem:[%s9880_s7 + $0x3f0] sm:$0xff] %v1155_v62  ;;  %1158 = vst [vmem:[%s9880_s7 + $0x3f8] sm:$0xff] %v1157_v63 }
  0xc7 PF: > { %s1165_s24 = sand.u32 1, %s9604_s21   ;;  %s1167_s2 = sand.u32 1, %s9600_s20  }
  0xc8   : > { %s10137_s0 = sshll.u32 %s1167_s2, 2  ;;  %s8381_s17 = sshll.u32 %s9604_s21, 6 }
  0xc9   : > { %s10145_s28 = scalar_lea.hbm %s16512_s14, %s8381_s17  ;;  %s1169_s23 = scalar_lea.vmem [#allocation16], %s10137_s0 }
  0xca   : > { %s1176_s25 = sshll.u32 %s1169_s23, 4  ;;  %s10150_s16 = scalar_lea.sflag [#allocation17], %s1165_s24  ;;  %s10148_s25 = int_to_ptr.vmem [resolvable:$true] %s1176_s25 }
  0xcb   : > { %s9472_s27 = scalar_lea.hbm %s10145_s28, 64  ;;  %p16569_p1 = scmp.ne.s32.totalorder %s16556_s3, 0 }
  0xcc   : > { %p9473_p2 = scmp.ne.s32.totalorder %s10145_s28, %s9472_s27  ;;  %s9476_s2 = scalar_lea.hbm %s16512_s14, 128 }
  0xcd   : > { %p9477_p6 = scmp.lt.s32.totalorder %s10145_s28, %s16512_s14  ;;  %p9478_p5 = scmp.lt.s32.totalorder %s9476_s2, %s9472_s27 }
  0xce   : > { %p9474_p12 = pnand %p9473_p2, %p16569_p1 }
  0xcf   : > { %p9479_p13 = por %p9478_p5, %p9477_p6 }
  0xd0   : > { %p9475_p11 = pneg %p9474_p12 }
  0xd2   : > { %p9480_p3 = pnand %p9479_p13, %p9475_p11 }
  0xd4   : > { %9483 = shalt.err (!%p9480_p3)
}
  0xd5   : > { %s9484_s24 = scalar_lea.vmem %s10148_s25, 64  ;;  %s9615_s23 = smov [#allocation16]  }
  0xd6   : > { %p9485_p7 = scmp.ne.s32.totalorder %s10148_s25, %s9484_s24  ;;  %s9488_s22 = sshll.u32 %s9615_s23, 4  ;;  %s9489_s22 = int_to_ptr.vmem [resolvable:$false] %s9488_s22 }
  0xd7   : > { %s9490_s7 = scalar_lea.vmem %s9489_s22, 128  ;;  %p9491_p4 = scmp.lt.s32.totalorder %s10148_s25, %s9489_s22 }
  0xd8   : > { %p9486_p9 = pnand %p9485_p7, %p16569_p1  ;;  %p9492_p0 = scmp.lt.s32.totalorder %s9490_s7, %s9484_s24 }
  0xda   : > { %p9487_p8 = pneg %p9486_p9  ;;  %p9493_p2 = por %p9492_p0, %p9491_p4 }
  0xdc   : > { %p9494_p12 = pnand %p9493_p2, %p9487_p8 }
  0xde   : > { %9497 = shalt.err (!%p9494_p12)
}
  0xdf   : > { %s16533_s27 = smov 16   ;;  %s9617_s2 = smov 1  }
  0xe0   : > { %8667 = dma.hbm_to_vmem [thread:$0]  (%p16569_p1), %s10145_s28, 64, %s10148_s25, %s10150_s16, %s16533_s27, %s16533_s27, %s9617_s2  }
  0xe1   : > { %s10181_s24 = scalar_lea.hbm %s16516_s18, %s8381_s17  ;;  %s1218_s23 = scalar_lea.vmem [#allocation18], %s10137_s0 }
  0xe2   : > { %s1225_s22 = sshll.u32 %s1218_s23, 4  ;;  %s9498_s7 = scalar_lea.hbm %s10181_s24, 64  ;;  %s1226_s22 = int_to_ptr.vmem [resolvable:$true] %s1225_s22 }
  0xe3   : > { %p9499_p11 = scmp.ne.s32.totalorder %s10181_s24, %s9498_s7  ;;  %s9502_s28 = scalar_lea.hbm %s16516_s18, 128 }
  0xe4   : > { %p9503_p13 = scmp.lt.s32.totalorder %s10181_s24, %s16516_s18  ;;  %p9504_p3 = scmp.lt.s32.totalorder %s9502_s28, %s9498_s7 }
  0xe5   : > { %p9500_p6 = pnand %p9499_p11, %p16569_p1 }
  0xe6   : > { %p9505_p7 = por %p9504_p3, %p9503_p13 }
  0xe7   : > { %p9501_p5 = pneg %p9500_p6 }
  0xe9   : > { %p9506_p9 = pnand %p9505_p7, %p9501_p5 }
  0xeb   : > { %9509 = shalt.err (!%p9506_p9)
}
  0xec   : > { %s9510_s0 = scalar_lea.vmem %s1226_s22, 64  ;;  %s9618_s17 = smov [#allocation18]  }
  0xed   : > { %p9511_p8 = scmp.ne.s32.totalorder %s1226_s22, %s9510_s0  ;;  %s9514_s6 = sshll.u32 %s9618_s17, 4  ;;  %s9515_s6 = int_to_ptr.vmem [resolvable:$false] %s9514_s6 }
  0xee   : > { %s9516_s19 = scalar_lea.vmem %s9515_s6, 128  ;;  %p9517_p2 = scmp.lt.s32.totalorder %s1226_s22, %s9515_s6 }
  0xef   : > { %p9512_p4 = pnand %p9511_p8, %p16569_p1  ;;  %p9518_p12 = scmp.lt.s32.totalorder %s9516_s19, %s9510_s0 }
  0xf1   : > { %p9513_p0 = pneg %p9512_p4  ;;  %p9519_p11 = por %p9518_p12, %p9517_p2 }
  0xf3   : > { %p9520_p6 = pnand %p9519_p11, %p9513_p0 }
  0xf5   : > { %9523 = shalt.err (!%p9520_p6)
}
  0xf6   : > { %s16570_s5 = smov 16  }
  0xf7   : > { %8668 = dma.hbm_to_vmem [thread:$0]  (%p16569_p1), %s10181_s24, 64, %s1226_s22, %s10150_s16, %s16570_s5, %s16570_s5, %s9617_s2  }
  0xf8 PF: > { %p16571_p5 = scmp.ne.s32.totalorder %s16562_s29, 0 }
  0xfa   : > { %1237 = sbr.rel (%p16571_p5) target bundleno = 2765 (0xacd), region = 130 }
  0xff   : > { %p16572_p13 = scmp.eq.s32.totalorder %s9747_s1, 0 }
 0x101   : > { %9567 = dma.done.wait (%p16572_p13), [#allocation4], 512   ;;  %p16573_p3 = pmov %p16572_p13 }
 0x103   : > { %9569 = vsyncadd (%p16573_p3), [#allocation4], 4294966784  ;;  %p16574_p7 = pmov %p16573_p3 }
 0x104   : > { %p16575_p9 = pmov %p16573_p3 }
 0x105   : > { %9571 = dma.done.wait (%p16574_p7), [#allocation7], 528  }
 0x106   : > { %9573 = vsyncadd (%p16575_p9), [#allocation7], 4294966768  ;;  %p16576_p8 = pmov %p16573_p3 }
 0x107   : > { %p16577_p1 = pmov %p16573_p3 }
 0x108   : > { %9575 = dma.done.wait (%p16576_p8), [#allocation10], 1024  }
 0x109   : > { %9577 = vsyncadd (%p16577_p1), [#allocation10], 4294966272  ;;  %p16578_p4 = pmov %p16577_p1 }
 0x10a   : > { %p16579_p0 = pmov %p16577_p1 }
 0x10b   : > { %9579 = dma.done.wait (%p16578_p4), [#allocation13], 32  }
 0x10c   : > { %9581 = vsyncadd (%p16579_p0), [#allocation13], 4294967264  ;;  %s10223_s8 = sand.u32 1, %s9596_s30   ;;  %s1274_s3 = sand.u32 1, %s9747_s1  }
 0x10d   : > { %s8325_s29 = sshll.u32 %s10223_s8, 10  ;;  %s16539_s16 = sshll.u32 %s10223_s8, 2 }
 0x10e   : > { %s10228_s27 = scalar_lea.vmem [#allocation15], %s8325_s29  ;;  %s1275_s2 = scalar_lea.sflag [#allocation17], %s1274_s3 }
 0x10f   : > { %s10232_s24 = scalar_lea.vmem [#allocation16], %s16539_s16  ;;  %p16580_p2 = scmp.ne.s32.totalorder %s16557_s26, 0 }
 0x111   : > { %9583 = dma.done.wait (%p16580_p2), %s1275_s2, 128  }
 0x112   : > { %9585 = vsyncadd (%p16580_p2), %s1275_s2, 4294967168  ;;  %v10239_v0 = vld [vmem:[%s10228_s27 + $0x10] sm:$0xff]  ;;  %v10242_v1 = vld [vmem:[%s10228_s27] sm:$0xff]  ;;  %s9619_s23 = smov 96   ;;  %s16614_s7 = sld [smem:[#allocation186_spill]]  ;;  %vm2028_vm0 = vcmask 261120  }
 0x113   : > { %2417 = vrot.lane.b32.xlu1 %v10239_v0, %s9619_s23  ;;  %2413 = vrot.lane.b32.xlu0 %v10242_v1, %s9619_s23  ;;  %v10249_v2 = vld [vmem:[%s10228_s27 + $0x18] sm:$0xff]  ;;  %v10252_v3 = vld [vmem:[%s10228_s27 + $0x8] sm:$0xff]  ;;  %s16615_s29 = sld [smem:[#allocation185_spill]]  ;;  %s9620_s16 = smov 32   ;;  %vm3565_vm1 = vcmask 523520   ;;  %vm5102_vm2 = vcmask 785920  }
 0x114   : > { %v10259_v4 = vld [vmem:[%s10228_s27 + $0x28] sm:$0xff]  ;;  %v10262_v5 = vld [vmem:[%s10228_s27 + $0x20] sm:$0xff]  ;;  %v10269_v6 = vld [vmem:[%s10228_s27 + $0x38] sm:$0xff]  ;;  %s9621_s17 = smov 64   ;;  %vm6639_vm3 = vcmask 1048320   ;;  %s17164_s3 = sld [smem:[#allocation184_spill]] }
 0x115   : > { %v10272_v7 = vld [vmem:[%s10228_s27 + $0x30] sm:$0xff]  ;;  %v10279_v8 = vld [vmem:[%s10228_s27 + $0x48] sm:$0xff]  ;;  %v10282_v9 = vld [vmem:[%s10228_s27 + $0x40] sm:$0xff]  ;;  %s17251_s22 = sld [smem:[#allocation187_spill]]  ;;  %s8329_s0 = sshll.u32 %s9747_s1, 2  ;;  %vm9624_vm4 = vmmov 0  }
 0x116   : > { %v10289_v10 = vld [vmem:[%s10228_s27 + $0x58] sm:$0xff]  ;;  %v10292_v11 = vld [vmem:[%s10228_s27 + $0x50] sm:$0xff]  ;;  %v10299_v12 = vld [vmem:[%s10228_s27 + $0x68] sm:$0xff]  ;;  %p1369_p12 = scmp.lt.s32.totalorder %s8329_s0, 7  ;;  %s17253_s2 = sld [smem:[#allocation193_spill]] }
 0x117   : > { %2419 = vrot.lane.b32.xlu1 %v10249_v2, %s9619_s23  ;;  %2415 = vrot.lane.b32.xlu0 %v10252_v3, %s9619_s23  ;;  %v10302_v13 = vld [vmem:[%s10228_s27 + $0x60] sm:$0xff]  ;;  %v10309_v14 = vld [vmem:[%s10228_s27 + $0x78] sm:$0xff]  ;;  %s17255_s6 = sld [smem:[#allocation190_spill]]  ;;  %s8076_s25 = scalar_lea.sflag [#allocation5], %s10223_s8 }
 0x118   : > { %v10312_v15 = vld [vmem:[%s10228_s27 + $0x70] sm:$0xff]  ;;  %v10319_v16 = vld [vmem:[%s10228_s27 + $0x88] sm:$0xff]  ;;  %v10322_v17 = vld [vmem:[%s10228_s27 + $0x80] sm:$0xff]  ;;  %s17269_s0 = smov (!%p1369_p12, %s8329_s0), 7 }
 0x119   : > { %v10329_v18 = vld [vmem:[%s10228_s27 + $0x98] sm:$0xff]  ;;  %v10332_v19 = vld [vmem:[%s10228_s27 + $0x90] sm:$0xff]  ;;  %v10339_v20 = vld [vmem:[%s10228_s27 + $0xa8] sm:$0xff] }
 0x11a   : > { %v10342_v21 = vld [vmem:[%s10228_s27 + $0xa0] sm:$0xff]  ;;  %v10349_v22 = vld [vmem:[%s10228_s27 + $0xb8] sm:$0xff]  ;;  %v10352_v23 = vld [vmem:[%s10228_s27 + $0xb0] sm:$0xff] }
 0x11b   : > { %2423 = vrot.lane.b32.xlu1 %v10259_v4, %s9619_s23  ;;  %2421 = vrot.lane.b32.xlu0 %v10262_v5, %s9619_s23  ;;  %v10359_v24 = vld [vmem:[%s10228_s27 + $0xc8] sm:$0xff]  ;;  %v10362_v25 = vld [vmem:[%s10228_s27 + $0xc0] sm:$0xff] }
 0x11c   : > { %v10369_v26 = vld [vmem:[%s10228_s27 + $0xd8] sm:$0xff]  ;;  %v10372_v27 = vld [vmem:[%s10228_s27 + $0xd0] sm:$0xff]  ;;  %v10379_v28 = vld [vmem:[%s10228_s27 + $0xe8] sm:$0xff] }
 0x11d   : > { %v10382_v29 = vld [vmem:[%s10228_s27 + $0xe0] sm:$0xff]  ;;  %v10389_v30 = vld [vmem:[%s10228_s27 + $0xf8] sm:$0xff]  ;;  %v10392_v31 = vld [vmem:[%s10228_s27 + $0xf0] sm:$0xff] }
 0x11e   : > { %v10399_v32 = vld [vmem:[%s10228_s27 + $0x108] sm:$0xff]  ;;  %v10402_v33 = vld [vmem:[%s10228_s27 + $0x100] sm:$0xff]  ;;  %v10409_v34 = vld [vmem:[%s10228_s27 + $0x118] sm:$0xff] }
 0x11f   : > { %2427 = vrot.lane.b32.xlu1 %v10269_v6, %s9619_s23  ;;  %2425 = vrot.lane.b32.xlu0 %v10272_v7, %s9619_s23  ;;  %v10412_v35 = vld [vmem:[%s10228_s27 + $0x110] sm:$0xff]  ;;  %v10419_v36 = vld [vmem:[%s10228_s27 + $0x128] sm:$0xff] }
 0x120   : > { %v10422_v37 = vld [vmem:[%s10228_s27 + $0x120] sm:$0xff]  ;;  %v10429_v38 = vld [vmem:[%s10228_s27 + $0x138] sm:$0xff]  ;;  %v10432_v39 = vld [vmem:[%s10228_s27 + $0x130] sm:$0xff] }
 0x121   : > { %v10439_v40 = vld [vmem:[%s10228_s27 + $0x148] sm:$0xff]  ;;  %v10442_v41 = vld [vmem:[%s10228_s27 + $0x140] sm:$0xff]  ;;  %v10449_v42 = vld [vmem:[%s10228_s27 + $0x158] sm:$0xff] }
 0x122   : > { %v10452_v43 = vld [vmem:[%s10228_s27 + $0x150] sm:$0xff]  ;;  %v10459_v44 = vld [vmem:[%s10228_s27 + $0x168] sm:$0xff]  ;;  %v10462_v45 = vld [vmem:[%s10228_s27 + $0x160] sm:$0xff] }
 0x123   : > { %2431 = vrot.lane.b32.xlu1 %v10279_v8, %s9619_s23  ;;  %2429 = vrot.lane.b32.xlu0 %v10282_v9, %s9619_s23  ;;  %16581 = vst [vmem:[#allocation31_spill] sm:$0xff] %v10462_v45  ;;  %v10469_v46 = vld [vmem:[%s10228_s27 + $0x178] sm:$0xff]  ;;  %v10472_v47 = vld [vmem:[%s10228_s27 + $0x170] sm:$0xff] }
 0x124   : > { %16582 = vst [vmem:[#allocation32_spill] sm:$0xff] %v10469_v46  ;;  %16583 = vst [vmem:[#allocation33_spill] sm:$0xff] %v10472_v47  ;;  %v10479_v48 = vld [vmem:[%s10228_s27 + $0x188] sm:$0xff]  ;;  %v10482_v49 = vld [vmem:[%s10228_s27 + $0x180] sm:$0xff] }
 0x125   : > { %16584 = vst [vmem:[#allocation34_spill] sm:$0xff] %v10479_v48  ;;  %16585 = vst [vmem:[#allocation35_spill] sm:$0xff] %v10482_v49  ;;  %v2208_v50 = vld [vmem:[%s10228_s27 + $0x198] sm:$0xff]  ;;  %v2207_v51 = vld [vmem:[%s10228_s27 + $0x190] sm:$0xff] }
 0x126   : > { %v2210_v52 = vld [vmem:[%s10228_s27 + $0x1a8] sm:$0xff]  ;;  %v2209_v53 = vld [vmem:[%s10228_s27 + $0x1a0] sm:$0xff]  ;;  %v2212_v54 = vld [vmem:[%s10228_s27 + $0x1b8] sm:$0xff] }
 0x127   : > { %2435 = vrot.lane.b32.xlu1 %v10289_v10, %s9619_s23  ;;  %2433 = vrot.lane.b32.xlu0 %v10292_v11, %s9619_s23  ;;  %v2211_v55 = vld [vmem:[%s10228_s27 + $0x1b0] sm:$0xff]  ;;  %v2214_v56 = vld [vmem:[%s10228_s27 + $0x1c8] sm:$0xff] }
 0x128   : > { %v2213_v57 = vld [vmem:[%s10228_s27 + $0x1c0] sm:$0xff]  ;;  %v2216_v58 = vld [vmem:[%s10228_s27 + $0x1d8] sm:$0xff]  ;;  %v2215_v59 = vld [vmem:[%s10228_s27 + $0x1d0] sm:$0xff] }
 0x129   : > { %v2218_v62 = vld [vmem:[%s10228_s27 + $0x1e8] sm:$0xff]  ;;  %v2217_v63 = vld [vmem:[%s10228_s27 + $0x1e0] sm:$0xff] }
 0x12b   : > { %2439 = vrot.lane.b32.xlu1 %v10299_v12, %s9619_s23  ;;  %2437 = vrot.lane.b32.xlu0 %v10302_v13, %s9619_s23 }
 0x12f   : > { %2443 = vrot.lane.b32.xlu1 %v10309_v14, %s9619_s23  ;;  %2441 = vrot.lane.b32.xlu0 %v10312_v15, %s9619_s23 }
 0x133   : > { %2447 = vrot.lane.b32.xlu1 %v10319_v16, %s9619_s23  ;;  %2445 = vrot.lane.b32.xlu0 %v10322_v17, %s9619_s23 }
 0x137   : > { %2451 = vrot.lane.b32.xlu1 %v10329_v18, %s9619_s23  ;;  %2449 = vrot.lane.b32.xlu0 %v10332_v19, %s9619_s23 }
 0x13b   : > { %2455 = vrot.lane.b32.xlu1 %v10339_v20, %s9619_s23  ;;  %2453 = vrot.lane.b32.xlu0 %v10342_v21, %s9619_s23 }
 0x13f   : > { %2459 = vrot.lane.b32.xlu1 %v10349_v22, %s9619_s23  ;;  %2457 = vrot.lane.b32.xlu0 %v10352_v23, %s9619_s23 }
 0x143   : > { %2463 = vrot.lane.b32.xlu1 %v10359_v24, %s9619_s23  ;;  %2461 = vrot.lane.b32.xlu0 %v10362_v25, %s9619_s23 }
 0x147   : > { %2467 = vrot.lane.b32.xlu1 %v10369_v26, %s9619_s23  ;;  %2465 = vrot.lane.b32.xlu0 %v10372_v27, %s9619_s23 }
 0x14b   : > { %2471 = vrot.lane.b32.xlu1 %v10379_v28, %s9619_s23  ;;  %2469 = vrot.lane.b32.xlu0 %v10382_v29, %s9619_s23 }
 0x14f   : > { %2475 = vrot.lane.b32.xlu1 %v10389_v30, %s9619_s23  ;;  %2473 = vrot.lane.b32.xlu0 %v10392_v31, %s9619_s23 }
 0x153   : > { %2479 = vrot.lane.b32.xlu1 %v10399_v32, %s9619_s23  ;;  %2477 = vrot.lane.b32.xlu0 %v10402_v33, %s9619_s23 }
 0x157   : > { %2483 = vrot.lane.b32.xlu1 %v10409_v34, %s9619_s23  ;;  %2481 = vrot.lane.b32.xlu0 %v10412_v35, %s9619_s23 }
 0x15b   : > { %2487 = vrot.lane.b32.xlu1 %v10419_v36, %s9619_s23  ;;  %2485 = vrot.lane.b32.xlu0 %v10422_v37, %s9619_s23 }
 0x15f   : > { %2491 = vrot.lane.b32.xlu1 %v10429_v38, %s9619_s23  ;;  %2489 = vrot.lane.b32.xlu0 %v10432_v39, %s9619_s23 }
 0x163   : > { %2495 = vrot.lane.b32.xlu1 %v10439_v40, %s9619_s23  ;;  %2493 = vrot.lane.b32.xlu0 %v10442_v41, %s9619_s23 }
 0x167   : > { %2499 = vrot.lane.b32.xlu1 %v10449_v42, %s9619_s23  ;;  %2497 = vrot.lane.b32.xlu0 %v10452_v43, %s9619_s23 }
 0x16b   : > { %2503 = vrot.lane.b32.xlu1 %v10459_v44, %s9619_s23  ;;  %2501 = vrot.lane.b32.xlu0 %v10462_v45, %s9619_s23 }
 0x16f   : > { %2507 = vrot.lane.b32.xlu1 %v10469_v46, %s9619_s23  ;;  %2505 = vrot.lane.b32.xlu0 %v10472_v47, %s9619_s23 }
 0x173   : > { %2511 = vrot.lane.b32.xlu1 %v10479_v48, %s9619_s23  ;;  %2509 = vrot.lane.b32.xlu0 %v10482_v49, %s9619_s23  ;;  %v2246_v49 = vld [vmem:[%s10228_s27 + $0x2c8] sm:$0xff]  ;;  %v2245_v48 = vld [vmem:[%s10228_s27 + $0x2c0] sm:$0xff] }
 0x177   : > { %2515 = vrot.lane.b32.xlu1 %v2208_v50, %s9619_s23  ;;  %2513 = vrot.lane.b32.xlu0 %v2207_v51, %s9619_s23 }
 0x17b   : > { %2519 = vrot.lane.b32.xlu1 %v2210_v52, %s9619_s23  ;;  %2517 = vrot.lane.b32.xlu0 %v2209_v53, %s9619_s23  ;;  %v2220_v52 = vld [vmem:[%s10228_s27 + $0x1f8] sm:$0xff]  ;;  %v2219_v53 = vld [vmem:[%s10228_s27 + $0x1f0] sm:$0xff] }
 0x17f   : > { %2523 = vrot.lane.b32.xlu1 %v2212_v54, %s9619_s23  ;;  %2521 = vrot.lane.b32.xlu0 %v2211_v55, %s9619_s23 }
 0x183   : > { %2527 = vrot.lane.b32.xlu1 %v2214_v56, %s9619_s23  ;;  %2525 = vrot.lane.b32.xlu0 %v2213_v57, %s9619_s23  ;;  %v2222_v56 = vld [vmem:[%s10228_s27 + $0x208] sm:$0xff]  ;;  %v2221_v57 = vld [vmem:[%s10228_s27 + $0x200] sm:$0xff] }
 0x185   : > { %v10506_v60 = vpop.permute.xlu1 %2417  ;;  %v10508_v61 = vpop.permute.xlu0 %2413 }
 0x186   : > { %16586 = vst [vmem:[#allocation36_spill] sm:$0xff] %v10506_v60  ;;  %16587 = vst [vmem:[#allocation37_spill] sm:$0xff] %v10508_v61  ;;  %v1391_v60 = vld [vmem:[%s16615_s29 + $0x18] sm:$0xff]  ;;  %v1524_v61 = vld [vmem:[%s16614_s7 + $0x40] sm:$0xff] }
 0x187   : > { %2531 = vrot.lane.b32.xlu1 %v2216_v58, %s9619_s23  ;;  %2529 = vrot.lane.b32.xlu0 %v2215_v59, %s9619_s23 }
 0x189   : > { %v10514_v50 = vpop.permute.xlu1 %2419  ;;  %v10516_v51 = vpop.permute.xlu0 %2415 }
 0x18a   : > { %16588 = vst [vmem:[#allocation38_spill] sm:$0xff] %v10514_v50  ;;  %16589 = vst [vmem:[#allocation39_spill] sm:$0xff] %v10516_v51  ;;  %v1390_v50 = vld [vmem:[%s16615_s29 + $0x10] sm:$0xff] }
 0x18b   : > { %2535 = vrot.lane.b32.xlu1 %v2218_v62, %s9619_s23  ;;  %2533 = vrot.lane.b32.xlu0 %v2217_v63, %s9619_s23  ;;  %v2224_v62 = vld [vmem:[%s10228_s27 + $0x218] sm:$0xff]  ;;  %v2223_v63 = vld [vmem:[%s10228_s27 + $0x210] sm:$0xff] }
 0x18d   : > { %v10522_v54 = vpop.permute.xlu1 %2423  ;;  %v10524_v55 = vpop.permute.xlu0 %2421 }
 0x18e   : > { %16590 = vst [vmem:[#allocation40_spill] sm:$0xff] %v10522_v54  ;;  %16591 = vst [vmem:[#allocation41_spill] sm:$0xff] %v10524_v55 }
 0x18f   : > { %2539 = vrot.lane.b32.xlu1 %v2220_v52, %s9619_s23  ;;  %2537 = vrot.lane.b32.xlu0 %v2219_v53, %s9619_s23  ;;  %v2226_v53 = vld [vmem:[%s10228_s27 + $0x228] sm:$0xff] }
 0x191   : > { %v10530_v58 = vpop.permute.xlu1 %2427  ;;  %v10532_v59 = vpop.permute.xlu0 %2425 }
 0x192   : > { %16592 = vst [vmem:[#allocation42_spill] sm:$0xff] %v10530_v58  ;;  %16593 = vst [vmem:[#allocation43_spill] sm:$0xff] %v10532_v59  ;;  %v2225_v58 = vld [vmem:[%s10228_s27 + $0x220] sm:$0xff] }
 0x193   : > { %2543 = vrot.lane.b32.xlu1 %v2222_v56, %s9619_s23  ;;  %2541 = vrot.lane.b32.xlu0 %v2221_v57, %s9619_s23  ;;  %v2228_v57 = vld [vmem:[%s10228_s27 + $0x238] sm:$0xff] }
 0x195   : > { %v10538_v55 = vpop.permute.xlu1 %2431  ;;  %v10540_v52 = vpop.permute.xlu0 %2429 }
 0x196   : > { %16594 = vst [vmem:[#allocation44_spill] sm:$0xff] %v10538_v55  ;;  %16595 = vst [vmem:[#allocation45_spill] sm:$0xff] %v10540_v52  ;;  %v2227_v55 = vld [vmem:[%s10228_s27 + $0x230] sm:$0xff] }
 0x197   : > { %2547 = vrot.lane.b32.xlu1 %v2224_v62, %s9619_s23  ;;  %2545 = vrot.lane.b32.xlu0 %v2223_v63, %s9619_s23  ;;  %v2230_v63 = vld [vmem:[%s10228_s27 + $0x248] sm:$0xff] }
 0x199   : > { %v10546_v59 = vpop.permute.xlu1 %2435  ;;  %v10548_v56 = vpop.permute.xlu0 %2433 }
 0x19a   : > { %16596 = vst [vmem:[#allocation46_spill] sm:$0xff] %v10546_v59  ;;  %16597 = vst [vmem:[#allocation47_spill] sm:$0xff] %v10548_v56  ;;  %v2229_v59 = vld [vmem:[%s10228_s27 + $0x240] sm:$0xff] }
 0x19b   : > { %2551 = vrot.lane.b32.xlu1 %v2226_v53, %s9619_s23  ;;  %2549 = vrot.lane.b32.xlu0 %v2225_v58, %s9619_s23  ;;  %v2232_v58 = vld [vmem:[%s10228_s27 + $0x258] sm:$0xff] }
 0x19d   : > { %v10554_v52 = vpop.permute.xlu1 %2439  ;;  %v10556_v62 = vpop.permute.xlu0 %2437 }
 0x19e   : > { %16598 = vst [vmem:[#allocation48_spill] sm:$0xff] %v10554_v52  ;;  %16599 = vst [vmem:[#allocation49_spill] sm:$0xff] %v10556_v62  ;;  %v2231_v52 = vld [vmem:[%s10228_s27 + $0x250] sm:$0xff] }
 0x19f   : > { %2555 = vrot.lane.b32.xlu1 %v2228_v57, %s9619_s23  ;;  %2553 = vrot.lane.b32.xlu0 %v2227_v55, %s9619_s23  ;;  %v2234_v55 = vld [vmem:[%s10228_s27 + $0x268] sm:$0xff] }
 0x1a1   : > { %v10562_v56 = vpop.permute.xlu1 %2443  ;;  %v10564_v53 = vpop.permute.xlu0 %2441 }
 0x1a2   : > { %16600 = vst [vmem:[#allocation50_spill] sm:$0xff] %v10562_v56  ;;  %16601 = vst [vmem:[#allocation51_spill] sm:$0xff] %v10564_v53  ;;  %v2233_v56 = vld [vmem:[%s10228_s27 + $0x260] sm:$0xff] }
 0x1a3   : > { %2559 = vrot.lane.b32.xlu1 %v2230_v63, %s9619_s23  ;;  %2557 = vrot.lane.b32.xlu0 %v2229_v59, %s9619_s23  ;;  %v2236_v59 = vld [vmem:[%s10228_s27 + $0x278] sm:$0xff] }
 0x1a5   : > { %v10570_v62 = vpop.permute.xlu1 %2447  ;;  %v10572_v57 = vpop.permute.xlu0 %2445 }
 0x1a6   : > { %16602 = vst [vmem:[#allocation52_spill] sm:$0xff] %v10570_v62  ;;  %16603 = vst [vmem:[#allocation53_spill] sm:$0xff] %v10572_v57  ;;  %v2235_v62 = vld [vmem:[%s10228_s27 + $0x270] sm:$0xff] }
 0x1a7   : > { %2563 = vrot.lane.b32.xlu1 %v2232_v58, %s9619_s23  ;;  %2561 = vrot.lane.b32.xlu0 %v2231_v52, %s9619_s23  ;;  %v2238_v52 = vld [vmem:[%s10228_s27 + $0x288] sm:$0xff] }
 0x1a9   : > { %v10578_v53 = vpop.permute.xlu1 %2451  ;;  %v10580_v63 = vpop.permute.xlu0 %2449 }
 0x1aa   : > { %16604 = vst [vmem:[#allocation54_spill] sm:$0xff] %v10578_v53  ;;  %16605 = vst [vmem:[#allocation55_spill] sm:$0xff] %v10580_v63  ;;  %v2237_v53 = vld [vmem:[%s10228_s27 + $0x280] sm:$0xff] }
 0x1ab   : > { %2567 = vrot.lane.b32.xlu1 %v2234_v55, %s9619_s23  ;;  %2565 = vrot.lane.b32.xlu0 %v2233_v56, %s9619_s23  ;;  %v2240_v56 = vld [vmem:[%s10228_s27 + $0x298] sm:$0xff]  ;;  %v2239_v55 = vld [vmem:[%s10228_s27 + $0x290] sm:$0xff] }
 0x1ad   : > { %v10586_v57 = vpop.permute.xlu1 %2455  ;;  %v10588_v58 = vpop.permute.xlu0 %2453 }
 0x1ae   : > { %16606 = vst [vmem:[#allocation56_spill] sm:$0xff] %v10586_v57  ;;  %16607 = vst [vmem:[#allocation57_spill] sm:$0xff] %v10588_v58 }
 0x1af   : > { %2571 = vrot.lane.b32.xlu1 %v2236_v59, %s9619_s23  ;;  %2569 = vrot.lane.b32.xlu0 %v2235_v62, %s9619_s23  ;;  %v2242_v62 = vld [vmem:[%s10228_s27 + $0x2a8] sm:$0xff]  ;;  %v2241_v59 = vld [vmem:[%s10228_s27 + $0x2a0] sm:$0xff] }
 0x1b1   : > { %v10594_v63 = vpop.permute.xlu1 %2459  ;;  %v10596_v54 = vpop.permute.xlu0 %2457 }
 0x1b2   : > { %16608 = vst [vmem:[#allocation58_spill] sm:$0xff] %v10594_v63  ;;  %16609 = vst [vmem:[#allocation59_spill] sm:$0xff] %v10596_v54 }
 0x1b3   : > { %2575 = vrot.lane.b32.xlu1 %v2238_v52, %s9619_s23  ;;  %2573 = vrot.lane.b32.xlu0 %v2237_v53, %s9619_s23  ;;  %v1518_v53 = vld [vmem:[%s16614_s7 + $0x10] sm:$0xff]  ;;  %v1516_v52 = vld [vmem:[%s16614_s7] sm:$0xff] }
 0x1b5   : > { %v10602_v57 = vpop.permute.xlu1 %2463  ;;  %v10604_v58 = vpop.permute.xlu0 %2461 }
 0x1b6   : > { %16610 = vst [vmem:[#allocation60_spill] sm:$0xff] %v10602_v57  ;;  %16611 = vst [vmem:[#allocation61_spill] sm:$0xff] %v10604_v58  ;;  %v2244_v58 = vld [vmem:[%s10228_s27 + $0x2b8] sm:$0xff]  ;;  %v2243_v57 = vld [vmem:[%s10228_s27 + $0x2b0] sm:$0xff] }
 0x1b7   : > { %2579 = vrot.lane.b32.xlu1 %v2240_v56, %s9619_s23  ;;  %2577 = vrot.lane.b32.xlu0 %v2239_v55, %s9619_s23  ;;  %v1519_v56 = vld [vmem:[%s16614_s7 + $0x18] sm:$0xff]  ;;  %v1774_v55 = vmul.f32 %v10239_v0, %v1518_v53 }
 0x1b9   : > { %v10610_v63 = vpop.permute.xlu1 %2467  ;;  %v10612_v54 = vpop.permute.xlu0 %2465 }
 0x1ba   : > { %16612 = vst [vmem:[#allocation62_spill] sm:$0xff] %v10610_v63  ;;  %16613 = vst [vmem:[#allocation63_spill] sm:$0xff] %v10612_v54  ;;  %v1772_v54 = vmul.f32 %v10242_v1, %v1516_v52  ;;  %v1517_v63 = vld [vmem:[%s16614_s7 + $0x8] sm:$0xff] }
 0x1bb   : > { %2583 = vrot.lane.b32.xlu1 %v2242_v62, %s9619_s23  ;;  %2581 = vrot.lane.b32.xlu0 %v2241_v59, %s9619_s23  ;;  %v1388_v62 = vld [vmem:[%s16615_s29] sm:$0xff]  ;;  %v1775_v59 = vmul.f32 %v10249_v2, %v1519_v56  ;;  %v1773_v0 = vmul.f32 %v10252_v3, %v1517_v63  ;;  %v1521_v1 = vld [vmem:[%s16614_s7 + $0x28] sm:$0xff] }
 0x1bc   : > { %v1389_v2 = vld [vmem:[%s16615_s29 + $0x8] sm:$0xff]  ;;  %v1777_v3 = vmul.f32 %v10259_v4, %v1521_v1  ;;  %v1520_v63 = vld [vmem:[%s16614_s7 + $0x20] sm:$0xff]  ;;  %v1523_v56 = vld [vmem:[%s16614_s7 + $0x38] sm:$0xff]  ;;  %v10671_v1 = vadd.f32 %v1774_v55, %v1390_v50  ;;  %v10673_v51 = vadd.f32 %v1772_v54, %v1388_v62 }
 0x1bd   : > { %v10643_v53 = vpop.permute.xlu1 %2471  ;;  %v10645_v52 = vpop.permute.xlu0 %2469  ;;  %v1525_v4 = vld [vmem:[%s16614_s7 + $0x48] sm:$0xff]  ;;  %v10680_v47 = vadd.f32 %v1775_v59, %v1391_v60  ;;  %v10682_v46 = vadd.f32 %v1773_v0, %v1389_v2  ;;  %v1776_v45 = vmul.f32 %v10262_v5, %v1520_v63  ;;  %v1527_v50 = vld [vmem:[%s16614_s7 + $0x58] sm:$0xff]  ;;  %v1526_v54 = vld [vmem:[%s16614_s7 + $0x50] sm:$0xff]  ;;  %v1780_v2 = vmul.f32 %v10282_v9, %v1524_v61 }
 0x1be   : > { %16616 = vst [vmem:[#allocation64_spill] sm:$0xff] %v10643_v53  ;;  %16617 = vst [vmem:[#allocation65_spill] sm:$0xff] %v10645_v52  ;;  %v1393_v52 = vld [vmem:[%s16615_s29 + $0x28] sm:$0xff]  ;;  %v1522_v53 = vld [vmem:[%s16614_s7 + $0x30] sm:$0xff]  ;;  %v1781_v0 = vmul.f32 %v10279_v8, %v1525_v4  ;;  %v1783_v61 = vmul.f32 %v10289_v10, %v1527_v50 }
 0x1bf   : > { %2587 = vrot.lane.b32.xlu1 %v2244_v58, %s9619_s23  ;;  %2585 = vrot.lane.b32.xlu0 %v2243_v57, %s9619_s23  ;;  %16618 = vst [vmem:[#allocation66_spill] sm:$0xff] %v10671_v1  ;;  %16619 = vst [vmem:[#allocation67_spill] sm:$0xff] %v10680_v47  ;;  %v1779_v58 = vmul.f32 %v10269_v6, %v1523_v56  ;;  %v1529_v57 = vld [vmem:[%s16614_s7 + $0x68] sm:$0xff]  ;;  %v10699_v62 = vadd.f32 %v1777_v3, %v1393_v52  ;;  %v1392_v5 = vld [vmem:[%s16615_s29 + $0x20] sm:$0xff] }
 0x1c0   : > { %v1395_v6 = vld [vmem:[%s16615_s29 + $0x38] sm:$0xff]  ;;  %v1778_v59 = vmul.f32 %v10272_v7, %v1522_v53  ;;  %v1528_v63 = vld [vmem:[%s16614_s7 + $0x60] sm:$0xff]  ;;  %v1530_v3 = vld [vmem:[%s16614_s7 + $0x70] sm:$0xff]  ;;  %v1782_v53 = vmul.f32 %v10292_v11, %v1526_v54  ;;  %v1785_v56 = vmul.f32 %v10299_v12, %v1529_v57  ;;  %v10757_v47 = vadd.f32 %v1776_v45, %v1392_v5  ;;  %2030 = vst.msk [vmem:[#allocation2 + $0x8] sm:$0xff] %vm2028_vm0, %v10682_v46 }
 0x1c1   : > { %v10695_v60 = vpop.permute.xlu1 %2475  ;;  %v10697_v55 = vpop.permute.xlu0 %2473  ;;  %16622 = vst [vmem:[#allocation70_spill] sm:$0xff] %v10699_v62  ;;  %v1531_v52 = vld [vmem:[%s16614_s7 + $0x78] sm:$0xff]  ;;  %v1394_v7 = vld [vmem:[%s16615_s29 + $0x30] sm:$0xff]  ;;  %v1397_v8 = vld [vmem:[%s16615_s29 + $0x48] sm:$0xff]  ;;  %v1784_v50 = vmul.f32 %v10302_v13, %v1528_v63  ;;  %v10759_v1 = vadd.f32 %v1779_v58, %v1395_v6 }
 0x1c2   : > { %16620 = vst [vmem:[#allocation68_spill] sm:$0xff] %v10695_v60  ;;  %16621 = vst [vmem:[#allocation69_spill] sm:$0xff] %v10697_v55  ;;  %v1396_v9 = vld [vmem:[%s16615_s29 + $0x40] sm:$0xff]  ;;  %v1533_v4 = vld [vmem:[%s16614_s7 + $0x88] sm:$0xff]  ;;  %v1787_v54 = vmul.f32 %v10309_v14, %v1531_v52  ;;  %v10782_v52 = vadd.f32 %v1778_v59, %v1394_v7 }
 0x1c3   : > { %v1532_v55 = vld [vmem:[%s16614_s7 + $0x80] sm:$0xff]  ;;  %2591 = vrot.lane.b32.xlu1 %v2246_v49, %s9619_s23  ;;  %2589 = vrot.lane.b32.xlu0 %v2245_v48, %s9619_s23  ;;  %v1399_v10 = vld [vmem:[%s16615_s29 + $0x58] sm:$0xff]  ;;  %v1786_v49 = vmul.f32 %v10312_v15, %v1530_v3  ;;  %v1789_v48 = vmul.f32 %v10319_v16, %v1533_v4  ;;  %v10784_v3 = vadd.f32 %v1781_v0, %v1397_v8 }
 0x1c4   : > { %v1398_v11 = vld [vmem:[%s16615_s29 + $0x50] sm:$0xff]  ;;  %v1401_v12 = vld [vmem:[%s16615_s29 + $0x68] sm:$0xff]  ;;  %v1535_v57 = vld [vmem:[%s16614_s7 + $0x98] sm:$0xff]  ;;  %v1788_v45 = vmul.f32 %v10322_v17, %v1532_v55  ;;  %v10786_v4 = vadd.f32 %v1780_v2, %v1396_v9  ;;  %v10801_v2 = vadd.f32 %v1783_v61, %v1399_v10  ;;  %2029 = vst.msk [vmem:[#allocation2] sm:$0xff] %vm2028_vm0, %v10673_v51 }
 0x1c5   : > { %v2248_v60 = vld [vmem:[%s10228_s27 + $0x2d8] sm:$0xff]  ;;  %v2247_v62 = vld [vmem:[%s10228_s27 + $0x2d0] sm:$0xff]  ;;  %v1405_v16 = vld [vmem:[%s16615_s29 + $0x88] sm:$0xff]  ;;  %v1791_v58 = vmul.f32 %v10329_v18, %v1535_v57  ;;  %v10778_v6 = vpop.permute.xlu1 %2479  ;;  %v10780_v63 = vpop.permute.xlu0 %2477  ;;  %v10803_v7 = vadd.f32 %v1782_v53, %v1398_v11  ;;  %v10805_v8 = vadd.f32 %v1785_v56, %v1401_v12  ;;  %2033 = vst.msk [vmem:[#allocation2 + $0x20] sm:$0xff] %vm2028_vm0, %v10757_v47 }
 0x1c6   : > { %v1400_v13 = vld [vmem:[%s16615_s29 + $0x60] sm:$0xff]  ;;  %v1403_v14 = vld [vmem:[%s16615_s29 + $0x78] sm:$0xff]  ;;  %v1402_v15 = vld [vmem:[%s16615_s29 + $0x70] sm:$0xff]  ;;  %16623 = vst [vmem:[#allocation71_spill] sm:$0xff] %v10778_v6  ;;  %v10824_v10 = vadd.f32 %v1789_v48, %v1405_v16 }
 0x1c7   : > { %v1534_v5 = vld [vmem:[%s16614_s7 + $0x90] sm:$0xff]  ;;  %16624 = vst [vmem:[#allocation72_spill] sm:$0xff] %v10780_v63  ;;  %v1404_v17 = vld [vmem:[%s16615_s29 + $0x80] sm:$0xff]  ;;  %v1407_v18 = vld [vmem:[%s16615_s29 + $0x98] sm:$0xff]  ;;  %2595 = vrot.lane.b32.xlu1 %v2248_v60, %s9619_s23  ;;  %v10818_v61 = vadd.f32 %v1784_v50, %v1400_v13  ;;  %v10820_v53 = vadd.f32 %v1787_v54, %v1403_v14  ;;  %v10822_v56 = vadd.f32 %v1786_v49, %v1402_v15 }
 0x1c8   : > { %v1790_v55 = vmul.f32 %v10332_v19, %v1534_v5  ;;  %v1537_v59 = vld [vmem:[%s16614_s7 + $0xa8] sm:$0xff]  ;;  %v1536_v0 = vld [vmem:[%s16614_s7 + $0xa0] sm:$0xff]  ;;  %v1406_v19 = vld [vmem:[%s16615_s29 + $0x90] sm:$0xff]  ;;  %2593 = vrot.lane.b32.xlu0 %v2247_v62, %s9619_s23  ;;  %v10831_v63 = vadd.f32 %v1788_v45, %v1404_v17  ;;  %v10833_v6 = vadd.f32 %v1791_v58, %v1407_v18  ;;  %2035 = vst.msk [vmem:[#allocation2 + $0x30] sm:$0xff] %vm2028_vm0, %v10782_v52 }
 0x1c9   : > { %v1539_v9 = vld [vmem:[%s16614_s7 + $0xb8] sm:$0xff]  ;;  %v1538_v57 = vld [vmem:[%s16614_s7 + $0xb0] sm:$0xff]  ;;  %v1541_v11 = vld [vmem:[%s16614_s7 + $0xc8] sm:$0xff]  ;;  %v1793_v60 = vmul.f32 %v10339_v20, %v1537_v59  ;;  %v1792_v62 = vmul.f32 %v10342_v21, %v1536_v0  ;;  %v10846_v48 = vpop.permute.xlu1 %2483  ;;  %v10848_v13 = vpop.permute.xlu0 %2481  ;;  %2036 = vst.msk [vmem:[#allocation2 + $0x38] sm:$0xff] %vm2028_vm0, %v10759_v1 }
 0x1ca   : > { %v2250_v12 = vld [vmem:[%s10228_s27 + $0x2e8] sm:$0xff]  ;;  %v2249_v5 = vld [vmem:[%s10228_s27 + $0x2e0] sm:$0xff]  ;;  %v1543_v54 = vld [vmem:[%s16614_s7 + $0xd8] sm:$0xff]  ;;  %16625 = vst [vmem:[#allocation73_spill] sm:$0xff] %v10846_v48  ;;  %v10850_v14 = vadd.f32 %v1790_v55, %v1406_v19  ;;  %v1795_v15 = vmul.f32 %v10349_v22, %v1539_v9  ;;  %v1794_v16 = vmul.f32 %v10352_v23, %v1538_v57  ;;  %v1797_v45 = vmul.f32 %v10359_v24, %v1541_v11 }
 0x1cb   : > { %v1540_v50 = vld [vmem:[%s16614_s7 + $0xc0] sm:$0xff]  ;;  %v1542_v49 = vld [vmem:[%s16614_s7 + $0xd0] sm:$0xff]  ;;  %16626 = vst [vmem:[#allocation74_spill] sm:$0xff] %v10848_v13  ;;  %v1409_v20 = vld [vmem:[%s16615_s29 + $0xa8] sm:$0xff]  ;;  %v1799_v59 = vmul.f32 %v10369_v26, %v1543_v54  ;;  %2599 = vrot.lane.b32.xlu1 %v2250_v12, %s9619_s23 }
 0x1cc   : > { %v1408_v21 = vld [vmem:[%s16615_s29 + $0xa0] sm:$0xff]  ;;  %v1545_v58 = vld [vmem:[%s16614_s7 + $0xe8] sm:$0xff]  ;;  %v1547_v18 = vld [vmem:[%s16614_s7 + $0xf8] sm:$0xff]  ;;  %v1796_v55 = vmul.f32 %v10362_v25, %v1540_v50  ;;  %v1798_v0 = vmul.f32 %v10372_v27, %v1542_v49  ;;  %2597 = vrot.lane.b32.xlu0 %v2249_v5, %s9619_s23  ;;  %v10908_v13 = vadd.f32 %v1793_v60, %v1409_v20  ;;  %2037 = vst.msk [vmem:[#allocation2 + $0x40] sm:$0xff] %vm2028_vm0, %v10786_v4 }
 0x1cd   : > { %v1544_v17 = vld [vmem:[%s16614_s7 + $0xe0] sm:$0xff]  ;;  %v1411_v22 = vld [vmem:[%s16615_s29 + $0xb8] sm:$0xff]  ;;  %v1410_v23 = vld [vmem:[%s16615_s29 + $0xb0] sm:$0xff]  ;;  %v1801_v57 = vmul.f32 %v10379_v28, %v1545_v58  ;;  %v1803_v12 = vmul.f32 %v10389_v30, %v1547_v18  ;;  %v10910_v48 = vadd.f32 %v1792_v62, %v1408_v21  ;;  %v10929_v21 = vpop.permute.xlu1 %2487  ;;  %v10931_v58 = vpop.permute.xlu0 %2485  ;;  %2038 = vst.msk [vmem:[#allocation2 + $0x48] sm:$0xff] %vm2028_vm0, %v10784_v3 }
 0x1ce   : > { %v1413_v24 = vld [vmem:[%s16615_s29 + $0xc8] sm:$0xff]  ;;  %v1546_v19 = vld [vmem:[%s16614_s7 + $0xf0] sm:$0xff]  ;;  %v1412_v25 = vld [vmem:[%s16615_s29 + $0xc0] sm:$0xff]  ;;  %v1800_v11 = vmul.f32 %v10382_v29, %v1544_v17  ;;  %16627 = vst [vmem:[#allocation75_spill] sm:$0xff] %v10929_v21  ;;  %v10933_v17 = vadd.f32 %v1795_v15, %v1411_v22  ;;  %v10935_v18 = vadd.f32 %v1794_v16, %v1410_v23 }
 0x1cf   : > { %v1549_v9 = vld [vmem:[%s16614_s7 + $0x108] sm:$0xff]  ;;  %v1415_v26 = vld [vmem:[%s16615_s29 + $0xd8] sm:$0xff]  ;;  %v1414_v27 = vld [vmem:[%s16615_s29 + $0xd0] sm:$0xff]  ;;  %v1802_v5 = vmul.f32 %v10392_v31, %v1546_v19  ;;  %16628 = vst [vmem:[#allocation76_spill] sm:$0xff] %v10931_v58  ;;  %v10937_v19 = vadd.f32 %v1797_v45, %v1413_v24  ;;  %v10949_v16 = vadd.f32 %v1796_v55, %v1412_v25 }
 0x1d0   : > { %v1548_v50 = vld [vmem:[%s16614_s7 + $0x100] sm:$0xff]  ;;  %v2251_v49 = vld [vmem:[%s10228_s27 + $0x2f0] sm:$0xff]  ;;  %v1417_v28 = vld [vmem:[%s16615_s29 + $0xe8] sm:$0xff]  ;;  %v1805_v60 = vmul.f32 %v10399_v32, %v1549_v9  ;;  %v10951_v45 = vadd.f32 %v1799_v59, %v1415_v26  ;;  %v10953_v22 = vadd.f32 %v1798_v0, %v1414_v27  ;;  %2039 = vst.msk [vmem:[#allocation2 + $0x50] sm:$0xff] %vm2028_vm0, %v10803_v7 }
 0x1d1   : > { %v2252_v54 = vld [vmem:[%s10228_s27 + $0x2f8] sm:$0xff]  ;;  %v1418_v31 = vld [vmem:[%s16615_s29 + $0xf0] sm:$0xff]  ;;  %v1804_v62 = vmul.f32 %v10402_v33, %v1548_v50  ;;  %v1421_v32 = vld [vmem:[%s16615_s29 + $0x108] sm:$0xff]  ;;  %2601 = vrot.lane.b32.xlu0 %v2251_v49, %s9619_s23  ;;  %v10966_v55 = vadd.f32 %v1801_v57, %v1417_v28  ;;  %2040 = vst.msk [vmem:[#allocation2 + $0x58] sm:$0xff] %vm2028_vm0, %v10801_v2 }
 0x1d2   : > { %v1416_v29 = vld [vmem:[%s16615_s29 + $0xe0] sm:$0xff]  ;;  %v1419_v30 = vld [vmem:[%s16615_s29 + $0xf8] sm:$0xff]  ;;  %v1550_v15 = vld [vmem:[%s16614_s7 + $0x110] sm:$0xff]  ;;  %2603 = vrot.lane.b32.xlu1 %v2252_v54, %s9619_s23  ;;  %v10972_v25 = vadd.f32 %v1802_v5, %v1418_v31  ;;  %v10987_v5 = vpop.permute.xlu0 %2489  ;;  %2041 = vst.msk [vmem:[#allocation2 + $0x60] sm:$0xff] %vm2028_vm0, %v10818_v61 }
 0x1d3   : > { %v1551_v20 = vld [vmem:[%s16614_s7 + $0x118] sm:$0xff]  ;;  %v1420_v33 = vld [vmem:[%s16615_s29 + $0x100] sm:$0xff]  ;;  %v1553_v24 = vld [vmem:[%s16614_s7 + $0x128] sm:$0xff]  ;;  %v10968_v59 = vadd.f32 %v1800_v11, %v1416_v29  ;;  %v10970_v0 = vadd.f32 %v1803_v12, %v1419_v30  ;;  %v1806_v57 = vmul.f32 %v10412_v35, %v1550_v15  ;;  %v10985_v12 = vpop.permute.xlu1 %2491  ;;  %16634 = vst [vmem:[#allocation82_spill] sm:$0xff] %v10987_v5 }
 0x1d4   : > { %v1807_v9 = vmul.f32 %v10409_v34, %v1551_v20  ;;  %v1423_v23 = vld [vmem:[%s16615_s29 + $0x118] sm:$0xff]  ;;  %v1552_v34 = vld [vmem:[%s16614_s7 + $0x120] sm:$0xff]  ;;  %16630 = vst [vmem:[#allocation78_spill] sm:$0xff] %v10972_v25  ;;  %v2254_v27 = vld [vmem:[%s10228_s27 + $0x308] sm:$0xff]  ;;  %v10979_v20 = vadd.f32 %v1805_v60, %v1421_v32  ;;  %v10981_v54 = vadd.f32 %v1804_v62, %v1420_v33  ;;  %v1809_v11 = vmul.f32 %v10419_v36, %v1553_v24 }
 0x1d5   : > { %16629 = vst [vmem:[#allocation77_spill] sm:$0xff] %v10970_v0  ;;  %v1555_v26 = vld [vmem:[%s16614_s7 + $0x138] sm:$0xff]  ;;  %v2253_v50 = vld [vmem:[%s10228_s27 + $0x300] sm:$0xff]  ;;  %16633 = vst [vmem:[#allocation81_spill] sm:$0xff] %v10985_v12  ;;  %v1808_v31 = vmul.f32 %v10422_v37, %v1552_v34 }
 0x1d6   : > { %16631 = vst [vmem:[#allocation79_spill] sm:$0xff] %v10979_v20  ;;  %16632 = vst [vmem:[#allocation80_spill] sm:$0xff] %v10981_v54  ;;  %v1554_v49 = vld [vmem:[%s16614_s7 + $0x130] sm:$0xff]  ;;  %v1557_v28 = vld [vmem:[%s16614_s7 + $0x148] sm:$0xff]  ;;  %v10998_v30 = vadd.f32 %v1807_v9, %v1423_v23  ;;  %v1811_v60 = vmul.f32 %v10429_v38, %v1555_v26  ;;  %2607 = vrot.lane.b32.xlu1 %v2254_v27, %s9619_s23  ;;  %2605 = vrot.lane.b32.xlu0 %v2253_v50, %s9619_s23 }
 0x1d7   : > { %v1556_v29 = vld [vmem:[%s16614_s7 + $0x140] sm:$0xff]  ;;  %v1422_v35 = vld [vmem:[%s16615_s29 + $0x110] sm:$0xff]  ;;  %v1425_v36 = vld [vmem:[%s16615_s29 + $0x128] sm:$0xff]  ;;  %v1810_v62 = vmul.f32 %v10432_v39, %v1554_v49  ;;  %v1813_v24 = vmul.f32 %v10439_v40, %v1557_v28  ;;  %2042 = vst.msk [vmem:[#allocation2 + $0x68] sm:$0xff] %vm2028_vm0, %v10805_v8 }
 0x1d8   : > { %16635 = vst [vmem:[#allocation83_spill] sm:$0xff] %v10998_v30  ;;  %v2256_v32 = vld [vmem:[%s10228_s27 + $0x318] sm:$0xff]  ;;  %v2255_v33 = vld [vmem:[%s10228_s27 + $0x310] sm:$0xff]  ;;  %v1561_v23 = vld [vmem:[%s16614_s7 + $0x168] sm:$0xff]  ;;  %v1812_v34 = vmul.f32 %v10442_v41, %v1556_v29  ;;  %v11059_v30 = vadd.f32 %v1806_v57, %v1422_v35 }
 0x1d9   : > { %v1559_v9 = vld [vmem:[%s16614_s7 + $0x158] sm:$0xff]  ;;  %v1558_v15 = vld [vmem:[%s16614_s7 + $0x150] sm:$0xff]  ;;  %v1424_v37 = vld [vmem:[%s16615_s29 + $0x120] sm:$0xff]  ;;  %v1817_v50 = vmul.f32 %v10459_v44, %v1561_v23  ;;  %v11063_v44 = vpop.permute.xlu1 %2495  ;;  %2043 = vst.msk [vmem:[#allocation2 + $0x70] sm:$0xff] %vm2028_vm0, %v10822_v56 }
 0x1da   : > { %v1427_v38 = vld [vmem:[%s16615_s29 + $0x138] sm:$0xff]  ;;  %v1426_v39 = vld [vmem:[%s16615_s29 + $0x130] sm:$0xff]  ;;  %v1815_v26 = vmul.f32 %v10449_v42, %v1559_v9  ;;  %v1560_v49 = vld [vmem:[%s16614_s7 + $0x160] sm:$0xff]  ;;  %v1814_v42 = vmul.f32 %v10452_v43, %v1558_v15  ;;  %v11061_v43 = vadd.f32 %v1809_v11, %v1425_v36  ;;  %16640 = vst [vmem:[#allocation84_spill] sm:$0xff] %v11063_v44  ;;  %v11065_v15 = vpop.permute.xlu0 %2493  ;;  %2611 = vrot.lane.b32.xlu1 %v2256_v32, %s9619_s23 }
 0x1db   : > { %v1563_v5 = vld [vmem:[%s16614_s7 + $0x178] sm:$0xff]  ;;  %v1429_v27 = vld [vmem:[%s16615_s29 + $0x148] sm:$0xff]  ;;  %v1428_v40 = vld [vmem:[%s16615_s29 + $0x140] sm:$0xff]  ;;  %16641 = vst [vmem:[#allocation85_spill] sm:$0xff] %v11065_v15  ;;  %v11090_v20 = vadd.f32 %v1810_v62, %v1426_v39  ;;  %2609 = vrot.lane.b32.xlu0 %v2255_v33, %s9619_s23 }
 0x1dc   : > { %v1431_v41 = vld [vmem:[%s16615_s29 + $0x158] sm:$0xff]  ;;  %v16636_v28 = vld [vmem:[#allocation31_spill] sm:$0xff]  ;;  %v16637_v9 = vld [vmem:[#allocation32_spill] sm:$0xff]  ;;  %v11110_v39 = vadd.f32 %v1813_v24, %v1429_v27  ;;  %2044 = vst.msk [vmem:[#allocation2 + $0x78] sm:$0xff] %vm2028_vm0, %v10820_v53 }
 0x1dd   : > { %v1816_v29 = vmul.f32 %v16636_v28, %v1560_v49  ;;  %v1819_v12 = vmul.f32 %v16637_v9, %v1563_v5  ;;  %v1562_v58 = vld [vmem:[%s16614_s7 + $0x170] sm:$0xff]  ;;  %v1565_v21 = vld [vmem:[%s16614_s7 + $0x188] sm:$0xff]  ;;  %16638 = vst [vmem:[#allocation31_spill] sm:$0xff] %v11059_v30  ;;  %16639 = vst [vmem:[#allocation32_spill] sm:$0xff] %v11061_v43  ;;  %v11086_v43 = vadd.f32 %v1808_v31, %v1424_v37 }
 0x1de   : > { %v1430_v5 = vld [vmem:[%s16615_s29 + $0x150] sm:$0xff]  ;;  %v1433_v23 = vld [vmem:[%s16615_s29 + $0x168] sm:$0xff]  ;;  %v1432_v57 = vld [vmem:[%s16615_s29 + $0x160] sm:$0xff]  ;;  %v11088_v30 = vadd.f32 %v1811_v60, %v1427_v38  ;;  %16646 = vst [vmem:[#allocation86_spill] sm:$0xff] %v11090_v20 }
 0x1df   : > { %v1435_v11 = vld [vmem:[%s16615_s29 + $0x178] sm:$0xff]  ;;  %v1564_v9 = vld [vmem:[%s16614_s7 + $0x180] sm:$0xff]  ;;  %v2258_v54 = vld [vmem:[%s10228_s27 + $0x328] sm:$0xff]  ;;  %v11134_v27 = vadd.f32 %v1817_v50, %v1433_v23  ;;  %2045 = vst.msk [vmem:[#allocation2 + $0x80] sm:$0xff] %vm2028_vm0, %v10831_v63 }
 0x1e0   : > { %v16642_v35 = vld [vmem:[#allocation33_spill] sm:$0xff]  ;;  %v16643_v49 = vld [vmem:[#allocation34_spill] sm:$0xff]  ;;  %v2257_v0 = vld [vmem:[%s10228_s27 + $0x320] sm:$0xff]  ;;  %2615 = vrot.lane.b32.xlu1 %v2258_v54, %s9619_s23  ;;  %2046 = vst.msk [vmem:[#allocation2 + $0x88] sm:$0xff] %vm2028_vm0, %v10824_v10 }
 0x1e1   : > { %v1818_v36 = vmul.f32 %v16642_v35, %v1562_v58  ;;  %v1821_v28 = vmul.f32 %v16643_v49, %v1565_v21  ;;  %v1695_v15 = vld [vmem:[%s10228_s27 + $0x198] sm:$0xff]  ;;  %v1694_v44 = vld [vmem:[%s10228_s27 + $0x190] sm:$0xff]  ;;  %16644 = vst [vmem:[#allocation33_spill] sm:$0xff] %v11086_v43  ;;  %16645 = vst [vmem:[#allocation34_spill] sm:$0xff] %v11088_v30  ;;  %v11112_v30 = vadd.f32 %v1812_v34, %v1428_v40  ;;  %2613 = vrot.lane.b32.xlu0 %v2257_v0, %s9619_s23 }
 0x1e2   : > { %v1434_v58 = vld [vmem:[%s16615_s29 + $0x170] sm:$0xff]  ;;  %v1437_v21 = vld [vmem:[%s16615_s29 + $0x188] sm:$0xff]  ;;  %v1567_v31 = vld [vmem:[%s16614_s7 + $0x198] sm:$0xff]  ;;  %16652 = vst [vmem:[#allocation90_spill] sm:$0xff] %v11134_v27  ;;  %v11136_v40 = vadd.f32 %v1816_v29, %v1432_v57 }
 0x1e3   : > { %v16647_v35 = vld [vmem:[#allocation35_spill] sm:$0xff]  ;;  %v1566_v60 = vld [vmem:[%s16614_s7 + $0x190] sm:$0xff]  ;;  %v1699_v38 = vld [vmem:[%s10228_s27 + $0x1b8] sm:$0xff]  ;;  %16649 = vst [vmem:[#allocation87_spill] sm:$0xff] %v11112_v30  ;;  %v11155_v23 = vadd.f32 %v1818_v36, %v1434_v58  ;;  %v11157_v57 = vadd.f32 %v1821_v28, %v1437_v21 }
 0x1e4   : > { %v1820_v49 = vmul.f32 %v16647_v35, %v1564_v9  ;;  %v1697_v62 = vld [vmem:[%s10228_s27 + $0x1a8] sm:$0xff]  ;;  %v1696_v37 = vld [vmem:[%s10228_s27 + $0x1a0] sm:$0xff]  ;;  %16648 = vst [vmem:[#allocation35_spill] sm:$0xff] %v11110_v39  ;;  %v11116_v9 = vadd.f32 %v1815_v26, %v1431_v41  ;;  %v1571_v32 = vld [vmem:[%s16614_s7 + $0x1b8] sm:$0xff]  ;;  %v11132_v26 = vadd.f32 %v1814_v42, %v1430_v5  ;;  %v11138_v41 = vadd.f32 %v1819_v12, %v1435_v11  ;;  %v11151_v5 = vpop.permute.xlu1 %2499  ;;  %v11153_v12 = vpop.permute.xlu0 %2497 }
 0x1e5   : > { %v1436_v35 = vld [vmem:[%s16615_s29 + $0x180] sm:$0xff]  ;;  %v1569_v20 = vld [vmem:[%s16614_s7 + $0x1a8] sm:$0xff]  ;;  %v1698_v33 = vld [vmem:[%s10228_s27 + $0x1b0] sm:$0xff]  ;;  %16653 = vst [vmem:[#allocation91_spill] sm:$0xff] %v11136_v40  ;;  %v1823_v11 = vmul.f32 %v1695_v15, %v1567_v31  ;;  %v1827_v31 = vmul.f32 %v1699_v38, %v1571_v32 }
 0x1e6   : > { %16650 = vst [vmem:[#allocation88_spill] sm:$0xff] %v11116_v9  ;;  %v1568_v24 = vld [vmem:[%s16614_s7 + $0x1a0] sm:$0xff]  ;;  %v1701_v34 = vld [vmem:[%s10228_s27 + $0x1c8] sm:$0xff]  ;;  %16651 = vst [vmem:[#allocation89_spill] sm:$0xff] %v11132_v26  ;;  %v11170_v58 = vadd.f32 %v1820_v49, %v1436_v35  ;;  %v1825_v28 = vmul.f32 %v1697_v62, %v1569_v20 }
 0x1e7   : > { %16654 = vst [vmem:[#allocation92_spill] sm:$0xff] %v11138_v41  ;;  %v1570_v9 = vld [vmem:[%s16614_s7 + $0x1b0] sm:$0xff]  ;;  %v1573_v39 = vld [vmem:[%s16614_s7 + $0x1c8] sm:$0xff]  ;;  %v1572_v42 = vld [vmem:[%s16614_s7 + $0x1c0] sm:$0xff]  ;;  %v1822_v41 = vmul.f32 %v1694_v44, %v1566_v60  ;;  %v1824_v21 = vmul.f32 %v1696_v37, %v1568_v24 }
 0x1e8   : > { %v1700_v50 = vld [vmem:[%s10228_s27 + $0x1c0] sm:$0xff]  ;;  %v1703_v29 = vld [vmem:[%s10228_s27 + $0x1d8] sm:$0xff]  ;;  %16655 = vst [vmem:[#allocation93_spill] sm:$0xff] %v11151_v5  ;;  %16656 = vst [vmem:[#allocation94_spill] sm:$0xff] %v11153_v12  ;;  %v1826_v37 = vmul.f32 %v1698_v33, %v1570_v9  ;;  %v1829_v38 = vmul.f32 %v1701_v34, %v1573_v39  ;;  %v11213_v43 = vpop.permute.xlu1 %2503  ;;  %v11215_v25 = vpop.permute.xlu0 %2501 }
 0x1e9   : > { %16657 = vst [vmem:[#allocation95_spill] sm:$0xff] %v11155_v23  ;;  %16658 = vst [vmem:[#allocation96_spill] sm:$0xff] %v11157_v57  ;;  %v1575_v27 = vld [vmem:[%s16614_s7 + $0x1d8] sm:$0xff]  ;;  %v1574_v40 = vld [vmem:[%s16614_s7 + $0x1d0] sm:$0xff]  ;;  %v1828_v35 = vmul.f32 %v1700_v50, %v1572_v42 }
 0x1ea   : > { %v1702_v26 = vld [vmem:[%s10228_s27 + $0x1d0] sm:$0xff]  ;;  %v1705_v5 = vld [vmem:[%s10228_s27 + $0x1e8] sm:$0xff]  ;;  %v1704_v30 = vld [vmem:[%s10228_s27 + $0x1e0] sm:$0xff]  ;;  %16659 = vst [vmem:[#allocation97_spill] sm:$0xff] %v11170_v58  ;;  %v1831_v9 = vmul.f32 %v1703_v29, %v1575_v27 }
 0x1eb   : > { %v2260_v12 = vld [vmem:[%s10228_s27 + $0x338] sm:$0xff]  ;;  %v2259_v36 = vld [vmem:[%s10228_s27 + $0x330] sm:$0xff]  ;;  %v1577_v60 = vld [vmem:[%s16614_s7 + $0x1e8] sm:$0xff]  ;;  %v1830_v39 = vmul.f32 %v1702_v26, %v1574_v40  ;;  %16660 = vst [vmem:[#allocation98_spill] sm:$0xff] %v11213_v43 }
 0x1ec   : > { %v1439_v44 = vld [vmem:[%s16615_s29 + $0x198] sm:$0xff]  ;;  %v1438_v15 = vld [vmem:[%s16615_s29 + $0x190] sm:$0xff]  ;;  %v1441_v49 = vld [vmem:[%s16615_s29 + $0x1a8] sm:$0xff]  ;;  %v1833_v33 = vmul.f32 %v1705_v5, %v1577_v60  ;;  %16661 = vst [vmem:[#allocation99_spill] sm:$0xff] %v11215_v25  ;;  %2619 = vrot.lane.b32.xlu1 %v2260_v12, %s9619_s23 }
 0x1ed   : > { %v1707_v57 = vld [vmem:[%s10228_s27 + $0x1f8] sm:$0xff]  ;;  %v1706_v23 = vld [vmem:[%s10228_s27 + $0x1f0] sm:$0xff]  ;;  %v1709_v0 = vld [vmem:[%s10228_s27 + $0x208] sm:$0xff]  ;;  %v11217_v27 = vadd.f32 %v1823_v11, %v1439_v44  ;;  %v11219_v26 = vadd.f32 %v1822_v41, %v1438_v15  ;;  %v11240_v43 = vadd.f32 %v1825_v28, %v1441_v49  ;;  %2617 = vrot.lane.b32.xlu0 %v2259_v36, %s9619_s23  ;;  %2047 = vst.msk [vmem:[#allocation2 + $0x90] sm:$0xff] %vm2028_vm0, %v10850_v14 }
 0x1ee   : > { %v1440_v20 = vld [vmem:[%s16615_s29 + $0x1a0] sm:$0xff]  ;;  %v1443_v62 = vld [vmem:[%s16615_s29 + $0x1b8] sm:$0xff]  ;;  %v1442_v24 = vld [vmem:[%s16615_s29 + $0x1b0] sm:$0xff]  ;;  %2048 = vst.msk [vmem:[#allocation2 + $0x98] sm:$0xff] %vm2028_vm0, %v10833_v6 }
 0x1ef   : > { %v1576_v54 = vld [vmem:[%s16614_s7 + $0x1e0] sm:$0xff]  ;;  %v1445_v32 = vld [vmem:[%s16615_s29 + $0x1c8] sm:$0xff]  ;;  %v1579_v42 = vld [vmem:[%s16614_s7 + $0x1f8] sm:$0xff]  ;;  %16662 = vst [vmem:[#allocation100_spill] sm:$0xff] %v11217_v27  ;;  %v11242_v27 = vadd.f32 %v1824_v21, %v1440_v20 }
 0x1f0   : > { %v1444_v58 = vld [vmem:[%s16615_s29 + $0x1c0] sm:$0xff]  ;;  %v1832_v34 = vmul.f32 %v1704_v30, %v1576_v54  ;;  %v1578_v50 = vld [vmem:[%s16614_s7 + $0x1f0] sm:$0xff]  ;;  %16663 = vst [vmem:[#allocation101_spill] sm:$0xff] %v11219_v26  ;;  %v1447_v30 = vld [vmem:[%s16615_s29 + $0x1d8] sm:$0xff]  ;;  %v1835_v11 = vmul.f32 %v1707_v57, %v1579_v42  ;;  %v11244_v26 = vadd.f32 %v1827_v31, %v1443_v62  ;;  %v11263_v62 = vadd.f32 %v1826_v37, %v1442_v24 }
 0x1f1   : > { %v1446_v40 = vld [vmem:[%s16615_s29 + $0x1d0] sm:$0xff]  ;;  %v1449_v29 = vld [vmem:[%s16615_s29 + $0x1e8] sm:$0xff]  ;;  %v1448_v5 = vld [vmem:[%s16615_s29 + $0x1e0] sm:$0xff]  ;;  %v1834_v41 = vmul.f32 %v1706_v23, %v1578_v50  ;;  %16664 = vst [vmem:[#allocation102_spill] sm:$0xff] %v11240_v43  ;;  %v11267_v50 = vadd.f32 %v1828_v35, %v1444_v58  ;;  %v11283_v58 = vadd.f32 %v1831_v9, %v1447_v30  ;;  %v11302_v30 = vpop.permute.xlu1 %2507 }
 0x1f2   : > { %v1581_v44 = vld [vmem:[%s16614_s7 + $0x208] sm:$0xff]  ;;  %v1711_v60 = vld [vmem:[%s10228_s27 + $0x218] sm:$0xff]  ;;  %16665 = vst [vmem:[#allocation103_spill] sm:$0xff] %v11242_v27  ;;  %16666 = vst [vmem:[#allocation104_spill] sm:$0xff] %v11244_v26  ;;  %v11285_v35 = vadd.f32 %v1830_v39, %v1446_v40  ;;  %v11287_v24 = vadd.f32 %v1833_v33, %v1449_v29 }
 0x1f3   : > { %v1708_v15 = vld [vmem:[%s10228_s27 + $0x200] sm:$0xff]  ;;  %v2262_v54 = vld [vmem:[%s10228_s27 + $0x348] sm:$0xff]  ;;  %v1451_v57 = vld [vmem:[%s16615_s29 + $0x1f8] sm:$0xff]  ;;  %v1837_v42 = vmul.f32 %v1709_v0, %v1581_v44  ;;  %16667 = vst [vmem:[#allocation105_spill] sm:$0xff] %v11263_v62  ;;  %v11265_v0 = vadd.f32 %v1829_v38, %v1445_v32  ;;  %v11289_v32 = vadd.f32 %v1832_v34, %v1448_v5  ;;  %v11304_v34 = vpop.permute.xlu0 %2505 }
 0x1f4   : > { %v2261_v25 = vld [vmem:[%s10228_s27 + $0x340] sm:$0xff]  ;;  %v1450_v23 = vld [vmem:[%s16615_s29 + $0x1f0] sm:$0xff]  ;;  %v1583_v21 = vld [vmem:[%s16614_s7 + $0x218] sm:$0xff]  ;;  %16669 = vst [vmem:[#allocation107_spill] sm:$0xff] %v11267_v50  ;;  %v11306_v40 = vadd.f32 %v1835_v11, %v1451_v57  ;;  %2623 = vrot.lane.b32.xlu1 %v2262_v54, %s9619_s23 }
 0x1f5   : > { %v1580_v28 = vld [vmem:[%s16614_s7 + $0x200] sm:$0xff]  ;;  %v1710_v31 = vld [vmem:[%s10228_s27 + $0x210] sm:$0xff]  ;;  %v1713_v49 = vld [vmem:[%s10228_s27 + $0x228] sm:$0xff]  ;;  %16668 = vst [vmem:[#allocation106_spill] sm:$0xff] %v11265_v0  ;;  %v11308_v29 = vadd.f32 %v1834_v41, %v1450_v23  ;;  %2621 = vrot.lane.b32.xlu0 %v2261_v25, %s9619_s23  ;;  %v11364_v43 = vpop.permute.xlu1 %2511 }
 0x1f6   : > { %v1712_v20 = vld [vmem:[%s10228_s27 + $0x220] sm:$0xff]  ;;  %v1582_v26 = vld [vmem:[%s16614_s7 + $0x210] sm:$0xff]  ;;  %v1715_v37 = vld [vmem:[%s10228_s27 + $0x238] sm:$0xff]  ;;  %16670 = vst [vmem:[#allocation108_spill] sm:$0xff] %v11283_v58  ;;  %v1836_v5 = vmul.f32 %v1708_v15, %v1580_v28 }
 0x1f7   : > { %v1453_v44 = vld [vmem:[%s16615_s29 + $0x208] sm:$0xff]  ;;  %v1584_v36 = vld [vmem:[%s16614_s7 + $0x220] sm:$0xff]  ;;  %v1714_v38 = vld [vmem:[%s10228_s27 + $0x230] sm:$0xff]  ;;  %16671 = vst [vmem:[#allocation109_spill] sm:$0xff] %v11285_v35  ;;  %v11366_v27 = vpop.permute.xlu0 %2509 }
 0x1f8   : > { %v1585_v12 = vld [vmem:[%s16614_s7 + $0x228] sm:$0xff]  ;;  %16672 = vst [vmem:[#allocation110_spill] sm:$0xff] %v11287_v24  ;;  %16673 = vst [vmem:[#allocation111_spill] sm:$0xff] %v11289_v32  ;;  %v1587_v0 = vld [vmem:[%s16614_s7 + $0x238] sm:$0xff]  ;;  %v1839_v24 = vmul.f32 %v1711_v60, %v1583_v21  ;;  %v11321_v57 = vadd.f32 %v1837_v42, %v1453_v44  ;;  %v1838_v60 = vmul.f32 %v1710_v31, %v1582_v26 }
 0x1f9   : > { %v1586_v50 = vld [vmem:[%s16614_s7 + $0x230] sm:$0xff]  ;;  %v1589_v9 = vld [vmem:[%s16614_s7 + $0x248] sm:$0xff]  ;;  %16674 = vst [vmem:[#allocation112_spill] sm:$0xff] %v11302_v30  ;;  %16675 = vst [vmem:[#allocation113_spill] sm:$0xff] %v11304_v34  ;;  %v1841_v23 = vmul.f32 %v1713_v49, %v1585_v12  ;;  %v1840_v28 = vmul.f32 %v1712_v20, %v1584_v36  ;;  %v1843_v49 = vmul.f32 %v1715_v37, %v1587_v0 }
 0x1fa   : > { %v1717_v39 = vld [vmem:[%s10228_s27 + $0x248] sm:$0xff]  ;;  %v1716_v33 = vld [vmem:[%s10228_s27 + $0x240] sm:$0xff]  ;;  %16676 = vst [vmem:[#allocation114_spill] sm:$0xff] %v11306_v40  ;;  %16677 = vst [vmem:[#allocation115_spill] sm:$0xff] %v11308_v29  ;;  %v1842_v20 = vmul.f32 %v1714_v38, %v1586_v50 }
 0x1fb   : > { %v1588_v32 = vld [vmem:[%s16614_s7 + $0x240] sm:$0xff]  ;;  %v1591_v58 = vld [vmem:[%s16614_s7 + $0x258] sm:$0xff]  ;;  %v1721_v62 = vld [vmem:[%s10228_s27 + $0x268] sm:$0xff]  ;;  %16678 = vst [vmem:[#allocation116_spill] sm:$0xff] %v11321_v57  ;;  %v1845_v44 = vmul.f32 %v1717_v39, %v1589_v9 }
 0x1fc   : > { %v1719_v35 = vld [vmem:[%s10228_s27 + $0x258] sm:$0xff]  ;;  %v1718_v30 = vld [vmem:[%s10228_s27 + $0x250] sm:$0xff]  ;;  %v1720_v40 = vld [vmem:[%s10228_s27 + $0x260] sm:$0xff]  ;;  %v1844_v0 = vmul.f32 %v1716_v33, %v1588_v32  ;;  %16679 = vst [vmem:[#allocation117_spill] sm:$0xff] %v11364_v43 }
 0x1fd   : > { %v2264_v34 = vld [vmem:[%s10228_s27 + $0x358] sm:$0xff]  ;;  %v2263_v11 = vld [vmem:[%s10228_s27 + $0x350] sm:$0xff]  ;;  %v1457_v26 = vld [vmem:[%s16615_s29 + $0x228] sm:$0xff]  ;;  %v1847_v50 = vmul.f32 %v1719_v35, %v1591_v58  ;;  %16680 = vst [vmem:[#allocation118_spill] sm:$0xff] %v11366_v27 }
 0x1fe   : > { %v1452_v41 = vld [vmem:[%s16615_s29 + $0x200] sm:$0xff]  ;;  %v1455_v15 = vld [vmem:[%s16615_s29 + $0x218] sm:$0xff]  ;;  %v1590_v21 = vld [vmem:[%s16614_s7 + $0x250] sm:$0xff]  ;;  %2627 = vrot.lane.b32.xlu1 %v2264_v34, %s9619_s23  ;;  %2049 = vst.msk [vmem:[#allocation2 + $0xa0] sm:$0xff] %vm2028_vm0, %v10910_v48 }
 0x1ff   : > { %v1723_v29 = vld [vmem:[%s10228_s27 + $0x278] sm:$0xff]  ;;  %v1454_v42 = vld [vmem:[%s16615_s29 + $0x210] sm:$0xff]  ;;  %v1593_v54 = vld [vmem:[%s16614_s7 + $0x268] sm:$0xff]  ;;  %v1846_v37 = vmul.f32 %v1718_v30, %v1590_v21  ;;  %v11368_v32 = vadd.f32 %v1836_v5, %v1452_v41  ;;  %v11370_v58 = vadd.f32 %v1839_v24, %v1455_v15  ;;  %2625 = vrot.lane.b32.xlu0 %v2263_v11, %s9619_s23  ;;  %2050 = vst.msk [vmem:[#allocation2 + $0xa8] sm:$0xff] %vm2028_vm0, %v10908_v13 }
 0x200   : > { %v1456_v31 = vld [vmem:[%s16615_s29 + $0x220] sm:$0xff]  ;;  %v1722_v25 = vld [vmem:[%s10228_s27 + $0x270] sm:$0xff]  ;;  %v1461_v57 = vld [vmem:[%s16615_s29 + $0x248] sm:$0xff]  ;;  %v1849_v38 = vmul.f32 %v1721_v62, %v1593_v54  ;;  %v11391_v43 = vadd.f32 %v1838_v60, %v1454_v42  ;;  %2051 = vst.msk [vmem:[#allocation2 + $0xb0] sm:$0xff] %vm2028_vm0, %v10935_v18 }
 0x201   : > { %v1459_v12 = vld [vmem:[%s16615_s29 + $0x238] sm:$0xff]  ;;  %v1458_v36 = vld [vmem:[%s16615_s29 + $0x230] sm:$0xff]  ;;  %v1592_v9 = vld [vmem:[%s16614_s7 + $0x260] sm:$0xff]  ;;  %16681 = vst [vmem:[#allocation119_spill] sm:$0xff] %v11368_v32  ;;  %v11395_v32 = vadd.f32 %v1840_v28, %v1456_v31 }
 0x202   : > { %v1595_v39 = vld [vmem:[%s16614_s7 + $0x278] sm:$0xff]  ;;  %16682 = vst [vmem:[#allocation120_spill] sm:$0xff] %v11370_v58  ;;  %v1460_v62 = vld [vmem:[%s16615_s29 + $0x240] sm:$0xff]  ;;  %v1462_v33 = vld [vmem:[%s16615_s29 + $0x250] sm:$0xff]  ;;  %v1848_v5 = vmul.f32 %v1720_v40, %v1592_v9  ;;  %v11393_v58 = vadd.f32 %v1841_v23, %v1457_v26  ;;  %v11414_v31 = vadd.f32 %v1843_v49, %v1459_v12 }
 0x203   : > { %v1463_v35 = vld [vmem:[%s16615_s29 + $0x258] sm:$0xff]  ;;  %v1465_v30 = vld [vmem:[%s16615_s29 + $0x268] sm:$0xff]  ;;  %v1851_v24 = vmul.f32 %v1723_v29, %v1595_v39  ;;  %v1594_v41 = vld [vmem:[%s16614_s7 + $0x270] sm:$0xff]  ;;  %16683 = vst [vmem:[#allocation121_spill] sm:$0xff] %v11391_v43  ;;  %v11418_v39 = vadd.f32 %v1845_v44, %v1461_v57  ;;  %v11434_v57 = vadd.f32 %v1844_v0, %v1460_v62  ;;  %v11438_v12 = vadd.f32 %v1846_v37, %v1462_v33  ;;  %v11453_v62 = vpop.permute.xlu1 %2515 }
 0x204   : > { %v1725_v15 = vld [vmem:[%s10228_s27 + $0x288] sm:$0xff]  ;;  %v1724_v21 = vld [vmem:[%s10228_s27 + $0x280] sm:$0xff]  ;;  %16684 = vst [vmem:[#allocation122_spill] sm:$0xff] %v11393_v58  ;;  %16685 = vst [vmem:[#allocation123_spill] sm:$0xff] %v11395_v32  ;;  %v1850_v9 = vmul.f32 %v1722_v25, %v1594_v41  ;;  %v11416_v25 = vadd.f32 %v1842_v20, %v1458_v36  ;;  %v11436_v44 = vadd.f32 %v1847_v50, %v1463_v35 }
 0x205   : > { %v2266_v54 = vld [vmem:[%s10228_s27 + $0x368] sm:$0xff]  ;;  %v2265_v27 = vld [vmem:[%s10228_s27 + $0x360] sm:$0xff]  ;;  %v1467_v29 = vld [vmem:[%s16615_s29 + $0x278] sm:$0xff]  ;;  %16686 = vst [vmem:[#allocation124_spill] sm:$0xff] %v11414_v31  ;;  %v11440_v36 = vadd.f32 %v1849_v38, %v1465_v30  ;;  %v11455_v38 = vpop.permute.xlu0 %2513 }
 0x206   : > { %v1464_v40 = vld [vmem:[%s16615_s29 + $0x260] sm:$0xff]  ;;  %v1597_v60 = vld [vmem:[%s16614_s7 + $0x288] sm:$0xff]  ;;  %v1726_v42 = vld [vmem:[%s10228_s27 + $0x290] sm:$0xff]  ;;  %16687 = vst [vmem:[#allocation125_spill] sm:$0xff] %v11416_v25  ;;  %v11459_v33 = vadd.f32 %v1851_v24, %v1467_v29  ;;  %2631 = vrot.lane.b32.xlu1 %v2266_v54, %s9619_s23 }
 0x207   : > { %v1596_v23 = vld [vmem:[%s16614_s7 + $0x280] sm:$0xff]  ;;  %v1729_v26 = vld [vmem:[%s10228_s27 + $0x2a8] sm:$0xff]  ;;  %16688 = vst [vmem:[#allocation126_spill] sm:$0xff] %v11418_v39  ;;  %v1599_v58 = vld [vmem:[%s16614_s7 + $0x298] sm:$0xff]  ;;  %v11457_v35 = vadd.f32 %v1848_v5, %v1464_v40  ;;  %v1853_v30 = vmul.f32 %v1725_v15, %v1597_v60  ;;  %2629 = vrot.lane.b32.xlu0 %v2265_v27, %s9619_s23  ;;  %v11515_v32 = vpop.permute.xlu1 %2519 }
 0x208   : > { %v1727_v28 = vld [vmem:[%s10228_s27 + $0x298] sm:$0xff]  ;;  %v1466_v41 = vld [vmem:[%s16615_s29 + $0x270] sm:$0xff]  ;;  %v1601_v11 = vld [vmem:[%s16614_s7 + $0x2a8] sm:$0xff]  ;;  %16689 = vst [vmem:[#allocation127_spill] sm:$0xff] %v11434_v57 }
 0x209   : > { %v1598_v34 = vld [vmem:[%s16614_s7 + $0x290] sm:$0xff]  ;;  %v1728_v49 = vld [vmem:[%s10228_s27 + $0x2a0] sm:$0xff]  ;;  %v1731_v20 = vld [vmem:[%s10228_s27 + $0x2b8] sm:$0xff]  ;;  %16690 = vst [vmem:[#allocation128_spill] sm:$0xff] %v11436_v44  ;;  %v11472_v40 = vadd.f32 %v1850_v9, %v1466_v41  ;;  %v1857_v60 = vmul.f32 %v1729_v26, %v1601_v11  ;;  %v11517_v43 = vpop.permute.xlu0 %2517 }
 0x20a   : > { %16691 = vst [vmem:[#allocation129_spill] sm:$0xff] %v11438_v12  ;;  %16692 = vst [vmem:[#allocation130_spill] sm:$0xff] %v11440_v36  ;;  %v1600_v39 = vld [vmem:[%s16614_s7 + $0x2a0] sm:$0xff]  ;;  %v1603_v31 = vld [vmem:[%s16614_s7 + $0x2b8] sm:$0xff]  ;;  %v1852_v36 = vmul.f32 %v1724_v21, %v1596_v23  ;;  %v1855_v21 = vmul.f32 %v1727_v28, %v1599_v58  ;;  %v1854_v29 = vmul.f32 %v1726_v42, %v1598_v34 }
 0x20b   : > { %v1602_v0 = vld [vmem:[%s16614_s7 + $0x2b0] sm:$0xff]  ;;  %16693 = vst [vmem:[#allocation131_spill] sm:$0xff] %v11453_v62  ;;  %16694 = vst [vmem:[#allocation132_spill] sm:$0xff] %v11455_v38  ;;  %v1605_v44 = vld [vmem:[%s16614_s7 + $0x2c8] sm:$0xff]  ;;  %v1856_v42 = vmul.f32 %v1728_v49, %v1600_v39  ;;  %v1859_v26 = vmul.f32 %v1731_v20, %v1603_v31 }
 0x20c   : > { %v1730_v50 = vld [vmem:[%s10228_s27 + $0x2b0] sm:$0xff]  ;;  %v1733_v37 = vld [vmem:[%s10228_s27 + $0x2c8] sm:$0xff]  ;;  %16695 = vst [vmem:[#allocation133_spill] sm:$0xff] %v11457_v35  ;;  %16696 = vst [vmem:[#allocation134_spill] sm:$0xff] %v11459_v33 }
 0x20d   : > { %v1604_v12 = vld [vmem:[%s16614_s7 + $0x2c0] sm:$0xff]  ;;  %v1734_v25 = vld [vmem:[%s10228_s27 + $0x2d0] sm:$0xff]  ;;  %16697 = vst [vmem:[#allocation135_spill] sm:$0xff] %v11472_v40  ;;  %v1469_v24 = vld [vmem:[%s16615_s29 + $0x288] sm:$0xff]  ;;  %v1858_v41 = vmul.f32 %v1730_v50, %v1602_v0  ;;  %v1861_v39 = vmul.f32 %v1733_v37, %v1605_v44 }
 0x20e   : > { %v1732_v57 = vld [vmem:[%s10228_s27 + $0x2c0] sm:$0xff]  ;;  %v1735_v62 = vld [vmem:[%s10228_s27 + $0x2d8] sm:$0xff]  ;;  %v2267_v5 = vld [vmem:[%s10228_s27 + $0x370] sm:$0xff]  ;;  %16698 = vst [vmem:[#allocation136_spill] sm:$0xff] %v11515_v32  ;;  %v11519_v44 = vadd.f32 %v1853_v30, %v1469_v24 }
 0x20f   : > { %v2268_v38 = vld [vmem:[%s10228_s27 + $0x378] sm:$0xff]  ;;  %v1737_v33 = vld [vmem:[%s10228_s27 + $0x2e8] sm:$0xff]  ;;  %v1736_v35 = vld [vmem:[%s10228_s27 + $0x2e0] sm:$0xff]  ;;  %v1860_v31 = vmul.f32 %v1732_v57, %v1604_v12  ;;  %16699 = vst [vmem:[#allocation137_spill] sm:$0xff] %v11517_v43  ;;  %2633 = vrot.lane.b32.xlu0 %v2267_v5, %s9619_s23 }
 0x210   : > { %v1468_v15 = vld [vmem:[%s16615_s29 + $0x280] sm:$0xff]  ;;  %v1607_v23 = vld [vmem:[%s16614_s7 + $0x2d8] sm:$0xff]  ;;  %v1470_v58 = vld [vmem:[%s16615_s29 + $0x290] sm:$0xff]  ;;  %16700 = vst [vmem:[#allocation138_spill] sm:$0xff] %v11519_v44  ;;  %2635 = vrot.lane.b32.xlu1 %v2268_v38, %s9619_s23 }
 0x211   : > { %v1471_v9 = vld [vmem:[%s16615_s29 + $0x298] sm:$0xff]  ;;  %v1473_v28 = vld [vmem:[%s16615_s29 + $0x2a8] sm:$0xff]  ;;  %v1606_v54 = vld [vmem:[%s16614_s7 + $0x2d0] sm:$0xff]  ;;  %v1863_v49 = vmul.f32 %v1735_v62, %v1607_v23  ;;  %v11521_v57 = vadd.f32 %v1852_v36, %v1468_v15  ;;  %v11544_v44 = vadd.f32 %v1854_v29, %v1470_v58  ;;  %2052 = vst.msk [vmem:[#allocation2 + $0xb8] sm:$0xff] %vm2028_vm0, %v10933_v17 }
 0x212   : > { %v1739_v27 = vld [vmem:[%s10228_s27 + $0x2f8] sm:$0xff]  ;;  %v1474_v40 = vld [vmem:[%s16615_s29 + $0x2b0] sm:$0xff]  ;;  %v1862_v20 = vmul.f32 %v1734_v25, %v1606_v54  ;;  %v1609_v0 = vld [vmem:[%s16614_s7 + $0x2e8] sm:$0xff]  ;;  %v11542_v32 = vadd.f32 %v1855_v21, %v1471_v9  ;;  %2053 = vst.msk [vmem:[#allocation2 + $0xc0] sm:$0xff] %vm2028_vm0, %v10949_v16 }
 0x213   : > { %v1472_v34 = vld [vmem:[%s16615_s29 + $0x2a0] sm:$0xff]  ;;  %v1475_v11 = vld [vmem:[%s16615_s29 + $0x2b8] sm:$0xff]  ;;  %16701 = vst [vmem:[#allocation139_spill] sm:$0xff] %v11521_v57  ;;  %v1477_v25 = vld [vmem:[%s16615_s29 + $0x2c8] sm:$0xff]  ;;  %v1865_v30 = vmul.f32 %v1737_v33, %v1609_v0  ;;  %v11546_v57 = vadd.f32 %v1857_v60, %v1473_v28 }
 0x214   : > { %v1608_v50 = vld [vmem:[%s16614_s7 + $0x2e0] sm:$0xff]  ;;  %v1479_v37 = vld [vmem:[%s16615_s29 + $0x2d8] sm:$0xff]  ;;  %v1478_v62 = vld [vmem:[%s16615_s29 + $0x2d0] sm:$0xff]  ;;  %16702 = vst [vmem:[#allocation140_spill] sm:$0xff] %v11542_v32  ;;  %v11565_v28 = vadd.f32 %v1856_v42, %v1472_v34 }
 0x215   : > { %v1476_v12 = vld [vmem:[%s16615_s29 + $0x2c0] sm:$0xff]  ;;  %v1864_v36 = vmul.f32 %v1736_v35, %v1608_v50  ;;  %v1611_v24 = vld [vmem:[%s16614_s7 + $0x2f8] sm:$0xff]  ;;  %v1741_v23 = vld [vmem:[%s10228_s27 + $0x308] sm:$0xff]  ;;  %16703 = vst [vmem:[#allocation141_spill] sm:$0xff] %v11544_v44  ;;  %v11569_v50 = vadd.f32 %v1858_v41, %v1474_v40  ;;  %v11585_v40 = vadd.f32 %v1861_v39, %v1477_v25  ;;  %v11589_v34 = vadd.f32 %v1863_v49, %v1479_v37  ;;  %v11604_v25 = vpop.permute.xlu1 %2523 }
 0x216   : > { %v1738_v15 = vld [vmem:[%s10228_s27 + $0x2f0] sm:$0xff]  ;;  %v2270_v54 = vld [vmem:[%s10228_s27 + $0x388] sm:$0xff]  ;;  %v2269_v43 = vld [vmem:[%s10228_s27 + $0x380] sm:$0xff]  ;;  %16704 = vst [vmem:[#allocation142_spill] sm:$0xff] %v11546_v57  ;;  %v1867_v0 = vmul.f32 %v1739_v27, %v1611_v24  ;;  %v11567_v27 = vadd.f32 %v1859_v26, %v1475_v11  ;;  %v11587_v41 = vadd.f32 %v1860_v31, %v1476_v12  ;;  %v11591_v11 = vadd.f32 %v1862_v20, %v1478_v62  ;;  %v11606_v20 = vpop.permute.xlu0 %2521 }
 0x217   : > { %v1481_v33 = vld [vmem:[%s16615_s29 + $0x2e8] sm:$0xff]  ;;  %v1480_v35 = vld [vmem:[%s16615_s29 + $0x2e0] sm:$0xff]  ;;  %v1610_v21 = vld [vmem:[%s16614_s7 + $0x2f0] sm:$0xff]  ;;  %16705 = vst [vmem:[#allocation143_spill] sm:$0xff] %v11565_v28  ;;  %2639 = vrot.lane.b32.xlu1 %v2270_v54, %s9619_s23 }
 0x218   : > { %v1613_v29 = vld [vmem:[%s16614_s7 + $0x308] sm:$0xff]  ;;  %v1743_v9 = vld [vmem:[%s10228_s27 + $0x318] sm:$0xff]  ;;  %v1742_v58 = vld [vmem:[%s10228_s27 + $0x310] sm:$0xff]  ;;  %16706 = vst [vmem:[#allocation144_spill] sm:$0xff] %v11567_v27  ;;  %v11608_v12 = vadd.f32 %v1865_v30, %v1481_v33  ;;  %v11610_v37 = vadd.f32 %v1864_v36, %v1480_v35  ;;  %v1866_v62 = vmul.f32 %v1738_v15, %v1610_v21  ;;  %2637 = vrot.lane.b32.xlu0 %v2269_v43, %s9619_s23 }
 0x219   : > { %v1740_v60 = vld [vmem:[%s10228_s27 + $0x300] sm:$0xff]  ;;  %16707 = vst [vmem:[#allocation145_spill] sm:$0xff] %v11569_v50  ;;  %v1483_v24 = vld [vmem:[%s16615_s29 + $0x2f8] sm:$0xff]  ;;  %v1614_v5 = vld [vmem:[%s16614_s7 + $0x310] sm:$0xff]  ;;  %v11666_v32 = vpop.permute.xlu1 %2527 }
 0x21a   : > { %v1612_v57 = vld [vmem:[%s16614_s7 + $0x300] sm:$0xff]  ;;  %v1615_v38 = vld [vmem:[%s16614_s7 + $0x318] sm:$0xff]  ;;  %v1745_v42 = vld [vmem:[%s10228_s27 + $0x328] sm:$0xff]  ;;  %16708 = vst [vmem:[#allocation146_spill] sm:$0xff] %v11585_v40  ;;  %v11623_v33 = vadd.f32 %v1867_v0, %v1483_v24  ;;  %v1870_v21 = vmul.f32 %v1742_v58, %v1614_v5  ;;  %v11668_v44 = vpop.permute.xlu0 %2525 }
 0x21b   : > { %v1744_v26 = vld [vmem:[%s10228_s27 + $0x320] sm:$0xff]  ;;  %16709 = vst [vmem:[#allocation147_spill] sm:$0xff] %v11587_v41  ;;  %16710 = vst [vmem:[#allocation148_spill] sm:$0xff] %v11589_v34  ;;  %v1619_v39 = vld [vmem:[%s16614_s7 + $0x338] sm:$0xff]  ;;  %v1869_v34 = vmul.f32 %v1741_v23, %v1613_v29  ;;  %v1868_v23 = vmul.f32 %v1740_v60, %v1612_v57  ;;  %v1871_v35 = vmul.f32 %v1743_v9, %v1615_v38 }
 0x21c   : > { %16711 = vst [vmem:[#allocation149_spill] sm:$0xff] %v11591_v11  ;;  %v1617_v27 = vld [vmem:[%s16614_s7 + $0x328] sm:$0xff]  ;;  %v1616_v50 = vld [vmem:[%s16614_s7 + $0x320] sm:$0xff]  ;;  %v1746_v49 = vld [vmem:[%s10228_s27 + $0x330] sm:$0xff] }
 0x21d   : > { %v1747_v31 = vld [vmem:[%s10228_s27 + $0x338] sm:$0xff]  ;;  %16712 = vst [vmem:[#allocation150_spill] sm:$0xff] %v11604_v25  ;;  %16713 = vst [vmem:[#allocation151_spill] sm:$0xff] %v11606_v20  ;;  %v1618_v11 = vld [vmem:[%s16614_s7 + $0x330] sm:$0xff]  ;;  %v1873_v9 = vmul.f32 %v1745_v42, %v1617_v27  ;;  %v1872_v58 = vmul.f32 %v1744_v26, %v1616_v50 }
 0x21e   : > { %16714 = vst [vmem:[#allocation152_spill] sm:$0xff] %v11608_v12  ;;  %16715 = vst [vmem:[#allocation153_spill] sm:$0xff] %v11610_v37  ;;  %v1621_v40 = vld [vmem:[%s16614_s7 + $0x348] sm:$0xff]  ;;  %v1751_v28 = vld [vmem:[%s10228_s27 + $0x358] sm:$0xff]  ;;  %v1875_v24 = vmul.f32 %v1747_v31, %v1619_v39  ;;  %v1874_v27 = vmul.f32 %v1746_v49, %v1618_v11 }
 0x21f   : > { %v1749_v41 = vld [vmem:[%s10228_s27 + $0x348] sm:$0xff]  ;;  %v1748_v25 = vld [vmem:[%s10228_s27 + $0x340] sm:$0xff]  ;;  %v2272_v20 = vld [vmem:[%s10228_s27 + $0x398] sm:$0xff]  ;;  %16716 = vst [vmem:[#allocation154_spill] sm:$0xff] %v11623_v33 }
 0x220   : > { %v2271_v30 = vld [vmem:[%s10228_s27 + $0x390] sm:$0xff]  ;;  %v1485_v15 = vld [vmem:[%s16615_s29 + $0x308] sm:$0xff]  ;;  %v1620_v29 = vld [vmem:[%s16614_s7 + $0x340] sm:$0xff]  ;;  %v1877_v50 = vmul.f32 %v1749_v41, %v1621_v40  ;;  %16717 = vst [vmem:[#allocation155_spill] sm:$0xff] %v11666_v32  ;;  %2643 = vrot.lane.b32.xlu1 %v2272_v20, %s9619_s23 }
 0x221   : > { %v1482_v36 = vld [vmem:[%s16615_s29 + $0x2f0] sm:$0xff]  ;;  %v1484_v0 = vld [vmem:[%s16615_s29 + $0x300] sm:$0xff]  ;;  %v1487_v57 = vld [vmem:[%s16615_s29 + $0x318] sm:$0xff]  ;;  %v1876_v42 = vmul.f32 %v1748_v25, %v1620_v29  ;;  %16718 = vst [vmem:[#allocation156_spill] sm:$0xff] %v11668_v44  ;;  %v11672_v40 = vadd.f32 %v1869_v34, %v1485_v15  ;;  %2641 = vrot.lane.b32.xlu0 %v2271_v30, %s9619_s23 }
 0x222   : > { %v1750_v12 = vld [vmem:[%s10228_s27 + $0x350] sm:$0xff]  ;;  %v1753_v37 = vld [vmem:[%s10228_s27 + $0x368] sm:$0xff]  ;;  %v1752_v43 = vld [vmem:[%s10228_s27 + $0x360] sm:$0xff]  ;;  %v11670_v11 = vadd.f32 %v1866_v62, %v1482_v36  ;;  %v11693_v32 = vadd.f32 %v1868_v23, %v1484_v0  ;;  %2054 = vst.msk [vmem:[#allocation2 + $0xc8] sm:$0xff] %vm2028_vm0, %v10937_v19 }
 0x223   : > { %v1486_v60 = vld [vmem:[%s16615_s29 + $0x310] sm:$0xff]  ;;  %v1623_v54 = vld [vmem:[%s16614_s7 + $0x358] sm:$0xff]  ;;  %v1489_v38 = vld [vmem:[%s16615_s29 + $0x328] sm:$0xff]  ;;  %16720 = vst [vmem:[#allocation158_spill] sm:$0xff] %v11672_v40  ;;  %v11695_v40 = vadd.f32 %v1871_v35, %v1487_v57 }
 0x224   : > { %v1488_v5 = vld [vmem:[%s16615_s29 + $0x320] sm:$0xff]  ;;  %v1491_v33 = vld [vmem:[%s16615_s29 + $0x338] sm:$0xff]  ;;  %v1879_v26 = vmul.f32 %v1751_v28, %v1623_v54  ;;  %v1622_v39 = vld [vmem:[%s16614_s7 + $0x350] sm:$0xff]  ;;  %16719 = vst [vmem:[#allocation157_spill] sm:$0xff] %v11670_v11  ;;  %v11697_v11 = vadd.f32 %v1870_v21, %v1486_v60  ;;  %v11716_v60 = vadd.f32 %v1873_v9, %v1489_v38 }
 0x225   : > { %v1625_v31 = vld [vmem:[%s16614_s7 + $0x368] sm:$0xff]  ;;  %v1490_v28 = vld [vmem:[%s16615_s29 + $0x330] sm:$0xff]  ;;  %v1492_v49 = vld [vmem:[%s16615_s29 + $0x340] sm:$0xff]  ;;  %v1878_v62 = vmul.f32 %v1750_v12, %v1622_v39  ;;  %16721 = vst [vmem:[#allocation159_spill] sm:$0xff] %v11693_v32 }
 0x226   : > { %v1493_v41 = vld [vmem:[%s16615_s29 + $0x348] sm:$0xff]  ;;  %v1495_v25 = vld [vmem:[%s16615_s29 + $0x358] sm:$0xff]  ;;  %v1881_v34 = vmul.f32 %v1753_v37, %v1625_v31  ;;  %v1624_v36 = vld [vmem:[%s16614_s7 + $0x360] sm:$0xff]  ;;  %16722 = vst [vmem:[#allocation160_spill] sm:$0xff] %v11695_v40  ;;  %v11720_v31 = vadd.f32 %v1875_v24, %v1491_v33  ;;  %v11736_v33 = vadd.f32 %v1874_v27, %v1490_v28  ;;  %v11740_v38 = vadd.f32 %v1876_v42, %v1492_v49  ;;  %v11755_v42 = vpop.permute.xlu1 %2531 }
 0x227   : > { %v1755_v15 = vld [vmem:[%s10228_s27 + $0x378] sm:$0xff]  ;;  %v1754_v29 = vld [vmem:[%s10228_s27 + $0x370] sm:$0xff]  ;;  %v2274_v54 = vld [vmem:[%s10228_s27 + $0x3a8] sm:$0xff]  ;;  %16723 = vst [vmem:[#allocation161_spill] sm:$0xff] %v11697_v11  ;;  %v1880_v39 = vmul.f32 %v1752_v43, %v1624_v36  ;;  %v11718_v43 = vadd.f32 %v1872_v58, %v1488_v5  ;;  %v11738_v24 = vadd.f32 %v1877_v50, %v1493_v41  ;;  %v11742_v5 = vadd.f32 %v1879_v26, %v1495_v25  ;;  %v11757_v41 = vpop.permute.xlu0 %2529 }
 0x228   : > { %v2273_v44 = vld [vmem:[%s10228_s27 + $0x3a0] sm:$0xff]  ;;  %v1494_v12 = vld [vmem:[%s16615_s29 + $0x350] sm:$0xff]  ;;  %v1627_v23 = vld [vmem:[%s16614_s7 + $0x378] sm:$0xff]  ;;  %16724 = vst [vmem:[#allocation162_spill] sm:$0xff] %v11716_v60  ;;  %2647 = vrot.lane.b32.xlu1 %v2274_v54, %s9619_s23 }
 0x229   : > { %v1497_v37 = vld [vmem:[%s16615_s29 + $0x368] sm:$0xff]  ;;  %v1626_v35 = vld [vmem:[%s16614_s7 + $0x370] sm:$0xff]  ;;  %v1759_v57 = vld [vmem:[%s10228_s27 + $0x398] sm:$0xff]  ;;  %16725 = vst [vmem:[#allocation163_spill] sm:$0xff] %v11718_v43  ;;  %v11759_v26 = vadd.f32 %v1878_v62, %v1494_v12  ;;  %v1883_v25 = vmul.f32 %v1755_v15, %v1627_v23  ;;  %2645 = vrot.lane.b32.xlu0 %v2273_v44, %s9619_s23 }
 0x22a   : > { %v1757_v21 = vld [vmem:[%s10228_s27 + $0x388] sm:$0xff]  ;;  %v1756_v0 = vld [vmem:[%s10228_s27 + $0x380] sm:$0xff]  ;;  %16726 = vst [vmem:[#allocation164_spill] sm:$0xff] %v11720_v31  ;;  %v1631_v30 = vld [vmem:[%s16614_s7 + $0x398] sm:$0xff]  ;;  %v11761_v49 = vadd.f32 %v1881_v34, %v1497_v37 }
 0x22b   : > { %v1496_v36 = vld [vmem:[%s16615_s29 + $0x360] sm:$0xff]  ;;  %v1629_v40 = vld [vmem:[%s16614_s7 + $0x388] sm:$0xff]  ;;  %v1758_v9 = vld [vmem:[%s10228_s27 + $0x390] sm:$0xff]  ;;  %16727 = vst [vmem:[#allocation165_spill] sm:$0xff] %v11736_v33  ;;  %v1887_v37 = vmul.f32 %v1759_v57, %v1631_v30 }
 0x22c   : > { %v1628_v20 = vld [vmem:[%s16614_s7 + $0x380] sm:$0xff]  ;;  %v1761_v58 = vld [vmem:[%s10228_s27 + $0x3a8] sm:$0xff]  ;;  %16728 = vst [vmem:[#allocation166_spill] sm:$0xff] %v11738_v24  ;;  %16729 = vst [vmem:[#allocation167_spill] sm:$0xff] %v11740_v38  ;;  %v11768_v32 = vadd.f32 %v1880_v39, %v1496_v36  ;;  %v1885_v34 = vmul.f32 %v1757_v21, %v1629_v40 }
 0x22d   : > { %16730 = vst [vmem:[#allocation168_spill] sm:$0xff] %v11742_v5  ;;  %v1630_v31 = vld [vmem:[%s16614_s7 + $0x390] sm:$0xff]  ;;  %v1633_v60 = vld [vmem:[%s16614_s7 + $0x3a8] sm:$0xff]  ;;  %v1632_v27 = vld [vmem:[%s16614_s7 + $0x3a0] sm:$0xff]  ;;  %v1882_v5 = vmul.f32 %v1754_v29, %v1626_v35  ;;  %v1884_v12 = vmul.f32 %v1756_v0, %v1628_v20 }
 0x22e   : > { %v1760_v50 = vld [vmem:[%s10228_s27 + $0x3a0] sm:$0xff]  ;;  %v1763_v28 = vld [vmem:[%s10228_s27 + $0x3b8] sm:$0xff]  ;;  %16731 = vst [vmem:[#allocation169_spill] sm:$0xff] %v11755_v42  ;;  %16732 = vst [vmem:[#allocation170_spill] sm:$0xff] %v11757_v41  ;;  %v1886_v21 = vmul.f32 %v1758_v9, %v1630_v31  ;;  %v1889_v0 = vmul.f32 %v1761_v58, %v1633_v60 }
 0x22f   : > { %16733 = vst [vmem:[#allocation171_spill] sm:$0xff] %v11759_v26  ;;  %16734 = vst [vmem:[#allocation172_spill] sm:$0xff] %v11761_v49  ;;  %v1762_v24 = vld [vmem:[%s10228_s27 + $0x3b0] sm:$0xff]  ;;  %v1765_v38 = vld [vmem:[%s10228_s27 + $0x3c8] sm:$0xff]  ;;  %v1888_v57 = vmul.f32 %v1760_v50, %v1632_v27  ;;  %v11816_v49 = vpop.permute.xlu1 %2535 }
 0x230   : > { %v1764_v33 = vld [vmem:[%s10228_s27 + $0x3c0] sm:$0xff]  ;;  %v2276_v43 = vld [vmem:[%s10228_s27 + $0x3b8] sm:$0xff]  ;;  %v2275_v11 = vld [vmem:[%s10228_s27 + $0x3b0] sm:$0xff]  ;;  %16735 = vst [vmem:[#allocation173_spill] sm:$0xff] %v11768_v32  ;;  %v11818_v32 = vpop.permute.xlu0 %2533 }
 0x231   : > { %v1499_v42 = vld [vmem:[%s16615_s29 + $0x378] sm:$0xff]  ;;  %v1498_v62 = vld [vmem:[%s16615_s29 + $0x370] sm:$0xff]  ;;  %v1501_v23 = vld [vmem:[%s16615_s29 + $0x388] sm:$0xff]  ;;  %16736 = vst [vmem:[#allocation174_spill] sm:$0xff] %v11816_v49  ;;  %2651 = vrot.lane.b32.xlu1 %v2276_v43, %s9619_s23 }
 0x232   : > { %v1635_v15 = vld [vmem:[%s16614_s7 + $0x3b8] sm:$0xff]  ;;  %v1634_v29 = vld [vmem:[%s16614_s7 + $0x3b0] sm:$0xff]  ;;  %v1500_v40 = vld [vmem:[%s16615_s29 + $0x380] sm:$0xff]  ;;  %16737 = vst [vmem:[#allocation175_spill] sm:$0xff] %v11818_v32  ;;  %v11820_v26 = vadd.f32 %v1883_v25, %v1499_v42  ;;  %v11833_v49 = vadd.f32 %v1885_v34, %v1501_v23  ;;  %2649 = vrot.lane.b32.xlu0 %v2275_v11, %s9619_s23 }
 0x233   : > { %v1767_v39 = vld [vmem:[%s10228_s27 + $0x3d8] sm:$0xff]  ;;  %v1637_v44 = vld [vmem:[%s16614_s7 + $0x3c8] sm:$0xff]  ;;  %v1502_v36 = vld [vmem:[%s16615_s29 + $0x390] sm:$0xff]  ;;  %v1891_v31 = vmul.f32 %v1763_v28, %v1635_v15  ;;  %v1890_v30 = vmul.f32 %v1762_v24, %v1634_v29  ;;  %v11822_v28 = vadd.f32 %v1882_v5, %v1498_v62  ;;  %v11835_v32 = vadd.f32 %v1884_v12, %v1500_v40  ;;  %2055 = vst.msk [vmem:[#allocation2 + $0xd0] sm:$0xff] %vm2028_vm0, %v10953_v22 }
 0x234   : > { %v1503_v35 = vld [vmem:[%s16615_s29 + $0x398] sm:$0xff]  ;;  %v1636_v54 = vld [vmem:[%s16614_s7 + $0x3c0] sm:$0xff]  ;;  %v1505_v20 = vld [vmem:[%s16615_s29 + $0x3a8] sm:$0xff]  ;;  %v1893_v9 = vmul.f32 %v1765_v38, %v1637_v44  ;;  %v11850_v34 = vadd.f32 %v1886_v21, %v1502_v36  ;;  %v11877_v36 = vpop.permute.xlu1 %2539  ;;  %2056 = vst.msk [vmem:[#allocation2 + $0xd8] sm:$0xff] %vm2028_vm0, %v10951_v45 }
 0x235   : > { %v1504_v60 = vld [vmem:[%s16615_s29 + $0x3a0] sm:$0xff]  ;;  %v1892_v58 = vmul.f32 %v1764_v33, %v1636_v54  ;;  %v1639_v27 = vld [vmem:[%s16614_s7 + $0x3d8] sm:$0xff]  ;;  %v1638_v50 = vld [vmem:[%s16614_s7 + $0x3d0] sm:$0xff]  ;;  %v11837_v42 = vadd.f32 %v1887_v37, %v1503_v35  ;;  %v11852_v12 = vadd.f32 %v1889_v0, %v1505_v20  ;;  %v11879_v20 = vpop.permute.xlu0 %2537  ;;  %2057 = vst.msk [vmem:[#allocation2 + $0xe0] sm:$0xff] %vm2028_vm0, %v10968_v59 }
 0x236   : > { %v1766_v41 = vld [vmem:[%s10228_s27 + $0x3d0] sm:$0xff]  ;;  %v1895_v24 = vmul.f32 %v1767_v39, %v1639_v27  ;;  %v1641_v15 = vld [vmem:[%s16614_s7 + $0x3e8] sm:$0xff]  ;;  %v1508_v25 = vld [vmem:[%s16615_s29 + $0x3c0] sm:$0xff]  ;;  %v11854_v37 = vadd.f32 %v1888_v57, %v1504_v60  ;;  %2058 = vst.msk [vmem:[#allocation2 + $0xe8] sm:$0xff] %vm2028_vm0, %v10966_v55 }
 0x237   : > { %v1507_v33 = vld [vmem:[%s16615_s29 + $0x3b8] sm:$0xff]  ;;  %v1894_v38 = vmul.f32 %v1766_v41, %v1638_v50  ;;  %v1769_v29 = vld [vmem:[%s10228_s27 + $0x3e8] sm:$0xff]  ;;  %v2277_v54 = vld [vmem:[%s10228_s27 + $0x3c0] sm:$0xff]  ;;  %v11868_v11 = vadd.f32 %v1892_v58, %v1508_v25  ;;  %2139 = vst.msk [vmem:[#allocation2 + $0x370] sm:$0xff] %vm2028_vm0, %v11822_v28 }
 0x238   : > { %v2278_v44 = vld [vmem:[%s10228_s27 + $0x3c8] sm:$0xff]  ;;  %v1897_v62 = vmul.f32 %v1769_v29, %v1641_v15  ;;  %v1511_v39 = vld [vmem:[%s16615_s29 + $0x3d8] sm:$0xff]  ;;  %v11862_v40 = vadd.f32 %v1891_v31, %v1507_v33  ;;  %v1640_v0 = vld [vmem:[%s16614_s7 + $0x3e0] sm:$0xff]  ;;  %2653 = vrot.lane.b32.xlu0 %v2277_v54, %s9619_s23  ;;  %2140 = vst.msk [vmem:[#allocation2 + $0x378] sm:$0xff] %vm2028_vm0, %v11820_v26 }
 0x239   : > { %v1506_v5 = vld [vmem:[%s16615_s29 + $0x3b0] sm:$0xff]  ;;  %v1509_v41 = vld [vmem:[%s16615_s29 + $0x3c8] sm:$0xff]  ;;  %v11882_v60 = vld [vmem:[%s10228_s27 + $0x3f8] sm:$0xff]  ;;  %v11884_v31 = vadd.f32 %v1895_v24, %v1511_v39  ;;  %2655 = vrot.lane.b32.xlu1 %v2278_v44, %s9619_s23  ;;  %v11916_v44 = vpop.permute.xlu1 %2543  ;;  %v11918_v54 = vpop.permute.xlu0 %2541  ;;  %2141 = vst.msk [vmem:[#allocation2 + $0x380] sm:$0xff] %vm2028_vm0, %v11835_v32 }
 0x23a   : > { %v1510_v23 = vld [vmem:[%s16615_s29 + $0x3d0] sm:$0xff]  ;;  %v11864_v43 = vadd.f32 %v1890_v30, %v1506_v5  ;;  %v11866_v35 = vadd.f32 %v1893_v9, %v1509_v41  ;;  %v1513_v21 = vld [vmem:[%s16615_s29 + $0x3e8] sm:$0xff]  ;;  %v1643_v27 = vld [vmem:[%s16614_s7 + $0x3f8] sm:$0xff]  ;;  %2142 = vst.msk [vmem:[#allocation2 + $0x388] sm:$0xff] %vm2028_vm0, %v11833_v49 }
 0x23b   : > { %v1768_v57 = vld [vmem:[%s10228_s27 + $0x3e0] sm:$0xff]  ;;  %v11886_v30 = vadd.f32 %v1894_v38, %v1510_v23  ;;  %v11888_v9 = vadd.f32 %v1897_v62, %v1513_v21  ;;  %v1899_v33 = vmul.f32 %v11882_v60, %v1643_v27  ;;  %v11900_v24 = vld [vmem:[%s10228_s27 + $0x3d8] sm:$0xff]  ;;  %v11908_v29 = vld [vmem:[%s10228_s27 + $0x3d0] sm:$0xff]  ;;  %2143 = vst.msk [vmem:[#allocation2 + $0x390] sm:$0xff] %vm2028_vm0, %v11850_v34 }
 0x23c   : > { %v1896_v58 = vmul.f32 %v1768_v57, %v1640_v0  ;;  %v1512_v50 = vld [vmem:[%s16615_s29 + $0x3e0] sm:$0xff]  ;;  %v1515_v15 = vld [vmem:[%s16615_s29 + $0x3f8] sm:$0xff]  ;;  %v1642_v41 = vld [vmem:[%s16614_s7 + $0x3f0] sm:$0xff]  ;;  %2144 = vst.msk [vmem:[#allocation2 + $0x398] sm:$0xff] %vm2028_vm0, %v11837_v42  ;;  %2657 = vrot.lane.b32.xlu0 %v11908_v29, %s9619_s23 }
 0x23d   : > { %v11910_v5 = vadd.f32 %v1899_v33, %v1515_v15  ;;  %v1770_v25 = vld [vmem:[%s10228_s27 + $0x3f0] sm:$0xff]  ;;  %v16738_v39 = vld [vmem:[#allocation66_spill] sm:$0xff]  ;;  %v16739_v23 = vld [vmem:[#allocation67_spill] sm:$0xff]  ;;  %2145 = vst.msk [vmem:[#allocation2 + $0x3a0] sm:$0xff] %vm2028_vm0, %v11854_v37  ;;  %2659 = vrot.lane.b32.xlu1 %v11900_v24, %s9619_s23  ;;  %v12186_v42 = vpop.permute.xlu1 %2547  ;;  %v12188_v34 = vpop.permute.xlu0 %2545 }
 0x23e   : > { %v11902_v38 = vadd.f32 %v1896_v58, %v1512_v50  ;;  %v11920_v62 = vmul.f32 %v1770_v25, %v1642_v41  ;;  %2031 = vst.msk [vmem:[#allocation2 + $0x10] sm:$0xff] %vm2028_vm0, %v16738_v39  ;;  %2032 = vst.msk [vmem:[#allocation2 + $0x18] sm:$0xff] %vm2028_vm0, %v16739_v23  ;;  %v16740_v21 = vld [vmem:[#allocation70_spill] sm:$0xff]  ;;  %v16742_v47 = vld [vmem:[#allocation77_spill] sm:$0xff] }
 0x23f   : > { %2034 = vst.msk [vmem:[#allocation2 + $0x28] sm:$0xff] %vm2028_vm0, %v16740_v21  ;;  %v16741_v46 = vld [vmem:[#allocation78_spill] sm:$0xff]  ;;  %2060 = vst.msk [vmem:[#allocation2 + $0xf8] sm:$0xff] %vm2028_vm0, %v16742_v47  ;;  %v16743_v51 = vld [vmem:[#allocation80_spill] sm:$0xff] }
 0x240   : > { %2059 = vst.msk [vmem:[#allocation2 + $0xf0] sm:$0xff] %vm2028_vm0, %v16741_v46  ;;  %2061 = vst.msk [vmem:[#allocation2 + $0x100] sm:$0xff] %vm2028_vm0, %v16743_v51  ;;  %v16744_v1 = vld [vmem:[#allocation79_spill] sm:$0xff]  ;;  %v16747_v52 = vld [vmem:[#allocation33_spill] sm:$0xff] }
 0x241   : > { %2062 = vst.msk [vmem:[#allocation2 + $0x108] sm:$0xff] %vm2028_vm0, %v16744_v1  ;;  %v16745_v6 = vld [vmem:[#allocation31_spill] sm:$0xff]  ;;  %2065 = vst.msk [vmem:[#allocation2 + $0x120] sm:$0xff] %vm2028_vm0, %v16747_v52  ;;  %v16748_v3 = vld [vmem:[#allocation32_spill] sm:$0xff] }
 0x242   : > { %2063 = vst.msk [vmem:[#allocation2 + $0x110] sm:$0xff] %vm2028_vm0, %v16745_v6  ;;  %v16746_v63 = vld [vmem:[#allocation83_spill] sm:$0xff]  ;;  %2066 = vst.msk [vmem:[#allocation2 + $0x128] sm:$0xff] %vm2028_vm0, %v16748_v3  ;;  %v16749_v4 = vld [vmem:[#allocation86_spill] sm:$0xff] }
 0x243   : > { %2064 = vst.msk [vmem:[#allocation2 + $0x118] sm:$0xff] %vm2028_vm0, %v16746_v63  ;;  %2067 = vst.msk [vmem:[#allocation2 + $0x130] sm:$0xff] %vm2028_vm0, %v16749_v4  ;;  %v16750_v2 = vld [vmem:[#allocation34_spill] sm:$0xff]  ;;  %v16751_v7 = vld [vmem:[#allocation87_spill] sm:$0xff] }
 0x244   : > { %2068 = vst.msk [vmem:[#allocation2 + $0x138] sm:$0xff] %vm2028_vm0, %v16750_v2  ;;  %2069 = vst.msk [vmem:[#allocation2 + $0x140] sm:$0xff] %vm2028_vm0, %v16751_v7  ;;  %v16752_v8 = vld [vmem:[#allocation35_spill] sm:$0xff]  ;;  %v16753_v61 = vld [vmem:[#allocation89_spill] sm:$0xff] }
 0x245   : > { %2070 = vst.msk [vmem:[#allocation2 + $0x148] sm:$0xff] %vm2028_vm0, %v16752_v8  ;;  %2071 = vst.msk [vmem:[#allocation2 + $0x150] sm:$0xff] %vm2028_vm0, %v16753_v61  ;;  %v16754_v53 = vld [vmem:[#allocation88_spill] sm:$0xff]  ;;  %v16755_v56 = vld [vmem:[#allocation91_spill] sm:$0xff] }
 0x246   : > { %2072 = vst.msk [vmem:[#allocation2 + $0x158] sm:$0xff] %vm2028_vm0, %v16754_v53  ;;  %2073 = vst.msk [vmem:[#allocation2 + $0x160] sm:$0xff] %vm2028_vm0, %v16755_v56  ;;  %v16756_v10 = vld [vmem:[#allocation90_spill] sm:$0xff]  ;;  %v16757_v48 = vld [vmem:[#allocation95_spill] sm:$0xff] }
 0x247   : > { %2074 = vst.msk [vmem:[#allocation2 + $0x168] sm:$0xff] %vm2028_vm0, %v16756_v10  ;;  %2075 = vst.msk [vmem:[#allocation2 + $0x170] sm:$0xff] %vm2028_vm0, %v16757_v48  ;;  %v16758_v13 = vld [vmem:[#allocation92_spill] sm:$0xff]  ;;  %v16759_v14 = vld [vmem:[#allocation97_spill] sm:$0xff] }
 0x248   : > { %2076 = vst.msk [vmem:[#allocation2 + $0x178] sm:$0xff] %vm2028_vm0, %v16758_v13  ;;  %2077 = vst.msk [vmem:[#allocation2 + $0x180] sm:$0xff] %vm2028_vm0, %v16759_v14  ;;  %v16760_v17 = vld [vmem:[#allocation96_spill] sm:$0xff]  ;;  %v16761_v18 = vld [vmem:[#allocation101_spill] sm:$0xff] }
 0x249   : > { %2078 = vst.msk [vmem:[#allocation2 + $0x188] sm:$0xff] %vm2028_vm0, %v16760_v17  ;;  %2079 = vst.msk [vmem:[#allocation2 + $0x190] sm:$0xff] %vm2028_vm0, %v16761_v18  ;;  %v16762_v19 = vld [vmem:[#allocation100_spill] sm:$0xff]  ;;  %v16763_v16 = vld [vmem:[#allocation103_spill] sm:$0xff] }
 0x24a   : > { %2080 = vst.msk [vmem:[#allocation2 + $0x198] sm:$0xff] %vm2028_vm0, %v16762_v19  ;;  %2081 = vst.msk [vmem:[#allocation2 + $0x1a0] sm:$0xff] %vm2028_vm0, %v16763_v16  ;;  %v16764_v45 = vld [vmem:[#allocation102_spill] sm:$0xff]  ;;  %v16765_v22 = vld [vmem:[#allocation105_spill] sm:$0xff] }
 0x24b   : > { %2082 = vst.msk [vmem:[#allocation2 + $0x1a8] sm:$0xff] %vm2028_vm0, %v16764_v45  ;;  %2083 = vst.msk [vmem:[#allocation2 + $0x1b0] sm:$0xff] %vm2028_vm0, %v16765_v22  ;;  %v16766_v55 = vld [vmem:[#allocation104_spill] sm:$0xff]  ;;  %v16767_v59 = vld [vmem:[#allocation107_spill] sm:$0xff] }
 0x24c   : > { %2084 = vst.msk [vmem:[#allocation2 + $0x1b8] sm:$0xff] %vm2028_vm0, %v16766_v55  ;;  %2085 = vst.msk [vmem:[#allocation2 + $0x1c0] sm:$0xff] %vm2028_vm0, %v16767_v59  ;;  %v16768_v0 = vld [vmem:[#allocation106_spill] sm:$0xff]  ;;  %v16769_v57 = vld [vmem:[#allocation109_spill] sm:$0xff] }
 0x24d   : > { %2086 = vst.msk [vmem:[#allocation2 + $0x1c8] sm:$0xff] %vm2028_vm0, %v16768_v0  ;;  %2087 = vst.msk [vmem:[#allocation2 + $0x1d0] sm:$0xff] %vm2028_vm0, %v16769_v57  ;;  %v16770_v58 = vld [vmem:[#allocation108_spill] sm:$0xff]  ;;  %v16771_v27 = vld [vmem:[#allocation111_spill] sm:$0xff] }
 0x24e   : > { %2088 = vst.msk [vmem:[#allocation2 + $0x1d8] sm:$0xff] %vm2028_vm0, %v16770_v58  ;;  %2089 = vst.msk [vmem:[#allocation2 + $0x1e0] sm:$0xff] %vm2028_vm0, %v16771_v27  ;;  %v16772_v50 = vld [vmem:[#allocation110_spill] sm:$0xff]  ;;  %v16773_v33 = vld [vmem:[#allocation115_spill] sm:$0xff] }
 0x24f   : > { %2090 = vst.msk [vmem:[#allocation2 + $0x1e8] sm:$0xff] %vm2028_vm0, %v16772_v50  ;;  %2091 = vst.msk [vmem:[#allocation2 + $0x1f0] sm:$0xff] %vm2028_vm0, %v16773_v33  ;;  %v16774_v15 = vld [vmem:[#allocation114_spill] sm:$0xff]  ;;  %v16775_v41 = vld [vmem:[#allocation119_spill] sm:$0xff] }
 0x250   : > { %2092 = vst.msk [vmem:[#allocation2 + $0x1f8] sm:$0xff] %vm2028_vm0, %v16774_v15  ;;  %2093 = vst.msk [vmem:[#allocation2 + $0x200] sm:$0xff] %vm2028_vm0, %v16775_v41  ;;  %v16776_v25 = vld [vmem:[#allocation116_spill] sm:$0xff]  ;;  %v16777_v39 = vld [vmem:[#allocation121_spill] sm:$0xff] }
 0x251   : > { %2094 = vst.msk [vmem:[#allocation2 + $0x208] sm:$0xff] %vm2028_vm0, %v16776_v25  ;;  %2095 = vst.msk [vmem:[#allocation2 + $0x210] sm:$0xff] %vm2028_vm0, %v16777_v39  ;;  %v16778_v23 = vld [vmem:[#allocation120_spill] sm:$0xff]  ;;  %v16779_v21 = vld [vmem:[#allocation123_spill] sm:$0xff] }
 0x252   : > { %2096 = vst.msk [vmem:[#allocation2 + $0x218] sm:$0xff] %vm2028_vm0, %v16778_v23  ;;  %2097 = vst.msk [vmem:[#allocation2 + $0x220] sm:$0xff] %vm2028_vm0, %v16779_v21  ;;  %v16780_v46 = vld [vmem:[#allocation122_spill] sm:$0xff]  ;;  %v16781_v47 = vld [vmem:[#allocation125_spill] sm:$0xff] }
 0x253   : > { %2098 = vst.msk [vmem:[#allocation2 + $0x228] sm:$0xff] %vm2028_vm0, %v16780_v46  ;;  %2099 = vst.msk [vmem:[#allocation2 + $0x230] sm:$0xff] %vm2028_vm0, %v16781_v47  ;;  %v16782_v51 = vld [vmem:[#allocation124_spill] sm:$0xff]  ;;  %v16783_v1 = vld [vmem:[#allocation127_spill] sm:$0xff] }
 0x254   : > { %2100 = vst.msk [vmem:[#allocation2 + $0x238] sm:$0xff] %vm2028_vm0, %v16782_v51  ;;  %2101 = vst.msk [vmem:[#allocation2 + $0x240] sm:$0xff] %vm2028_vm0, %v16783_v1  ;;  %v16784_v6 = vld [vmem:[#allocation126_spill] sm:$0xff]  ;;  %v16785_v63 = vld [vmem:[#allocation129_spill] sm:$0xff] }
 0x255   : > { %2102 = vst.msk [vmem:[#allocation2 + $0x248] sm:$0xff] %vm2028_vm0, %v16784_v6  ;;  %2103 = vst.msk [vmem:[#allocation2 + $0x250] sm:$0xff] %vm2028_vm0, %v16785_v63  ;;  %v16786_v52 = vld [vmem:[#allocation128_spill] sm:$0xff]  ;;  %v16787_v3 = vld [vmem:[#allocation133_spill] sm:$0xff] }
 0x256   : > { %2104 = vst.msk [vmem:[#allocation2 + $0x258] sm:$0xff] %vm2028_vm0, %v16786_v52  ;;  %2105 = vst.msk [vmem:[#allocation2 + $0x260] sm:$0xff] %vm2028_vm0, %v16787_v3  ;;  %v16788_v4 = vld [vmem:[#allocation130_spill] sm:$0xff]  ;;  %v16789_v2 = vld [vmem:[#allocation135_spill] sm:$0xff] }
 0x257   : > { %2106 = vst.msk [vmem:[#allocation2 + $0x268] sm:$0xff] %vm2028_vm0, %v16788_v4  ;;  %2107 = vst.msk [vmem:[#allocation2 + $0x270] sm:$0xff] %vm2028_vm0, %v16789_v2  ;;  %v16790_v7 = vld [vmem:[#allocation134_spill] sm:$0xff]  ;;  %v16791_v8 = vld [vmem:[#allocation139_spill] sm:$0xff] }
 0x258   : > { %2108 = vst.msk [vmem:[#allocation2 + $0x278] sm:$0xff] %vm2028_vm0, %v16790_v7  ;;  %2109 = vst.msk [vmem:[#allocation2 + $0x280] sm:$0xff] %vm2028_vm0, %v16791_v8  ;;  %v16792_v61 = vld [vmem:[#allocation138_spill] sm:$0xff]  ;;  %v16793_v53 = vld [vmem:[#allocation141_spill] sm:$0xff] }
 0x259   : > { %2110 = vst.msk [vmem:[#allocation2 + $0x288] sm:$0xff] %vm2028_vm0, %v16792_v61  ;;  %2111 = vst.msk [vmem:[#allocation2 + $0x290] sm:$0xff] %vm2028_vm0, %v16793_v53  ;;  %v16794_v56 = vld [vmem:[#allocation140_spill] sm:$0xff]  ;;  %v16795_v10 = vld [vmem:[#allocation143_spill] sm:$0xff] }
 0x25a   : > { %2112 = vst.msk [vmem:[#allocation2 + $0x298] sm:$0xff] %vm2028_vm0, %v16794_v56  ;;  %2113 = vst.msk [vmem:[#allocation2 + $0x2a0] sm:$0xff] %vm2028_vm0, %v16795_v10  ;;  %v16796_v48 = vld [vmem:[#allocation142_spill] sm:$0xff]  ;;  %v16797_v13 = vld [vmem:[#allocation145_spill] sm:$0xff] }
 0x25b   : > { %2114 = vst.msk [vmem:[#allocation2 + $0x2a8] sm:$0xff] %vm2028_vm0, %v16796_v48  ;;  %2115 = vst.msk [vmem:[#allocation2 + $0x2b0] sm:$0xff] %vm2028_vm0, %v16797_v13  ;;  %v16798_v14 = vld [vmem:[#allocation144_spill] sm:$0xff]  ;;  %v16799_v17 = vld [vmem:[#allocation147_spill] sm:$0xff] }
 0x25c   : > { %2116 = vst.msk [vmem:[#allocation2 + $0x2b8] sm:$0xff] %vm2028_vm0, %v16798_v14  ;;  %2117 = vst.msk [vmem:[#allocation2 + $0x2c0] sm:$0xff] %vm2028_vm0, %v16799_v17  ;;  %v16800_v18 = vld [vmem:[#allocation146_spill] sm:$0xff]  ;;  %v16801_v19 = vld [vmem:[#allocation149_spill] sm:$0xff] }
 0x25d   : > { %2118 = vst.msk [vmem:[#allocation2 + $0x2c8] sm:$0xff] %vm2028_vm0, %v16800_v18  ;;  %2119 = vst.msk [vmem:[#allocation2 + $0x2d0] sm:$0xff] %vm2028_vm0, %v16801_v19  ;;  %v16802_v16 = vld [vmem:[#allocation148_spill] sm:$0xff]  ;;  %v16803_v45 = vld [vmem:[#allocation153_spill] sm:$0xff] }
 0x25e   : > { %2120 = vst.msk [vmem:[#allocation2 + $0x2d8] sm:$0xff] %vm2028_vm0, %v16802_v16  ;;  %2121 = vst.msk [vmem:[#allocation2 + $0x2e0] sm:$0xff] %vm2028_vm0, %v16803_v45  ;;  %v16804_v22 = vld [vmem:[#allocation152_spill] sm:$0xff]  ;;  %v16805_v55 = vld [vmem:[#allocation157_spill] sm:$0xff] }
 0x25f   : > { %2122 = vst.msk [vmem:[#allocation2 + $0x2e8] sm:$0xff] %vm2028_vm0, %v16804_v22  ;;  %2123 = vst.msk [vmem:[#allocation2 + $0x2f0] sm:$0xff] %vm2028_vm0, %v16805_v55  ;;  %v16806_v59 = vld [vmem:[#allocation154_spill] sm:$0xff]  ;;  %v16807_v0 = vld [vmem:[#allocation159_spill] sm:$0xff] }
 0x260   : > { %2124 = vst.msk [vmem:[#allocation2 + $0x2f8] sm:$0xff] %vm2028_vm0, %v16806_v59  ;;  %2125 = vst.msk [vmem:[#allocation2 + $0x300] sm:$0xff] %vm2028_vm0, %v16807_v0  ;;  %v16808_v57 = vld [vmem:[#allocation158_spill] sm:$0xff]  ;;  %v16809_v58 = vld [vmem:[#allocation161_spill] sm:$0xff] }
 0x261   : > { %2126 = vst.msk [vmem:[#allocation2 + $0x308] sm:$0xff] %vm2028_vm0, %v16808_v57  ;;  %2127 = vst.msk [vmem:[#allocation2 + $0x310] sm:$0xff] %vm2028_vm0, %v16809_v58  ;;  %v16810_v27 = vld [vmem:[#allocation160_spill] sm:$0xff]  ;;  %v16811_v50 = vld [vmem:[#allocation163_spill] sm:$0xff] }
 0x262   : > { %2128 = vst.msk [vmem:[#allocation2 + $0x318] sm:$0xff] %vm2028_vm0, %v16810_v27  ;;  %2129 = vst.msk [vmem:[#allocation2 + $0x320] sm:$0xff] %vm2028_vm0, %v16811_v50  ;;  %v16812_v33 = vld [vmem:[#allocation162_spill] sm:$0xff]  ;;  %v16813_v15 = vld [vmem:[#allocation165_spill] sm:$0xff] }
 0x263   : > { %2130 = vst.msk [vmem:[#allocation2 + $0x328] sm:$0xff] %vm2028_vm0, %v16812_v33  ;;  %2131 = vst.msk [vmem:[#allocation2 + $0x330] sm:$0xff] %vm2028_vm0, %v16813_v15  ;;  %v16814_v41 = vld [vmem:[#allocation164_spill] sm:$0xff]  ;;  %v16815_v25 = vld [vmem:[#allocation167_spill] sm:$0xff] }
 0x264   : > { %2132 = vst.msk [vmem:[#allocation2 + $0x338] sm:$0xff] %vm2028_vm0, %v16814_v41  ;;  %2133 = vst.msk [vmem:[#allocation2 + $0x340] sm:$0xff] %vm2028_vm0, %v16815_v25  ;;  %v16816_v39 = vld [vmem:[#allocation166_spill] sm:$0xff]  ;;  %v16817_v23 = vld [vmem:[#allocation171_spill] sm:$0xff] }
 0x265   : > { %2134 = vst.msk [vmem:[#allocation2 + $0x348] sm:$0xff] %vm2028_vm0, %v16816_v39  ;;  %2135 = vst.msk [vmem:[#allocation2 + $0x350] sm:$0xff] %vm2028_vm0, %v16817_v23  ;;  %v16818_v21 = vld [vmem:[#allocation168_spill] sm:$0xff]  ;;  %v16819_v46 = vld [vmem:[#allocation173_spill] sm:$0xff] }
 0x266   : > { %2136 = vst.msk [vmem:[#allocation2 + $0x358] sm:$0xff] %vm2028_vm0, %v16818_v21  ;;  %2137 = vst.msk [vmem:[#allocation2 + $0x360] sm:$0xff] %vm2028_vm0, %v16819_v46  ;;  %v16820_v47 = vld [vmem:[#allocation172_spill] sm:$0xff]  ;;  %v2281_v28 = vld [vmem:[%s10228_s27 + $0x3e0] sm:$0xff] }
 0x267   : > { %2138 = vst.msk [vmem:[#allocation2 + $0x368] sm:$0xff] %vm2028_vm0, %v16820_v47  ;;  %2146 = vst.msk [vmem:[#allocation2 + $0x3a8] sm:$0xff] %vm2028_vm0, %v11852_v12  ;;  %v1514_v32 = vld [vmem:[%s16615_s29 + $0x3f0] sm:$0xff]  ;;  %2661 = vrot.lane.b32.xlu0 %v2281_v28, %s9619_s23  ;;  %v8778_v37 = vld [vmem:[%s16614_s7] sm:$0xff] }
 0x268   : > { %2147 = vst.msk [vmem:[#allocation2 + $0x3b0] sm:$0xff] %vm2028_vm0, %v11864_v43  ;;  %2148 = vst.msk [vmem:[#allocation2 + $0x3b8] sm:$0xff] %vm2028_vm0, %v11862_v40  ;;  %v2026_v26 = vadd.f32 %v11920_v62, %v1514_v32  ;;  %v2282_v49 = vld [vmem:[%s10228_s27 + $0x3e8] sm:$0xff]  ;;  %v2283_v12 = vld [vmem:[%s10228_s27 + $0x3f0] sm:$0xff] }
 0x269   : > { %2149 = vst.msk [vmem:[#allocation2 + $0x3c0] sm:$0xff] %vm2028_vm0, %v11868_v11  ;;  %2150 = vst.msk [vmem:[#allocation2 + $0x3c8] sm:$0xff] %vm2028_vm0, %v11866_v35  ;;  %2663 = vrot.lane.b32.xlu1 %v2282_v49, %s9619_s23  ;;  %v16821_v40 = vld [vmem:[#allocation37_spill] sm:$0xff]  ;;  %v8779_v35 = vld [vmem:[%s16614_s7 + $0x8] sm:$0xff] }
 0x26a   : > { %2151 = vst.msk [vmem:[#allocation2 + $0x3d0] sm:$0xff] %vm2028_vm0, %v11886_v30  ;;  %2152 = vst.msk [vmem:[#allocation2 + $0x3d8] sm:$0xff] %vm2028_vm0, %v11884_v31  ;;  %v2797_v43 = vmul.f32 %v8778_v37, %v16821_v40  ;;  %v16822_v11 = vld [vmem:[#allocation39_spill] sm:$0xff]  ;;  %v12202_v30 = vpop.permute.xlu1 %2551  ;;  %v8780_v24 = vld [vmem:[%s16614_s7 + $0x10] sm:$0xff] }
 0x26b   : > { %2153 = vst.msk [vmem:[#allocation2 + $0x3e0] sm:$0xff] %vm2028_vm0, %v11902_v38  ;;  %2154 = vst.msk [vmem:[#allocation2 + $0x3e8] sm:$0xff] %vm2028_vm0, %v11888_v9  ;;  %v2798_v31 = vmul.f32 %v8779_v35, %v16822_v11  ;;  %v12204_v9 = vpop.permute.xlu0 %2549  ;;  %2665 = vrot.lane.b32.xlu0 %v2283_v12, %s9619_s23  ;;  %v16823_v38 = vld [vmem:[#allocation36_spill] sm:$0xff]  ;;  %v8782_v51 = vld [vmem:[%s16614_s7 + $0x18] sm:$0xff] }
 0x26c   : > { %2156 = vst.msk [vmem:[#allocation2 + $0x3f8] sm:$0xff] %vm2028_vm0, %v11910_v5  ;;  %2155 = vst.msk [vmem:[#allocation2 + $0x3f0] sm:$0xff] %vm2028_vm0, %v2026_v26  ;;  %v2799_v29 = vmul.f32 %v8780_v24, %v16823_v38  ;;  %v8781_v5 = vld [vmem:[%s16615_s29] sm:$0xff]  ;;  %v8784_v4 = vld [vmem:[%s16615_s29 + $0x10] sm:$0xff] }
 0x26d   : > { %2667 = vrot.lane.b32.xlu1 %v11882_v60, %s9619_s23  ;;  %v2925_v62 = vadd.f32 %v8781_v5, %v2797_v43  ;;  %v16824_v1 = vld [vmem:[#allocation38_spill] sm:$0xff]  ;;  %v8783_v60 = vld [vmem:[%s16615_s29 + $0x8] sm:$0xff]  ;;  %v16826_v48 = vld [vmem:[#allocation41_spill] sm:$0xff] }
 0x26e   : > { %v2800_v6 = vmul.f32 %v8782_v51, %v16824_v1  ;;  %v2926_v63 = vadd.f32 %v8783_v60, %v2798_v31  ;;  %v12223_v52 = vpop.permute.xlu1 %2555  ;;  %v2927_v2 = vadd.f32 %v8784_v4, %v2799_v29  ;;  %v8785_v7 = vld [vmem:[%s16615_s29 + $0x18] sm:$0xff]  ;;  %v8786_v61 = vld [vmem:[%s16614_s7 + $0x28] sm:$0xff]  ;;  %v8787_v10 = vld [vmem:[%s16614_s7 + $0x20] sm:$0xff] }
 0x26f   : > { %v12225_v3 = vpop.permute.xlu0 %2553  ;;  %3181 = vrot.lane.b32.xlu0 %v2925_v62, %s9620_s16  ;;  %v16825_v53 = vld [vmem:[#allocation40_spill] sm:$0xff]  ;;  %v2801_v13 = vmul.f32 %v8787_v10, %v16826_v48  ;;  %v8789_v16 = vld [vmem:[%s16615_s29 + $0x20] sm:$0xff]  ;;  %v8790_v22 = vld [vmem:[%s16614_s7 + $0x38] sm:$0xff] }
 0x270   : > { %v2928_v8 = vadd.f32 %v8785_v7, %v2800_v6  ;;  %v2802_v56 = vmul.f32 %v8786_v61, %v16825_v53  ;;  %v8788_v18 = vld [vmem:[%s16615_s29 + $0x28] sm:$0xff]  ;;  %v16827_v55 = vld [vmem:[#allocation42_spill] sm:$0xff]  ;;  %v8791_v0 = vld [vmem:[%s16614_s7 + $0x30] sm:$0xff] }
 0x271   : > { %3183 = vrot.lane.b32.xlu1 %v2926_v63, %s9620_s16  ;;  %v2929_v45 = vadd.f32 %v8789_v16, %v2801_v13  ;;  %v2804_v59 = vmul.f32 %v8790_v22, %v16827_v55  ;;  %v16828_v57 = vld [vmem:[#allocation43_spill] sm:$0xff]  ;;  %v8792_v33 = vld [vmem:[%s16615_s29 + $0x38] sm:$0xff]  ;;  %v8793_v41 = vld [vmem:[%s16615_s29 + $0x30] sm:$0xff] }
 0x272   : > { %v12243_v14 = vpop.permute.xlu1 %2559  ;;  %v2930_v19 = vadd.f32 %v8788_v18, %v2802_v56  ;;  %v2803_v58 = vmul.f32 %v8791_v0, %v16828_v57  ;;  %v8794_v39 = vld [vmem:[%s16614_s7 + $0x48] sm:$0xff]  ;;  %v8795_v46 = vld [vmem:[%s16614_s7 + $0x40] sm:$0xff]  ;;  %v16830_v47 = vld [vmem:[#allocation45_spill] sm:$0xff] }
 0x273   : > { %v12245_v17 = vpop.permute.xlu0 %2557  ;;  %3185 = vrot.lane.b32.xlu0 %v2927_v2, %s9620_s16  ;;  %v2932_v15 = vadd.f32 %v8792_v33, %v2804_v59  ;;  %v16829_v23 = vld [vmem:[#allocation44_spill] sm:$0xff]  ;;  %v2805_v32 = vmul.f32 %v8795_v46, %v16830_v47  ;;  %v8797_v37 = vld [vmem:[%s16615_s29 + $0x40] sm:$0xff]  ;;  %v8798_v43 = vld [vmem:[%s16614_s7 + $0x58] sm:$0xff] }
 0x274   : > { %v2931_v25 = vadd.f32 %v8793_v41, %v2803_v58  ;;  %v2806_v21 = vmul.f32 %v8794_v39, %v16829_v23  ;;  %v8796_v28 = vld [vmem:[%s16615_s29 + $0x48] sm:$0xff]  ;;  %v16831_v35 = vld [vmem:[#allocation46_spill] sm:$0xff]  ;;  %v8799_v31 = vld [vmem:[%s16614_s7 + $0x50] sm:$0xff] }
 0x275   : > { %3187 = vrot.lane.b32.xlu1 %v2928_v8, %s9620_s16  ;;  %v2933_v40 = vadd.f32 %v8797_v37, %v2805_v32  ;;  %v2808_v11 = vmul.f32 %v8798_v43, %v16831_v35  ;;  %v16832_v24 = vld [vmem:[#allocation47_spill] sm:$0xff]  ;;  %v8800_v62 = vld [vmem:[%s16615_s29 + $0x58] sm:$0xff]  ;;  %v8801_v1 = vld [vmem:[%s16615_s29 + $0x50] sm:$0xff] }
 0x276   : > { %v12263_v27 = vpop.permute.xlu1 %2563  ;;  %v2934_v12 = vadd.f32 %v8796_v28, %v2806_v21  ;;  %v2807_v38 = vmul.f32 %v8799_v31, %v16832_v24  ;;  %v8802_v60 = vld [vmem:[%s16614_s7 + $0x68] sm:$0xff]  ;;  %v8803_v2 = vld [vmem:[%s16614_s7 + $0x60] sm:$0xff]  ;;  %v16834_v7 = vld [vmem:[#allocation49_spill] sm:$0xff] }
 0x277   : > { %v12265_v50 = vpop.permute.xlu0 %2561  ;;  %3189 = vrot.lane.b32.xlu0 %v2929_v45, %s9620_s16  ;;  %v2936_v51 = vadd.f32 %v8800_v62, %v2808_v11  ;;  %v16833_v63 = vld [vmem:[#allocation48_spill] sm:$0xff]  ;;  %v2809_v8 = vmul.f32 %v8803_v2, %v16834_v7  ;;  %v8805_v48 = vld [vmem:[%s16615_s29 + $0x60] sm:$0xff]  ;;  %v8806_v18 = vld [vmem:[%s16614_s7 + $0x78] sm:$0xff] }
 0x278   : > { %v2935_v6 = vadd.f32 %v8801_v1, %v2807_v38  ;;  %v2810_v4 = vmul.f32 %v8802_v60, %v16833_v63  ;;  %v8804_v56 = vld [vmem:[%s16615_s29 + $0x68] sm:$0xff]  ;;  %v8807_v45 = vld [vmem:[%s16614_s7 + $0x70] sm:$0xff]  ;;  %v8808_v57 = vld [vmem:[%s16615_s29 + $0x78] sm:$0xff] }
 0x279   : > { %3191 = vrot.lane.b32.xlu1 %v2930_v19, %s9620_s16  ;;  %v2937_v13 = vadd.f32 %v8805_v48, %v2809_v8  ;;  %v16835_v19 = vld [vmem:[#allocation50_spill] sm:$0xff]  ;;  %v16836_v22 = vld [vmem:[#allocation51_spill] sm:$0xff]  ;;  %v8809_v33 = vld [vmem:[%s16615_s29 + $0x70] sm:$0xff] }
 0x27a   : > { %v12283_v26 = vpop.permute.xlu1 %2567  ;;  %v2938_v10 = vadd.f32 %v8804_v56, %v2810_v4  ;;  %v2812_v16 = vmul.f32 %v8806_v18, %v16835_v19  ;;  %v2811_v55 = vmul.f32 %v8807_v45, %v16836_v22  ;;  %v8810_v41 = vld [vmem:[%s16614_s7 + $0x88] sm:$0xff]  ;;  %v8811_v23 = vld [vmem:[%s16614_s7 + $0x80] sm:$0xff]  ;;  %v16838_v21 = vld [vmem:[#allocation53_spill] sm:$0xff] }
 0x27b   : > { %v12285_v49 = vpop.permute.xlu0 %2565  ;;  %3193 = vrot.lane.b32.xlu0 %v2931_v25, %s9620_s16  ;;  %v16837_v25 = vld [vmem:[#allocation52_spill] sm:$0xff]  ;;  %v2813_v46 = vmul.f32 %v8811_v23, %v16838_v21  ;;  %v8813_v37 = vld [vmem:[%s16615_s29 + $0x80] sm:$0xff]  ;;  %v8814_v43 = vld [vmem:[%s16614_s7 + $0x98] sm:$0xff] }
 0x27c   : > { %v2940_v58 = vadd.f32 %v8808_v57, %v2812_v16  ;;  %v2814_v39 = vmul.f32 %v8810_v41, %v16837_v25  ;;  %v8812_v28 = vld [vmem:[%s16615_s29 + $0x88] sm:$0xff]  ;;  %v16839_v35 = vld [vmem:[#allocation54_spill] sm:$0xff]  ;;  %v8815_v31 = vld [vmem:[%s16614_s7 + $0x90] sm:$0xff] }
 0x27d   : > { %3195 = vrot.lane.b32.xlu1 %v2932_v15, %s9620_s16  ;;  %v2939_v15 = vadd.f32 %v8809_v33, %v2811_v55  ;;  %v2816_v11 = vmul.f32 %v8814_v43, %v16839_v35  ;;  %v16840_v24 = vld [vmem:[#allocation55_spill] sm:$0xff]  ;;  %v8816_v1 = vld [vmem:[%s16615_s29 + $0x98] sm:$0xff]  ;;  %v8817_v60 = vld [vmem:[%s16615_s29 + $0x90] sm:$0xff] }
 0x27e   : > { %v12303_v29 = vpop.permute.xlu1 %2571  ;;  %v2815_v38 = vmul.f32 %v8815_v31, %v16840_v24  ;;  %v8818_v4 = vld [vmem:[%s16614_s7 + $0xa8] sm:$0xff]  ;;  %v8819_v8 = vld [vmem:[%s16614_s7 + $0xa0] sm:$0xff]  ;;  %v16842_v56 = vld [vmem:[#allocation57_spill] sm:$0xff] }
 0x27f   : > { %v12305_v5 = vpop.permute.xlu0 %2569  ;;  %3197 = vrot.lane.b32.xlu0 %v2933_v40, %s9620_s16  ;;  %v2941_v40 = vadd.f32 %v8813_v37, %v2813_v46  ;;  %v16841_v2 = vld [vmem:[#allocation56_spill] sm:$0xff]  ;;  %v8821_v16 = vld [vmem:[%s16615_s29 + $0xa0] sm:$0xff]  ;;  %v8822_v22 = vld [vmem:[%s16614_s7 + $0xb8] sm:$0xff] }
 0x280   : > { %v2943_v63 = vadd.f32 %v8817_v60, %v2815_v38  ;;  %v2818_v7 = vmul.f32 %v8818_v4, %v16841_v2  ;;  %v8820_v18 = vld [vmem:[%s16615_s29 + $0xa8] sm:$0xff]  ;;  %v16843_v55 = vld [vmem:[#allocation58_spill] sm:$0xff]  ;;  %v8825_v21 = vld [vmem:[%s16615_s29 + $0xb0] sm:$0xff] }
 0x281   : > { %3199 = vrot.lane.b32.xlu1 %v2934_v12, %s9620_s16  ;;  %v2942_v12 = vadd.f32 %v8812_v28, %v2814_v39  ;;  %v2820_v57 = vmul.f32 %v8822_v22, %v16843_v55  ;;  %v16844_v33 = vld [vmem:[#allocation59_spill] sm:$0xff]  ;;  %v8824_v39 = vld [vmem:[%s16615_s29 + $0xb8] sm:$0xff]  ;;  %v8831_v2 = vld [vmem:[%s16614_s7 + $0xd0] sm:$0xff] }
 0x282   : > { %v12323_v61 = vpop.permute.xlu1 %2575  ;;  %v2946_v19 = vadd.f32 %v8820_v18, %v2818_v7  ;;  %v8826_v28 = vld [vmem:[%s16614_s7 + $0xc8] sm:$0xff]  ;;  %v16846_v43 = vld [vmem:[#allocation61_spill] sm:$0xff] }
 0x283   : > { %v12325_v53 = vpop.permute.xlu0 %2573  ;;  %3201 = vrot.lane.b32.xlu0 %v2935_v6, %s9620_s16  ;;  %v2944_v6 = vadd.f32 %v8816_v1, %v2816_v11  ;;  %v2948_v23 = vadd.f32 %v8824_v39, %v2820_v57  ;;  %v8828_v24 = vld [vmem:[%s16615_s29 + $0xc8] sm:$0xff]  ;;  %v8829_v1 = vld [vmem:[%s16615_s29 + $0xc0] sm:$0xff]  ;;  %v8830_v60 = vld [vmem:[%s16614_s7 + $0xd8] sm:$0xff] }
 0x284   : > { %v16848_v7 = vld [vmem:[#allocation63_spill] sm:$0xff]  ;;  %v8832_v18 = vld [vmem:[%s16615_s29 + $0xd8] sm:$0xff]  ;;  %v16849_v55 = vld [vmem:[#allocation64_spill] sm:$0xff] }
 0x285   : > { %3203 = vrot.lane.b32.xlu1 %v2936_v51, %s9620_s16  ;;  %v8834_v22 = vld [vmem:[%s16614_s7 + $0xe8] sm:$0xff] }
 0x286   : > { %v12343_v59 = vpop.permute.xlu1 %2579  ;;  %v2826_v57 = vmul.f32 %v8834_v22, %v16849_v55 }
 0x287   : > { %v12345_v0 = vpop.permute.xlu0 %2577  ;;  %3205 = vrot.lane.b32.xlu0 %v2937_v13, %s9620_s16 }
 0x289   : > { %3207 = vrot.lane.b32.xlu1 %v2938_v10, %s9620_s16  ;;  %v2817_v10 = vmul.f32 %v8819_v8, %v16842_v56  ;;  %v2823_v8 = vmul.f32 %v8831_v2, %v16848_v7  ;;  %v8842_v7 = vld [vmem:[%s16614_s7 + $0x108] sm:$0xff] }
 0x28a   : > { %v12363_v47 = vpop.permute.xlu1 %2583 }
 0x28b   : > { %v12365_v32 = vpop.permute.xlu0 %2581  ;;  %3209 = vrot.lane.b32.xlu0 %v2939_v15, %s9620_s16  ;;  %v2945_v45 = vadd.f32 %v8821_v16, %v2817_v10  ;;  %v8833_v16 = vld [vmem:[%s16615_s29 + $0xd0] sm:$0xff] }
 0x28d   : > { %3211 = vrot.lane.b32.xlu1 %v2940_v58, %s9620_s16  ;;  %v8823_v58 = vld [vmem:[%s16614_s7 + $0xb0] sm:$0xff] }
 0x28e   : > { %v12383_v62 = vpop.permute.xlu1 %2587  ;;  %v2819_v15 = vmul.f32 %v8823_v58, %v16844_v33  ;;  %v8835_v58 = vld [vmem:[%s16614_s7 + $0xe0] sm:$0xff]  ;;  %v16850_v33 = vld [vmem:[#allocation65_spill] sm:$0xff] }
 0x28f   : > { %v12385_v51 = vpop.permute.xlu0 %2585  ;;  %3213 = vrot.lane.b32.xlu0 %v2941_v40, %s9620_s16  ;;  %v8827_v40 = vld [vmem:[%s16614_s7 + $0xc0] sm:$0xff] }
 0x290   : > { %v2947_v46 = vadd.f32 %v8825_v21, %v2819_v15  ;;  %v2821_v35 = vmul.f32 %v8827_v40, %v16846_v43  ;;  %v2825_v15 = vmul.f32 %v8835_v58, %v16850_v33  ;;  %v8836_v21 = vld [vmem:[%s16615_s29 + $0xe8] sm:$0xff]  ;;  %v8845_v33 = vld [vmem:[%s16615_s29 + $0x100] sm:$0xff] }
 0x291   : > { %3215 = vrot.lane.b32.xlu1 %v2942_v12, %s9620_s16  ;;  %v16845_v12 = vld [vmem:[#allocation60_spill] sm:$0xff] }
 0x292   : > { %v12403_v48 = vpop.permute.xlu1 %2591  ;;  %v2822_v37 = vmul.f32 %v8826_v28, %v16845_v12  ;;  %v8837_v28 = vld [vmem:[%s16615_s29 + $0xe0] sm:$0xff]  ;;  %v16851_v40 = vld [vmem:[#allocation68_spill] sm:$0xff] }
 0x293   : > { %v12405_v13 = vpop.permute.xlu0 %2589  ;;  %3217 = vrot.lane.b32.xlu0 %v2943_v63, %s9620_s16  ;;  %v16847_v63 = vld [vmem:[#allocation62_spill] sm:$0xff]  ;;  %v2953_v12 = vadd.f32 %v8837_v28, %v2825_v15 }
 0x294   : > { %v2950_v38 = vadd.f32 %v8828_v24, %v2822_v37  ;;  %v2824_v4 = vmul.f32 %v8830_v60, %v16847_v63  ;;  %v8838_v37 = vld [vmem:[%s16614_s7 + $0xf8] sm:$0xff] }
 0x295   : > { %3219 = vrot.lane.b32.xlu1 %v2944_v6, %s9620_s16  ;;  %v2949_v6 = vadd.f32 %v8829_v1, %v2821_v35  ;;  %v2828_v43 = vmul.f32 %v8838_v37, %v16851_v40  ;;  %v8839_v35 = vld [vmem:[%s16614_s7 + $0xf0] sm:$0xff]  ;;  %v8840_v60 = vld [vmem:[%s16615_s29 + $0xf8] sm:$0xff] }
 0x296   : > { %v12423_v41 = vpop.permute.xlu1 %2595  ;;  %v16852_v24 = vld [vmem:[#allocation69_spill] sm:$0xff]  ;;  %v16856_v37 = vld [vmem:[#allocation74_spill] sm:$0xff] }
 0x297   : > { %v12425_v25 = vpop.permute.xlu0 %2593  ;;  %3221 = vrot.lane.b32.xlu0 %v2945_v45, %s9620_s16  ;;  %v2951_v45 = vadd.f32 %v8833_v16, %v2823_v8  ;;  %v2956_v63 = vadd.f32 %v8840_v60, %v2828_v43  ;;  %v16853_v8 = vld [vmem:[#allocation71_spill] sm:$0xff]  ;;  %v16854_v16 = vld [vmem:[#allocation72_spill] sm:$0xff] }
 0x298   : > { %v8849_v60 = vld [vmem:[%s16615_s29 + $0x110] sm:$0xff] }
 0x299   : > { %3223 = vrot.lane.b32.xlu1 %v2946_v19, %s9620_s16  ;;  %v2952_v19 = vadd.f32 %v8832_v18, %v2824_v4  ;;  %v8841_v4 = vld [vmem:[%s16615_s29 + $0xf0] sm:$0xff]  ;;  %v2830_v18 = vmul.f32 %v8842_v7, %v16853_v8  ;;  %v8851_v8 = vld [vmem:[%s16614_s7 + $0x120] sm:$0xff] }
 0x29a   : > { %v12443_v11 = vpop.permute.xlu1 %2599 }
 0x29b   : > { %v12445_v31 = vpop.permute.xlu0 %2597  ;;  %3225 = vrot.lane.b32.xlu0 %v2947_v46, %s9620_s16  ;;  %v2954_v46 = vadd.f32 %v8836_v21, %v2826_v57  ;;  %v8844_v57 = vld [vmem:[%s16615_s29 + $0x108] sm:$0xff]  ;;  %v8846_v21 = vld [vmem:[%s16614_s7 + $0x118] sm:$0xff] }
 0x29c   : > { %v2958_v58 = vadd.f32 %v8844_v57, %v2830_v18  ;;  %v16858_v18 = vld [vmem:[#allocation76_spill] sm:$0xff] }
 0x29d   : > { %3227 = vrot.lane.b32.xlu1 %v2948_v23, %s9620_s16  ;;  %v8852_v57 = vld [vmem:[%s16615_s29 + $0x128] sm:$0xff] }
 0x29e   : > { %v12463_v56 = vpop.permute.xlu1 %2603 }
 0x29f   : > { %v12465_v10 = vpop.permute.xlu0 %2601  ;;  %3229 = vrot.lane.b32.xlu0 %v2949_v6, %s9620_s16 }
 0x2a1   : > { %3231 = vrot.lane.b32.xlu1 %v2950_v38, %s9620_s16  ;;  %v2827_v38 = vmul.f32 %v8839_v35, %v16852_v24  ;;  %v8848_v24 = vld [vmem:[%s16615_s29 + $0x118] sm:$0xff] }
 0x2a2   : > { %v12483_v39 = vpop.permute.xlu1 %2607 }
 0x2a3   : > { %v12485_v23 = vpop.permute.xlu0 %2605  ;;  %3233 = vrot.lane.b32.xlu0 %v2951_v45, %s9620_s16  ;;  %v2955_v2 = vadd.f32 %v8841_v4, %v2827_v38  ;;  %v8850_v4 = vld [vmem:[%s16614_s7 + $0x128] sm:$0xff] }
 0x2a5   : > { %3235 = vrot.lane.b32.xlu1 %v2952_v19, %s9620_s16  ;;  %v8843_v19 = vld [vmem:[%s16614_s7 + $0x100] sm:$0xff] }
 0x2a6   : > { %v12503_v1 = vpop.permute.xlu1 %2611  ;;  %v2829_v45 = vmul.f32 %v8843_v19, %v16854_v16  ;;  %v2833_v19 = vmul.f32 %v8851_v8, %v16858_v18  ;;  %v16861_v8 = vld [vmem:[#allocation84_spill] sm:$0xff] }
 0x2a7   : > { %v12505_v6 = vpop.permute.xlu0 %2609  ;;  %3237 = vrot.lane.b32.xlu0 %v2953_v12, %s9620_s16  ;;  %v8847_v12 = vld [vmem:[%s16614_s7 + $0x110] sm:$0xff] }
 0x2a8   : > { %v2957_v15 = vadd.f32 %v8845_v33, %v2829_v45  ;;  %v2831_v40 = vmul.f32 %v8847_v12, %v16856_v37  ;;  %v8853_v33 = vld [vmem:[%s16615_s29 + $0x120] sm:$0xff]  ;;  %v8855_v12 = vld [vmem:[%s16614_s7 + $0x130] sm:$0xff] }
 0x2a9   : > { %3239 = vrot.lane.b32.xlu1 %v2954_v46, %s9620_s16  ;;  %v16855_v46 = vld [vmem:[#allocation73_spill] sm:$0xff]  ;;  %v16860_v37 = vld [vmem:[#allocation82_spill] sm:$0xff] }
 0x2aa   : > { %v12523_v22 = vpop.permute.xlu1 %2615  ;;  %v2832_v28 = vmul.f32 %v8846_v21, %v16855_v46  ;;  %v8854_v21 = vld [vmem:[%s16614_s7 + $0x138] sm:$0xff] }
 0x2ab   : > { %v12525_v55 = vpop.permute.xlu0 %2613  ;;  %3241 = vrot.lane.b32.xlu0 %v2955_v2, %s9620_s16  ;;  %v16857_v2 = vld [vmem:[#allocation75_spill] sm:$0xff]  ;;  %v16859_v46 = vld [vmem:[#allocation81_spill] sm:$0xff] }
 0x2ac   : > { %v2960_v38 = vadd.f32 %v8848_v24, %v2832_v28  ;;  %v2834_v7 = vmul.f32 %v8850_v4, %v16857_v2  ;;  %v2836_v28 = vmul.f32 %v8854_v21, %v16859_v46  ;;  %v8857_v4 = vld [vmem:[%s16615_s29 + $0x130] sm:$0xff]  ;;  %v8860_v21 = vld [vmem:[%s16615_s29 + $0x148] sm:$0xff] }
 0x2ad   : > { %3243 = vrot.lane.b32.xlu1 %v2956_v63, %s9620_s16  ;;  %v2959_v63 = vadd.f32 %v8849_v60, %v2831_v40  ;;  %v2835_v40 = vmul.f32 %v8855_v12, %v16860_v37  ;;  %v8856_v60 = vld [vmem:[%s16615_s29 + $0x138] sm:$0xff] }
 0x2ae   : > { %v12543_v43 = vpop.permute.xlu1 %2619  ;;  %v8862_v37 = vld [vmem:[%s16614_s7 + $0x158] sm:$0xff] }
 0x2af   : > { %v12545_v35 = vpop.permute.xlu0 %2617  ;;  %3245 = vrot.lane.b32.xlu0 %v2957_v15, %s9620_s16  ;;  %v2961_v15 = vadd.f32 %v8853_v33, %v2833_v19  ;;  %v2963_v2 = vadd.f32 %v8857_v4, %v2835_v40  ;;  %v8859_v19 = vld [vmem:[%s16614_s7 + $0x140] sm:$0xff]  ;;  %v16863_v40 = vld [vmem:[#allocation93_spill] sm:$0xff] }
 0x2b0   : > { %v16864_v4 = vld [vmem:[#allocation94_spill] sm:$0xff] }
 0x2b1   : > { %3247 = vrot.lane.b32.xlu1 %v2958_v58, %s9620_s16  ;;  %v2962_v58 = vadd.f32 %v8852_v57, %v2834_v7  ;;  %v8858_v7 = vld [vmem:[%s16614_s7 + $0x148] sm:$0xff]  ;;  %v16862_v57 = vld [vmem:[#allocation85_spill] sm:$0xff] }
 0x2b2   : > { %v12563_v16 = vpop.permute.xlu1 %2623  ;;  %v2838_v18 = vmul.f32 %v8858_v7, %v16861_v8 }
 0x2b3   : > { %v12565_v45 = vpop.permute.xlu0 %2621  ;;  %3249 = vrot.lane.b32.xlu0 %v2959_v63, %s9620_s16  ;;  %v2964_v63 = vadd.f32 %v8856_v60, %v2836_v28  ;;  %v8861_v28 = vld [vmem:[%s16615_s29 + $0x140] sm:$0xff]  ;;  %v2840_v60 = vmul.f32 %v8862_v37, %v16863_v40 }
 0x2b4   : > { %v2966_v46 = vadd.f32 %v8860_v21, %v2838_v18  ;;  %v8864_v18 = vld [vmem:[%s16615_s29 + $0x158] sm:$0xff]  ;;  %v8866_v21 = vld [vmem:[%s16614_s7 + $0x168] sm:$0xff] }
 0x2b5   : > { %3251 = vrot.lane.b32.xlu1 %v2960_v38, %s9620_s16 }
 0x2b6   : > { %v12583_v24 = vpop.permute.xlu1 %2627 }
 0x2b7   : > { %v12585_v38 = vpop.permute.xlu0 %2625  ;;  %3253 = vrot.lane.b32.xlu0 %v2961_v15, %s9620_s16 }
 0x2b9   : > { %3255 = vrot.lane.b32.xlu1 %v2962_v58, %s9620_s16  ;;  %v2837_v58 = vmul.f32 %v8859_v19, %v16862_v57  ;;  %v2968_v19 = vadd.f32 %v8864_v18, %v2840_v60  ;;  %v8865_v57 = vld [vmem:[%s16615_s29 + $0x150] sm:$0xff]  ;;  %v8869_v18 = vld [vmem:[%s16615_s29 + $0x160] sm:$0xff] }
 0x2ba   : > { %v12603_v33 = vpop.permute.xlu1 %2631 }
 0x2bb   : > { %v12605_v15 = vpop.permute.xlu0 %2629  ;;  %3257 = vrot.lane.b32.xlu0 %v2963_v2, %s9620_s16  ;;  %v2965_v12 = vadd.f32 %v8861_v28, %v2837_v58  ;;  %v16865_v28 = vld [vmem:[#allocation98_spill] sm:$0xff] }
 0x2bc   : > { %v2842_v37 = vmul.f32 %v8866_v21, %v16865_v28  ;;  %v8870_v21 = vld [vmem:[%s16614_s7 + $0x178] sm:$0xff]  ;;  %v16869_v28 = vld [vmem:[#allocation112_spill] sm:$0xff] }
 0x2bd   : > { %3259 = vrot.lane.b32.xlu1 %v2964_v63, %s9620_s16  ;;  %v8863_v63 = vld [vmem:[%s16614_s7 + $0x150] sm:$0xff] }
 0x2be   : > { %v2839_v2 = vmul.f32 %v8863_v63, %v16864_v4  ;;  %v12623_v7 = vpop.permute.xlu1 %2635  ;;  %v8868_v4 = vld [vmem:[%s16615_s29 + $0x168] sm:$0xff] }
 0x2bf   : > { %v12625_v8 = vpop.permute.xlu0 %2633  ;;  %3261 = vrot.lane.b32.xlu0 %v2965_v12, %s9620_s16  ;;  %v16866_v12 = vld [vmem:[#allocation99_spill] sm:$0xff] }
 0x2c0   : > { %v2967_v58 = vadd.f32 %v8865_v57, %v2839_v2  ;;  %v2970_v2 = vadd.f32 %v8868_v4, %v2842_v37 }
 0x2c1   : > { %3263 = vrot.lane.b32.xlu1 %v2966_v46, %s9620_s16  ;;  %v8867_v46 = vld [vmem:[%s16614_s7 + $0x160] sm:$0xff] }
 0x2c2   : > { %v2841_v40 = vmul.f32 %v8867_v46, %v16866_v12  ;;  %v12643_v63 = vpop.permute.xlu1 %2639  ;;  %v2844_v46 = vmul.f32 %v8870_v21, %v16869_v28  ;;  %v8874_v28 = vld [vmem:[%s16614_s7 + $0x188] sm:$0xff] }
 0x2c3   : > { %16867 = vst [vmem:[#allocation66_spill] sm:$0xff] %v12643_v63  ;;  %v12645_v60 = vpop.permute.xlu0 %2637  ;;  %3265 = vrot.lane.b32.xlu0 %v2967_v58, %s9620_s16  ;;  %v16870_v58 = vld [vmem:[#allocation113_spill] sm:$0xff] }
 0x2c4   : > { %16868 = vst [vmem:[#allocation67_spill] sm:$0xff] %v12645_v60  ;;  %v2969_v57 = vadd.f32 %v8869_v18, %v2841_v40  ;;  %v8872_v40 = vld [vmem:[%s16615_s29 + $0x178] sm:$0xff]  ;;  %v8873_v18 = vld [vmem:[%s16615_s29 + $0x170] sm:$0xff] }
 0x2c5   : > { %3267 = vrot.lane.b32.xlu1 %v2968_v19, %s9620_s16  ;;  %v8871_v19 = vld [vmem:[%s16614_s7 + $0x170] sm:$0xff]  ;;  %v2972_v4 = vadd.f32 %v8872_v40, %v2844_v46 }
 0x2c6   : > { %v2843_v12 = vmul.f32 %v8871_v19, %v16870_v58  ;;  %v12663_v60 = vpop.permute.xlu1 %2643  ;;  %v16873_v19 = vld [vmem:[#allocation117_spill] sm:$0xff] }
 0x2c7   : > { %16871 = vst [vmem:[#allocation70_spill] sm:$0xff] %v12663_v60  ;;  %v12665_v37 = vpop.permute.xlu0 %2641  ;;  %3269 = vrot.lane.b32.xlu0 %v2969_v57, %s9620_s16  ;;  %v2846_v58 = vmul.f32 %v8874_v28, %v16873_v19  ;;  %v16874_v57 = vld [vmem:[#allocation118_spill] sm:$0xff] }
 0x2c8   : > { %16872 = vst [vmem:[#allocation78_spill] sm:$0xff] %v12665_v37  ;;  %v2971_v21 = vadd.f32 %v8873_v18, %v2843_v12  ;;  %v8876_v12 = vld [vmem:[%s16615_s29 + $0x188] sm:$0xff]  ;;  %v8877_v18 = vld [vmem:[%s16615_s29 + $0x180] sm:$0xff]  ;;  %v8878_v19 = vld [vmem:[%s16614_s7 + $0x198] sm:$0xff] }
 0x2c9   : > { %3271 = vrot.lane.b32.xlu1 %v2970_v2, %s9620_s16  ;;  %v8875_v2 = vld [vmem:[%s16614_s7 + $0x180] sm:$0xff]  ;;  %v2974_v40 = vadd.f32 %v8876_v12, %v2846_v58 }
 0x2ca   : > { %v2845_v37 = vmul.f32 %v8875_v2, %v16874_v57  ;;  %v12683_v60 = vpop.permute.xlu1 %2647  ;;  %v16877_v2 = vld [vmem:[#allocation131_spill] sm:$0xff] }
 0x2cb   : > { %16875 = vst [vmem:[#allocation77_spill] sm:$0xff] %v12683_v60  ;;  %v12685_v46 = vpop.permute.xlu0 %2645  ;;  %3273 = vrot.lane.b32.xlu0 %v2971_v21, %s9620_s16  ;;  %v2848_v57 = vmul.f32 %v8878_v19, %v16877_v2  ;;  %v16878_v21 = vld [vmem:[#allocation132_spill] sm:$0xff] }
 0x2cc   : > { %16876 = vst [vmem:[#allocation80_spill] sm:$0xff] %v12685_v46  ;;  %v2973_v28 = vadd.f32 %v8877_v18, %v2845_v37  ;;  %v8880_v37 = vld [vmem:[%s16615_s29 + $0x198] sm:$0xff]  ;;  %v8881_v18 = vld [vmem:[%s16615_s29 + $0x190] sm:$0xff]  ;;  %v8882_v2 = vld [vmem:[%s16614_s7 + $0x1a8] sm:$0xff] }
 0x2cd   : > { %3275 = vrot.lane.b32.xlu1 %v2972_v4, %s9620_s16  ;;  %v8879_v4 = vld [vmem:[%s16614_s7 + $0x190] sm:$0xff]  ;;  %v2976_v12 = vadd.f32 %v8880_v37, %v2848_v57 }
 0x2ce   : > { %v2847_v46 = vmul.f32 %v8879_v4, %v16878_v21  ;;  %v12703_v60 = vpop.permute.xlu1 %2651  ;;  %v16881_v4 = vld [vmem:[#allocation136_spill] sm:$0xff] }
 0x2cf   : > { %16879 = vst [vmem:[#allocation79_spill] sm:$0xff] %v12703_v60  ;;  %v12705_v58 = vpop.permute.xlu0 %2649  ;;  %3277 = vrot.lane.b32.xlu0 %v2973_v28, %s9620_s16  ;;  %v2850_v21 = vmul.f32 %v8882_v2, %v16881_v4  ;;  %v16882_v28 = vld [vmem:[#allocation137_spill] sm:$0xff] }
 0x2d0   : > { %16880 = vst [vmem:[#allocation31_spill] sm:$0xff] %v12705_v58  ;;  %v2975_v19 = vadd.f32 %v8881_v18, %v2847_v46  ;;  %v8884_v46 = vld [vmem:[%s16615_s29 + $0x1a8] sm:$0xff]  ;;  %v8885_v18 = vld [vmem:[%s16615_s29 + $0x1a0] sm:$0xff]  ;;  %v8886_v4 = vld [vmem:[%s16614_s7 + $0x1b8] sm:$0xff] }
 0x2d1   : > { %3279 = vrot.lane.b32.xlu1 %v2974_v40, %s9620_s16  ;;  %v8883_v40 = vld [vmem:[%s16614_s7 + $0x1a0] sm:$0xff]  ;;  %v2978_v37 = vadd.f32 %v8884_v46, %v2850_v21 }
 0x2d2   : > { %v2849_v58 = vmul.f32 %v8883_v40, %v16882_v28  ;;  %v12723_v60 = vpop.permute.xlu1 %2655  ;;  %v16885_v40 = vld [vmem:[#allocation150_spill] sm:$0xff] }
 0x2d3   : > { %16883 = vst [vmem:[#allocation83_spill] sm:$0xff] %v12723_v60  ;;  %v12725_v57 = vpop.permute.xlu0 %2653  ;;  %3281 = vrot.lane.b32.xlu0 %v2975_v19, %s9620_s16  ;;  %v2852_v28 = vmul.f32 %v8886_v4, %v16885_v40  ;;  %v16886_v19 = vld [vmem:[#allocation151_spill] sm:$0xff] }
 0x2d4   : > { %16884 = vst [vmem:[#allocation33_spill] sm:$0xff] %v12725_v57  ;;  %v2977_v2 = vadd.f32 %v8885_v18, %v2849_v58  ;;  %v8888_v58 = vld [vmem:[%s16615_s29 + $0x1b8] sm:$0xff]  ;;  %v8889_v18 = vld [vmem:[%s16615_s29 + $0x1b0] sm:$0xff]  ;;  %v8890_v40 = vld [vmem:[%s16614_s7 + $0x1c8] sm:$0xff] }
 0x2d5   : > { %3283 = vrot.lane.b32.xlu1 %v2976_v12, %s9620_s16  ;;  %v8887_v12 = vld [vmem:[%s16614_s7 + $0x1b0] sm:$0xff]  ;;  %v2980_v46 = vadd.f32 %v8888_v58, %v2852_v28 }
 0x2d6   : > { %v2851_v57 = vmul.f32 %v8887_v12, %v16886_v19  ;;  %v12743_v60 = vpop.permute.xlu1 %2659  ;;  %v16889_v12 = vld [vmem:[#allocation155_spill] sm:$0xff] }
 0x2d7   : > { %16887 = vst [vmem:[#allocation32_spill] sm:$0xff] %v12743_v60  ;;  %v12745_v21 = vpop.permute.xlu0 %2657  ;;  %3285 = vrot.lane.b32.xlu0 %v2977_v2, %s9620_s16  ;;  %v2854_v19 = vmul.f32 %v8890_v40, %v16889_v12  ;;  %v16890_v2 = vld [vmem:[#allocation156_spill] sm:$0xff]  ;;  %v8894_v12 = vld [vmem:[%s16614_s7 + $0x1d8] sm:$0xff] }
 0x2d8   : > { %16888 = vst [vmem:[#allocation86_spill] sm:$0xff] %v12745_v21  ;;  %v2979_v4 = vadd.f32 %v8889_v18, %v2851_v57  ;;  %v8892_v57 = vld [vmem:[%s16615_s29 + $0x1c8] sm:$0xff]  ;;  %v8893_v18 = vld [vmem:[%s16615_s29 + $0x1c0] sm:$0xff] }
 0x2d9   : > { %3287 = vrot.lane.b32.xlu1 %v2978_v37, %s9620_s16  ;;  %v8891_v37 = vld [vmem:[%s16614_s7 + $0x1c0] sm:$0xff]  ;;  %v2982_v58 = vadd.f32 %v8892_v57, %v2854_v19 }
 0x2da   : > { %v2853_v21 = vmul.f32 %v8891_v37, %v16890_v2  ;;  %v16893_v37 = vld [vmem:[#allocation169_spill] sm:$0xff] }
 0x2db   : > { %v12763_v60 = vpop.permute.xlu1 %2663  ;;  %v12765_v28 = vpop.permute.xlu0 %2661  ;;  %3289 = vrot.lane.b32.xlu0 %v2979_v4, %s9620_s16  ;;  %v2856_v2 = vmul.f32 %v8894_v12, %v16893_v37  ;;  %v16894_v4 = vld [vmem:[#allocation170_spill] sm:$0xff]  ;;  %v8898_v37 = vld [vmem:[%s16614_s7 + $0x1e8] sm:$0xff] }
 0x2dc   : > { %16891 = vst [vmem:[#allocation34_spill] sm:$0xff] %v12763_v60  ;;  %16892 = vst [vmem:[#allocation87_spill] sm:$0xff] %v12765_v28  ;;  %v2981_v40 = vadd.f32 %v8893_v18, %v2853_v21  ;;  %v8896_v21 = vld [vmem:[%s16615_s29 + $0x1d8] sm:$0xff]  ;;  %v8897_v18 = vld [vmem:[%s16615_s29 + $0x1d0] sm:$0xff] }
 0x2dd   : > { %3291 = vrot.lane.b32.xlu1 %v2980_v46, %s9620_s16  ;;  %v8895_v46 = vld [vmem:[%s16614_s7 + $0x1d0] sm:$0xff]  ;;  %v2984_v57 = vadd.f32 %v8896_v21, %v2856_v2  ;;  %v8901_v21 = vld [vmem:[%s16615_s29 + $0x1e0] sm:$0xff] }
 0x2de   : > { %v2855_v28 = vmul.f32 %v8895_v46, %v16894_v4  ;;  %v16897_v46 = vld [vmem:[#allocation174_spill] sm:$0xff] }
 0x2df   : > { %v12783_v60 = vpop.permute.xlu1 %2667  ;;  %v12785_v19 = vpop.permute.xlu0 %2665  ;;  %3293 = vrot.lane.b32.xlu0 %v2981_v40, %s9620_s16  ;;  %v2858_v4 = vmul.f32 %v8898_v37, %v16897_v46  ;;  %v16898_v40 = vld [vmem:[#allocation175_spill] sm:$0xff] }
 0x2e0   : > { %16895 = vst [vmem:[#allocation35_spill] sm:$0xff] %v12783_v60  ;;  %16896 = vst [vmem:[#allocation89_spill] sm:$0xff] %v12785_v19  ;;  %v2983_v12 = vadd.f32 %v8897_v18, %v2855_v28  ;;  %v8900_v28 = vld [vmem:[%s16615_s29 + $0x1e8] sm:$0xff] }
 0x2e1   : > { %3295 = vrot.lane.b32.xlu1 %v2982_v58, %s9620_s16  ;;  %v8899_v58 = vld [vmem:[%s16614_s7 + $0x1e0] sm:$0xff]  ;;  %v2986_v2 = vadd.f32 %v8900_v28, %v2858_v4  ;;  %v8905_v4 = vld [vmem:[%s16615_s29 + $0x1f0] sm:$0xff] }
 0x2e2   : > { %v2857_v19 = vmul.f32 %v8899_v58, %v16898_v40  ;;  %v8906_v58 = vld [vmem:[%s16614_s7 + $0x208] sm:$0xff]  ;;  %v8907_v28 = vld [vmem:[%s16614_s7 + $0x200] sm:$0xff] }
 0x2e3   : > { %v3184_v60 = vpop.permute.xlu1 %3183  ;;  %v3182_v63 = vpop.permute.xlu0 %3181  ;;  %3297 = vrot.lane.b32.xlu0 %v2983_v12, %s9620_s16  ;;  %v2862_v40 = vmul.f32 %v8906_v58, %v11916_v44  ;;  %v8908_v44 = vld [vmem:[%s16615_s29 + $0x208] sm:$0xff] }
 0x2e4   : > { %3567 = vst.msk [vmem:[#allocation2 + $0x8] sm:$0xff] %vm3565_vm1, %v3184_v60  ;;  %3566 = vst.msk [vmem:[#allocation2] sm:$0xff] %vm3565_vm1, %v3182_v63  ;;  %v2985_v18 = vadd.f32 %v8901_v21, %v2857_v19  ;;  %v8902_v60 = vld [vmem:[%s16614_s7 + $0x1f8] sm:$0xff]  ;;  %v8914_v58 = vld [vmem:[%s16614_s7 + $0x228] sm:$0xff] }
 0x2e5   : > { %3299 = vrot.lane.b32.xlu1 %v2984_v57, %s9620_s16  ;;  %v2860_v63 = vmul.f32 %v8902_v60, %v11877_v36  ;;  %v8903_v57 = vld [vmem:[%s16614_s7 + $0x1f0] sm:$0xff]  ;;  %v8904_v36 = vld [vmem:[%s16615_s29 + $0x1f8] sm:$0xff]  ;;  %v2990_v60 = vadd.f32 %v8908_v44, %v2862_v40  ;;  %v2866_v40 = vmul.f32 %v8914_v58, %v12202_v30  ;;  %v8916_v30 = vld [vmem:[%s16615_s29 + $0x228] sm:$0xff] }
 0x2e6   : > { %v2859_v12 = vmul.f32 %v8903_v57, %v11879_v20  ;;  %v8910_v57 = vld [vmem:[%s16614_s7 + $0x218] sm:$0xff] }
 0x2e7   : > { %v3188_v37 = vpop.permute.xlu1 %3187  ;;  %v3186_v46 = vpop.permute.xlu0 %3185  ;;  %3301 = vrot.lane.b32.xlu0 %v2985_v18, %s9620_s16  ;;  %v2988_v19 = vadd.f32 %v8904_v36, %v2860_v63  ;;  %v8909_v63 = vld [vmem:[%s16615_s29 + $0x200] sm:$0xff]  ;;  %v2994_v44 = vadd.f32 %v8916_v30, %v2866_v40  ;;  %v8927_v30 = vld [vmem:[%s16614_s7 + $0x250] sm:$0xff] }
 0x2e8   : > { %3569 = vst.msk [vmem:[#allocation2 + $0x18] sm:$0xff] %vm3565_vm1, %v3188_v37  ;;  %3568 = vst.msk [vmem:[#allocation2 + $0x10] sm:$0xff] %vm3565_vm1, %v3186_v46  ;;  %v2987_v20 = vadd.f32 %v8905_v4, %v2859_v12  ;;  %v2864_v12 = vmul.f32 %v8910_v57, %v12186_v42  ;;  %v8911_v37 = vld [vmem:[%s16614_s7 + $0x210] sm:$0xff]  ;;  %v8912_v42 = vld [vmem:[%s16615_s29 + $0x218] sm:$0xff] }
 0x2e9   : > { %3303 = vrot.lane.b32.xlu1 %v2986_v2, %s9620_s16  ;;  %v2861_v2 = vmul.f32 %v8907_v28, %v11918_v54  ;;  %v2863_v46 = vmul.f32 %v8911_v37, %v12188_v34  ;;  %v8915_v28 = vld [vmem:[%s16614_s7 + $0x220] sm:$0xff]  ;;  %v8919_v57 = vld [vmem:[%s16614_s7 + $0x230] sm:$0xff] }
 0x2ea   : > { %v2992_v4 = vadd.f32 %v8912_v42, %v2864_v12  ;;  %v2867_v12 = vmul.f32 %v8919_v57, %v12225_v3  ;;  %v8922_v42 = vld [vmem:[%s16614_s7 + $0x248] sm:$0xff] }
 0x2eb   : > { %v3192_v21 = vpop.permute.xlu1 %3191  ;;  %v3190_v18 = vpop.permute.xlu0 %3189  ;;  %3305 = vrot.lane.b32.xlu0 %v2987_v20, %s9620_s16  ;;  %v2989_v54 = vadd.f32 %v8909_v63, %v2861_v2  ;;  %v8913_v20 = vld [vmem:[%s16615_s29 + $0x210] sm:$0xff]  ;;  %v2865_v2 = vmul.f32 %v8915_v28, %v12204_v9  ;;  %v8918_v63 = vld [vmem:[%s16614_s7 + $0x238] sm:$0xff]  ;;  %v8930_v57 = vld [vmem:[%s16614_s7 + $0x268] sm:$0xff] }
 0x2ec   : > { %3571 = vst.msk [vmem:[#allocation2 + $0x28] sm:$0xff] %vm3565_vm1, %v3192_v21  ;;  %3570 = vst.msk [vmem:[#allocation2 + $0x20] sm:$0xff] %vm3565_vm1, %v3190_v18  ;;  %v2991_v34 = vadd.f32 %v8913_v20, %v2863_v46  ;;  %v8923_v20 = vld [vmem:[%s16614_s7 + $0x240] sm:$0xff] }
 0x2ed   : > { %3307 = vrot.lane.b32.xlu1 %v2988_v19, %s9620_s16 }
 0x2ef   : > { %v3196_v36 = vpop.permute.xlu1 %3195  ;;  %v3194_v19 = vpop.permute.xlu0 %3193  ;;  %3309 = vrot.lane.b32.xlu0 %v2989_v54, %s9620_s16  ;;  %v2868_v54 = vmul.f32 %v8918_v63, %v12223_v52  ;;  %v8920_v52 = vld [vmem:[%s16615_s29 + $0x238] sm:$0xff] }
 0x2f0   : > { %3573 = vst.msk [vmem:[#allocation2 + $0x38] sm:$0xff] %vm3565_vm1, %v3196_v36  ;;  %3572 = vst.msk [vmem:[#allocation2 + $0x30] sm:$0xff] %vm3565_vm1, %v3194_v19  ;;  %v8921_v19 = vld [vmem:[%s16615_s29 + $0x230] sm:$0xff] }
 0x2f1   : > { %3311 = vrot.lane.b32.xlu1 %v2990_v60, %s9620_s16  ;;  %v8917_v60 = vld [vmem:[%s16615_s29 + $0x220] sm:$0xff]  ;;  %v2996_v36 = vadd.f32 %v8920_v52, %v2868_v54  ;;  %v2995_v3 = vadd.f32 %v8921_v19, %v2867_v12  ;;  %v8929_v54 = vld [vmem:[%s16615_s29 + $0x250] sm:$0xff]  ;;  %v2874_v12 = vmul.f32 %v8930_v57, %v12283_v26  ;;  %v8932_v26 = vld [vmem:[%s16615_s29 + $0x268] sm:$0xff] }
 0x2f2   : > { %v2993_v9 = vadd.f32 %v8917_v60, %v2865_v2  ;;  %v8925_v2 = vld [vmem:[%s16615_s29 + $0x240] sm:$0xff] }
 0x2f3   : > { %v3200_v21 = vpop.permute.xlu1 %3199  ;;  %v3198_v18 = vpop.permute.xlu0 %3197  ;;  %3313 = vrot.lane.b32.xlu0 %v2991_v34, %s9620_s16  ;;  %v2869_v34 = vmul.f32 %v8923_v20, %v12245_v17  ;;  %v3002_v19 = vadd.f32 %v8932_v26, %v2874_v12  ;;  %v8935_v20 = vld [vmem:[%s16614_s7 + $0x270] sm:$0xff]  ;;  %v8947_v26 = vld [vmem:[%s16614_s7 + $0x2a0] sm:$0xff] }
 0x2f4   : > { %3575 = vst.msk [vmem:[#allocation2 + $0x48] sm:$0xff] %vm3565_vm1, %v3200_v21  ;;  %3574 = vst.msk [vmem:[#allocation2 + $0x40] sm:$0xff] %vm3565_vm1, %v3198_v18  ;;  %v8926_v21 = vld [vmem:[%s16614_s7 + $0x258] sm:$0xff] }
 0x2f5   : > { %3315 = vrot.lane.b32.xlu1 %v2992_v4, %s9620_s16  ;;  %v2870_v4 = vmul.f32 %v8922_v42, %v12243_v14  ;;  %v8924_v14 = vld [vmem:[%s16615_s29 + $0x248] sm:$0xff]  ;;  %v2997_v17 = vadd.f32 %v8925_v2, %v2869_v34  ;;  %v2872_v18 = vmul.f32 %v8926_v21, %v12263_v27  ;;  %v8928_v27 = vld [vmem:[%s16615_s29 + $0x258] sm:$0xff]  ;;  %v2875_v34 = vmul.f32 %v8935_v20, %v12305_v5  ;;  %v8939_v21 = vld [vmem:[%s16614_s7 + $0x280] sm:$0xff] }
 0x2f6   : > { %v8934_v42 = vld [vmem:[%s16614_s7 + $0x278] sm:$0xff]  ;;  %v8938_v2 = vld [vmem:[%s16614_s7 + $0x288] sm:$0xff] }
 0x2f7   : > { %v3204_v37 = vpop.permute.xlu1 %3203  ;;  %v3202_v46 = vpop.permute.xlu0 %3201  ;;  %3317 = vrot.lane.b32.xlu0 %v2993_v9, %s9620_s16  ;;  %v2998_v28 = vadd.f32 %v8924_v14, %v2870_v4  ;;  %v3000_v63 = vadd.f32 %v8928_v27, %v2872_v18  ;;  %v2876_v4 = vmul.f32 %v8934_v42, %v12303_v29  ;;  %v8936_v29 = vld [vmem:[%s16615_s29 + $0x278] sm:$0xff]  ;;  %v2877_v18 = vmul.f32 %v8939_v21, %v12325_v53  ;;  %v8955_v21 = vld [vmem:[%s16614_s7 + $0x2c0] sm:$0xff] }
 0x2f8   : > { %3577 = vst.msk [vmem:[#allocation2 + $0x58] sm:$0xff] %vm3565_vm1, %v3204_v37  ;;  %3576 = vst.msk [vmem:[#allocation2 + $0x50] sm:$0xff] %vm3565_vm1, %v3202_v46  ;;  %v8931_v37 = vld [vmem:[%s16614_s7 + $0x260] sm:$0xff]  ;;  %v8942_v27 = vld [vmem:[%s16614_s7 + $0x298] sm:$0xff] }
 0x2f9   : > { %3319 = vrot.lane.b32.xlu1 %v2994_v44, %s9620_s16  ;;  %v2871_v44 = vmul.f32 %v8927_v30, %v12265_v50  ;;  %v2873_v46 = vmul.f32 %v8931_v37, %v12285_v49  ;;  %v3004_v14 = vadd.f32 %v8936_v29, %v2876_v4  ;;  %v8949_v4 = vld [vmem:[%s16615_s29 + $0x2a0] sm:$0xff]  ;;  %v8950_v20 = vld [vmem:[%s16614_s7 + $0x2b8] sm:$0xff] }
 0x2fb   : > { %v3208_v58 = vpop.permute.xlu1 %3207  ;;  %v3206_v40 = vpop.permute.xlu0 %3205  ;;  %3321 = vrot.lane.b32.xlu0 %v2995_v3, %s9620_s16  ;;  %v2999_v50 = vadd.f32 %v8929_v54, %v2871_v44  ;;  %v8933_v3 = vld [vmem:[%s16615_s29 + $0x260] sm:$0xff]  ;;  %v8943_v54 = vld [vmem:[%s16614_s7 + $0x290] sm:$0xff] }
 0x2fc   : > { %3579 = vst.msk [vmem:[#allocation2 + $0x68] sm:$0xff] %vm3565_vm1, %v3208_v58  ;;  %3578 = vst.msk [vmem:[#allocation2 + $0x60] sm:$0xff] %vm3565_vm1, %v3206_v40  ;;  %v3001_v49 = vadd.f32 %v8933_v3, %v2873_v46  ;;  %v8945_v46 = vld [vmem:[%s16615_s29 + $0x290] sm:$0xff] }
 0x2fd   : > { %3323 = vrot.lane.b32.xlu1 %v2996_v36, %s9620_s16 }
 0x2ff   : > { %v3212_v60 = vpop.permute.xlu1 %3211  ;;  %v3210_v9 = vpop.permute.xlu0 %3209  ;;  %3325 = vrot.lane.b32.xlu0 %v2997_v17, %s9620_s16  ;;  %v2878_v17 = vmul.f32 %v8938_v2, %v12323_v61  ;;  %v8940_v61 = vld [vmem:[%s16615_s29 + $0x288] sm:$0xff] }
 0x300   : > { %3581 = vst.msk [vmem:[#allocation2 + $0x78] sm:$0xff] %vm3565_vm1, %v3212_v60  ;;  %3580 = vst.msk [vmem:[#allocation2 + $0x70] sm:$0xff] %vm3565_vm1, %v3210_v9  ;;  %v8941_v9 = vld [vmem:[%s16615_s29 + $0x280] sm:$0xff]  ;;  %v8954_v2 = vld [vmem:[%s16614_s7 + $0x2c8] sm:$0xff] }
 0x301   : > { %3327 = vrot.lane.b32.xlu1 %v2998_v28, %s9620_s16  ;;  %v8937_v28 = vld [vmem:[%s16615_s29 + $0x270] sm:$0xff]  ;;  %v3006_v60 = vadd.f32 %v8940_v61, %v2878_v17  ;;  %v3005_v53 = vadd.f32 %v8941_v9, %v2877_v18  ;;  %v2886_v17 = vmul.f32 %v8954_v2, %v12403_v48  ;;  %v2885_v18 = vmul.f32 %v8955_v21, %v12405_v13  ;;  %v8956_v48 = vld [vmem:[%s16615_s29 + $0x2c8] sm:$0xff]  ;;  %v8958_v9 = vld [vmem:[%s16614_s7 + $0x2d8] sm:$0xff] }
 0x302   : > { %v3003_v5 = vadd.f32 %v8937_v28, %v2875_v34  ;;  %v2884_v34 = vmul.f32 %v8950_v20, %v12383_v62  ;;  %v8952_v62 = vld [vmem:[%s16615_s29 + $0x2b8] sm:$0xff]  ;;  %v8975_v21 = vld [vmem:[%s16614_s7 + $0x310] sm:$0xff] }
 0x303   : > { %v3216_v52 = vpop.permute.xlu1 %3215  ;;  %v3214_v36 = vpop.permute.xlu0 %3213  ;;  %3329 = vrot.lane.b32.xlu0 %v2999_v50, %s9620_s16  ;;  %v2879_v50 = vmul.f32 %v8943_v54, %v12345_v0  ;;  %v3014_v61 = vadd.f32 %v8956_v48, %v2886_v17  ;;  %v8974_v2 = vld [vmem:[%s16614_s7 + $0x318] sm:$0xff] }
 0x304   : > { %3583 = vst.msk [vmem:[#allocation2 + $0x88] sm:$0xff] %vm3565_vm1, %v3216_v52  ;;  %3582 = vst.msk [vmem:[#allocation2 + $0x80] sm:$0xff] %vm3565_vm1, %v3214_v36  ;;  %v8946_v52 = vld [vmem:[%s16614_s7 + $0x2a8] sm:$0xff]  ;;  %v3012_v28 = vadd.f32 %v8952_v62, %v2884_v34  ;;  %v8969_v34 = vld [vmem:[%s16615_s29 + $0x2f0] sm:$0xff]  ;;  %v2896_v17 = vmul.f32 %v8974_v2, %v12503_v1 }
 0x305   : > { %3331 = vrot.lane.b32.xlu1 %v3000_v63, %s9620_s16  ;;  %v2880_v63 = vmul.f32 %v8942_v27, %v12343_v59  ;;  %v8944_v59 = vld [vmem:[%s16615_s29 + $0x298] sm:$0xff]  ;;  %v3007_v0 = vadd.f32 %v8945_v46, %v2879_v50  ;;  %v2882_v36 = vmul.f32 %v8946_v52, %v12363_v47  ;;  %v8948_v47 = vld [vmem:[%s16615_s29 + $0x2a8] sm:$0xff]  ;;  %v8959_v27 = vld [vmem:[%s16614_s7 + $0x2d0] sm:$0xff] }
 0x306   : > { %v8963_v46 = vld [vmem:[%s16614_s7 + $0x2e0] sm:$0xff]  ;;  %v8976_v1 = vld [vmem:[%s16615_s29 + $0x318] sm:$0xff]  ;;  %v8999_v2 = vld [vmem:[%s16614_s7 + $0x370] sm:$0xff] }
 0x307   : > { %v3220_v58 = vpop.permute.xlu1 %3219  ;;  %v3218_v40 = vpop.permute.xlu0 %3217  ;;  %3333 = vrot.lane.b32.xlu0 %v3001_v49, %s9620_s16  ;;  %v3008_v37 = vadd.f32 %v8944_v59, %v2880_v63  ;;  %v3010_v42 = vadd.f32 %v8948_v47, %v2882_v36  ;;  %v2887_v63 = vmul.f32 %v8959_v27, %v12425_v25  ;;  %v8962_v59 = vld [vmem:[%s16614_s7 + $0x2e8] sm:$0xff]  ;;  %v8967_v47 = vld [vmem:[%s16614_s7 + $0x2f0] sm:$0xff]  ;;  %v3024_v48 = vadd.f32 %v8976_v1, %v2896_v17 }
 0x308   : > { %3585 = vst.msk [vmem:[#allocation2 + $0x98] sm:$0xff] %vm3565_vm1, %v3220_v58  ;;  %3584 = vst.msk [vmem:[#allocation2 + $0x90] sm:$0xff] %vm3565_vm1, %v3218_v40  ;;  %v8951_v58 = vld [vmem:[%s16614_s7 + $0x2b0] sm:$0xff]  ;;  %v2907_v17 = vmul.f32 %v8999_v2, %v12625_v8  ;;  %v9002_v1 = vld [vmem:[%s16614_s7 + $0x388] sm:$0xff] }
 0x309   : > { %3335 = vrot.lane.b32.xlu1 %v3002_v19, %s9620_s16  ;;  %v2881_v19 = vmul.f32 %v8947_v26, %v12365_v32  ;;  %v2883_v40 = vmul.f32 %v8951_v58, %v12385_v51  ;;  %v8970_v58 = vld [vmem:[%s16614_s7 + $0x308] sm:$0xff] }
 0x30a   : > { %v9020_v2 = vld [vmem:[%s16615_s29 + $0x3c8] sm:$0xff] }
 0x30b   : > { %v3224_v30 = vpop.permute.xlu1 %3223  ;;  %v3222_v44 = vpop.permute.xlu0 %3221  ;;  %3337 = vrot.lane.b32.xlu0 %v3003_v5, %s9620_s16  ;;  %v3009_v32 = vadd.f32 %v8949_v4, %v2881_v19  ;;  %v8953_v5 = vld [vmem:[%s16615_s29 + $0x2b0] sm:$0xff]  ;;  %v8965_v19 = vld [vmem:[%s16615_s29 + $0x2e0] sm:$0xff] }
 0x30c   : > { %3587 = vst.msk [vmem:[#allocation2 + $0xa8] sm:$0xff] %vm3565_vm1, %v3224_v30  ;;  %3586 = vst.msk [vmem:[#allocation2 + $0xa0] sm:$0xff] %vm3565_vm1, %v3222_v44  ;;  %v3011_v51 = vadd.f32 %v8953_v5, %v2883_v40  ;;  %v2894_v40 = vmul.f32 %v8970_v58, %v12483_v39  ;;  %v8972_v39 = vld [vmem:[%s16615_s29 + $0x308] sm:$0xff] }
 0x30d   : > { %3339 = vrot.lane.b32.xlu1 %v3004_v14, %s9620_s16  ;;  %v8994_v58 = vld [vmem:[%s16614_s7 + $0x368] sm:$0xff] }
 0x30e   : > { %v3022_v5 = vadd.f32 %v8972_v39, %v2894_v40  ;;  %v2906_v40 = vmul.f32 %v8994_v58, %v12603_v33  ;;  %v8996_v33 = vld [vmem:[%s16615_s29 + $0x368] sm:$0xff]  ;;  %v9016_v58 = vld [vmem:[%s16615_s29 + $0x3b8] sm:$0xff] }
 0x30f   : > { %v3228_v57 = vpop.permute.xlu1 %3227  ;;  %v3226_v12 = vpop.permute.xlu0 %3225  ;;  %3341 = vrot.lane.b32.xlu0 %v3005_v53, %s9620_s16  ;;  %v2888_v53 = vmul.f32 %v8958_v9, %v12423_v41  ;;  %v8960_v41 = vld [vmem:[%s16615_s29 + $0x2d8] sm:$0xff]  ;;  %v8979_v9 = vld [vmem:[%s16614_s7 + $0x320] sm:$0xff] }
 0x310   : > { %3589 = vst.msk [vmem:[#allocation2 + $0xb8] sm:$0xff] %vm3565_vm1, %v3228_v57  ;;  %3588 = vst.msk [vmem:[#allocation2 + $0xb0] sm:$0xff] %vm3565_vm1, %v3226_v12  ;;  %v8961_v12 = vld [vmem:[%s16615_s29 + $0x2d0] sm:$0xff]  ;;  %v3034_v39 = vadd.f32 %v8996_v33, %v2906_v40 }
 0x311   : > { %3343 = vrot.lane.b32.xlu1 %v3006_v60, %s9620_s16  ;;  %v8957_v60 = vld [vmem:[%s16615_s29 + $0x2c0] sm:$0xff]  ;;  %v3016_v57 = vadd.f32 %v8960_v41, %v2888_v53  ;;  %v3015_v25 = vadd.f32 %v8961_v12, %v2887_v63  ;;  %v2897_v53 = vmul.f32 %v8979_v9, %v12525_v55  ;;  %v8982_v41 = vld [vmem:[%s16614_s7 + $0x338] sm:$0xff]  ;;  %v8983_v12 = vld [vmem:[%s16614_s7 + $0x330] sm:$0xff] }
 0x312   : > { %v3013_v13 = vadd.f32 %v8957_v60, %v2885_v18  ;;  %v2895_v18 = vmul.f32 %v8975_v21, %v12505_v6  ;;  %v8978_v60 = vld [vmem:[%s16614_s7 + $0x328] sm:$0xff] }
 0x313   : > { %v3232_v3 = vpop.permute.xlu1 %3231  ;;  %v3230_v49 = vpop.permute.xlu0 %3229  ;;  %3345 = vrot.lane.b32.xlu0 %v3007_v0, %s9620_s16  ;;  %v2889_v0 = vmul.f32 %v8963_v46, %v12445_v31 }
 0x314   : > { %3591 = vst.msk [vmem:[#allocation2 + $0xc8] sm:$0xff] %vm3565_vm1, %v3232_v3  ;;  %3590 = vst.msk [vmem:[#allocation2 + $0xc0] sm:$0xff] %vm3565_vm1, %v3230_v49  ;;  %v8966_v3 = vld [vmem:[%s16614_s7 + $0x2f8] sm:$0xff] }
 0x315   : > { %3347 = vrot.lane.b32.xlu1 %v3008_v37, %s9620_s16  ;;  %v2890_v37 = vmul.f32 %v8962_v59, %v12443_v11  ;;  %v8964_v11 = vld [vmem:[%s16615_s29 + $0x2e8] sm:$0xff]  ;;  %v3017_v31 = vadd.f32 %v8965_v19, %v2889_v0  ;;  %v2892_v49 = vmul.f32 %v8966_v3, %v12463_v56  ;;  %v8968_v56 = vld [vmem:[%s16615_s29 + $0x2f8] sm:$0xff]  ;;  %v8985_v0 = vld [vmem:[%s16615_s29 + $0x330] sm:$0xff] }
 0x317   : > { %v3236_v29 = vpop.permute.xlu1 %3235  ;;  %v3234_v14 = vpop.permute.xlu0 %3233  ;;  %3349 = vrot.lane.b32.xlu0 %v3009_v32, %s9620_s16  ;;  %v3018_v26 = vadd.f32 %v8964_v11, %v2890_v37  ;;  %v3020_v20 = vadd.f32 %v8968_v56, %v2892_v49  ;;  %v8987_v11 = vld [vmem:[%s16614_s7 + $0x340] sm:$0xff] }
 0x318   : > { %3593 = vst.msk [vmem:[#allocation2 + $0xd8] sm:$0xff] %vm3565_vm1, %v3236_v29  ;;  %3592 = vst.msk [vmem:[#allocation2 + $0xd0] sm:$0xff] %vm3565_vm1, %v3234_v14  ;;  %v8971_v29 = vld [vmem:[%s16614_s7 + $0x300] sm:$0xff] }
 0x319   : > { %3351 = vrot.lane.b32.xlu1 %v3010_v42, %s9620_s16  ;;  %v2891_v42 = vmul.f32 %v8967_v47, %v12465_v10  ;;  %v2893_v14 = vmul.f32 %v8971_v29, %v12485_v23  ;;  %v8989_v49 = vld [vmem:[%s16615_s29 + $0x340] sm:$0xff]  ;;  %v8990_v47 = vld [vmem:[%s16614_s7 + $0x358] sm:$0xff] }
 0x31a   : > { %v8995_v29 = vld [vmem:[%s16614_s7 + $0x360] sm:$0xff] }
 0x31b   : > { %v3240_v30 = vpop.permute.xlu1 %3239  ;;  %v3238_v44 = vpop.permute.xlu0 %3237  ;;  %3353 = vrot.lane.b32.xlu0 %v3011_v51, %s9620_s16  ;;  %v3019_v10 = vadd.f32 %v8969_v34, %v2891_v42  ;;  %v8973_v51 = vld [vmem:[%s16615_s29 + $0x300] sm:$0xff]  ;;  %v2904_v42 = vmul.f32 %v8990_v47, %v12583_v24  ;;  %v8992_v24 = vld [vmem:[%s16615_s29 + $0x358] sm:$0xff] }
 0x31c   : > { %3595 = vst.msk [vmem:[#allocation2 + $0xe8] sm:$0xff] %vm3565_vm1, %v3240_v30  ;;  %3594 = vst.msk [vmem:[#allocation2 + $0xe0] sm:$0xff] %vm3565_vm1, %v3238_v44  ;;  %v3021_v23 = vadd.f32 %v8973_v51, %v2893_v14  ;;  %v2905_v14 = vmul.f32 %v8995_v29, %v12605_v15  ;;  %v8998_v51 = vld [vmem:[%s16614_s7 + $0x378] sm:$0xff]  ;;  %v9013_v47 = vld [vmem:[%s16615_s29 + $0x3a0] sm:$0xff] }
 0x31d   : > { %3355 = vrot.lane.b32.xlu1 %v3012_v28, %s9620_s16  ;;  %v3032_v34 = vadd.f32 %v8992_v24, %v2904_v42  ;;  %v16906_v24 = vld [vmem:[#allocation31_spill] sm:$0xff]  ;;  %v9017_v29 = vld [vmem:[%s16615_s29 + $0x3b0] sm:$0xff] }
 0x31f   : > { %v3244_v54 = vpop.permute.xlu1 %3243  ;;  %v3242_v50 = vpop.permute.xlu0 %3241  ;;  %3357 = vrot.lane.b32.xlu0 %v3013_v13, %s9620_s16  ;;  %v2898_v13 = vmul.f32 %v8978_v60, %v12523_v22  ;;  %v8980_v22 = vld [vmem:[%s16615_s29 + $0x328] sm:$0xff] }
 0x320   : > { %3597 = vst.msk [vmem:[#allocation2 + $0xf8] sm:$0xff] %vm3565_vm1, %v3244_v54  ;;  %3596 = vst.msk [vmem:[#allocation2 + $0xf0] sm:$0xff] %vm3565_vm1, %v3242_v50  ;;  %v8981_v50 = vld [vmem:[%s16615_s29 + $0x320] sm:$0xff] }
 0x321   : > { %3359 = vrot.lane.b32.xlu1 %v3014_v61, %s9620_s16  ;;  %v8977_v61 = vld [vmem:[%s16615_s29 + $0x310] sm:$0xff]  ;;  %v3026_v54 = vadd.f32 %v8980_v22, %v2898_v13  ;;  %v3025_v55 = vadd.f32 %v8981_v50, %v2897_v53  ;;  %v16900_v60 = vld [vmem:[#allocation67_spill] sm:$0xff]  ;;  %v9006_v50 = vld [vmem:[%s16614_s7 + $0x398] sm:$0xff] }
 0x322   : > { %v3023_v6 = vadd.f32 %v8977_v61, %v2895_v18  ;;  %v9005_v22 = vld [vmem:[%s16615_s29 + $0x380] sm:$0xff] }
 0x323   : > { %v3248_v52 = vpop.permute.xlu1 %3247  ;;  %v3246_v36 = vpop.permute.xlu0 %3245  ;;  %3361 = vrot.lane.b32.xlu0 %v3015_v25, %s9620_s16  ;;  %v2899_v25 = vmul.f32 %v8983_v12, %v12545_v35  ;;  %v16902_v12 = vld [vmem:[#allocation78_spill] sm:$0xff] }
 0x324   : > { %3599 = vst.msk [vmem:[#allocation2 + $0x108] sm:$0xff] %vm3565_vm1, %v3248_v52  ;;  %3598 = vst.msk [vmem:[#allocation2 + $0x100] sm:$0xff] %vm3565_vm1, %v3246_v36  ;;  %v8986_v52 = vld [vmem:[%s16614_s7 + $0x348] sm:$0xff] }
 0x325   : > { %3363 = vrot.lane.b32.xlu1 %v3016_v57, %s9620_s16  ;;  %v2900_v57 = vmul.f32 %v8982_v41, %v12543_v43  ;;  %v8984_v43 = vld [vmem:[%s16615_s29 + $0x338] sm:$0xff]  ;;  %v3027_v35 = vadd.f32 %v8985_v0, %v2899_v25  ;;  %v2902_v36 = vmul.f32 %v8986_v52, %v12563_v16  ;;  %v8988_v16 = vld [vmem:[%s16615_s29 + $0x348] sm:$0xff]  ;;  %v9009_v0 = vld [vmem:[%s16615_s29 + $0x390] sm:$0xff] }
 0x326   : > { %v9010_v52 = vld [vmem:[%s16614_s7 + $0x3a8] sm:$0xff] }
 0x327   : > { %v3252_v4 = vpop.permute.xlu1 %3251  ;;  %v3250_v32 = vpop.permute.xlu0 %3249  ;;  %3365 = vrot.lane.b32.xlu0 %v3017_v31, %s9620_s16  ;;  %v3028_v46 = vadd.f32 %v8984_v43, %v2900_v57  ;;  %v3030_v3 = vadd.f32 %v8988_v16, %v2902_v36  ;;  %v9007_v57 = vld [vmem:[%s16614_s7 + $0x390] sm:$0xff]  ;;  %v9008_v43 = vld [vmem:[%s16615_s29 + $0x398] sm:$0xff] }
 0x328   : > { %3601 = vst.msk [vmem:[#allocation2 + $0x118] sm:$0xff] %vm3565_vm1, %v3252_v4  ;;  %3600 = vst.msk [vmem:[#allocation2 + $0x110] sm:$0xff] %vm3565_vm1, %v3250_v32  ;;  %v8991_v4 = vld [vmem:[%s16614_s7 + $0x350] sm:$0xff]  ;;  %v2911_v25 = vmul.f32 %v9007_v57, %v16902_v12  ;;  %v9028_v12 = vld [vmem:[%s16615_s29 + $0x3e8] sm:$0xff] }
 0x329   : > { %3367 = vrot.lane.b32.xlu1 %v3018_v26, %s9620_s16  ;;  %v2901_v26 = vmul.f32 %v8987_v11, %v12565_v45  ;;  %v2903_v32 = vmul.f32 %v8991_v4, %v12585_v38  ;;  %v16903_v36 = vld [vmem:[#allocation77_spill] sm:$0xff] }
 0x32a   : > { %v2914_v11 = vmul.f32 %v9010_v52, %v16903_v36  ;;  %v9014_v4 = vld [vmem:[%s16614_s7 + $0x3b8] sm:$0xff] }
 0x32b   : > { %v3256_v62 = vpop.permute.xlu1 %3255  ;;  %v3254_v28 = vpop.permute.xlu0 %3253  ;;  %3369 = vrot.lane.b32.xlu0 %v3019_v10, %s9620_s16  ;;  %v3029_v45 = vadd.f32 %v8989_v49, %v2901_v26  ;;  %v8993_v10 = vld [vmem:[%s16615_s29 + $0x350] sm:$0xff]  ;;  %v9011_v26 = vld [vmem:[%s16614_s7 + $0x3a0] sm:$0xff]  ;;  %v9012_v49 = vld [vmem:[%s16615_s29 + $0x3a8] sm:$0xff] }
 0x32c   : > { %3603 = vst.msk [vmem:[#allocation2 + $0x128] sm:$0xff] %vm3565_vm1, %v3256_v62  ;;  %3602 = vst.msk [vmem:[#allocation2 + $0x120] sm:$0xff] %vm3565_vm1, %v3254_v28  ;;  %v3031_v38 = vadd.f32 %v8993_v10, %v2903_v32  ;;  %v16905_v32 = vld [vmem:[#allocation79_spill] sm:$0xff]  ;;  %v16914_v52 = vld [vmem:[#allocation89_spill] sm:$0xff] }
 0x32d   : > { %3371 = vrot.lane.b32.xlu1 %v3020_v20, %s9620_s16 }
 0x32f   : > { %v3260_v30 = vpop.permute.xlu1 %3259  ;;  %v3258_v44 = vpop.permute.xlu0 %3257  ;;  %3373 = vrot.lane.b32.xlu0 %v3021_v23, %s9620_s16  ;;  %v2908_v23 = vmul.f32 %v8998_v51, %v12623_v7  ;;  %v9000_v7 = vld [vmem:[%s16615_s29 + $0x378] sm:$0xff] }
 0x330   : > { %3605 = vst.msk [vmem:[#allocation2 + $0x138] sm:$0xff] %vm3565_vm1, %v3260_v30  ;;  %3604 = vst.msk [vmem:[#allocation2 + $0x130] sm:$0xff] %vm3565_vm1, %v3258_v44  ;;  %v9001_v44 = vld [vmem:[%s16615_s29 + $0x370] sm:$0xff] }
 0x331   : > { %3375 = vrot.lane.b32.xlu1 %v3022_v5, %s9620_s16  ;;  %v8997_v5 = vld [vmem:[%s16615_s29 + $0x360] sm:$0xff]  ;;  %v3036_v30 = vadd.f32 %v9000_v7, %v2908_v23  ;;  %v3035_v8 = vadd.f32 %v9001_v44, %v2907_v17  ;;  %v9022_v7 = vld [vmem:[%s16614_s7 + $0x3d8] sm:$0xff] }
 0x332   : > { %v3033_v15 = vadd.f32 %v8997_v5, %v2905_v14  ;;  %v16908_v5 = vld [vmem:[#allocation33_spill] sm:$0xff] }
 0x333   : > { %v3264_v27 = vpop.permute.xlu1 %3263  ;;  %v3262_v63 = vpop.permute.xlu0 %3261  ;;  %3377 = vrot.lane.b32.xlu0 %v3023_v6, %s9620_s16  ;;  %v9003_v6 = vld [vmem:[%s16614_s7 + $0x380] sm:$0xff] }
 0x334   : > { %3607 = vst.msk [vmem:[#allocation2 + $0x148] sm:$0xff] %vm3565_vm1, %v3264_v27  ;;  %3606 = vst.msk [vmem:[#allocation2 + $0x140] sm:$0xff] %vm3565_vm1, %v3262_v63  ;;  %v2909_v13 = vmul.f32 %v9003_v6, %v16900_v60  ;;  %v9004_v27 = vld [vmem:[%s16615_s29 + $0x388] sm:$0xff]  ;;  %v9024_v60 = vld [vmem:[%s16615_s29 + $0x3d8] sm:$0xff] }
 0x335   : > { %3379 = vrot.lane.b32.xlu1 %v3024_v48, %s9620_s16  ;;  %v16899_v48 = vld [vmem:[#allocation66_spill] sm:$0xff] }
 0x336   : > { %v2910_v61 = vmul.f32 %v9002_v1, %v16899_v48  ;;  %v16910_v1 = vld [vmem:[#allocation86_spill] sm:$0xff] }
 0x337   : > { %v3268_v59 = vpop.permute.xlu1 %3267  ;;  %v3266_v37 = vpop.permute.xlu0 %3265  ;;  %3381 = vrot.lane.b32.xlu0 %v3025_v55, %s9620_s16  ;;  %v16901_v55 = vld [vmem:[#allocation70_spill] sm:$0xff] }
 0x338   : > { %3609 = vst.msk [vmem:[#allocation2 + $0x158] sm:$0xff] %vm3565_vm1, %v3268_v59  ;;  %3608 = vst.msk [vmem:[#allocation2 + $0x150] sm:$0xff] %vm3565_vm1, %v3266_v37  ;;  %v3038_v63 = vadd.f32 %v9004_v27, %v2910_v61  ;;  %v2912_v41 = vmul.f32 %v9006_v50, %v16901_v55  ;;  %v9026_v27 = vld [vmem:[%s16614_s7 + $0x3e8] sm:$0xff] }
 0x339   : > { %3383 = vrot.lane.b32.xlu1 %v3026_v54, %s9620_s16  ;;  %v3037_v54 = vadd.f32 %v9005_v22, %v2909_v13  ;;  %v16912_v50 = vld [vmem:[#allocation87_spill] sm:$0xff] }
 0x33b   : > { %v3272_v19 = vpop.permute.xlu1 %3271  ;;  %v3270_v31 = vpop.permute.xlu0 %3269  ;;  %3385 = vrot.lane.b32.xlu0 %v3027_v35, %s9620_s16  ;;  %v3039_v35 = vadd.f32 %v9009_v0, %v2911_v25 }
 0x33c   : > { %3611 = vst.msk [vmem:[#allocation2 + $0x168] sm:$0xff] %vm3565_vm1, %v3272_v19  ;;  %3610 = vst.msk [vmem:[#allocation2 + $0x160] sm:$0xff] %vm3565_vm1, %v3270_v31  ;;  %v16904_v19 = vld [vmem:[#allocation80_spill] sm:$0xff] }
 0x33d   : > { %3387 = vrot.lane.b32.xlu1 %v3028_v46, %s9620_s16  ;;  %v3040_v46 = vadd.f32 %v9008_v43, %v2912_v41  ;;  %v2913_v31 = vmul.f32 %v9011_v26, %v16904_v19  ;;  %v9030_v43 = vld [vmem:[%s16614_s7 + $0x3f8] sm:$0xff] }
 0x33e   : > { %v9032_v19 = vld [vmem:[%s16615_s29 + $0x3f8] sm:$0xff] }
 0x33f   : > { %v3276_v56 = vpop.permute.xlu1 %3275  ;;  %v3274_v20 = vpop.permute.xlu0 %3273  ;;  %3389 = vrot.lane.b32.xlu0 %v3029_v45, %s9620_s16  ;;  %v3042_v45 = vadd.f32 %v9012_v49, %v2914_v11  ;;  %v3041_v42 = vadd.f32 %v9013_v47, %v2913_v31  ;;  %v3695_v47 = vld [vmem:[%s10228_s27 + $0x8] sm:$0xff] }
 0x340   : > { %3613 = vst.msk [vmem:[#allocation2 + $0x178] sm:$0xff] %vm3565_vm1, %v3276_v56  ;;  %3612 = vst.msk [vmem:[#allocation2 + $0x170] sm:$0xff] %vm3565_vm1, %v3274_v20  ;;  %v2916_v56 = vmul.f32 %v9014_v4, %v16905_v32  ;;  %v9015_v20 = vld [vmem:[%s16614_s7 + $0x3b0] sm:$0xff] }
 0x341   : > { %3391 = vrot.lane.b32.xlu1 %v3030_v3, %s9620_s16 }
 0x342   : > { %v3044_v40 = vadd.f32 %v9016_v58, %v2916_v56  ;;  %v3697_v56 = vld [vmem:[%s10228_s27 + $0x18] sm:$0xff] }
 0x343   : > { %v3280_v62 = vpop.permute.xlu1 %3279  ;;  %v3278_v28 = vpop.permute.xlu0 %3277  ;;  %3393 = vrot.lane.b32.xlu0 %v3031_v38, %s9620_s16 }
 0x344   : > { %3615 = vst.msk [vmem:[#allocation2 + $0x188] sm:$0xff] %vm3565_vm1, %v3280_v62  ;;  %3614 = vst.msk [vmem:[#allocation2 + $0x180] sm:$0xff] %vm3565_vm1, %v3278_v28  ;;  %v9018_v62 = vld [vmem:[%s16614_s7 + $0x3c8] sm:$0xff] }
 0x345   : > { %3395 = vrot.lane.b32.xlu1 %v3032_v34, %s9620_s16  ;;  %v2915_v34 = vmul.f32 %v9015_v20, %v16906_v24  ;;  %v16907_v28 = vld [vmem:[#allocation83_spill] sm:$0xff]  ;;  %v3696_v20 = vld [vmem:[%s10228_s27 + $0x10] sm:$0xff] }
 0x346   : > { %v2918_v33 = vmul.f32 %v9018_v62, %v16907_v28 }
 0x347   : > { %v3284_v21 = vpop.permute.xlu1 %3283  ;;  %v3282_v18 = vpop.permute.xlu0 %3281  ;;  %3397 = vrot.lane.b32.xlu0 %v3033_v15, %s9620_s16  ;;  %v3043_v14 = vadd.f32 %v9017_v29, %v2915_v34  ;;  %v13430_v29 = vld [vmem:[%s10228_s27 + $0x38] sm:$0xff] }
 0x348   : > { %3617 = vst.msk [vmem:[#allocation2 + $0x198] sm:$0xff] %vm3565_vm1, %v3284_v21  ;;  %3616 = vst.msk [vmem:[#allocation2 + $0x190] sm:$0xff] %vm3565_vm1, %v3282_v18  ;;  %v3046_v17 = vadd.f32 %v9020_v2, %v2918_v33  ;;  %v9021_v21 = vld [vmem:[%s16615_s29 + $0x3c0] sm:$0xff]  ;;  %v13439_v33 = vld [vmem:[%s10228_s27 + $0x48] sm:$0xff] }
 0x349   : > { %3399 = vrot.lane.b32.xlu1 %v3034_v39, %s9620_s16  ;;  %v9019_v39 = vld [vmem:[%s16614_s7 + $0x3c0] sm:$0xff] }
 0x34a   : > { %v2917_v15 = vmul.f32 %v9019_v39, %v16908_v5  ;;  %v13442_v39 = vld [vmem:[%s10228_s27 + $0x40] sm:$0xff] }
 0x34b   : > { %v3288_v9 = vpop.permute.xlu1 %3287  ;;  %v3286_v53 = vpop.permute.xlu0 %3285  ;;  %3401 = vrot.lane.b32.xlu0 %v3035_v8, %s9620_s16  ;;  %v9023_v8 = vld [vmem:[%s16614_s7 + $0x3d0] sm:$0xff] }
 0x34c   : > { %3619 = vst.msk [vmem:[#allocation2 + $0x1a8] sm:$0xff] %vm3565_vm1, %v3288_v9  ;;  %3618 = vst.msk [vmem:[#allocation2 + $0x1a0] sm:$0xff] %vm3565_vm1, %v3286_v53  ;;  %v3045_v18 = vadd.f32 %v9021_v21, %v2917_v15  ;;  %v2919_v48 = vmul.f32 %v9023_v8, %v16910_v1  ;;  %v9025_v9 = vld [vmem:[%s16615_s29 + $0x3d0] sm:$0xff] }
 0x34d   : > { %3403 = vrot.lane.b32.xlu1 %v3036_v30, %s9620_s16  ;;  %v16909_v30 = vld [vmem:[#allocation32_spill] sm:$0xff]  ;;  %v13478_v8 = vld [vmem:[%s10228_s27 + $0x70] sm:$0xff] }
 0x34e   : > { %v2920_v44 = vmul.f32 %v9022_v7, %v16909_v30  ;;  %v3047_v53 = vadd.f32 %v9025_v9, %v2919_v48  ;;  %v13463_v21 = vld [vmem:[%s10228_s27 + $0x68] sm:$0xff]  ;;  %v3713_v9 = vld [vmem:[%s10228_s27 + $0x98] sm:$0xff] }
 0x34f   : > { %v3292_v59 = vpop.permute.xlu1 %3291  ;;  %v3290_v37 = vpop.permute.xlu0 %3289  ;;  %3405 = vrot.lane.b32.xlu0 %v3037_v54, %s9620_s16  ;;  %v9027_v54 = vld [vmem:[%s16614_s7 + $0x3e0] sm:$0xff] }
 0x350   : > { %3621 = vst.msk [vmem:[#allocation2 + $0x1b8] sm:$0xff] %vm3565_vm1, %v3292_v59  ;;  %3620 = vst.msk [vmem:[#allocation2 + $0x1b0] sm:$0xff] %vm3565_vm1, %v3290_v37  ;;  %v3048_v13 = vadd.f32 %v9024_v60, %v2920_v44  ;;  %v2921_v55 = vmul.f32 %v9027_v54, %v16912_v50  ;;  %v9029_v59 = vld [vmem:[%s16615_s29 + $0x3e0] sm:$0xff] }
 0x351   : > { %3407 = vrot.lane.b32.xlu1 %v3038_v63, %s9620_s16  ;;  %v16911_v63 = vld [vmem:[#allocation34_spill] sm:$0xff]  ;;  %v13502_v54 = vld [vmem:[%s10228_s27 + $0xa0] sm:$0xff] }
 0x352   : > { %v2922_v22 = vmul.f32 %v9026_v27, %v16911_v63  ;;  %v3049_v37 = vadd.f32 %v9029_v59, %v2921_v55  ;;  %v13475_v44 = vld [vmem:[%s10228_s27 + $0x78] sm:$0xff]  ;;  %v13523_v59 = vld [vmem:[%s10228_s27 + $0xc8] sm:$0xff] }
 0x353   : > { %v3296_v16 = vpop.permute.xlu1 %3295  ;;  %v3294_v3 = vpop.permute.xlu0 %3293  ;;  %3409 = vrot.lane.b32.xlu0 %v3039_v35, %s9620_s16  ;;  %v9031_v35 = vld [vmem:[%s16614_s7 + $0x3f0] sm:$0xff] }
 0x354   : > { %3623 = vst.msk [vmem:[#allocation2 + $0x1c8] sm:$0xff] %vm3565_vm1, %v3296_v16  ;;  %3622 = vst.msk [vmem:[#allocation2 + $0x1c0] sm:$0xff] %vm3565_vm1, %v3294_v3  ;;  %v3050_v25 = vadd.f32 %v9028_v12, %v2922_v22  ;;  %v2923_v36 = vmul.f32 %v9031_v35, %v16914_v52  ;;  %v9033_v16 = vld [vmem:[%s16615_s29 + $0x3f0] sm:$0xff] }
 0x355   : > { %3411 = vrot.lane.b32.xlu1 %v3040_v46, %s9620_s16  ;;  %v16913_v46 = vld [vmem:[#allocation35_spill] sm:$0xff]  ;;  %v13499_v22 = vld [vmem:[%s10228_s27 + $0xa8] sm:$0xff]  ;;  %v13538_v35 = vld [vmem:[%s10228_s27 + $0xd0] sm:$0xff] }
 0x356   : > { %v2924_v0 = vmul.f32 %v9030_v43, %v16913_v46  ;;  %v3051_v3 = vadd.f32 %v9033_v16, %v2923_v36  ;;  %v13559_v16 = vld [vmem:[%s10228_s27 + $0xf8] sm:$0xff] }
 0x357   : > { %v3300_v10 = vpop.permute.xlu1 %3299  ;;  %v3298_v38 = vpop.permute.xlu0 %3297  ;;  %3413 = vrot.lane.b32.xlu0 %v3041_v42, %s9620_s16  ;;  %v3694_v42 = vld [vmem:[%s10228_s27] sm:$0xff] }
 0x358   : > { %3625 = vst.msk [vmem:[#allocation2 + $0x1d8] sm:$0xff] %vm3565_vm1, %v3300_v10  ;;  %3624 = vst.msk [vmem:[#allocation2 + $0x1d0] sm:$0xff] %vm3565_vm1, %v3298_v38  ;;  %v3052_v31 = vadd.f32 %v9032_v19, %v2924_v0  ;;  %v3699_v10 = vld [vmem:[%s10228_s27 + $0x28] sm:$0xff]  ;;  %v3698_v38 = vld [vmem:[%s10228_s27 + $0x20] sm:$0xff] }
 0x359   : > { %3415 = vrot.lane.b32.xlu1 %v3042_v45, %s9620_s16  ;;  %v13535_v0 = vld [vmem:[%s10228_s27 + $0xd8] sm:$0xff] }
 0x35b   : > { %v3304_v51 = vpop.permute.xlu1 %3303  ;;  %v3302_v23 = vpop.permute.xlu0 %3301  ;;  %3417 = vrot.lane.b32.xlu0 %v3043_v14, %s9620_s16  ;;  %v3700_v14 = vld [vmem:[%s10228_s27 + $0x30] sm:$0xff] }
 0x35c   : > { %3627 = vst.msk [vmem:[#allocation2 + $0x1e8] sm:$0xff] %vm3565_vm1, %v3304_v51  ;;  %3626 = vst.msk [vmem:[#allocation2 + $0x1e0] sm:$0xff] %vm3565_vm1, %v3302_v23  ;;  %v13451_v51 = vld [vmem:[%s10228_s27 + $0x58] sm:$0xff]  ;;  %v13454_v23 = vld [vmem:[%s10228_s27 + $0x50] sm:$0xff] }
 0x35d   : > { %3419 = vrot.lane.b32.xlu1 %v3044_v40, %s9620_s16 }
 0x35f   : > { %v3308_v61 = vpop.permute.xlu1 %3307  ;;  %v3306_v6 = vpop.permute.xlu0 %3305  ;;  %3421 = vrot.lane.b32.xlu0 %v3045_v18, %s9620_s16  ;;  %v13466_v18 = vld [vmem:[%s10228_s27 + $0x60] sm:$0xff] }
 0x360   : > { %3629 = vst.msk [vmem:[#allocation2 + $0x1f8] sm:$0xff] %vm3565_vm1, %v3308_v61  ;;  %3628 = vst.msk [vmem:[#allocation2 + $0x1f0] sm:$0xff] %vm3565_vm1, %v3306_v6  ;;  %v3711_v61 = vld [vmem:[%s10228_s27 + $0x88] sm:$0xff]  ;;  %v3710_v6 = vld [vmem:[%s10228_s27 + $0x80] sm:$0xff] }
 0x361   : > { %3423 = vrot.lane.b32.xlu1 %v3046_v17, %s9620_s16 }
 0x363   : > { %v3312_v41 = vpop.permute.xlu1 %3311  ;;  %v3310_v57 = vpop.permute.xlu0 %3309  ;;  %3425 = vrot.lane.b32.xlu0 %v3047_v53, %s9620_s16  ;;  %v3712_v53 = vld [vmem:[%s10228_s27 + $0x90] sm:$0xff] }
 0x364   : > { %3631 = vst.msk [vmem:[#allocation2 + $0x208] sm:$0xff] %vm3565_vm1, %v3312_v41  ;;  %3630 = vst.msk [vmem:[#allocation2 + $0x200] sm:$0xff] %vm3565_vm1, %v3310_v57  ;;  %v13511_v41 = vld [vmem:[%s10228_s27 + $0xb8] sm:$0xff]  ;;  %v13514_v57 = vld [vmem:[%s10228_s27 + $0xb0] sm:$0xff] }
 0x365   : > { %3427 = vrot.lane.b32.xlu1 %v3048_v13, %s9620_s16 }
 0x367   : > { %v3316_v11 = vpop.permute.xlu1 %3315  ;;  %v3314_v26 = vpop.permute.xlu0 %3313  ;;  %3429 = vrot.lane.b32.xlu0 %v3049_v37, %s9620_s16  ;;  %v13526_v37 = vld [vmem:[%s10228_s27 + $0xc0] sm:$0xff] }
 0x368   : > { %3633 = vst.msk [vmem:[#allocation2 + $0x218] sm:$0xff] %vm3565_vm1, %v3316_v11  ;;  %3632 = vst.msk [vmem:[#allocation2 + $0x210] sm:$0xff] %vm3565_vm1, %v3314_v26  ;;  %v13547_v11 = vld [vmem:[%s10228_s27 + $0xe8] sm:$0xff]  ;;  %v13550_v26 = vld [vmem:[%s10228_s27 + $0xe0] sm:$0xff] }
 0x369   : > { %3431 = vrot.lane.b32.xlu1 %v3050_v25, %s9620_s16 }
 0x36b   : > { %v3320_v49 = vpop.permute.xlu1 %3319  ;;  %v3318_v45 = vpop.permute.xlu0 %3317  ;;  %3433 = vrot.lane.b32.xlu0 %v3051_v3, %s9620_s16  ;;  %v13562_v3 = vld [vmem:[%s10228_s27 + $0xf0] sm:$0xff] }
 0x36c   : > { %3635 = vst.msk [vmem:[#allocation2 + $0x228] sm:$0xff] %vm3565_vm1, %v3320_v49  ;;  %3634 = vst.msk [vmem:[#allocation2 + $0x220] sm:$0xff] %vm3565_vm1, %v3318_v45 }
 0x36d   : > { %3435 = vrot.lane.b32.xlu1 %v3052_v31, %s9620_s16 }
 0x36f   : > { %v3324_v4 = vpop.permute.xlu1 %3323  ;;  %v3322_v32 = vpop.permute.xlu0 %3321  ;;  %3950 = vrot.lane.b32.xlu0 %v3694_v42, %s9621_s17  ;;  %v3726_v42 = vld [vmem:[%s10228_s27 + $0x100] sm:$0xff] }
 0x370   : > { %3637 = vst.msk [vmem:[#allocation2 + $0x238] sm:$0xff] %vm3565_vm1, %v3324_v4  ;;  %3636 = vst.msk [vmem:[#allocation2 + $0x230] sm:$0xff] %vm3565_vm1, %v3322_v32 }
 0x371   : > { %3952 = vrot.lane.b32.xlu1 %v3695_v47, %s9621_s17  ;;  %v3727_v47 = vld [vmem:[%s10228_s27 + $0x108] sm:$0xff] }
 0x373   : > { %v3328_v24 = vpop.permute.xlu1 %3327  ;;  %v3326_v34 = vpop.permute.xlu0 %3325  ;;  %3954 = vrot.lane.b32.xlu0 %v3696_v20, %s9621_s17  ;;  %v3728_v20 = vld [vmem:[%s10228_s27 + $0x110] sm:$0xff] }
 0x374   : > { %3639 = vst.msk [vmem:[#allocation2 + $0x248] sm:$0xff] %vm3565_vm1, %v3328_v24  ;;  %3638 = vst.msk [vmem:[#allocation2 + $0x240] sm:$0xff] %vm3565_vm1, %v3326_v34 }
 0x375   : > { %3956 = vrot.lane.b32.xlu1 %v3697_v56, %s9621_s17  ;;  %v13577_v56 = vld [vmem:[%s10228_s27 + $0x118] sm:$0xff] }
 0x377   : > { %v3332_v58 = vpop.permute.xlu1 %3331  ;;  %v3330_v40 = vpop.permute.xlu0 %3329  ;;  %3958 = vrot.lane.b32.xlu0 %v3698_v38, %s9621_s17  ;;  %v13589_v38 = vld [vmem:[%s10228_s27 + $0x120] sm:$0xff] }
 0x378   : > { %3641 = vst.msk [vmem:[#allocation2 + $0x258] sm:$0xff] %vm3565_vm1, %v3332_v58  ;;  %3640 = vst.msk [vmem:[#allocation2 + $0x250] sm:$0xff] %vm3565_vm1, %v3330_v40 }
 0x379   : > { %3960 = vrot.lane.b32.xlu1 %v3699_v10, %s9621_s17  ;;  %v13586_v10 = vld [vmem:[%s10228_s27 + $0x128] sm:$0xff] }
 0x37b   : > { %v3336_v62 = vpop.permute.xlu1 %3335  ;;  %v3334_v28 = vpop.permute.xlu0 %3333  ;;  %3962 = vrot.lane.b32.xlu0 %v3700_v14, %s9621_s17  ;;  %v13598_v14 = vld [vmem:[%s10228_s27 + $0x138] sm:$0xff] }
 0x37c   : > { %3643 = vst.msk [vmem:[#allocation2 + $0x268] sm:$0xff] %vm3565_vm1, %v3336_v62  ;;  %3642 = vst.msk [vmem:[#allocation2 + $0x260] sm:$0xff] %vm3565_vm1, %v3334_v28  ;;  %v13601_v62 = vld [vmem:[%s10228_s27 + $0x130] sm:$0xff] }
 0x37d   : > { %3964 = vrot.lane.b32.xlu1 %v13430_v29, %s9621_s17 }
 0x37f   : > { %v3340_v5 = vpop.permute.xlu1 %3339  ;;  %v3338_v15 = vpop.permute.xlu0 %3337  ;;  %3966 = vrot.lane.b32.xlu0 %v13442_v39, %s9621_s17 }
 0x380   : > { %3645 = vst.msk [vmem:[#allocation2 + $0x278] sm:$0xff] %vm3565_vm1, %v3340_v5  ;;  %3644 = vst.msk [vmem:[#allocation2 + $0x270] sm:$0xff] %vm3565_vm1, %v3338_v15  ;;  %v13610_v15 = vld [vmem:[%s10228_s27 + $0x148] sm:$0xff] }
 0x381   : > { %3968 = vrot.lane.b32.xlu1 %v13439_v33, %s9621_s17 }
 0x383   : > { %v3344_v2 = vpop.permute.xlu1 %3343  ;;  %v3342_v17 = vpop.permute.xlu0 %3341  ;;  %3970 = vrot.lane.b32.xlu0 %v13454_v23, %s9621_s17 }
 0x384   : > { %3647 = vst.msk [vmem:[#allocation2 + $0x288] sm:$0xff] %vm3565_vm1, %v3344_v2  ;;  %3646 = vst.msk [vmem:[#allocation2 + $0x280] sm:$0xff] %vm3565_vm1, %v3342_v17  ;;  %v13613_v2 = vld [vmem:[%s10228_s27 + $0x140] sm:$0xff] }
 0x385   : > { %3972 = vrot.lane.b32.xlu1 %v13451_v51, %s9621_s17 }
 0x387   : > { %v3348_v7 = vpop.permute.xlu1 %3347  ;;  %v3346_v30 = vpop.permute.xlu0 %3345  ;;  %3974 = vrot.lane.b32.xlu0 %v13466_v18, %s9621_s17 }
 0x388   : > { %3649 = vst.msk [vmem:[#allocation2 + $0x298] sm:$0xff] %vm3565_vm1, %v3348_v7  ;;  %3648 = vst.msk [vmem:[#allocation2 + $0x290] sm:$0xff] %vm3565_vm1, %v3346_v30  ;;  %v13622_v30 = vld [vmem:[%s10228_s27 + $0x158] sm:$0xff] }
 0x389   : > { %3976 = vrot.lane.b32.xlu1 %v13463_v21, %s9621_s17 }
 0x38b   : > { %v3352_v1 = vpop.permute.xlu1 %3351  ;;  %v3350_v48 = vpop.permute.xlu0 %3349  ;;  %3978 = vrot.lane.b32.xlu0 %v13478_v8, %s9621_s17 }
 0x38c   : > { %3651 = vst.msk [vmem:[#allocation2 + $0x2a8] sm:$0xff] %vm3565_vm1, %v3352_v1  ;;  %3650 = vst.msk [vmem:[#allocation2 + $0x2a0] sm:$0xff] %vm3565_vm1, %v3350_v48  ;;  %v13625_v1 = vld [vmem:[%s10228_s27 + $0x150] sm:$0xff] }
 0x38d   : > { %3980 = vrot.lane.b32.xlu1 %v13475_v44, %s9621_s17 }
 0x38f   : > { %v3356_v60 = vpop.permute.xlu1 %3355  ;;  %v3354_v13 = vpop.permute.xlu0 %3353  ;;  %3982 = vrot.lane.b32.xlu0 %v3710_v6, %s9621_s17  ;;  %v13634_v6 = vld [vmem:[%s10228_s27 + $0x168] sm:$0xff] }
 0x390   : > { %3653 = vst.msk [vmem:[#allocation2 + $0x2b8] sm:$0xff] %vm3565_vm1, %v3356_v60  ;;  %3652 = vst.msk [vmem:[#allocation2 + $0x2b0] sm:$0xff] %vm3565_vm1, %v3354_v13  ;;  %v13637_v60 = vld [vmem:[%s10228_s27 + $0x160] sm:$0xff] }
 0x391   : > { %3984 = vrot.lane.b32.xlu1 %v3711_v61, %s9621_s17 }
 0x393   : > { %v3360_v27 = vpop.permute.xlu1 %3359  ;;  %v3358_v63 = vpop.permute.xlu0 %3357  ;;  %3986 = vrot.lane.b32.xlu0 %v3712_v53, %s9621_s17  ;;  %v13646_v53 = vld [vmem:[%s10228_s27 + $0x178] sm:$0xff] }
 0x394   : > { %3655 = vst.msk [vmem:[#allocation2 + $0x2c8] sm:$0xff] %vm3565_vm1, %v3360_v27  ;;  %3654 = vst.msk [vmem:[#allocation2 + $0x2c0] sm:$0xff] %vm3565_vm1, %v3358_v63  ;;  %v13649_v27 = vld [vmem:[%s10228_s27 + $0x170] sm:$0xff] }
 0x395   : > { %3988 = vrot.lane.b32.xlu1 %v3713_v9, %s9621_s17 }
 0x397   : > { %v3364_v50 = vpop.permute.xlu1 %3363  ;;  %v3362_v55 = vpop.permute.xlu0 %3361  ;;  %3990 = vrot.lane.b32.xlu0 %v13502_v54, %s9621_s17 }
 0x398   : > { %3657 = vst.msk [vmem:[#allocation2 + $0x2d8] sm:$0xff] %vm3565_vm1, %v3364_v50  ;;  %3656 = vst.msk [vmem:[#allocation2 + $0x2d0] sm:$0xff] %vm3565_vm1, %v3362_v55  ;;  %v13658_v55 = vld [vmem:[%s10228_s27 + $0x188] sm:$0xff] }
 0x399   : > { %3992 = vrot.lane.b32.xlu1 %v13499_v22, %s9621_s17 }
 0x39b   : > { %v3368_v12 = vpop.permute.xlu1 %3367  ;;  %v3366_v25 = vpop.permute.xlu0 %3365  ;;  %3994 = vrot.lane.b32.xlu0 %v13514_v57, %s9621_s17 }
 0x39c   : > { %3659 = vst.msk [vmem:[#allocation2 + $0x2e8] sm:$0xff] %vm3565_vm1, %v3368_v12  ;;  %3658 = vst.msk [vmem:[#allocation2 + $0x2e0] sm:$0xff] %vm3565_vm1, %v3366_v25  ;;  %v13661_v12 = vld [vmem:[%s10228_s27 + $0x180] sm:$0xff] }
 0x39d   : > { %3996 = vrot.lane.b32.xlu1 %v13511_v41, %s9621_s17 }
 0x39f   : > { %v3372_v43 = vpop.permute.xlu1 %3371  ;;  %v3370_v46 = vpop.permute.xlu0 %3369  ;;  %3998 = vrot.lane.b32.xlu0 %v13526_v37, %s9621_s17 }
 0x3a0   : > { %3661 = vst.msk [vmem:[#allocation2 + $0x2f8] sm:$0xff] %vm3565_vm1, %v3372_v43  ;;  %3660 = vst.msk [vmem:[#allocation2 + $0x2f0] sm:$0xff] %vm3565_vm1, %v3370_v46  ;;  %v13670_v46 = vld [vmem:[%s10228_s27 + $0x198] sm:$0xff] }
 0x3a1   : > { %4000 = vrot.lane.b32.xlu1 %v13523_v59, %s9621_s17 }
 0x3a3   : > { %v3376_v52 = vpop.permute.xlu1 %3375  ;;  %v3374_v36 = vpop.permute.xlu0 %3373  ;;  %4002 = vrot.lane.b32.xlu0 %v13538_v35, %s9621_s17 }
 0x3a4   : > { %3663 = vst.msk [vmem:[#allocation2 + $0x308] sm:$0xff] %vm3565_vm1, %v3376_v52  ;;  %3662 = vst.msk [vmem:[#allocation2 + $0x300] sm:$0xff] %vm3565_vm1, %v3374_v36  ;;  %v13673_v52 = vld [vmem:[%s10228_s27 + $0x190] sm:$0xff] }
 0x3a5   : > { %4004 = vrot.lane.b32.xlu1 %v13535_v0, %s9621_s17 }
 0x3a7   : > { %v3380_v19 = vpop.permute.xlu1 %3379  ;;  %v3378_v31 = vpop.permute.xlu0 %3377  ;;  %4006 = vrot.lane.b32.xlu0 %v13550_v26, %s9621_s17 }
 0x3a8   : > { %3665 = vst.msk [vmem:[#allocation2 + $0x318] sm:$0xff] %vm3565_vm1, %v3380_v19  ;;  %3664 = vst.msk [vmem:[#allocation2 + $0x310] sm:$0xff] %vm3565_vm1, %v3378_v31  ;;  %v13682_v31 = vld [vmem:[%s10228_s27 + $0x1a8] sm:$0xff] }
 0x3a9   : > { %4008 = vrot.lane.b32.xlu1 %v13547_v11, %s9621_s17 }
 0x3ab   : > { %v3384_v49 = vpop.permute.xlu1 %3383  ;;  %v3382_v45 = vpop.permute.xlu0 %3381  ;;  %4010 = vrot.lane.b32.xlu0 %v13562_v3, %s9621_s17 }
 0x3ac   : > { %3667 = vst.msk [vmem:[#allocation2 + $0x328] sm:$0xff] %vm3565_vm1, %v3384_v49  ;;  %3666 = vst.msk [vmem:[#allocation2 + $0x320] sm:$0xff] %vm3565_vm1, %v3382_v45  ;;  %v13685_v49 = vld [vmem:[%s10228_s27 + $0x1a0] sm:$0xff] }
 0x3ad   : > { %4012 = vrot.lane.b32.xlu1 %v13559_v16, %s9621_s17 }
 0x3af   : > { %v3388_v4 = vpop.permute.xlu1 %3387  ;;  %v3386_v32 = vpop.permute.xlu0 %3385  ;;  %4014 = vrot.lane.b32.xlu0 %v3726_v42, %s9621_s17  ;;  %v13694_v42 = vld [vmem:[%s10228_s27 + $0x1b8] sm:$0xff] }
 0x3b0   : > { %3669 = vst.msk [vmem:[#allocation2 + $0x338] sm:$0xff] %vm3565_vm1, %v3388_v4  ;;  %3668 = vst.msk [vmem:[#allocation2 + $0x330] sm:$0xff] %vm3565_vm1, %v3386_v32  ;;  %v13697_v4 = vld [vmem:[%s10228_s27 + $0x1b0] sm:$0xff] }
 0x3b1   : > { %4016 = vrot.lane.b32.xlu1 %v3727_v47, %s9621_s17 }
 0x3b3   : > { %v3392_v24 = vpop.permute.xlu1 %3391  ;;  %v3390_v34 = vpop.permute.xlu0 %3389  ;;  %4018 = vrot.lane.b32.xlu0 %v3728_v20, %s9621_s17 }
 0x3b4   : > { %3671 = vst.msk [vmem:[#allocation2 + $0x348] sm:$0xff] %vm3565_vm1, %v3392_v24  ;;  %3670 = vst.msk [vmem:[#allocation2 + $0x340] sm:$0xff] %vm3565_vm1, %v3390_v34  ;;  %v13706_v24 = vld [vmem:[%s10228_s27 + $0x1c8] sm:$0xff]  ;;  %v13709_v34 = vld [vmem:[%s10228_s27 + $0x1c0] sm:$0xff] }
 0x3b5   : > { %4020 = vrot.lane.b32.xlu1 %v13577_v56, %s9621_s17 }
 0x3b7   : > { %v3396_v58 = vpop.permute.xlu1 %3395  ;;  %v3394_v40 = vpop.permute.xlu0 %3393  ;;  %4022 = vrot.lane.b32.xlu0 %v13589_v38, %s9621_s17 }
 0x3b8   : > { %3673 = vst.msk [vmem:[#allocation2 + $0x358] sm:$0xff] %vm3565_vm1, %v3396_v58  ;;  %3672 = vst.msk [vmem:[#allocation2 + $0x350] sm:$0xff] %vm3565_vm1, %v3394_v40 }
 0x3b9   : > { %4024 = vrot.lane.b32.xlu1 %v13586_v10, %s9621_s17 }
 0x3bb   : > { %v3400_v28 = vpop.permute.xlu1 %3399  ;;  %v3398_v5 = vpop.permute.xlu0 %3397  ;;  %4026 = vrot.lane.b32.xlu0 %v13601_v62, %s9621_s17 }
 0x3bc   : > { %3675 = vst.msk [vmem:[#allocation2 + $0x368] sm:$0xff] %vm3565_vm1, %v3400_v28  ;;  %3674 = vst.msk [vmem:[#allocation2 + $0x360] sm:$0xff] %vm3565_vm1, %v3398_v5  ;;  %v13718_v28 = vld [vmem:[%s10228_s27 + $0x1d8] sm:$0xff]  ;;  %v13721_v5 = vld [vmem:[%s10228_s27 + $0x1d0] sm:$0xff] }
 0x3bd   : > { %4028 = vrot.lane.b32.xlu1 %v13598_v14, %s9621_s17 }
 0x3bf   : > { %v3404_v17 = vpop.permute.xlu1 %3403  ;;  %v3402_v7 = vpop.permute.xlu0 %3401  ;;  %4030 = vrot.lane.b32.xlu0 %v13613_v2, %s9621_s17 }
 0x3c0   : > { %3677 = vst.msk [vmem:[#allocation2 + $0x378] sm:$0xff] %vm3565_vm1, %v3404_v17  ;;  %3676 = vst.msk [vmem:[#allocation2 + $0x370] sm:$0xff] %vm3565_vm1, %v3402_v7 }
 0x3c1   : > { %4032 = vrot.lane.b32.xlu1 %v13610_v15, %s9621_s17 }
 0x3c3   : > { %v3408_v48 = vpop.permute.xlu1 %3407  ;;  %v3406_v61 = vpop.permute.xlu0 %3405  ;;  %4034 = vrot.lane.b32.xlu0 %v13625_v1, %s9621_s17 }
 0x3c4   : > { %3679 = vst.msk [vmem:[#allocation2 + $0x388] sm:$0xff] %vm3565_vm1, %v3408_v48  ;;  %3678 = vst.msk [vmem:[#allocation2 + $0x380] sm:$0xff] %vm3565_vm1, %v3406_v61  ;;  %v13732_v48 = vld [vmem:[%s10228_s27 + $0x1e8] sm:$0xff]  ;;  %v13735_v61 = vld [vmem:[%s10228_s27 + $0x1e0] sm:$0xff] }
 0x3c5   : > { %4036 = vrot.lane.b32.xlu1 %v13622_v30, %s9621_s17 }
 0x3c7   : > { %v3412_v13 = vpop.permute.xlu1 %3411  ;;  %v3410_v9 = vpop.permute.xlu0 %3409  ;;  %4038 = vrot.lane.b32.xlu0 %v13637_v60, %s9621_s17 }
 0x3c8   : > { %3681 = vst.msk [vmem:[#allocation2 + $0x398] sm:$0xff] %vm3565_vm1, %v3412_v13  ;;  %3680 = vst.msk [vmem:[#allocation2 + $0x390] sm:$0xff] %vm3565_vm1, %v3410_v9 }
 0x3c9   : > { %4040 = vrot.lane.b32.xlu1 %v13634_v6, %s9621_s17 }
 0x3cb   : > { %v3416_v63 = vpop.permute.xlu1 %3415  ;;  %v3414_v50 = vpop.permute.xlu0 %3413  ;;  %4042 = vrot.lane.b32.xlu0 %v13649_v27, %s9621_s17 }
 0x3cc   : > { %3683 = vst.msk [vmem:[#allocation2 + $0x3a8] sm:$0xff] %vm3565_vm1, %v3416_v63  ;;  %3682 = vst.msk [vmem:[#allocation2 + $0x3a0] sm:$0xff] %vm3565_vm1, %v3414_v50  ;;  %v13746_v63 = vld [vmem:[%s10228_s27 + $0x1f8] sm:$0xff]  ;;  %v13749_v50 = vld [vmem:[%s10228_s27 + $0x1f0] sm:$0xff] }
 0x3cd   : > { %4044 = vrot.lane.b32.xlu1 %v13646_v53, %s9621_s17 }
 0x3cf   : > { %v3420_v25 = vpop.permute.xlu1 %3419  ;;  %v3418_v43 = vpop.permute.xlu0 %3417  ;;  %4046 = vrot.lane.b32.xlu0 %v13661_v12, %s9621_s17 }
 0x3d0   : > { %3685 = vst.msk [vmem:[#allocation2 + $0x3b8] sm:$0xff] %vm3565_vm1, %v3420_v25  ;;  %3684 = vst.msk [vmem:[#allocation2 + $0x3b0] sm:$0xff] %vm3565_vm1, %v3418_v43 }
 0x3d1   : > { %4048 = vrot.lane.b32.xlu1 %v13658_v55, %s9621_s17 }
 0x3d3   : > { %v3424_v36 = vpop.permute.xlu1 %3423  ;;  %v3422_v19 = vpop.permute.xlu0 %3421  ;;  %4050 = vrot.lane.b32.xlu0 %v13673_v52, %s9621_s17 }
 0x3d4   : > { %3687 = vst.msk [vmem:[#allocation2 + $0x3c8] sm:$0xff] %vm3565_vm1, %v3424_v36  ;;  %3686 = vst.msk [vmem:[#allocation2 + $0x3c0] sm:$0xff] %vm3565_vm1, %v3422_v19  ;;  %v3759_v36 = vld [vmem:[%s10228_s27 + $0x208] sm:$0xff]  ;;  %v3758_v19 = vld [vmem:[%s10228_s27 + $0x200] sm:$0xff] }
 0x3d5   : > { %4052 = vrot.lane.b32.xlu1 %v13670_v46, %s9621_s17 }
 0x3d7   : > { %v3428_v45 = vpop.permute.xlu1 %3427  ;;  %v3426_v47 = vpop.permute.xlu0 %3425  ;;  %4054 = vrot.lane.b32.xlu0 %v13685_v49, %s9621_s17 }
 0x3d8   : > { %3689 = vst.msk [vmem:[#allocation2 + $0x3d8] sm:$0xff] %vm3565_vm1, %v3428_v45  ;;  %3688 = vst.msk [vmem:[#allocation2 + $0x3d0] sm:$0xff] %vm3565_vm1, %v3426_v47 }
 0x3d9   : > { %4056 = vrot.lane.b32.xlu1 %v13682_v31, %s9621_s17 }
 0x3db   : > { %v3432_v32 = vpop.permute.xlu1 %3431  ;;  %v3430_v20 = vpop.permute.xlu0 %3429  ;;  %4058 = vrot.lane.b32.xlu0 %v13697_v4, %s9621_s17 }
 0x3dc   : > { %3691 = vst.msk [vmem:[#allocation2 + $0x3e8] sm:$0xff] %vm3565_vm1, %v3432_v32  ;;  %3690 = vst.msk [vmem:[#allocation2 + $0x3e0] sm:$0xff] %vm3565_vm1, %v3430_v20  ;;  %v3761_v32 = vld [vmem:[%s10228_s27 + $0x218] sm:$0xff]  ;;  %v3760_v20 = vld [vmem:[%s10228_s27 + $0x210] sm:$0xff] }
 0x3dd   : > { %4060 = vrot.lane.b32.xlu1 %v13694_v42, %s9621_s17 }
 0x3df   : > { %v3436_v58 = vpop.permute.xlu1 %3435  ;;  %v3434_v40 = vpop.permute.xlu0 %3433  ;;  %4062 = vrot.lane.b32.xlu0 %v13709_v34, %s9621_s17 }
 0x3e0   : > { %3693 = vst.msk [vmem:[#allocation2 + $0x3f8] sm:$0xff] %vm3565_vm1, %v3436_v58  ;;  %3692 = vst.msk [vmem:[#allocation2 + $0x3f0] sm:$0xff] %vm3565_vm1, %v3434_v40 }
 0x3e1   : > { %4064 = vrot.lane.b32.xlu1 %v13706_v24, %s9621_s17 }
 0x3e3   : > { %v13723_v17 = vpop.permute.xlu1 %3952  ;;  %v13725_v7 = vpop.permute.xlu0 %3950  ;;  %4066 = vrot.lane.b32.xlu0 %v13721_v5, %s9621_s17 }
 0x3e4   : > { %16915 = vst [vmem:[#allocation88_spill] sm:$0xff] %v13723_v17  ;;  %16916 = vst [vmem:[#allocation91_spill] sm:$0xff] %v13725_v7  ;;  %v3763_v7 = vld [vmem:[%s10228_s27 + $0x228] sm:$0xff]  ;;  %v3762_v17 = vld [vmem:[%s10228_s27 + $0x220] sm:$0xff] }
 0x3e5   : > { %4068 = vrot.lane.b32.xlu1 %v13718_v28, %s9621_s17 }
 0x3e7   : > { %v13737_v13 = vpop.permute.xlu1 %3956  ;;  %v13739_v9 = vpop.permute.xlu0 %3954  ;;  %4070 = vrot.lane.b32.xlu0 %v13735_v61, %s9621_s17 }
 0x3e8   : > { %16917 = vst [vmem:[#allocation90_spill] sm:$0xff] %v13737_v13  ;;  %16918 = vst [vmem:[#allocation95_spill] sm:$0xff] %v13739_v9  ;;  %v3764_v13 = vld [vmem:[%s10228_s27 + $0x230] sm:$0xff] }
 0x3e9   : > { %4072 = vrot.lane.b32.xlu1 %v13732_v48, %s9621_s17 }
 0x3eb   : > { %v13751_v25 = vpop.permute.xlu1 %3960  ;;  %v13753_v43 = vpop.permute.xlu0 %3958  ;;  %4074 = vrot.lane.b32.xlu0 %v13749_v50, %s9621_s17 }
 0x3ec   : > { %16919 = vst [vmem:[#allocation92_spill] sm:$0xff] %v13751_v25  ;;  %16920 = vst [vmem:[#allocation97_spill] sm:$0xff] %v13753_v43  ;;  %v3766_v25 = vld [vmem:[%s10228_s27 + $0x240] sm:$0xff] }
 0x3ed   : > { %4076 = vrot.lane.b32.xlu1 %v13746_v63, %s9621_s17 }
 0x3ef   : > { %v13761_v45 = vpop.permute.xlu1 %3964  ;;  %v13763_v47 = vpop.permute.xlu0 %3962  ;;  %4078 = vrot.lane.b32.xlu0 %v3758_v19, %s9621_s17  ;;  %v3765_v19 = vld [vmem:[%s10228_s27 + $0x238] sm:$0xff] }
 0x3f0   : > { %16921 = vst [vmem:[#allocation96_spill] sm:$0xff] %v13761_v45  ;;  %16922 = vst [vmem:[#allocation101_spill] sm:$0xff] %v13763_v47  ;;  %v3768_v45 = vld [vmem:[%s10228_s27 + $0x250] sm:$0xff] }
 0x3f1   : > { %4080 = vrot.lane.b32.xlu1 %v3759_v36, %s9621_s17 }
 0x3f3   : > { %v13769_v58 = vpop.permute.xlu1 %3968  ;;  %v13771_v40 = vpop.permute.xlu0 %3966  ;;  %4082 = vrot.lane.b32.xlu0 %v3760_v20, %s9621_s17  ;;  %v3767_v20 = vld [vmem:[%s10228_s27 + $0x248] sm:$0xff] }
 0x3f4   : > { %16923 = vst [vmem:[#allocation100_spill] sm:$0xff] %v13769_v58  ;;  %16924 = vst [vmem:[#allocation103_spill] sm:$0xff] %v13771_v40  ;;  %v13811_v58 = vld [vmem:[%s10228_s27 + $0x260] sm:$0xff] }
 0x3f5   : > { %4084 = vrot.lane.b32.xlu1 %v3761_v32, %s9621_s17  ;;  %16933 = vst [vmem:[#allocation110_spill] sm:$0xff] %v13811_v58 }
 0x3f7   : > { %v13777_v9 = vpop.permute.xlu1 %3972  ;;  %v13779_v36 = vpop.permute.xlu0 %3970  ;;  %4086 = vrot.lane.b32.xlu0 %v3762_v17, %s9621_s17  ;;  %v3769_v17 = vld [vmem:[%s10228_s27 + $0x258] sm:$0xff] }
 0x3f8   : > { %16925 = vst [vmem:[#allocation102_spill] sm:$0xff] %v13777_v9  ;;  %16926 = vst [vmem:[#allocation105_spill] sm:$0xff] %v13779_v36 }
 0x3f9   : > { %4088 = vrot.lane.b32.xlu1 %v3763_v7, %s9621_s17 }
 0x3fb   : > { %v13785_v43 = vpop.permute.xlu1 %3976  ;;  %v13787_v32 = vpop.permute.xlu0 %3974  ;;  %4090 = vrot.lane.b32.xlu0 %v3764_v13, %s9621_s17  ;;  %v13808_v13 = vld [vmem:[%s10228_s27 + $0x268] sm:$0xff] }
 0x3fc   : > { %16927 = vst [vmem:[#allocation104_spill] sm:$0xff] %v13785_v43  ;;  %16928 = vst [vmem:[#allocation107_spill] sm:$0xff] %v13787_v32 }
 0x3fd   : > { %4092 = vrot.lane.b32.xlu1 %v3765_v19, %s9621_s17 }
 0x3ff   : > { %v13793_v47 = vpop.permute.xlu1 %3980  ;;  %v13795_v7 = vpop.permute.xlu0 %3978  ;;  %4094 = vrot.lane.b32.xlu0 %v3766_v25, %s9621_s17 }
 0x400   : > { %16929 = vst [vmem:[#allocation106_spill] sm:$0xff] %v13793_v47  ;;  %16930 = vst [vmem:[#allocation109_spill] sm:$0xff] %v13795_v7  ;;  %v3779_v7 = vld [vmem:[%s10228_s27 + $0x2a8] sm:$0xff]  ;;  %v3778_v47 = vld [vmem:[%s10228_s27 + $0x2a0] sm:$0xff] }
 0x401   : > { %4096 = vrot.lane.b32.xlu1 %v3767_v20, %s9621_s17  ;;  %v13822_v20 = vld [vmem:[%s10228_s27 + $0x278] sm:$0xff] }
 0x403   : > { %v13801_v40 = vpop.permute.xlu1 %3984  ;;  %v13803_v19 = vpop.permute.xlu0 %3982  ;;  %4098 = vrot.lane.b32.xlu0 %v3768_v45, %s9621_s17 }
 0x404   : > { %16931 = vst [vmem:[#allocation108_spill] sm:$0xff] %v13801_v40  ;;  %16932 = vst [vmem:[#allocation111_spill] sm:$0xff] %v13803_v19  ;;  %v3775_v40 = vld [vmem:[%s10228_s27 + $0x288] sm:$0xff] }
 0x405   : > { %4100 = vrot.lane.b32.xlu1 %v3769_v17, %s9621_s17  ;;  %v13825_v17 = vld [vmem:[%s10228_s27 + $0x270] sm:$0xff] }
 0x407   : > { %v13813_v36 = vpop.permute.xlu1 %3988  ;;  %v13815_v25 = vpop.permute.xlu0 %3986  ;;  %4102 = vrot.lane.b32.xlu0 %v13811_v58, %s9621_s17 }
 0x408   : > { %16934 = vst [vmem:[#allocation115_spill] sm:$0xff] %v13813_v36  ;;  %16935 = vst [vmem:[#allocation114_spill] sm:$0xff] %v13815_v25  ;;  %v3774_v25 = vld [vmem:[%s10228_s27 + $0x280] sm:$0xff] }
 0x409   : > { %4104 = vrot.lane.b32.xlu1 %v13808_v13, %s9621_s17 }
 0x40b   : > { %v13827_v45 = vpop.permute.xlu1 %3992  ;;  %v13829_v19 = vpop.permute.xlu0 %3990  ;;  %4106 = vrot.lane.b32.xlu0 %v13825_v17, %s9621_s17 }
 0x40c   : > { %16936 = vst [vmem:[#allocation119_spill] sm:$0xff] %v13827_v45  ;;  %16937 = vst [vmem:[#allocation116_spill] sm:$0xff] %v13829_v19  ;;  %v3777_v45 = vld [vmem:[%s10228_s27 + $0x298] sm:$0xff]  ;;  %v3776_v19 = vld [vmem:[%s10228_s27 + $0x290] sm:$0xff] }
 0x40d   : > { %4108 = vrot.lane.b32.xlu1 %v13822_v20, %s9621_s17 }
 0x40f   : > { %v13837_v36 = vpop.permute.xlu1 %3996  ;;  %v13839_v9 = vpop.permute.xlu0 %3994  ;;  %4110 = vrot.lane.b32.xlu0 %v3774_v25, %s9621_s17 }
 0x410   : > { %16938 = vst [vmem:[#allocation121_spill] sm:$0xff] %v13837_v36  ;;  %16939 = vst [vmem:[#allocation120_spill] sm:$0xff] %v13839_v9 }
 0x411   : > { %4112 = vrot.lane.b32.xlu1 %v3775_v40, %s9621_s17  ;;  %v3780_v40 = vld [vmem:[%s10228_s27 + $0x2b0] sm:$0xff] }
 0x413   : > { %v13845_v32 = vpop.permute.xlu1 %4000  ;;  %v13847_v43 = vpop.permute.xlu0 %3998  ;;  %4114 = vrot.lane.b32.xlu0 %v3776_v19, %s9621_s17 }
 0x415   : > { %4116 = vrot.lane.b32.xlu1 %v3777_v45, %s9621_s17 }
 0x417   : > { %v13853_v36 = vpop.permute.xlu1 %4004  ;;  %v13855_v58 = vpop.permute.xlu0 %4002  ;;  %4118 = vrot.lane.b32.xlu0 %v3778_v47, %s9621_s17 }
 0x419   : > { %4120 = vrot.lane.b32.xlu1 %v3779_v7, %s9621_s17 }
 0x41b   : > { %v13860_v25 = vpop.permute.xlu1 %4008  ;;  %v13862_v9 = vpop.permute.xlu0 %4006  ;;  %4122 = vrot.lane.b32.xlu0 %v3780_v40, %s9621_s17 }
 0x41d   : > { %5549 = vrot.lane.b32.xlu1 %v13559_v16, %s9620_s16 }
 0x41f   : > { %v13867_v19 = vpop.permute.xlu1 %4012  ;;  %v13869_v45 = vpop.permute.xlu0 %4010  ;;  %5517 = vrot.lane.b32.xlu0 %v13475_v44, %s9620_s16 }
 0x421   : > { %5547 = vrot.lane.b32.xlu1 %v13562_v3, %s9620_s16 }
 0x423   : > { %v13875_v47 = vpop.permute.xlu1 %4016  ;;  %v13877_v7 = vpop.permute.xlu0 %4014  ;;  %5613 = vrot.lane.b32.xlu0 %v13746_v63, %s9620_s16 }
 0x424   : > { %16940 = vst [vmem:[#allocation123_spill] sm:$0xff] %v13875_v47  ;;  %16941 = vst [vmem:[#allocation122_spill] sm:$0xff] %v13877_v7 }
 0x425   : > { %5515 = vrot.lane.b32.xlu1 %v13478_v8, %s9620_s16 }
 0x427   : > { %v13883_v16 = vpop.permute.xlu1 %4020  ;;  %v13885_v40 = vpop.permute.xlu0 %4018  ;;  %5581 = vrot.lane.b32.xlu0 %v13646_v53, %s9620_s16 }
 0x428   : > { %16942 = vst [vmem:[#allocation125_spill] sm:$0xff] %v13883_v16  ;;  %16943 = vst [vmem:[#allocation124_spill] sm:$0xff] %v13885_v40 }
 0x429   : > { %5545 = vrot.lane.b32.xlu1 %v13547_v11, %s9620_s16 }
 0x42b   : > { %v13891_v44 = vpop.permute.xlu1 %4024  ;;  %v13893_v3 = vpop.permute.xlu0 %4022  ;;  %5611 = vrot.lane.b32.xlu0 %v13749_v50, %s9620_s16 }
 0x42c   : > { %16944 = vst [vmem:[#allocation127_spill] sm:$0xff] %v13891_v44  ;;  %16945 = vst [vmem:[#allocation126_spill] sm:$0xff] %v13893_v3  ;;  %v3785_v3 = vld [vmem:[%s10228_s27 + $0x2d8] sm:$0xff] }
 0x42d   : > { %5513 = vrot.lane.b32.xlu1 %v13463_v21, %s9620_s16 }
 0x42f   : > { %v13899_v8 = vpop.permute.xlu1 %4028  ;;  %v13901_v63 = vpop.permute.xlu0 %4026  ;;  %5579 = vrot.lane.b32.xlu0 %v13649_v27, %s9620_s16 }
 0x430   : > { %16946 = vst [vmem:[#allocation129_spill] sm:$0xff] %v13899_v8  ;;  %16947 = vst [vmem:[#allocation128_spill] sm:$0xff] %v13901_v63  ;;  %v3802_v63 = vld [vmem:[%s10228_s27 + $0x360] sm:$0xff] }
 0x431   : > { %5543 = vrot.lane.b32.xlu1 %v13550_v26, %s9620_s16 }
 0x433   : > { %v13907_v11 = vpop.permute.xlu1 %4032  ;;  %v13909_v53 = vpop.permute.xlu0 %4030  ;;  %5609 = vrot.lane.b32.xlu0 %v13732_v48, %s9620_s16 }
 0x434   : > { %16948 = vst [vmem:[#allocation133_spill] sm:$0xff] %v13909_v53 }
 0x435   : > { %5511 = vrot.lane.b32.xlu1 %v13466_v18, %s9620_s16 }
 0x437   : > { %v13915_v21 = vpop.permute.xlu1 %4036  ;;  %v13917_v50 = vpop.permute.xlu0 %4034  ;;  %5577 = vrot.lane.b32.xlu0 %v13634_v6, %s9620_s16 }
 0x439   : > { %5541 = vrot.lane.b32.xlu1 %v13535_v0, %s9620_s16 }
 0x43b   : > { %v13923_v26 = vpop.permute.xlu1 %4040  ;;  %v13925_v27 = vpop.permute.xlu0 %4038  ;;  %5607 = vrot.lane.b32.xlu0 %v13735_v61, %s9620_s16 }
 0x43d   : > { %5509 = vrot.lane.b32.xlu1 %v13451_v51, %s9620_s16 }
 0x43f   : > { %v13931_v18 = vpop.permute.xlu1 %4044  ;;  %v13933_v48 = vpop.permute.xlu0 %4042  ;;  %5575 = vrot.lane.b32.xlu0 %v13637_v60, %s9620_s16 }
 0x441   : > { %5539 = vrot.lane.b32.xlu1 %v13538_v35, %s9620_s16 }
 0x443   : > { %v13939_v0 = vpop.permute.xlu1 %4048  ;;  %v13941_v6 = vpop.permute.xlu0 %4046  ;;  %5605 = vrot.lane.b32.xlu0 %v13718_v28, %s9620_s16 }
 0x444   : > { %16949 = vst [vmem:[#allocation130_spill] sm:$0xff] %v13939_v0  ;;  %16950 = vst [vmem:[#allocation135_spill] sm:$0xff] %v13941_v6  ;;  %v3786_v0 = vld [vmem:[%s10228_s27 + $0x2e0] sm:$0xff] }
 0x445   : > { %5507 = vrot.lane.b32.xlu1 %v13454_v23, %s9620_s16 }
 0x447   : > { %v13947_v51 = vpop.permute.xlu1 %4052  ;;  %v13949_v61 = vpop.permute.xlu0 %4050  ;;  %5573 = vrot.lane.b32.xlu0 %v13622_v30, %s9620_s16 }
 0x448   : > { %16951 = vst [vmem:[#allocation134_spill] sm:$0xff] %v13947_v51  ;;  %16952 = vst [vmem:[#allocation139_spill] sm:$0xff] %v13949_v61 }
 0x449   : > { %5537 = vrot.lane.b32.xlu1 %v13523_v59, %s9620_s16 }
 0x44b   : > { %v13955_v35 = vpop.permute.xlu1 %4056  ;;  %v13957_v60 = vpop.permute.xlu0 %4054  ;;  %5603 = vrot.lane.b32.xlu0 %v13721_v5, %s9620_s16 }
 0x44c   : > { %16953 = vst [vmem:[#allocation138_spill] sm:$0xff] %v13955_v35  ;;  %16954 = vst [vmem:[#allocation141_spill] sm:$0xff] %v13957_v60 }
 0x44d   : > { %5505 = vrot.lane.b32.xlu1 %v13439_v33, %s9620_s16 }
 0x44f   : > { %v13963_v23 = vpop.permute.xlu1 %4060  ;;  %v13965_v28 = vpop.permute.xlu0 %4058  ;;  %5571 = vrot.lane.b32.xlu0 %v13625_v1, %s9620_s16 }
 0x450   : > { %16955 = vst [vmem:[#allocation140_spill] sm:$0xff] %v13963_v23  ;;  %16956 = vst [vmem:[#allocation143_spill] sm:$0xff] %v13965_v28 }
 0x451   : > { %5535 = vrot.lane.b32.xlu1 %v13526_v37, %s9620_s16 }
 0x453   : > { %v13971_v59 = vpop.permute.xlu1 %4064  ;;  %v13973_v30 = vpop.permute.xlu0 %4062  ;;  %5601 = vrot.lane.b32.xlu0 %v13706_v24, %s9620_s16 }
 0x454   : > { %16957 = vst [vmem:[#allocation142_spill] sm:$0xff] %v13973_v30 }
 0x455   : > { %5503 = vrot.lane.b32.xlu1 %v13442_v39, %s9620_s16 }
 0x457   : > { %v13979_v33 = vpop.permute.xlu1 %4068  ;;  %v13981_v5 = vpop.permute.xlu0 %4066  ;;  %5569 = vrot.lane.b32.xlu0 %v13610_v15, %s9620_s16 }
 0x459   : > { %5533 = vrot.lane.b32.xlu1 %v13511_v41, %s9620_s16  ;;  %v5237_v41 = vld [vmem:[%s10228_s27 + $0x30] sm:$0xff] }
 0x45b   : > { %v13987_v37 = vpop.permute.xlu1 %4072  ;;  %v13989_v1 = vpop.permute.xlu0 %4070  ;;  %5599 = vrot.lane.b32.xlu0 %v13709_v34, %s9620_s16 }
 0x45d   : > { %5501 = vrot.lane.b32.xlu1 %v13430_v29, %s9620_s16 }
 0x45f   : > { %v13995_v39 = vpop.permute.xlu1 %4076  ;;  %v13997_v24 = vpop.permute.xlu0 %4074  ;;  %5567 = vrot.lane.b32.xlu0 %v13613_v2, %s9620_s16 }
 0x461   : > { %5531 = vrot.lane.b32.xlu1 %v13514_v57, %s9620_s16  ;;  %v5236_v57 = vld [vmem:[%s10228_s27 + $0x28] sm:$0xff] }
 0x463   : > { %v14004_v15 = vpop.permute.xlu1 %4080  ;;  %v14006_v7 = vpop.permute.xlu0 %4078  ;;  %5597 = vrot.lane.b32.xlu0 %v13694_v42, %s9620_s16 }
 0x464   : > { %16958 = vst [vmem:[#allocation145_spill] sm:$0xff] %v14004_v15  ;;  %16959 = vst [vmem:[#allocation144_spill] sm:$0xff] %v14006_v7 }
 0x465   : > { %5499 = vrot.lane.b32.xlu1 %v5237_v41, %s9620_s16 }
 0x467   : > { %v14011_v29 = vpop.permute.xlu1 %4084  ;;  %v14013_v34 = vpop.permute.xlu0 %4082  ;;  %5565 = vrot.lane.b32.xlu0 %v13598_v14, %s9620_s16 }
 0x468   : > { %16960 = vst [vmem:[#allocation147_spill] sm:$0xff] %v14011_v29  ;;  %16961 = vst [vmem:[#allocation146_spill] sm:$0xff] %v14013_v34 }
 0x469   : > { %5529 = vrot.lane.b32.xlu1 %v13499_v22, %s9620_s16  ;;  %v5235_v22 = vld [vmem:[%s10228_s27 + $0x20] sm:$0xff] }
 0x46b   : > { %v14020_v2 = vpop.permute.xlu1 %4088  ;;  %v14022_v7 = vpop.permute.xlu0 %4086  ;;  %5595 = vrot.lane.b32.xlu0 %v13697_v4, %s9620_s16  ;;  %v5250_v4 = vld [vmem:[%s10228_s27 + $0x98] sm:$0xff] }
 0x46c   : > { %16962 = vst [vmem:[#allocation149_spill] sm:$0xff] %v14020_v2  ;;  %16963 = vst [vmem:[#allocation148_spill] sm:$0xff] %v14022_v7 }
 0x46d   : > { %5497 = vrot.lane.b32.xlu1 %v5236_v57, %s9620_s16 }
 0x46f   : > { %v14027_v42 = vpop.permute.xlu1 %4092  ;;  %v14029_v41 = vpop.permute.xlu0 %4090  ;;  %5563 = vrot.lane.b32.xlu0 %v13601_v62, %s9620_s16 }
 0x470   : > { %16964 = vst [vmem:[#allocation153_spill] sm:$0xff] %v14027_v42  ;;  %16965 = vst [vmem:[#allocation152_spill] sm:$0xff] %v14029_v41 }
 0x471   : > { %5527 = vrot.lane.b32.xlu1 %v13502_v54, %s9620_s16  ;;  %v5234_v54 = vld [vmem:[%s10228_s27 + $0x18] sm:$0xff] }
 0x473   : > { %v14036_v14 = vpop.permute.xlu1 %4096  ;;  %v14038_v15 = vpop.permute.xlu0 %4094  ;;  %5593 = vrot.lane.b32.xlu0 %v13682_v31, %s9620_s16  ;;  %v5249_v31 = vld [vmem:[%s10228_s27 + $0x90] sm:$0xff] }
 0x474   : > { %16966 = vst [vmem:[#allocation157_spill] sm:$0xff] %v14036_v14  ;;  %16967 = vst [vmem:[#allocation154_spill] sm:$0xff] %v14038_v15 }
 0x475   : > { %5495 = vrot.lane.b32.xlu1 %v5235_v22, %s9620_s16 }
 0x477   : > { %v14044_v57 = vpop.permute.xlu1 %4100  ;;  %v14046_v34 = vpop.permute.xlu0 %4098  ;;  %5561 = vrot.lane.b32.xlu0 %v13586_v10, %s9620_s16  ;;  %v5233_v10 = vld [vmem:[%s10228_s27 + $0x10] sm:$0xff] }
 0x478   : > { %16968 = vst [vmem:[#allocation159_spill] sm:$0xff] %v14044_v57  ;;  %16969 = vst [vmem:[#allocation158_spill] sm:$0xff] %v14046_v34  ;;  %v3787_v57 = vld [vmem:[%s10228_s27 + $0x2e8] sm:$0xff] }
 0x479   : > { %5525 = vrot.lane.b32.xlu1 %v5250_v4, %s9620_s16 }
 0x47b   : > { %v14052_v62 = vpop.permute.xlu1 %4104  ;;  %v14054_v29 = vpop.permute.xlu0 %4102  ;;  %5591 = vrot.lane.b32.xlu0 %v13685_v49, %s9620_s16  ;;  %v5248_v49 = vld [vmem:[%s10228_s27 + $0x88] sm:$0xff] }
 0x47c   : > { %16970 = vst [vmem:[#allocation161_spill] sm:$0xff] %v14052_v62  ;;  %16971 = vst [vmem:[#allocation160_spill] sm:$0xff] %v14054_v29 }
 0x47d   : > { %5493 = vrot.lane.b32.xlu1 %v5234_v54, %s9620_s16 }
 0x47f   : > { %v14060_v22 = vpop.permute.xlu1 %4108  ;;  %v14062_v7 = vpop.permute.xlu0 %4106  ;;  %5559 = vrot.lane.b32.xlu0 %v13589_v38, %s9620_s16  ;;  %v5232_v38 = vld [vmem:[%s10228_s27 + $0x8] sm:$0xff] }
 0x480   : > { %16972 = vst [vmem:[#allocation163_spill] sm:$0xff] %v14060_v22  ;;  %16973 = vst [vmem:[#allocation162_spill] sm:$0xff] %v14062_v7 }
 0x481   : > { %5523 = vrot.lane.b32.xlu1 %v5249_v31, %s9620_s16 }
 0x483   : > { %v14068_v4 = vpop.permute.xlu1 %4112  ;;  %v14070_v54 = vpop.permute.xlu0 %4110  ;;  %5589 = vrot.lane.b32.xlu0 %v13670_v46, %s9620_s16  ;;  %v5247_v46 = vld [vmem:[%s10228_s27 + $0x80] sm:$0xff] }
 0x484   : > { %16974 = vst [vmem:[#allocation165_spill] sm:$0xff] %v14068_v4  ;;  %16975 = vst [vmem:[#allocation164_spill] sm:$0xff] %v14070_v54  ;;  %v5265_v54 = vld [vmem:[%s10228_s27 + $0x110] sm:$0xff] }
 0x485   : > { %5491 = vrot.lane.b32.xlu1 %v5233_v10, %s9620_s16 }
 0x487   : > { %v14076_v2 = vpop.permute.xlu1 %4116  ;;  %v14078_v31 = vpop.permute.xlu0 %4114  ;;  %5557 = vrot.lane.b32.xlu0 %v13577_v56, %s9620_s16  ;;  %v3789_v56 = vld [vmem:[%s10228_s27 + $0x2f8] sm:$0xff] }
 0x488   : > { %16976 = vst [vmem:[#allocation167_spill] sm:$0xff] %v14076_v2  ;;  %16977 = vst [vmem:[#allocation166_spill] sm:$0xff] %v14078_v31 }
 0x489   : > { %5521 = vrot.lane.b32.xlu1 %v5248_v49, %s9620_s16 }
 0x48b   : > { %v14084_v4 = vpop.permute.xlu1 %4120  ;;  %v14086_v10 = vpop.permute.xlu0 %4118  ;;  %5587 = vrot.lane.b32.xlu0 %v13673_v52, %s9620_s16  ;;  %v5264_v52 = vld [vmem:[%s10228_s27 + $0x108] sm:$0xff] }
 0x48c   : > { %16978 = vst [vmem:[#allocation171_spill] sm:$0xff] %v14084_v4  ;;  %16979 = vst [vmem:[#allocation168_spill] sm:$0xff] %v14086_v10 }
 0x48d   : > { %5489 = vrot.lane.b32.xlu1 %v5232_v38, %s9620_s16  ;;  %v5231_v38 = vld [vmem:[%s10228_s27] sm:$0xff] }
 0x48f   : > { %v14093_v31 = vpop.permute.xlu1 %5549  ;;  %v14095_v49 = vpop.permute.xlu0 %4122  ;;  %5555 = vrot.lane.b32.xlu0 %v5265_v54, %s9620_s16 }
 0x490   : > { %16980 = vst [vmem:[#allocation173_spill] sm:$0xff] %v14095_v49  ;;  %v3788_v49 = vld [vmem:[%s10228_s27 + $0x2f0] sm:$0xff] }
 0x491   : > { %5519 = vrot.lane.b32.xlu1 %v5247_v46, %s9620_s16 }
 0x493   : > { %v14100_v2 = vpop.permute.xlu1 %5547  ;;  %v14102_v10 = vpop.permute.xlu0 %5517  ;;  %5585 = vrot.lane.b32.xlu0 %v13658_v55, %s9620_s16  ;;  %v3821_v55 = vld [vmem:[%s10228_s27 + $0x3f8] sm:$0xff] }
 0x495   : > { %4140 = vrot.lane.b32.xlu1 %v3789_v56, %s9621_s17 }
 0x497   : > { %v14109_v4 = vpop.permute.xlu1 %5515  ;;  %v14111_v46 = vpop.permute.xlu0 %5613  ;;  %5487 = vrot.lane.b32.xlu0 %v5231_v38, %s9620_s16 }
 0x499   : > { %5553 = vrot.lane.b32.xlu1 %v5264_v52, %s9620_s16  ;;  %v5263_v52 = vld [vmem:[%s10228_s27 + $0x100] sm:$0xff] }
 0x49b   : > { %v14115_v54 = vpop.permute.xlu1 %5545  ;;  %v14117_v41 = vpop.permute.xlu0 %5581  ;;  %5583 = vrot.lane.b32.xlu0 %v13661_v12, %s9620_s16  ;;  %v3805_v12 = vld [vmem:[%s10228_s27 + $0x378] sm:$0xff] }
 0x49d   : > { %5677 = vrot.lane.b32.xlu1 %v3789_v56, %s9620_s16 }
 0x49f   : > { %v14124_v42 = vpop.permute.xlu1 %5513  ;;  %v14126_v15 = vpop.permute.xlu0 %5611  ;;  %4138 = vrot.lane.b32.xlu0 %v3788_v49, %s9621_s17 }
 0x4a1   : > { %4204 = vrot.lane.b32.xlu1 %v3821_v55, %s9621_s17 }
 0x4a3   : > { %v14131_v38 = vpop.permute.xlu1 %5543  ;;  %v14133_v14 = vpop.permute.xlu0 %5579  ;;  %5551 = vrot.lane.b32.xlu0 %v5263_v52, %s9620_s16 }
 0x4a5   : > { %5645 = vrot.lane.b32.xlu1 %v13822_v20, %s9620_s16  ;;  %v3820_v20 = vld [vmem:[%s10228_s27 + $0x3f0] sm:$0xff] }
 0x4a7   : > { %v14139_v56 = vpop.permute.xlu1 %5511  ;;  %v14141_v34 = vpop.permute.xlu0 %5609  ;;  %4172 = vrot.lane.b32.xlu0 %v3805_v12, %s9621_s17 }
 0x4a9   : > { %5675 = vrot.lane.b32.xlu1 %v3788_v49, %s9620_s16  ;;  %v3804_v49 = vld [vmem:[%s10228_s27 + $0x370] sm:$0xff] }
 0x4ab   : > { %v14146_v29 = vpop.permute.xlu1 %5541  ;;  %v14148_v62 = vpop.permute.xlu0 %5577  ;;  %5741 = vrot.lane.b32.xlu0 %v3821_v55, %s9620_s16 }
 0x4ad   : > { %4136 = vrot.lane.b32.xlu1 %v3787_v57, %s9621_s17 }
 0x4af   : > { %v14153_v52 = vpop.permute.xlu1 %5509  ;;  %v14155_v7 = vpop.permute.xlu0 %5607  ;;  %4202 = vrot.lane.b32.xlu0 %v3820_v20, %s9621_s17 }
 0x4b1   : > { %5643 = vrot.lane.b32.xlu1 %v13825_v17, %s9620_s16  ;;  %v3819_v17 = vld [vmem:[%s10228_s27 + $0x3e8] sm:$0xff] }
 0x4b3   : > { %v14161_v22 = vpop.permute.xlu1 %5539  ;;  %v14163_v6 = vpop.permute.xlu0 %5575  ;;  %5709 = vrot.lane.b32.xlu0 %v3805_v12, %s9620_s16 }
 0x4b5   : > { %4170 = vrot.lane.b32.xlu1 %v3804_v49, %s9621_s17 }
 0x4b7   : > { %v14167_v55 = vpop.permute.xlu1 %5507  ;;  %v14169_v47 = vpop.permute.xlu0 %5605  ;;  %5673 = vrot.lane.b32.xlu0 %v3787_v57, %s9620_s16  ;;  %v3803_v57 = vld [vmem:[%s10228_s27 + $0x368] sm:$0xff] }
 0x4b9   : > { %5739 = vrot.lane.b32.xlu1 %v3820_v20, %s9620_s16 }
 0x4bb   : > { %v14175_v40 = vpop.permute.xlu1 %5537  ;;  %v14177_v61 = vpop.permute.xlu0 %5573  ;;  %4134 = vrot.lane.b32.xlu0 %v3786_v0, %s9621_s17 }
 0x4bd   : > { %4200 = vrot.lane.b32.xlu1 %v3819_v17, %s9621_s17 }
 0x4bf   : > { %v14181_v12 = vpop.permute.xlu1 %5505  ;;  %v14183_v16 = vpop.permute.xlu0 %5603  ;;  %5641 = vrot.lane.b32.xlu0 %v13808_v13, %s9620_s16  ;;  %v3818_v13 = vld [vmem:[%s10228_s27 + $0x3e0] sm:$0xff] }
 0x4c1   : > { %5707 = vrot.lane.b32.xlu1 %v3804_v49, %s9620_s16 }
 0x4c3   : > { %v14189_v20 = vpop.permute.xlu1 %5535  ;;  %v14191_v51 = vpop.permute.xlu0 %5571  ;;  %4168 = vrot.lane.b32.xlu0 %v3803_v57, %s9621_s17 }
 0x4c5   : > { %5671 = vrot.lane.b32.xlu1 %v3786_v0, %s9620_s16  ;;  %v16984_v0 = vld [vmem:[#allocation110_spill] sm:$0xff] }
 0x4c7   : > { %v14196_v60 = vpop.permute.xlu1 %5503  ;;  %v14198_v44 = vpop.permute.xlu0 %5601  ;;  %5737 = vrot.lane.b32.xlu0 %v3819_v17, %s9620_s16 }
 0x4c8   : > { %16981 = vst [vmem:[#allocation172_spill] sm:$0xff] %v14196_v60 }
 0x4c9   : > { %4132 = vrot.lane.b32.xlu1 %v3785_v3, %s9621_s17 }
 0x4cb   : > { %v14203_v49 = vpop.permute.xlu1 %5533  ;;  %v14205_v35 = vpop.permute.xlu0 %5569  ;;  %4198 = vrot.lane.b32.xlu0 %v3818_v13, %s9621_s17 }
 0x4cc   : > { %16982 = vst [vmem:[#allocation37_spill] sm:$0xff] %v14203_v49  ;;  %16983 = vst [vmem:[#allocation39_spill] sm:$0xff] %v14205_v35  ;;  %v3784_v49 = vld [vmem:[%s10228_s27 + $0x2d0] sm:$0xff] }
 0x4cd   : > { %5639 = vrot.lane.b32.xlu1 %v16984_v0, %s9620_s16  ;;  %v3817_v0 = vld [vmem:[%s10228_s27 + $0x3d8] sm:$0xff] }
 0x4cf   : > { %v14211_v28 = vpop.permute.xlu1 %5501  ;;  %v14213_v8 = vpop.permute.xlu0 %5599  ;;  %5705 = vrot.lane.b32.xlu0 %v3803_v57, %s9620_s16  ;;  %v5306_v57 = vld [vmem:[%s10228_s27 + $0x258] sm:$0xff] }
 0x4d0   : > { %16985 = vst [vmem:[#allocation36_spill] sm:$0xff] %v14211_v28  ;;  %16986 = vst [vmem:[#allocation38_spill] sm:$0xff] %v14213_v8 }
 0x4d1   : > { %4166 = vrot.lane.b32.xlu1 %v3802_v63, %s9621_s17 }
 0x4d3   : > { %v14217_v17 = vpop.permute.xlu1 %5531  ;;  %v14219_v23 = vpop.permute.xlu0 %5567  ;;  %5669 = vrot.lane.b32.xlu0 %v3785_v3, %s9620_s16  ;;  %v3801_v3 = vld [vmem:[%s10228_s27 + $0x358] sm:$0xff] }
 0x4d4   : > { %16987 = vst [vmem:[#allocation40_spill] sm:$0xff] %v14217_v17  ;;  %16988 = vst [vmem:[#allocation41_spill] sm:$0xff] %v14219_v23 }
 0x4d5   : > { %5735 = vrot.lane.b32.xlu1 %v3818_v13, %s9620_s16 }
 0x4d7   : > { %v14225_v53 = vpop.permute.xlu1 %5499  ;;  %v14227_v28 = vpop.permute.xlu0 %5597  ;;  %4130 = vrot.lane.b32.xlu0 %v3784_v49, %s9621_s17 }
 0x4d8   : > { %16989 = vst [vmem:[#allocation42_spill] sm:$0xff] %v14225_v53  ;;  %16990 = vst [vmem:[#allocation43_spill] sm:$0xff] %v14227_v28  ;;  %v3783_v28 = vld [vmem:[%s10228_s27 + $0x2c8] sm:$0xff] }
 0x4d9   : > { %4196 = vrot.lane.b32.xlu1 %v3817_v0, %s9621_s17 }
 0x4db   : > { %v14232_v17 = vpop.permute.xlu1 %5529  ;;  %v14234_v23 = vpop.permute.xlu0 %5565  ;;  %5637 = vrot.lane.b32.xlu0 %v5306_v57, %s9620_s16  ;;  %v3816_v57 = vld [vmem:[%s10228_s27 + $0x3d0] sm:$0xff] }
 0x4dc   : > { %16991 = vst [vmem:[#allocation44_spill] sm:$0xff] %v14232_v17  ;;  %16992 = vst [vmem:[#allocation45_spill] sm:$0xff] %v14234_v23 }
 0x4dd   : > { %5703 = vrot.lane.b32.xlu1 %v3802_v63, %s9620_s16  ;;  %v5305_v63 = vld [vmem:[%s10228_s27 + $0x250] sm:$0xff] }
 0x4df   : > { %v14239_v13 = vpop.permute.xlu1 %5497  ;;  %v14241_v53 = vpop.permute.xlu0 %5595  ;;  %4164 = vrot.lane.b32.xlu0 %v3801_v3, %s9621_s17 }
 0x4e0   : > { %16993 = vst [vmem:[#allocation46_spill] sm:$0xff] %v14239_v13  ;;  %16994 = vst [vmem:[#allocation47_spill] sm:$0xff] %v14241_v53 }
 0x4e1   : > { %5667 = vrot.lane.b32.xlu1 %v3784_v49, %s9620_s16  ;;  %v3800_v49 = vld [vmem:[%s10228_s27 + $0x350] sm:$0xff] }
 0x4e3   : > { %v14246_v8 = vpop.permute.xlu1 %5527  ;;  %v14248_v17 = vpop.permute.xlu0 %5563  ;;  %5733 = vrot.lane.b32.xlu0 %v3817_v0, %s9620_s16 }
 0x4e4   : > { %16995 = vst [vmem:[#allocation48_spill] sm:$0xff] %v14246_v8  ;;  %16996 = vst [vmem:[#allocation49_spill] sm:$0xff] %v14248_v17 }
 0x4e5   : > { %4128 = vrot.lane.b32.xlu1 %v3783_v28, %s9621_s17 }
 0x4e7   : > { %v14254_v13 = vpop.permute.xlu1 %5495  ;;  %v14256_v53 = vpop.permute.xlu0 %5593  ;;  %4194 = vrot.lane.b32.xlu0 %v3816_v57, %s9621_s17 }
 0x4e8   : > { %16997 = vst [vmem:[#allocation50_spill] sm:$0xff] %v14254_v13  ;;  %16998 = vst [vmem:[#allocation51_spill] sm:$0xff] %v14256_v53  ;;  %v3782_v53 = vld [vmem:[%s10228_s27 + $0x2c0] sm:$0xff] }
 0x4e9   : > { %5635 = vrot.lane.b32.xlu1 %v5305_v63, %s9620_s16  ;;  %v3815_v63 = vld [vmem:[%s10228_s27 + $0x3c8] sm:$0xff] }
 0x4eb   : > { %v14261_v8 = vpop.permute.xlu1 %5525  ;;  %v14263_v17 = vpop.permute.xlu0 %5561  ;;  %5701 = vrot.lane.b32.xlu0 %v3801_v3, %s9620_s16  ;;  %v5304_v3 = vld [vmem:[%s10228_s27 + $0x248] sm:$0xff] }
 0x4ec   : > { %16999 = vst [vmem:[#allocation52_spill] sm:$0xff] %v14261_v8  ;;  %17000 = vst [vmem:[#allocation53_spill] sm:$0xff] %v14263_v17 }
 0x4ed   : > { %4162 = vrot.lane.b32.xlu1 %v3800_v49, %s9621_s17 }
 0x4ef   : > { %v14267_v0 = vpop.permute.xlu1 %5493  ;;  %v14269_v13 = vpop.permute.xlu0 %5591  ;;  %5665 = vrot.lane.b32.xlu0 %v3783_v28, %s9620_s16  ;;  %v3799_v28 = vld [vmem:[%s10228_s27 + $0x348] sm:$0xff] }
 0x4f0   : > { %17001 = vst [vmem:[#allocation54_spill] sm:$0xff] %v14267_v0  ;;  %17002 = vst [vmem:[#allocation55_spill] sm:$0xff] %v14269_v13 }
 0x4f1   : > { %5731 = vrot.lane.b32.xlu1 %v3816_v57, %s9620_s16 }
 0x4f3   : > { %v14275_v23 = vpop.permute.xlu1 %5523  ;;  %v14277_v8 = vpop.permute.xlu0 %5559  ;;  %4126 = vrot.lane.b32.xlu0 %v3782_v53, %s9621_s17 }
 0x4f4   : > { %17003 = vst [vmem:[#allocation56_spill] sm:$0xff] %v14275_v23  ;;  %17004 = vst [vmem:[#allocation57_spill] sm:$0xff] %v14277_v8  ;;  %v3781_v8 = vld [vmem:[%s10228_s27 + $0x2b8] sm:$0xff] }
 0x4f5   : > { %4192 = vrot.lane.b32.xlu1 %v3815_v63, %s9621_s17 }
 0x4f7   : > { %v14282_v0 = vpop.permute.xlu1 %5491  ;;  %v14284_v13 = vpop.permute.xlu0 %5589  ;;  %5633 = vrot.lane.b32.xlu0 %v5304_v3, %s9620_s16  ;;  %v3814_v3 = vld [vmem:[%s10228_s27 + $0x3c0] sm:$0xff] }
 0x4f8   : > { %17005 = vst [vmem:[#allocation58_spill] sm:$0xff] %v14282_v0  ;;  %17006 = vst [vmem:[#allocation59_spill] sm:$0xff] %v14284_v13 }
 0x4f9   : > { %5699 = vrot.lane.b32.xlu1 %v3800_v49, %s9620_s16  ;;  %v5303_v49 = vld [vmem:[%s10228_s27 + $0x240] sm:$0xff] }
 0x4fb   : > { %v14289_v57 = vpop.permute.xlu1 %5521  ;;  %v14291_v23 = vpop.permute.xlu0 %5557  ;;  %4160 = vrot.lane.b32.xlu0 %v3799_v28, %s9621_s17 }
 0x4fc   : > { %17007 = vst [vmem:[#allocation60_spill] sm:$0xff] %v14289_v57  ;;  %17008 = vst [vmem:[#allocation61_spill] sm:$0xff] %v14291_v23 }
 0x4fd   : > { %5663 = vrot.lane.b32.xlu1 %v3782_v53, %s9620_s16  ;;  %v3798_v53 = vld [vmem:[%s10228_s27 + $0x340] sm:$0xff] }
 0x4ff   : > { %v14296_v17 = vpop.permute.xlu1 %5489  ;;  %v14298_v0 = vpop.permute.xlu0 %5587  ;;  %5729 = vrot.lane.b32.xlu0 %v3815_v63, %s9620_s16 }
 0x500   : > { %17009 = vst [vmem:[#allocation62_spill] sm:$0xff] %v14296_v17  ;;  %17010 = vst [vmem:[#allocation63_spill] sm:$0xff] %v14298_v0 }
 0x501   : > { %4124 = vrot.lane.b32.xlu1 %v3781_v8, %s9621_s17 }
 0x503   : > { %v14304_v57 = vpop.permute.xlu1 %5519  ;;  %v14306_v23 = vpop.permute.xlu0 %5555  ;;  %4190 = vrot.lane.b32.xlu0 %v3814_v3, %s9621_s17 }
 0x504   : > { %17011 = vst [vmem:[#allocation64_spill] sm:$0xff] %v14304_v57  ;;  %17012 = vst [vmem:[#allocation65_spill] sm:$0xff] %v14306_v23  ;;  %v3813_v23 = vld [vmem:[%s10228_s27 + $0x3b8] sm:$0xff] }
 0x505   : > { %5631 = vrot.lane.b32.xlu1 %v5303_v49, %s9620_s16  ;;  %v5302_v49 = vld [vmem:[%s10228_s27 + $0x238] sm:$0xff] }
 0x507   : > { %v14311_v17 = vpop.permute.xlu1 %4140  ;;  %v14313_v0 = vpop.permute.xlu0 %5585  ;;  %5697 = vrot.lane.b32.xlu0 %v3799_v28, %s9620_s16  ;;  %v3797_v28 = vld [vmem:[%s10228_s27 + $0x338] sm:$0xff] }
 0x508   : > { %17013 = vst [vmem:[#allocation68_spill] sm:$0xff] %v14311_v17  ;;  %17014 = vst [vmem:[#allocation69_spill] sm:$0xff] %v14313_v0 }
 0x509   : > { %4158 = vrot.lane.b32.xlu1 %v3798_v53, %s9621_s17 }
 0x50b   : > { %v14317_v63 = vpop.permute.xlu1 %5553  ;;  %v14319_v57 = vpop.permute.xlu0 %5487  ;;  %5661 = vrot.lane.b32.xlu0 %v3781_v8, %s9620_s16  ;;  %v5317_v8 = vld [vmem:[%s10228_s27 + $0x2b0] sm:$0xff] }
 0x50c   : > { %17015 = vst [vmem:[#allocation71_spill] sm:$0xff] %v14317_v63  ;;  %17016 = vst [vmem:[#allocation72_spill] sm:$0xff] %v14319_v57 }
 0x50d   : > { %5727 = vrot.lane.b32.xlu1 %v3814_v3, %s9620_s16 }
 0x50f   : > { %v14325_v17 = vpop.permute.xlu1 %5677  ;;  %v14327_v0 = vpop.permute.xlu0 %5583  ;;  %4188 = vrot.lane.b32.xlu0 %v3813_v23, %s9621_s17 }
 0x510   : > { %17017 = vst [vmem:[#allocation73_spill] sm:$0xff] %v14325_v17  ;;  %17018 = vst [vmem:[#allocation74_spill] sm:$0xff] %v14327_v0  ;;  %v3812_v0 = vld [vmem:[%s10228_s27 + $0x3b0] sm:$0xff] }
 0x511   : > { %5629 = vrot.lane.b32.xlu1 %v5302_v49, %s9620_s16  ;;  %v5301_v49 = vld [vmem:[%s10228_s27 + $0x230] sm:$0xff] }
 0x513   : > { %v14332_v63 = vpop.permute.xlu1 %4204  ;;  %v14334_v57 = vpop.permute.xlu0 %4138  ;;  %5695 = vrot.lane.b32.xlu0 %v3798_v53, %s9620_s16  ;;  %v3796_v53 = vld [vmem:[%s10228_s27 + $0x330] sm:$0xff] }
 0x514   : > { %17019 = vst [vmem:[#allocation75_spill] sm:$0xff] %v14332_v63  ;;  %17020 = vst [vmem:[#allocation76_spill] sm:$0xff] %v14334_v57 }
 0x515   : > { %4156 = vrot.lane.b32.xlu1 %v3797_v28, %s9621_s17 }
 0x517   : > { %v14339_v3 = vpop.permute.xlu1 %5645  ;;  %v14341_v17 = vpop.permute.xlu0 %5551  ;;  %5659 = vrot.lane.b32.xlu0 %v5317_v8, %s9620_s16 }
 0x518   : > { %17021 = vst [vmem:[#allocation81_spill] sm:$0xff] %v14339_v3  ;;  %17022 = vst [vmem:[#allocation82_spill] sm:$0xff] %v14341_v17 }
 0x519   : > { %5725 = vrot.lane.b32.xlu1 %v3813_v23, %s9620_s16  ;;  %v5316_v23 = vld [vmem:[%s10228_s27 + $0x2a8] sm:$0xff] }
 0x51b   : > { %v14347_v63 = vpop.permute.xlu1 %5675  ;;  %v14349_v57 = vpop.permute.xlu0 %4172  ;;  %4186 = vrot.lane.b32.xlu0 %v3812_v0, %s9621_s17 }
 0x51c   : > { %17023 = vst [vmem:[#allocation84_spill] sm:$0xff] %v14347_v63  ;;  %17024 = vst [vmem:[#allocation85_spill] sm:$0xff] %v14349_v57  ;;  %v3811_v57 = vld [vmem:[%s10228_s27 + $0x3a8] sm:$0xff] }
 0x51d   : > { %5627 = vrot.lane.b32.xlu1 %v5301_v49, %s9620_s16  ;;  %v5300_v49 = vld [vmem:[%s10228_s27 + $0x228] sm:$0xff] }
 0x51f   : > { %v14354_v3 = vpop.permute.xlu1 %4136  ;;  %v14356_v17 = vpop.permute.xlu0 %5741  ;;  %5693 = vrot.lane.b32.xlu0 %v3797_v28, %s9620_s16  ;;  %v3795_v28 = vld [vmem:[%s10228_s27 + $0x328] sm:$0xff] }
 0x520   : > { %17025 = vst [vmem:[#allocation93_spill] sm:$0xff] %v14354_v3  ;;  %17026 = vst [vmem:[#allocation94_spill] sm:$0xff] %v14356_v17 }
 0x521   : > { %4154 = vrot.lane.b32.xlu1 %v3796_v53, %s9621_s17 }
 0x523   : > { %v14361_v8 = vpop.permute.xlu1 %5643  ;;  %v14363_v63 = vpop.permute.xlu0 %4202  ;;  %5657 = vrot.lane.b32.xlu0 %v5316_v23, %s9620_s16 }
 0x524   : > { %17027 = vst [vmem:[#allocation98_spill] sm:$0xff] %v14361_v8  ;;  %17028 = vst [vmem:[#allocation99_spill] sm:$0xff] %v14363_v63 }
 0x525   : > { %5723 = vrot.lane.b32.xlu1 %v3812_v0, %s9620_s16  ;;  %v5315_v0 = vld [vmem:[%s10228_s27 + $0x2a0] sm:$0xff] }
 0x527   : > { %v14369_v3 = vpop.permute.xlu1 %4170  ;;  %v14371_v17 = vpop.permute.xlu0 %5709  ;;  %4184 = vrot.lane.b32.xlu0 %v3811_v57, %s9621_s17 }
 0x528   : > { %17029 = vst [vmem:[#allocation112_spill] sm:$0xff] %v14369_v3  ;;  %17030 = vst [vmem:[#allocation113_spill] sm:$0xff] %v14371_v17  ;;  %v3810_v17 = vld [vmem:[%s10228_s27 + $0x3a0] sm:$0xff] }
 0x529   : > { %5625 = vrot.lane.b32.xlu1 %v5300_v49, %s9620_s16  ;;  %v5299_v49 = vld [vmem:[%s10228_s27 + $0x220] sm:$0xff] }
 0x52b   : > { %v14376_v8 = vpop.permute.xlu1 %5739  ;;  %v14378_v63 = vpop.permute.xlu0 %5673  ;;  %5691 = vrot.lane.b32.xlu0 %v3796_v53, %s9620_s16  ;;  %v3794_v53 = vld [vmem:[%s10228_s27 + $0x320] sm:$0xff] }
 0x52c   : > { %17031 = vst [vmem:[#allocation117_spill] sm:$0xff] %v14376_v8  ;;  %17032 = vst [vmem:[#allocation118_spill] sm:$0xff] %v14378_v63 }
 0x52d   : > { %4152 = vrot.lane.b32.xlu1 %v3795_v28, %s9621_s17 }
 0x52f   : > { %v14383_v23 = vpop.permute.xlu1 %4200  ;;  %v14385_v3 = vpop.permute.xlu0 %4134  ;;  %5655 = vrot.lane.b32.xlu0 %v5315_v0, %s9620_s16 }
 0x530   : > { %17033 = vst [vmem:[#allocation131_spill] sm:$0xff] %v14383_v23  ;;  %17034 = vst [vmem:[#allocation132_spill] sm:$0xff] %v14385_v3 }
 0x531   : > { %5721 = vrot.lane.b32.xlu1 %v3811_v57, %s9620_s16  ;;  %v5314_v57 = vld [vmem:[%s10228_s27 + $0x298] sm:$0xff] }
 0x533   : > { %v14391_v8 = vpop.permute.xlu1 %5707  ;;  %v14393_v63 = vpop.permute.xlu0 %5641  ;;  %4182 = vrot.lane.b32.xlu0 %v3810_v17, %s9621_s17 }
 0x534   : > { %17035 = vst [vmem:[#allocation136_spill] sm:$0xff] %v14391_v8  ;;  %17036 = vst [vmem:[#allocation137_spill] sm:$0xff] %v14393_v63  ;;  %v3809_v63 = vld [vmem:[%s10228_s27 + $0x398] sm:$0xff] }
 0x535   : > { %5623 = vrot.lane.b32.xlu1 %v5299_v49, %s9620_s16  ;;  %v5298_v49 = vld [vmem:[%s10228_s27 + $0x218] sm:$0xff] }
 0x537   : > { %v14398_v23 = vpop.permute.xlu1 %5671  ;;  %v14400_v3 = vpop.permute.xlu0 %4168  ;;  %5689 = vrot.lane.b32.xlu0 %v3795_v28, %s9620_s16  ;;  %v3793_v28 = vld [vmem:[%s10228_s27 + $0x318] sm:$0xff] }
 0x538   : > { %17037 = vst [vmem:[#allocation150_spill] sm:$0xff] %v14398_v23  ;;  %17038 = vst [vmem:[#allocation151_spill] sm:$0xff] %v14400_v3 }
 0x539   : > { %4150 = vrot.lane.b32.xlu1 %v3794_v53, %s9621_s17 }
 0x53b   : > { %v14405_v0 = vpop.permute.xlu1 %4132  ;;  %v14407_v8 = vpop.permute.xlu0 %5737  ;;  %5653 = vrot.lane.b32.xlu0 %v5314_v57, %s9620_s16 }
 0x53c   : > { %17039 = vst [vmem:[#allocation155_spill] sm:$0xff] %v14405_v0  ;;  %17040 = vst [vmem:[#allocation156_spill] sm:$0xff] %v14407_v8 }
 0x53d   : > { %5719 = vrot.lane.b32.xlu1 %v3810_v17, %s9620_s16  ;;  %v5313_v17 = vld [vmem:[%s10228_s27 + $0x290] sm:$0xff] }
 0x53f   : > { %v14413_v23 = vpop.permute.xlu1 %5639  ;;  %v14415_v3 = vpop.permute.xlu0 %4198  ;;  %4180 = vrot.lane.b32.xlu0 %v3809_v63, %s9621_s17 }
 0x540   : > { %17041 = vst [vmem:[#allocation169_spill] sm:$0xff] %v14413_v23  ;;  %17042 = vst [vmem:[#allocation170_spill] sm:$0xff] %v14415_v3  ;;  %v3808_v3 = vld [vmem:[%s10228_s27 + $0x390] sm:$0xff] }
 0x541   : > { %5621 = vrot.lane.b32.xlu1 %v5298_v49, %s9620_s16  ;;  %v5297_v49 = vld [vmem:[%s10228_s27 + $0x210] sm:$0xff] }
 0x543   : > { %v14420_v0 = vpop.permute.xlu1 %4166  ;;  %v14422_v8 = vpop.permute.xlu0 %5705  ;;  %5687 = vrot.lane.b32.xlu0 %v3794_v53, %s9620_s16  ;;  %v3792_v53 = vld [vmem:[%s10228_s27 + $0x310] sm:$0xff] }
 0x544   : > { %17043 = vst [vmem:[#allocation174_spill] sm:$0xff] %v14420_v0  ;;  %17044 = vst [vmem:[#allocation175_spill] sm:$0xff] %v14422_v8 }
 0x545   : > { %4148 = vrot.lane.b32.xlu1 %v3793_v28, %s9621_s17 }
 0x547   : > { %v14427_v57 = vpop.permute.xlu1 %5735  ;;  %v14429_v23 = vpop.permute.xlu0 %5669  ;;  %5651 = vrot.lane.b32.xlu0 %v5313_v17, %s9620_s16  ;;  %v9034_v17 = vld [vmem:[%s16614_s7 + $0xf8] sm:$0xff] }
 0x548   : > { %17045 = vst [vmem:[#allocation66_spill] sm:$0xff] %v14427_v57  ;;  %17046 = vst [vmem:[#allocation67_spill] sm:$0xff] %v14429_v23 }
 0x549   : > { %5717 = vrot.lane.b32.xlu1 %v3809_v63, %s9620_s16  ;;  %v5312_v63 = vld [vmem:[%s10228_s27 + $0x288] sm:$0xff] }
 0x54b   : > { %v14435_v13 = vpop.permute.xlu1 %4196  ;;  %v14437_v0 = vpop.permute.xlu0 %4130  ;;  %4178 = vrot.lane.b32.xlu0 %v3808_v3, %s9621_s17 }
 0x54c   : > { %17047 = vst [vmem:[#allocation70_spill] sm:$0xff] %v14435_v13  ;;  %17048 = vst [vmem:[#allocation78_spill] sm:$0xff] %v14437_v0  ;;  %v4365_v0 = vmul.f32 %v9034_v17, %v13867_v19  ;;  %v5296_v19 = vld [vmem:[%s10228_s27 + $0x208] sm:$0xff] }
 0x54d   : > { %5619 = vrot.lane.b32.xlu1 %v5297_v49, %s9620_s16 }
 0x54f   : > { %v14442_v8 = vpop.permute.xlu1 %5703  ;;  %v14444_v57 = vpop.permute.xlu0 %5637  ;;  %5685 = vrot.lane.b32.xlu0 %v3793_v28, %s9620_s16  ;;  %v9035_v28 = vld [vmem:[%s16615_s29 + $0xf8] sm:$0xff] }
 0x550   : > { %17049 = vst [vmem:[#allocation77_spill] sm:$0xff] %v14442_v8  ;;  %17050 = vst [vmem:[#allocation80_spill] sm:$0xff] %v14444_v57  ;;  %v3807_v57 = vld [vmem:[%s10228_s27 + $0x388] sm:$0xff]  ;;  %v4493_v8 = vadd.f32 %v9035_v28, %v4365_v0  ;;  %v9037_v0 = vld [vmem:[%s16615_s29 + $0x78] sm:$0xff] }
 0x551   : > { %4146 = vrot.lane.b32.xlu1 %v3792_v53, %s9621_s17 }
 0x553   : > { %v14453_v49 = vpop.permute.xlu1 %5667  ;;  %v14455_v13 = vpop.permute.xlu0 %4164  ;;  %5649 = vrot.lane.b32.xlu0 %v5312_v63, %s9620_s16  ;;  %v17055_v63 = vld [vmem:[#allocation106_spill] sm:$0xff] }
 0x554   : > { %17051 = vst [vmem:[#allocation79_spill] sm:$0xff] %v14453_v49  ;;  %17052 = vst [vmem:[#allocation31_spill] sm:$0xff] %v14455_v13 }
 0x555   : > { %5715 = vrot.lane.b32.xlu1 %v3808_v3, %s9620_s16  ;;  %v9036_v3 = vld [vmem:[%s16614_s7 + $0x78] sm:$0xff] }
 0x556   : > { %v4349_v49 = vmul.f32 %v9036_v3, %v17055_v63  ;;  %v5311_v63 = vld [vmem:[%s10228_s27 + $0x280] sm:$0xff] }
 0x557   : > { %v14463_v23 = vpop.permute.xlu1 %4128  ;;  %v14465_v35 = vpop.permute.xlu0 %5733  ;;  %4176 = vrot.lane.b32.xlu0 %v3807_v57, %s9621_s17 }
 0x558   : > { %17053 = vst [vmem:[#allocation83_spill] sm:$0xff] %v14463_v23  ;;  %17054 = vst [vmem:[#allocation33_spill] sm:$0xff] %v14465_v35  ;;  %v4477_v23 = vadd.f32 %v9037_v0, %v4349_v49  ;;  %v3806_v49 = vld [vmem:[%s10228_s27 + $0x380] sm:$0xff] }
 0x559   : > { %4780 = vrot.lane.b32.xlu1 %v4493_v8, %s9621_s17  ;;  %v3791_v8 = vld [vmem:[%s10228_s27 + $0x308] sm:$0xff] }
 0x55b   : > { %v14474_v13 = vpop.permute.xlu1 %5635  ;;  %v14476_v60 = vpop.permute.xlu0 %4194  ;;  %5617 = vrot.lane.b32.xlu0 %v5296_v19, %s9620_s16 }
 0x55c   : > { %17056 = vst [vmem:[#allocation32_spill] sm:$0xff] %v14474_v13  ;;  %17057 = vst [vmem:[#allocation86_spill] sm:$0xff] %v14476_v60  ;;  %v5902_v13 = vmul.f32 %v9034_v17, %v14093_v31  ;;  %v9039_v31 = vld [vmem:[%s16614_s7 + $0x1f8] sm:$0xff] }
 0x55d   : > { %5683 = vrot.lane.b32.xlu1 %v3792_v53, %s9620_s16  ;;  %v4397_v17 = vmul.f32 %v9039_v31, %v13995_v39 }
 0x55f   : > { %v14484_v35 = vpop.permute.xlu1 %4162  ;;  %v14486_v30 = vpop.permute.xlu0 %5701  ;;  %4144 = vrot.lane.b32.xlu0 %v3791_v8, %s9621_s17 }
 0x560   : > { %17058 = vst [vmem:[#allocation34_spill] sm:$0xff] %v14484_v35  ;;  %17059 = vst [vmem:[#allocation87_spill] sm:$0xff] %v14486_v30  ;;  %v9038_v35 = vld [vmem:[%s16614_s7 + $0xf0] sm:$0xff]  ;;  %v9041_v30 = vld [vmem:[%s16615_s29 + $0x1f8] sm:$0xff] }
 0x561   : > { %4748 = vrot.lane.b32.xlu1 %v4477_v23, %s9621_s17  ;;  %v4364_v23 = vmul.f32 %v9038_v35, %v13869_v45  ;;  %v9040_v45 = vld [vmem:[%s16615_s29 + $0xf0] sm:$0xff]  ;;  %v4525_v39 = vadd.f32 %v9041_v30, %v4397_v17 }
 0x562   : > { %v9042_v17 = vld [vmem:[%s16614_s7 + $0x70] sm:$0xff] }
 0x563   : > { %v14492_v53 = vpop.permute.xlu1 %5731  ;;  %v14494_v19 = vpop.permute.xlu0 %5665  ;;  %5647 = vrot.lane.b32.xlu0 %v5311_v63, %s9620_s16  ;;  %v4492_v63 = vadd.f32 %v9040_v45, %v4364_v23  ;;  %v3790_v23 = vld [vmem:[%s10228_s27 + $0x300] sm:$0xff] }
 0x564   : > { %17060 = vst [vmem:[#allocation35_spill] sm:$0xff] %v14492_v53  ;;  %17061 = vst [vmem:[#allocation89_spill] sm:$0xff] %v14494_v19  ;;  %v6030_v53 = vadd.f32 %v9035_v28, %v5902_v13 }
 0x565   : > { %5713 = vrot.lane.b32.xlu1 %v3807_v57, %s9620_s16 }
 0x567   : > { %v14507_v19 = vpop.permute.xlu1 %4192  ;;  %v14509_v57 = vpop.permute.xlu0 %4126  ;;  %6317 = vrot.lane.b32.xlu0 %v6030_v53, %s9619_s23  ;;  %v5886_v53 = vmul.f32 %v9036_v3, %v14102_v10 }
 0x568   : > { %17062 = vst [vmem:[#allocation110_spill] sm:$0xff] %v14507_v19  ;;  %17063 = vst [vmem:[#allocation106_spill] sm:$0xff] %v14509_v57  ;;  %v5295_v57 = vld [vmem:[%s10228_s27 + $0x200] sm:$0xff]  ;;  %s8383_s27 = sshll.u32 %s17269_s0, 5 }
 0x569   : > { %4174 = vrot.lane.b32.xlu1 %v3806_v49, %s9621_s17  ;;  %v6014_v3 = vadd.f32 %v9037_v0, %v5886_v53  ;;  %s16227_s5 = scalar_lea.vmem %s16513_s15, %s8383_s27 }
 0x56b   : > { %v14519_v13 = vpop.permute.xlu1 %5699  ;;  %v14521_v28 = vpop.permute.xlu0 %5633  ;;  %4778 = vrot.lane.b32.xlu0 %v4492_v63, %s9621_s17  ;;  %v9043_v63 = vld [vmem:[%s16614_s7 + $0x178] sm:$0xff] }
 0x56c   : > { %17064 = vst [vmem:[#allocation176_spill] sm:$0xff] %v14519_v13  ;;  %17065 = vst [vmem:[#allocation177_spill] sm:$0xff] %v14521_v28  ;;  %v17068_v28 = vld [vmem:[#allocation109_spill] sm:$0xff]  ;;  %v4381_v10 = vmul.f32 %v9043_v63, %v13931_v18  ;;  %v5901_v18 = vmul.f32 %v9038_v35, %v14100_v2  ;;  %v9047_v2 = vld [vmem:[%s16615_s29 + $0xe8] sm:$0xff] }
 0x56d   : > { %4844 = vrot.lane.b32.xlu1 %v4525_v39, %s9621_s17  ;;  %v4348_v39 = vmul.f32 %v9042_v17, %v17068_v28  ;;  %v9045_v28 = vld [vmem:[%s16615_s29 + $0x178] sm:$0xff] }
 0x56e   : > { %v4509_v13 = vadd.f32 %v9045_v28, %v4381_v10 }
 0x56f   : > { %v14527_v19 = vpop.permute.xlu1 %5663  ;;  %v14529_v60 = vpop.permute.xlu0 %4160  ;;  %5615 = vrot.lane.b32.xlu0 %v5295_v57, %s9620_s16 }
 0x570   : > { %17066 = vst [vmem:[#allocation178_spill] sm:$0xff] %v14527_v19  ;;  %17067 = vst [vmem:[#allocation179_spill] sm:$0xff] %v14529_v60 }
 0x571   : > { %5681 = vrot.lane.b32.xlu1 %v3791_v8, %s9620_s16  ;;  %v9044_v8 = vld [vmem:[%s16615_s29 + $0x70] sm:$0xff] }
 0x572   : > { %v4476_v57 = vadd.f32 %v9044_v8, %v4348_v39 }
 0x573   : > { %v14542_v19 = vpop.permute.xlu1 %4124  ;;  %v14544_v60 = vpop.permute.xlu0 %5729  ;;  %6285 = vrot.lane.b32.xlu0 %v6014_v3, %s9619_s23  ;;  %v9046_v3 = vld [vmem:[%s16614_s7 + $0xe8] sm:$0xff] }
 0x574   : > { %17069 = vst [vmem:[#allocation109_spill] sm:$0xff] %v14542_v19  ;;  %17070 = vst [vmem:[#allocation180_spill] sm:$0xff] %v14544_v60  ;;  %v4363_v39 = vmul.f32 %v9046_v3, %v13860_v25  ;;  %v6029_v19 = vadd.f32 %v9040_v45, %v5901_v18  ;;  %v5934_v60 = vmul.f32 %v9039_v31, %v14111_v46  ;;  %v9048_v25 = vld [vmem:[%s16614_s7 + $0x1f0] sm:$0xff] }
 0x575   : > { %4142 = vrot.lane.b32.xlu1 %v3790_v23, %s9621_s17  ;;  %v4396_v45 = vmul.f32 %v9048_v25, %v13997_v24  ;;  %v5885_v18 = vmul.f32 %v9042_v17, %v14109_v4  ;;  %v17072_v24 = vld [vmem:[#allocation104_spill] sm:$0xff] }
 0x576   : > { %v6062_v46 = vadd.f32 %v9041_v30, %v5934_v60  ;;  %v9050_v30 = vld [vmem:[%s16614_s7 + $0x68] sm:$0xff]  ;;  %v9051_v4 = vld [vmem:[%s16614_s7 + $0x170] sm:$0xff] }
 0x577   : > { %v14555_v0 = vpop.permute.xlu1 %5631  ;;  %v14557_v53 = vpop.permute.xlu0 %4190  ;;  %4746 = vrot.lane.b32.xlu0 %v4476_v57, %s9621_s17  ;;  %v6013_v17 = vadd.f32 %v9044_v8, %v5885_v18  ;;  %v5900_v8 = vmul.f32 %v9046_v3, %v14115_v54  ;;  %v9055_v54 = vld [vmem:[%s16614_s7 + $0x1e8] sm:$0xff] }
 0x579   : > { %4812 = vrot.lane.b32.xlu1 %v4509_v13, %s9621_s17  ;;  %v4491_v13 = vadd.f32 %v9047_v2, %v4363_v39  ;;  %v5918_v39 = vmul.f32 %v9043_v63, %v14117_v41  ;;  %v4380_v41 = vmul.f32 %v9051_v4, %v13933_v48  ;;  %v6028_v3 = vadd.f32 %v9047_v2, %v5900_v8 }
 0x57a   : > { %v5884_v2 = vmul.f32 %v9050_v30, %v14124_v42  ;;  %v9059_v42 = vld [vmem:[%s16614_s7 + $0x168] sm:$0xff] }
 0x57b   : > { %v14566_v10 = vpop.permute.xlu1 %4158  ;;  %v14568_v35 = vpop.permute.xlu0 %5697  ;;  %5711 = vrot.lane.b32.xlu0 %v3806_v49, %s9620_s16  ;;  %v6046_v63 = vadd.f32 %v9045_v28, %v5918_v39  ;;  %v5933_v28 = vmul.f32 %v9048_v25, %v14126_v15  ;;  %v4395_v15 = vmul.f32 %v9055_v54, %v13987_v37 }
 0x57c   : > { %17071 = vst [vmem:[#allocation181_spill] sm:$0xff] %v14566_v10 }
 0x57d   : > { %6315 = vrot.lane.b32.xlu1 %v6029_v19, %s9619_s23  ;;  %v9049_v19 = vld [vmem:[%s16615_s29 + $0x1f0] sm:$0xff] }
 0x57e   : > { %v4524_v49 = vadd.f32 %v9049_v19, %v4396_v45  ;;  %v6061_v25 = vadd.f32 %v9049_v19, %v5933_v28  ;;  %v5917_v19 = vmul.f32 %v9051_v4, %v14133_v14  ;;  %v4379_v14 = vmul.f32 %v9059_v42, %v13923_v26 }
 0x57f   : > { %v14579_v31 = vpop.permute.xlu1 %5727  ;;  %v14581_v57 = vpop.permute.xlu0 %5661  ;;  %6381 = vrot.lane.b32.xlu0 %v6062_v46, %s9619_s23 }
 0x581   : > { %4776 = vrot.lane.b32.xlu1 %v4491_v13, %s9621_s17  ;;  %v4347_v13 = vmul.f32 %v9050_v30, %v17072_v24  ;;  %v9053_v24 = vld [vmem:[%s16615_s29 + $0x170] sm:$0xff] }
 0x582   : > { %v4508_v48 = vadd.f32 %v9053_v24, %v4380_v41  ;;  %v6045_v4 = vadd.f32 %v9053_v24, %v5917_v19  ;;  %v5932_v24 = vmul.f32 %v9055_v54, %v14141_v34 }
 0x583   : > { %v14590_v10 = vpop.permute.xlu1 %5629  ;;  %v14592_v60 = vpop.permute.xlu0 %4188  ;;  %4842 = vrot.lane.b32.xlu0 %v4524_v49, %s9621_s17 }
 0x585   : > { %5679 = vrot.lane.b32.xlu1 %v3790_v23, %s9620_s16  ;;  %v9052_v23 = vld [vmem:[%s16615_s29 + $0x68] sm:$0xff] }
 0x586   : > { %v4475_v49 = vadd.f32 %v9052_v23, %v4347_v13  ;;  %v9054_v13 = vld [vmem:[%s16614_s7 + $0xe0] sm:$0xff]  ;;  %v6012_v30 = vadd.f32 %v9052_v23, %v5884_v2 }
 0x587   : > { %v14604_v45 = vpop.permute.xlu1 %4156  ;;  %v14606_v46 = vpop.permute.xlu0 %5695  ;;  %6283 = vrot.lane.b32.xlu0 %v6013_v17, %s9619_s23  ;;  %v4362_v17 = vmul.f32 %v9054_v13, %v13862_v9  ;;  %v9056_v9 = vld [vmem:[%s16615_s29 + $0xe0] sm:$0xff]  ;;  %v5899_v23 = vmul.f32 %v9054_v13, %v14131_v38 }
 0x588   : > { %v9063_v38 = vld [vmem:[%s16614_s7 + $0x1e0] sm:$0xff] }
 0x589   : > { %6349 = vrot.lane.b32.xlu1 %v6046_v63, %s9619_s23  ;;  %v4394_v34 = vmul.f32 %v9063_v38, %v13989_v1  ;;  %v6027_v13 = vadd.f32 %v9056_v9, %v5899_v23 }
 0x58b   : > { %v14618_v18 = vpop.permute.xlu1 %5725  ;;  %v14620_v39 = vpop.permute.xlu0 %5659  ;;  %4744 = vrot.lane.b32.xlu0 %v4475_v49, %s9621_s17  ;;  %v4490_v49 = vadd.f32 %v9056_v9, %v4362_v17  ;;  %v9058_v17 = vld [vmem:[%s16614_s7 + $0x60] sm:$0xff] }
 0x58c   : > { %v5883_v9 = vmul.f32 %v9058_v17, %v14139_v56  ;;  %v9067_v56 = vld [vmem:[%s16614_s7 + $0x160] sm:$0xff] }
 0x58d   : > { %4810 = vrot.lane.b32.xlu1 %v4508_v48, %s9621_s17  ;;  %v9057_v48 = vld [vmem:[%s16615_s29 + $0x1e8] sm:$0xff] }
 0x58e   : > { %v4523_v37 = vadd.f32 %v9057_v48, %v4395_v15  ;;  %v6060_v54 = vadd.f32 %v9057_v48, %v5932_v24  ;;  %v5916_v48 = vmul.f32 %v9059_v42, %v14148_v62  ;;  %v4378_v62 = vmul.f32 %v9067_v56, %v13925_v27 }
 0x58f   : > { %v14632_v41 = vpop.permute.xlu1 %5627  ;;  %v14634_v63 = vpop.permute.xlu0 %4186  ;;  %6313 = vrot.lane.b32.xlu0 %v6028_v3, %s9619_s23  ;;  %v17074_v3 = vld [vmem:[#allocation107_spill] sm:$0xff] }
 0x591   : > { %6379 = vrot.lane.b32.xlu1 %v6061_v25, %s9619_s23  ;;  %v4346_v25 = vmul.f32 %v9058_v17, %v17074_v3  ;;  %v9061_v3 = vld [vmem:[%s16615_s29 + $0x168] sm:$0xff] }
 0x592   : > { %v4507_v26 = vadd.f32 %v9061_v3, %v4379_v14  ;;  %v6044_v42 = vadd.f32 %v9061_v3, %v5916_v48  ;;  %v5931_v3 = vmul.f32 %v9063_v38, %v14155_v7 }
 0x593   : > { %v14646_v8 = vpop.permute.xlu1 %4154  ;;  %v14648_v28 = vpop.permute.xlu0 %5693  ;;  %4774 = vrot.lane.b32.xlu0 %v4490_v49, %s9621_s17  ;;  %v9060_v49 = vld [vmem:[%s16615_s29 + $0x60] sm:$0xff] }
 0x594   : > { %17073 = vst [vmem:[#allocation104_spill] sm:$0xff] %v14646_v8  ;;  %v6011_v17 = vadd.f32 %v9060_v49, %v5883_v9 }
 0x595   : > { %4840 = vrot.lane.b32.xlu1 %v4523_v37, %s9621_s17  ;;  %v4474_v37 = vadd.f32 %v9060_v49, %v4346_v25  ;;  %v9062_v25 = vld [vmem:[%s16614_s7 + $0xd8] sm:$0xff] }
 0x596   : > { %v5898_v49 = vmul.f32 %v9062_v25, %v14146_v29  ;;  %v9071_v29 = vld [vmem:[%s16614_s7 + $0x1d8] sm:$0xff] }
 0x597   : > { %v14660_v15 = vpop.permute.xlu1 %5723  ;;  %v14662_v8 = vpop.permute.xlu0 %5657  ;;  %6281 = vrot.lane.b32.xlu0 %v6012_v30, %s9619_s23  ;;  %v4361_v30 = vmul.f32 %v9062_v25, %v13853_v36  ;;  %v9064_v36 = vld [vmem:[%s16615_s29 + $0xd8] sm:$0xff]  ;;  %v4393_v7 = vmul.f32 %v9071_v29, %v13979_v33 }
 0x598   : > { %v6026_v25 = vadd.f32 %v9064_v36, %v5898_v49 }
 0x599   : > { %6347 = vrot.lane.b32.xlu1 %v6045_v4, %s9619_s23 }
 0x59b   : > { %v14674_v2 = vpop.permute.xlu1 %5625  ;;  %v14676_v19 = vpop.permute.xlu0 %4184  ;;  %4742 = vrot.lane.b32.xlu0 %v4474_v37, %s9621_s17  ;;  %v4489_v37 = vadd.f32 %v9064_v36, %v4361_v30  ;;  %v9066_v30 = vld [vmem:[%s16614_s7 + $0x58] sm:$0xff] }
 0x59c   : > { %v5882_v36 = vmul.f32 %v9066_v30, %v14153_v52  ;;  %v9075_v52 = vld [vmem:[%s16614_s7 + $0x158] sm:$0xff] }
 0x59d   : > { %4808 = vrot.lane.b32.xlu1 %v4507_v26, %s9621_s17  ;;  %v9065_v26 = vld [vmem:[%s16615_s29 + $0x1e0] sm:$0xff] }
 0x59e   : > { %v4522_v1 = vadd.f32 %v9065_v26, %v4394_v34  ;;  %v6059_v38 = vadd.f32 %v9065_v26, %v5931_v3  ;;  %v5915_v26 = vmul.f32 %v9067_v56, %v14163_v6  ;;  %v4377_v6 = vmul.f32 %v9075_v52, %v13915_v21 }
 0x59f   : > { %v14688_v14 = vpop.permute.xlu1 %4152  ;;  %v14690_v4 = vpop.permute.xlu0 %5691  ;;  %6311 = vrot.lane.b32.xlu0 %v6027_v13, %s9619_s23  ;;  %v17076_v13 = vld [vmem:[#allocation102_spill] sm:$0xff] }
 0x5a1   : > { %6377 = vrot.lane.b32.xlu1 %v6060_v54, %s9619_s23  ;;  %v4345_v54 = vmul.f32 %v9066_v30, %v17076_v13  ;;  %v9069_v13 = vld [vmem:[%s16615_s29 + $0x160] sm:$0xff] }
 0x5a2   : > { %v4506_v27 = vadd.f32 %v9069_v13, %v4378_v62  ;;  %v6043_v56 = vadd.f32 %v9069_v13, %v5915_v26  ;;  %v5930_v13 = vmul.f32 %v9071_v29, %v14169_v47 }
 0x5a3   : > { %v14702_v23 = vpop.permute.xlu1 %5721  ;;  %v14704_v24 = vpop.permute.xlu0 %5655  ;;  %4772 = vrot.lane.b32.xlu0 %v4489_v37, %s9621_s17  ;;  %v9068_v37 = vld [vmem:[%s16615_s29 + $0x58] sm:$0xff] }
 0x5a4   : > { %17075 = vst [vmem:[#allocation107_spill] sm:$0xff] %v14704_v24  ;;  %v6010_v30 = vadd.f32 %v9068_v37, %v5882_v36 }
 0x5a5   : > { %4838 = vrot.lane.b32.xlu1 %v4522_v1, %s9621_s17  ;;  %v4473_v1 = vadd.f32 %v9068_v37, %v4345_v54  ;;  %v9070_v54 = vld [vmem:[%s16614_s7 + $0xd0] sm:$0xff] }
 0x5a6   : > { %v5897_v37 = vmul.f32 %v9070_v54, %v14161_v22  ;;  %v9079_v22 = vld [vmem:[%s16614_s7 + $0x1d0] sm:$0xff] }
 0x5a7   : > { %v14716_v34 = vpop.permute.xlu1 %5623  ;;  %v14718_v24 = vpop.permute.xlu0 %4182  ;;  %6279 = vrot.lane.b32.xlu0 %v6011_v17, %s9619_s23  ;;  %v4360_v17 = vmul.f32 %v9070_v54, %v13855_v58  ;;  %v9072_v58 = vld [vmem:[%s16615_s29 + $0xd0] sm:$0xff]  ;;  %v4392_v47 = vmul.f32 %v9079_v22, %v13981_v5 }
 0x5a8   : > { %v6025_v54 = vadd.f32 %v9072_v58, %v5897_v37 }
 0x5a9   : > { %6345 = vrot.lane.b32.xlu1 %v6044_v42, %s9619_s23 }
 0x5ab   : > { %v14730_v9 = vpop.permute.xlu1 %4150  ;;  %v14732_v48 = vpop.permute.xlu0 %5689  ;;  %4740 = vrot.lane.b32.xlu0 %v4473_v1, %s9621_s17  ;;  %v4488_v1 = vadd.f32 %v9072_v58, %v4360_v17  ;;  %v9074_v17 = vld [vmem:[%s16614_s7 + $0x50] sm:$0xff] }
 0x5ac   : > { %v5881_v58 = vmul.f32 %v9074_v17, %v14167_v55  ;;  %v9083_v55 = vld [vmem:[%s16614_s7 + $0x150] sm:$0xff] }
 0x5ad   : > { %4806 = vrot.lane.b32.xlu1 %v4506_v27, %s9621_s17  ;;  %v9073_v27 = vld [vmem:[%s16615_s29 + $0x1d8] sm:$0xff] }
 0x5ae   : > { %v4521_v33 = vadd.f32 %v9073_v27, %v4393_v7  ;;  %v6058_v29 = vadd.f32 %v9073_v27, %v5930_v13  ;;  %v5914_v27 = vmul.f32 %v9075_v52, %v14177_v61  ;;  %v4376_v61 = vmul.f32 %v9083_v55, %v13917_v50  ;;  %v9085_v50 = vld [vmem:[%s16615_s29 + $0x150] sm:$0xff] }
 0x5af   : > { %v14744_v62 = vpop.permute.xlu1 %5719  ;;  %v14746_v42 = vpop.permute.xlu0 %5653  ;;  %6309 = vrot.lane.b32.xlu0 %v6026_v25, %s9619_s23  ;;  %v17078_v25 = vld [vmem:[#allocation105_spill] sm:$0xff] }
 0x5b1   : > { %6375 = vrot.lane.b32.xlu1 %v6059_v38, %s9619_s23  ;;  %v4344_v38 = vmul.f32 %v9074_v17, %v17078_v25  ;;  %v9077_v25 = vld [vmem:[%s16615_s29 + $0x158] sm:$0xff] }
 0x5b2   : > { %v4505_v21 = vadd.f32 %v9077_v25, %v4377_v6  ;;  %v6042_v52 = vadd.f32 %v9077_v25, %v5914_v27 }
 0x5b3   : > { %v14758_v49 = vpop.permute.xlu1 %5621  ;;  %v14760_v3 = vpop.permute.xlu0 %4180  ;;  %4770 = vrot.lane.b32.xlu0 %v4488_v1, %s9621_s17  ;;  %v9076_v1 = vld [vmem:[%s16615_s29 + $0x50] sm:$0xff] }
 0x5b4   : > { %17077 = vst [vmem:[#allocation102_spill] sm:$0xff] %v14758_v49  ;;  %v6009_v17 = vadd.f32 %v9076_v1, %v5881_v58  ;;  %v5929_v58 = vmul.f32 %v9079_v22, %v14183_v16 }
 0x5b5   : > { %4836 = vrot.lane.b32.xlu1 %v4521_v33, %s9621_s17  ;;  %v4472_v33 = vadd.f32 %v9076_v1, %v4344_v38  ;;  %v9078_v38 = vld [vmem:[%s16614_s7 + $0xc8] sm:$0xff]  ;;  %v4504_v1 = vadd.f32 %v9085_v50, %v4376_v61 }
 0x5b6   : > { %v5896_v25 = vmul.f32 %v9078_v38, %v14175_v40  ;;  %v9087_v40 = vld [vmem:[%s16614_s7 + $0x1c8] sm:$0xff] }
 0x5b7   : > { %v14772_v7 = vpop.permute.xlu1 %4148  ;;  %v14774_v49 = vpop.permute.xlu0 %5687  ;;  %6277 = vrot.lane.b32.xlu0 %v6010_v30, %s9619_s23  ;;  %v4359_v30 = vmul.f32 %v9078_v38, %v13845_v32  ;;  %v9080_v32 = vld [vmem:[%s16615_s29 + $0xc8] sm:$0xff]  ;;  %v4391_v16 = vmul.f32 %v9087_v40, %v13971_v59 }
 0x5b8   : > { %v6024_v38 = vadd.f32 %v9080_v32, %v5896_v25 }
 0x5b9   : > { %6343 = vrot.lane.b32.xlu1 %v6043_v56, %s9619_s23 }
 0x5bb   : > { %v14786_v36 = vpop.permute.xlu1 %5717  ;;  %v14788_v26 = vpop.permute.xlu0 %5651  ;;  %4738 = vrot.lane.b32.xlu0 %v4472_v33, %s9621_s17  ;;  %v4487_v33 = vadd.f32 %v9080_v32, %v4359_v30  ;;  %v9082_v30 = vld [vmem:[%s16614_s7 + $0x48] sm:$0xff] }
 0x5bc   : > { %v5880_v32 = vmul.f32 %v9082_v30, %v14181_v12  ;;  %v9091_v12 = vld [vmem:[%s16614_s7 + $0x148] sm:$0xff] }
 0x5bd   : > { %4804 = vrot.lane.b32.xlu1 %v4505_v21, %s9621_s17  ;;  %v9081_v21 = vld [vmem:[%s16615_s29 + $0x1d0] sm:$0xff] }
 0x5be   : > { %v4520_v5 = vadd.f32 %v9081_v21, %v4392_v47  ;;  %v6057_v22 = vadd.f32 %v9081_v21, %v5929_v58  ;;  %v5913_v21 = vmul.f32 %v9083_v55, %v14191_v51  ;;  %v4375_v51 = vmul.f32 %v9091_v12, %v13907_v11  ;;  %v9093_v11 = vld [vmem:[%s16615_s29 + $0x148] sm:$0xff] }
 0x5bf   : > { %v14800_v6 = vpop.permute.xlu1 %5619  ;;  %v14802_v56 = vpop.permute.xlu0 %4178  ;;  %6307 = vrot.lane.b32.xlu0 %v6025_v54, %s9619_s23  ;;  %v17080_v54 = vld [vmem:[#allocation100_spill] sm:$0xff] }
 0x5c0   : > { %v6041_v55 = vadd.f32 %v9085_v50, %v5913_v21 }
 0x5c1   : > { %6373 = vrot.lane.b32.xlu1 %v6058_v29, %s9619_s23  ;;  %v4343_v29 = vmul.f32 %v9082_v30, %v17080_v54 }
 0x5c3   : > { %v14814_v37 = vpop.permute.xlu1 %4146  ;;  %v14816_v13 = vpop.permute.xlu0 %5685  ;;  %4768 = vrot.lane.b32.xlu0 %v4487_v33, %s9621_s17  ;;  %v9084_v33 = vld [vmem:[%s16615_s29 + $0x48] sm:$0xff] }
 0x5c4   : > { %17079 = vst [vmem:[#allocation105_spill] sm:$0xff] %v14814_v37  ;;  %v6008_v30 = vadd.f32 %v9084_v33, %v5880_v32  ;;  %v5928_v32 = vmul.f32 %v9087_v40, %v14198_v44  ;;  %v17087_v44 = vld [vmem:[#allocation142_spill] sm:$0xff] }
 0x5c5   : > { %4834 = vrot.lane.b32.xlu1 %v4520_v5, %s9621_s17  ;;  %v4471_v5 = vadd.f32 %v9084_v33, %v4343_v29  ;;  %v9086_v29 = vld [vmem:[%s16614_s7 + $0xc0] sm:$0xff]  ;;  %v4503_v33 = vadd.f32 %v9093_v11, %v4375_v51 }
 0x5c6   : > { %v5895_v50 = vmul.f32 %v9086_v29, %v14189_v20  ;;  %v9095_v20 = vld [vmem:[%s16614_s7 + $0x1c0] sm:$0xff] }
 0x5c7   : > { %v14828_v47 = vpop.permute.xlu1 %5715  ;;  %v14830_v37 = vpop.permute.xlu0 %5649  ;;  %6275 = vrot.lane.b32.xlu0 %v6009_v17, %s9619_s23  ;;  %v4358_v17 = vmul.f32 %v9086_v29, %v13847_v43  ;;  %v9088_v43 = vld [vmem:[%s16615_s29 + $0xc0] sm:$0xff]  ;;  %v4390_v29 = vmul.f32 %v9095_v20, %v17087_v44 }
 0x5c8   : > { %v6023_v40 = vadd.f32 %v9088_v43, %v5895_v50  ;;  %v17088_v50 = vld [vmem:[#allocation172_spill] sm:$0xff] }
 0x5c9   : > { %6341 = vrot.lane.b32.xlu1 %v6042_v52, %s9619_s23 }
 0x5cb   : > { %v4781_v27 = vpop.permute.xlu1 %4780  ;;  %v14842_v54 = vpop.permute.xlu0 %4176  ;;  %4736 = vrot.lane.b32.xlu0 %v4471_v5, %s9621_s17  ;;  %v4486_v5 = vadd.f32 %v9088_v43, %v4358_v17  ;;  %v17082_v17 = vld [vmem:[#allocation103_spill] sm:$0xff] }
 0x5cc   : > { %5134 = vst.msk [vmem:[#allocation2 + $0xf8] sm:$0xff] %vm5102_vm2, %v4781_v27  ;;  %v9090_v27 = vld [vmem:[%s16614_s7 + $0x40] sm:$0xff] }
 0x5cd   : > { %4802 = vrot.lane.b32.xlu1 %v4504_v1, %s9621_s17  ;;  %v9089_v1 = vld [vmem:[%s16615_s29 + $0x1c8] sm:$0xff]  ;;  %v9097_v43 = vld [vmem:[%s16615_s29 + $0x1c0] sm:$0xff] }
 0x5ce   : > { %v4519_v59 = vadd.f32 %v9089_v1, %v4391_v16  ;;  %v6056_v51 = vadd.f32 %v9089_v1, %v5928_v32  ;;  %v4518_v1 = vadd.f32 %v9097_v43, %v4390_v29  ;;  %v5879_v32 = vmul.f32 %v9090_v27, %v17088_v50 }
 0x5cf   : > { %v14855_v61 = vpop.permute.xlu1 %5683  ;;  %v14857_v52 = vpop.permute.xlu0 %5617  ;;  %6305 = vrot.lane.b32.xlu0 %v6024_v38, %s9619_s23  ;;  %v4342_v38 = vmul.f32 %v9090_v27, %v17082_v17  ;;  %v9094_v17 = vld [vmem:[%s16614_s7 + $0xb8] sm:$0xff]  ;;  %v9099_v27 = vld [vmem:[%s16614_s7 + $0x140] sm:$0xff] }
 0x5d1   : > { %6371 = vrot.lane.b32.xlu1 %v6057_v22, %s9619_s23 }
 0x5d3   : > { %v4749_v25 = vpop.permute.xlu1 %4748  ;;  %v14869_v58 = vpop.permute.xlu0 %4144  ;;  %4766 = vrot.lane.b32.xlu0 %v4486_v5, %s9621_s17  ;;  %v9092_v5 = vld [vmem:[%s16615_s29 + $0x40] sm:$0xff] }
 0x5d4   : > { %17081 = vst [vmem:[#allocation100_spill] sm:$0xff] %v14869_v58  ;;  %5118 = vst.msk [vmem:[#allocation2 + $0x78] sm:$0xff] %vm5102_vm2, %v4749_v25 }
 0x5d5   : > { %4832 = vrot.lane.b32.xlu1 %v4519_v59, %s9621_s17  ;;  %v4470_v59 = vadd.f32 %v9092_v5, %v4342_v38  ;;  %v17086_v38 = vld [vmem:[#allocation121_spill] sm:$0xff] }
 0x5d7   : > { %v14882_v16 = vpop.permute.xlu1 %5713  ;;  %v14884_v22 = vpop.permute.xlu0 %5647  ;;  %6273 = vrot.lane.b32.xlu0 %v6008_v30, %s9619_s23  ;;  %v4357_v30 = vmul.f32 %v9094_v17, %v17086_v38  ;;  %v17089_v38 = vld [vmem:[#allocation39_spill] sm:$0xff] }
 0x5d8   : > { %17083 = vst [vmem:[#allocation103_spill] sm:$0xff] %v14882_v16  ;;  %17084 = vst [vmem:[#allocation182_spill] sm:$0xff] %v14884_v22  ;;  %v5912_v44 = vmul.f32 %v9091_v12, %v17089_v38  ;;  %v17093_v12 = vld [vmem:[#allocation133_spill] sm:$0xff]  ;;  %v6007_v38 = vadd.f32 %v9092_v5, %v5879_v32 }
 0x5d9   : > { %6339 = vrot.lane.b32.xlu1 %v6041_v55, %s9619_s23  ;;  %v4374_v50 = vmul.f32 %v9099_v27, %v17093_v12 }
 0x5db   : > { %v14896_v21 = vpop.permute.xlu1 %4174  ;;  %v6318_v25 = vpop.permute.xlu0 %6317  ;;  %4734 = vrot.lane.b32.xlu0 %v4470_v59, %s9621_s17  ;;  %v9096_v59 = vld [vmem:[%s16615_s29 + $0xb8] sm:$0xff] }
 0x5dc   : > { %17085 = vst [vmem:[#allocation183_spill] sm:$0xff] %v14896_v21  ;;  %6671 = vst.msk [vmem:[#allocation2 + $0xf8] sm:$0xff] %vm6639_vm3, %v6318_v25 }
 0x5dd   : > { %4800 = vrot.lane.b32.xlu1 %v4503_v33, %s9621_s17  ;;  %v4485_v33 = vadd.f32 %v9096_v59, %v4357_v30  ;;  %v9098_v30 = vld [vmem:[%s16614_s7 + $0x38] sm:$0xff] }
 0x5df   : > { %v4845_v55 = vpop.permute.xlu1 %4844  ;;  %v4779_v25 = vpop.permute.xlu0 %4778  ;;  %6303 = vrot.lane.b32.xlu0 %v6023_v40, %s9619_s23  ;;  %v17092_v40 = vld [vmem:[#allocation96_spill] sm:$0xff] }
 0x5e0   : > { %5166 = vst.msk [vmem:[#allocation2 + $0x1f8] sm:$0xff] %vm5102_vm2, %v4845_v55  ;;  %5133 = vst.msk [vmem:[#allocation2 + $0xf0] sm:$0xff] %vm5102_vm2, %v4779_v25  ;;  %v4341_v29 = vmul.f32 %v9098_v30, %v17092_v40  ;;  %v9101_v40 = vld [vmem:[%s16615_s29 + $0x140] sm:$0xff] }
 0x5e1   : > { %6369 = vrot.lane.b32.xlu1 %v6056_v51, %s9619_s23  ;;  %v4502_v5 = vadd.f32 %v9101_v40, %v4374_v50 }
 0x5e3   : > { %v14921_v55 = vpop.permute.xlu1 %5681  ;;  %v14923_v25 = vpop.permute.xlu0 %5615  ;;  %v6801_v51 = vld [vmem:[#allocation2 + $0xf8] sm:$0xff]  ;;  %4764 = vrot.lane.b32.xlu0 %v4485_v33, %s9621_s17 }
 0x5e4   : > { %17090 = vst [vmem:[#allocation121_spill] sm:$0xff] %v14921_v55  ;;  %17091 = vst [vmem:[#allocation142_spill] sm:$0xff] %v14923_v25  ;;  %8385 = vmatprep.subr.mxu0 %v6801_v51  ;;  %v6040_v55 = vadd.f32 %v9093_v11, %v5912_v44  ;;  %v9100_v33 = vld [vmem:[%s16615_s29 + $0x38] sm:$0xff] }
 0x5e5   : > { %4830 = vrot.lane.b32.xlu1 %v4518_v1, %s9621_s17  ;;  %v4469_v1 = vadd.f32 %v9100_v33, %v4341_v29  ;;  %v17095_v11 = vld [vmem:[#allocation37_spill] sm:$0xff]  ;;  %v17096_v44 = vld [vmem:[#allocation38_spill] sm:$0xff]  ;;  %v17097_v29 = vld [vmem:[#allocation120_spill] sm:$0xff] }
 0x5e6   : > { %v5894_v32 = vmul.f32 %v9094_v17, %v17095_v11  ;;  %v5927_v12 = vmul.f32 %v9095_v20, %v17096_v44  ;;  %v9103_v17 = vld [vmem:[%s16614_s7 + $0x1b8] sm:$0xff]  ;;  %v17098_v20 = vld [vmem:[#allocation140_spill] sm:$0xff] }
 0x5e7   : > { %v14935_v25 = vpop.permute.xlu1 %4142  ;;  %v6286_v51 = vpop.permute.xlu0 %6285  ;;  %6271 = vrot.lane.b32.xlu0 %v6007_v38, %s9619_s23  ;;  %v4389_v38 = vmul.f32 %v9103_v17, %v17098_v20  ;;  %v17101_v20 = vld [vmem:[#allocation41_spill] sm:$0xff] }
 0x5e8   : > { %17094 = vst [vmem:[#allocation172_spill] sm:$0xff] %v14935_v25  ;;  %6655 = vst.msk [vmem:[#allocation2 + $0x78] sm:$0xff] %vm6639_vm3, %v6286_v51  ;;  %v6022_v11 = vadd.f32 %v9096_v59, %v5894_v32  ;;  %v9105_v59 = vld [vmem:[%s16615_s29 + $0x1b8] sm:$0xff]  ;;  %v17100_v32 = vld [vmem:[#allocation36_spill] sm:$0xff] }
 0x5e9   : > { %6337 = vrot.lane.b32.xlu1 %v6040_v55, %s9619_s23  ;;  %v9102_v55 = vld [vmem:[%s16614_s7 + $0xb0] sm:$0xff] }
 0x5ea   : > { %v4356_v50 = vmul.f32 %v9102_v55, %v17097_v29 }
 0x5eb   : > { %v4813_v25 = vpop.permute.xlu1 %4812  ;;  %v4747_v51 = vpop.permute.xlu0 %4746  ;;  %4732 = vrot.lane.b32.xlu0 %v4469_v1, %s9621_s17  ;;  %v9104_v1 = vld [vmem:[%s16615_s29 + $0xb0] sm:$0xff] }
 0x5ec   : > { %5150 = vst.msk [vmem:[#allocation2 + $0x178] sm:$0xff] %vm5102_vm2, %v4813_v25  ;;  %5117 = vst.msk [vmem:[#allocation2 + $0x70] sm:$0xff] %vm5102_vm2, %v4747_v51  ;;  %v6055_v25 = vadd.f32 %v9097_v43, %v5927_v12  ;;  %v4484_v29 = vadd.f32 %v9104_v1, %v4356_v50  ;;  %v4517_v43 = vadd.f32 %v9105_v59, %v4389_v38  ;;  %v9106_v50 = vld [vmem:[%s16614_s7 + $0x30] sm:$0xff] }
 0x5ed   : > { %4798 = vrot.lane.b32.xlu1 %v4502_v5, %s9621_s17  ;;  %v5878_v12 = vmul.f32 %v9098_v30, %v17100_v32  ;;  %v9107_v30 = vld [vmem:[%s16614_s7 + $0x138] sm:$0xff] }
 0x5ef   : > { %v6316_v44 = vpop.permute.xlu1 %6315  ;;  %v14960_v51 = vpop.permute.xlu0 %5711  ;;  %v6785_v5 = vld [vmem:[#allocation2 + $0x78] sm:$0xff]  ;;  %6301 = vrot.lane.b32.xlu0 %v6022_v11, %s9619_s23  ;;  %v6006_v32 = vadd.f32 %v9100_v33, %v5878_v12 }
 0x5f0   : > { %17099 = vst [vmem:[#allocation39_spill] sm:$0xff] %v14960_v51  ;;  %6670 = vst.msk [vmem:[#allocation2 + $0xf0] sm:$0xff] %vm6639_vm3, %v6316_v44  ;;  %8386 = vmatpush3.msra.mxu0 %v6785_v5  ;;  %v5911_v51 = vmul.f32 %v9099_v27, %v17101_v20  ;;  %v17102_v11 = vld [vmem:[#allocation101_spill] sm:$0xff] }
 0x5f1   : > { %6367 = vrot.lane.b32.xlu1 %v6055_v25, %s9619_s23  ;;  %v4340_v38 = vmul.f32 %v9106_v50, %v17102_v11  ;;  %v17103_v27 = vld [vmem:[#allocation129_spill] sm:$0xff] }
 0x5f2   : > { %v4373_v25 = vmul.f32 %v9107_v30, %v17103_v27  ;;  %v6039_v20 = vadd.f32 %v9101_v40, %v5911_v51  ;;  %v9109_v33 = vld [vmem:[%s16615_s29 + $0x138] sm:$0xff]  ;;  %v17105_v51 = vld [vmem:[#allocation40_spill] sm:$0xff]  ;;  %v17106_v27 = vld [vmem:[#allocation43_spill] sm:$0xff] }
 0x5f3   : > { %v4777_v44 = vpop.permute.xlu1 %4776  ;;  %v6382_v5 = vpop.permute.xlu0 %6381  ;;  %4762 = vrot.lane.b32.xlu0 %v4484_v29, %s9621_s17  ;;  %v9108_v29 = vld [vmem:[%s16615_s29 + $0x30] sm:$0xff]  ;;  %v5893_v12 = vmul.f32 %v9102_v55, %v17105_v51 }
 0x5f4   : > { %5132 = vst.msk [vmem:[#allocation2 + $0xe8] sm:$0xff] %vm5102_vm2, %v4777_v44  ;;  %v4468_v11 = vadd.f32 %v9108_v29, %v4340_v38  ;;  %v4501_v40 = vadd.f32 %v9109_v33, %v4373_v25  ;;  %v9110_v38 = vld [vmem:[%s16614_s7 + $0xa8] sm:$0xff] }
 0x5f5   : > { %6703 = vst.msk [vmem:[#allocation2 + $0x1f8] sm:$0xff] %vm6639_vm3, %v6382_v5  ;;  %4828 = vrot.lane.b32.xlu1 %v4517_v43, %s9621_s17  ;;  %v17107_v25 = vld [vmem:[#allocation119_spill] sm:$0xff]  ;;  %v6021_v51 = vadd.f32 %v9104_v1, %v5893_v12  ;;  %v9113_v1 = vld [vmem:[%s16615_s29 + $0x1b0] sm:$0xff] }
 0x5f6   : > { %v4355_v55 = vmul.f32 %v9110_v38, %v17107_v25 }
 0x5f7   : > { %v14985_v44 = vpop.permute.xlu1 %5679  ;;  %v4843_v5 = vpop.permute.xlu0 %4842  ;;  %v6800_v43 = vld [vmem:[#allocation2 + $0xf0] sm:$0xff]  ;;  %6269 = vrot.lane.b32.xlu0 %v6006_v32, %s9619_s23  ;;  %v17108_v32 = vld [vmem:[#allocation143_spill] sm:$0xff] }
 0x5f8   : > { %17104 = vst [vmem:[#allocation96_spill] sm:$0xff] %v14985_v44  ;;  %5165 = vst.msk [vmem:[#allocation2 + $0x1f0] sm:$0xff] %vm5102_vm2, %v4843_v5  ;;  %8387 = vmatprep.subr.mxu0 %v6800_v43  ;;  %v5926_v44 = vmul.f32 %v9103_v17, %v17106_v27  ;;  %v9111_v17 = vld [vmem:[%s16614_s7 + $0x1b0] sm:$0xff] }
 0x5f9   : > { %6335 = vrot.lane.b32.xlu1 %v6039_v20, %s9619_s23  ;;  %v4388_v20 = vmul.f32 %v9111_v17, %v17108_v32 }
 0x5fa   : > { %v6054_v27 = vadd.f32 %v9105_v59, %v5926_v44  ;;  %v17109_v44 = vld [vmem:[#allocation42_spill] sm:$0xff] }
 0x5fb   : > { %v6350_v5 = vpop.permute.xlu1 %6349  ;;  %v6284_v43 = vpop.permute.xlu0 %6283  ;;  %4730 = vrot.lane.b32.xlu0 %v4468_v11, %s9621_s17  ;;  %v9112_v11 = vld [vmem:[%s16615_s29 + $0xa8] sm:$0xff]  ;;  %v4516_v59 = vadd.f32 %v9113_v1, %v4388_v20  ;;  %v5877_v12 = vmul.f32 %v9106_v50, %v17109_v44  ;;  %v9115_v20 = vld [vmem:[%s16614_s7 + $0x130] sm:$0xff] }
 0x5fc   : > { %v6833_v21 = vld [vmem:[#allocation2 + $0x1f8] sm:$0xff]  ;;  %6687 = vst.msk [vmem:[#allocation2 + $0x178] sm:$0xff] %vm6639_vm3, %v6350_v5  ;;  %6654 = vst.msk [vmem:[#allocation2 + $0x70] sm:$0xff] %vm6639_vm3, %v6284_v43  ;;  %v9114_v50 = vld [vmem:[%s16614_s7 + $0x28] sm:$0xff] }
 0x5fd   : > { %8420 = vmatprep.subr.mxu1 %v6833_v21  ;;  %4796 = vrot.lane.b32.xlu1 %v4501_v40, %s9621_s17  ;;  %v4483_v40 = vadd.f32 %v9112_v11, %v4355_v55  ;;  %v17110_v43 = vld [vmem:[#allocation45_spill] sm:$0xff]  ;;  %v17111_v55 = vld [vmem:[#allocation92_spill] sm:$0xff] }
 0x5fe   : > { %v5910_v25 = vmul.f32 %v9107_v30, %v17110_v43  ;;  %v4339_v30 = vmul.f32 %v9114_v50, %v17111_v55  ;;  %v6005_v43 = vadd.f32 %v9108_v29, %v5877_v12  ;;  %v9117_v29 = vld [vmem:[%s16615_s29 + $0x130] sm:$0xff] }
 0x5ff   : > { %v4811_v5 = vpop.permute.xlu1 %4810  ;;  %v4745_v21 = vpop.permute.xlu0 %4744  ;;  %6299 = vrot.lane.b32.xlu0 %v6021_v51, %s9619_s23  ;;  %v17112_v51 = vld [vmem:[#allocation128_spill] sm:$0xff] }
 0x600   : > { %5149 = vst.msk [vmem:[#allocation2 + $0x170] sm:$0xff] %vm5102_vm2, %v4811_v5  ;;  %5116 = vst.msk [vmem:[#allocation2 + $0x68] sm:$0xff] %vm5102_vm2, %v4745_v21  ;;  %v4372_v44 = vmul.f32 %v9115_v20, %v17112_v51  ;;  %v17113_v12 = vld [vmem:[#allocation44_spill] sm:$0xff] }
 0x601   : > { %6365 = vrot.lane.b32.xlu1 %v6054_v27, %s9619_s23 }
 0x603   : > { %v6380_v32 = vpop.permute.xlu1 %6379  ;;  %v6314_v5 = vpop.permute.xlu0 %6313  ;;  %v6784_v21 = vld [vmem:[#allocation2 + $0x70] sm:$0xff]  ;;  %v6817_v27 = vld [vmem:[#allocation2 + $0x178] sm:$0xff]  ;;  %4760 = vrot.lane.b32.xlu0 %v4483_v40, %s9621_s17  ;;  %v9116_v40 = vld [vmem:[%s16615_s29 + $0x28] sm:$0xff] }
 0x604   : > { %6702 = vst.msk [vmem:[#allocation2 + $0x1f0] sm:$0xff] %vm6639_vm3, %v6380_v32  ;;  %6669 = vst.msk [vmem:[#allocation2 + $0xe8] sm:$0xff] %vm6639_vm3, %v6314_v5  ;;  %8388 = vmatpush3.msra.mxu0 %v6784_v21  ;;  %8421 = vmatpush3.msra.mxu1 %v6817_v27  ;;  %v6038_v32 = vadd.f32 %v9109_v33, %v5910_v25  ;;  %v4500_v33 = vadd.f32 %v9117_v29, %v4372_v44  ;;  %v17114_v27 = vld [vmem:[#allocation47_spill] sm:$0xff] }
 0x605   : > { %4826 = vrot.lane.b32.xlu1 %v4516_v59, %s9621_s17  ;;  %v4467_v59 = vadd.f32 %v9116_v40, %v4339_v30  ;;  %v5892_v25 = vmul.f32 %v9110_v38, %v17113_v12  ;;  %v5925_v55 = vmul.f32 %v9111_v17, %v17114_v27  ;;  %v9118_v38 = vld [vmem:[%s16614_s7 + $0xa0] sm:$0xff]  ;;  %v17115_v30 = vld [vmem:[#allocation116_spill] sm:$0xff] }
 0x606   : > { %v4354_v17 = vmul.f32 %v9118_v38, %v17115_v30  ;;  %v9119_v44 = vld [vmem:[%s16614_s7 + $0x1a8] sm:$0xff] }
 0x607   : > { %v4841_v5 = vpop.permute.xlu1 %4840  ;;  %v4775_v21 = vpop.permute.xlu0 %4774  ;;  %6267 = vrot.lane.b32.xlu0 %v6005_v43, %s9619_s23  ;;  %v17116_v43 = vld [vmem:[#allocation138_spill] sm:$0xff]  ;;  %v6020_v27 = vadd.f32 %v9112_v11, %v5892_v25  ;;  %v9121_v11 = vld [vmem:[%s16615_s29 + $0x1a8] sm:$0xff] }
 0x608   : > { %5164 = vst.msk [vmem:[#allocation2 + $0x1e8] sm:$0xff] %vm5102_vm2, %v4841_v5  ;;  %5131 = vst.msk [vmem:[#allocation2 + $0xe0] sm:$0xff] %vm5102_vm2, %v4775_v21  ;;  %v4387_v12 = vmul.f32 %v9119_v44, %v17116_v43  ;;  %v17117_v25 = vld [vmem:[#allocation46_spill] sm:$0xff] }
 0x609   : > { %6333 = vrot.lane.b32.xlu1 %v6038_v32, %s9619_s23 }
 0x60b   : > { %v6348_v51 = vpop.permute.xlu1 %6347  ;;  %v6282_v5 = vpop.permute.xlu0 %6281  ;;  %v6799_v21 = vld [vmem:[#allocation2 + $0xe8] sm:$0xff]  ;;  %v6832_v32 = vld [vmem:[#allocation2 + $0x1f0] sm:$0xff]  ;;  %4728 = vrot.lane.b32.xlu0 %v4467_v59, %s9621_s17  ;;  %v9120_v59 = vld [vmem:[%s16615_s29 + $0xa0] sm:$0xff] }
 0x60c   : > { %6686 = vst.msk [vmem:[#allocation2 + $0x170] sm:$0xff] %vm6639_vm3, %v6348_v51  ;;  %6653 = vst.msk [vmem:[#allocation2 + $0x68] sm:$0xff] %vm6639_vm3, %v6282_v5  ;;  %8389 = vmatprep.subr.mxu0 %v6799_v21  ;;  %8422 = vmatprep.subr.mxu1 %v6832_v32  ;;  %v6053_v51 = vadd.f32 %v9113_v1, %v5925_v55  ;;  %v4515_v1 = vadd.f32 %v9121_v11, %v4387_v12  ;;  %v17118_v32 = vld [vmem:[#allocation49_spill] sm:$0xff]  ;;  %v9123_v12 = vld [vmem:[%s16614_s7 + $0x128] sm:$0xff] }
 0x60d   : > { %4794 = vrot.lane.b32.xlu1 %v4500_v33, %s9621_s17  ;;  %v4482_v33 = vadd.f32 %v9120_v59, %v4354_v17  ;;  %v5876_v55 = vmul.f32 %v9114_v50, %v17117_v25  ;;  %v5909_v30 = vmul.f32 %v9115_v20, %v17118_v32  ;;  %v9122_v50 = vld [vmem:[%s16614_s7 + $0x20] sm:$0xff]  ;;  %v17119_v17 = vld [vmem:[#allocation97_spill] sm:$0xff] }
 0x60e   : > { %v4338_v20 = vmul.f32 %v9122_v50, %v17119_v17 }
 0x60f   : > { %v4809_v5 = vpop.permute.xlu1 %4808  ;;  %v4743_v21 = vpop.permute.xlu0 %4742  ;;  %6297 = vrot.lane.b32.xlu0 %v6020_v27, %s9619_s23  ;;  %v17120_v27 = vld [vmem:[#allocation127_spill] sm:$0xff]  ;;  %v6004_v32 = vadd.f32 %v9116_v40, %v5876_v55  ;;  %v17121_v55 = vld [vmem:[#allocation48_spill] sm:$0xff] }
 0x610   : > { %5148 = vst.msk [vmem:[#allocation2 + $0x168] sm:$0xff] %vm5102_vm2, %v4809_v5  ;;  %5115 = vst.msk [vmem:[#allocation2 + $0x60] sm:$0xff] %vm5102_vm2, %v4743_v21  ;;  %v4371_v25 = vmul.f32 %v9123_v12, %v17120_v27  ;;  %v9125_v40 = vld [vmem:[%s16615_s29 + $0x128] sm:$0xff] }
 0x611   : > { %6363 = vrot.lane.b32.xlu1 %v6053_v51, %s9619_s23 }
 0x613   : > { %v6378_v43 = vpop.permute.xlu1 %6377  ;;  %v6312_v5 = vpop.permute.xlu0 %6311  ;;  %v6783_v21 = vld [vmem:[#allocation2 + $0x68] sm:$0xff]  ;;  %v6816_v51 = vld [vmem:[#allocation2 + $0x170] sm:$0xff]  ;;  %4758 = vrot.lane.b32.xlu0 %v4482_v33, %s9621_s17  ;;  %v9124_v33 = vld [vmem:[%s16615_s29 + $0x20] sm:$0xff] }
 0x614   : > { %6701 = vst.msk [vmem:[#allocation2 + $0x1e8] sm:$0xff] %vm6639_vm3, %v6378_v43  ;;  %6668 = vst.msk [vmem:[#allocation2 + $0xe0] sm:$0xff] %vm6639_vm3, %v6312_v5  ;;  %8390 = vmatpush3.msra.mxu0 %v6783_v21  ;;  %8423 = vmatpush3.msra.mxu1 %v6816_v51  ;;  %v6037_v43 = vadd.f32 %v9117_v29, %v5909_v30  ;;  %v4499_v29 = vadd.f32 %v9125_v40, %v4371_v25  ;;  %v17122_v51 = vld [vmem:[#allocation51_spill] sm:$0xff] }
 0x615   : > { %4824 = vrot.lane.b32.xlu1 %v4515_v1, %s9621_s17  ;;  %v4466_v1 = vadd.f32 %v9124_v33, %v4338_v20  ;;  %v5891_v30 = vmul.f32 %v9118_v38, %v17121_v55  ;;  %v5924_v17 = vmul.f32 %v9119_v44, %v17122_v51  ;;  %v9126_v38 = vld [vmem:[%s16614_s7 + $0x98] sm:$0xff]  ;;  %v17123_v20 = vld [vmem:[#allocation115_spill] sm:$0xff] }
 0x616   : > { %v4353_v44 = vmul.f32 %v9126_v38, %v17123_v20  ;;  %v9127_v25 = vld [vmem:[%s16614_s7 + $0x1a0] sm:$0xff] }
 0x617   : > { %v4839_v5 = vpop.permute.xlu1 %4838  ;;  %v4773_v21 = vpop.permute.xlu0 %4772  ;;  %6265 = vrot.lane.b32.xlu0 %v6004_v32, %s9619_s23  ;;  %v17124_v32 = vld [vmem:[#allocation141_spill] sm:$0xff]  ;;  %v6019_v51 = vadd.f32 %v9120_v59, %v5891_v30  ;;  %v9129_v59 = vld [vmem:[%s16615_s29 + $0x1a0] sm:$0xff] }
 0x618   : > { %5163 = vst.msk [vmem:[#allocation2 + $0x1e0] sm:$0xff] %vm5102_vm2, %v4839_v5  ;;  %5130 = vst.msk [vmem:[#allocation2 + $0xd8] sm:$0xff] %vm5102_vm2, %v4773_v21  ;;  %v4386_v55 = vmul.f32 %v9127_v25, %v17124_v32  ;;  %v17125_v30 = vld [vmem:[#allocation50_spill] sm:$0xff] }
 0x619   : > { %6331 = vrot.lane.b32.xlu1 %v6037_v43, %s9619_s23 }
 0x61b   : > { %v6346_v27 = vpop.permute.xlu1 %6345  ;;  %v6280_v5 = vpop.permute.xlu0 %6279  ;;  %v6798_v21 = vld [vmem:[#allocation2 + $0xe0] sm:$0xff]  ;;  %v6831_v43 = vld [vmem:[#allocation2 + $0x1e8] sm:$0xff]  ;;  %4726 = vrot.lane.b32.xlu0 %v4466_v1, %s9621_s17  ;;  %v9128_v1 = vld [vmem:[%s16615_s29 + $0x98] sm:$0xff] }
 0x61c   : > { %6685 = vst.msk [vmem:[#allocation2 + $0x168] sm:$0xff] %vm6639_vm3, %v6346_v27  ;;  %6652 = vst.msk [vmem:[#allocation2 + $0x60] sm:$0xff] %vm6639_vm3, %v6280_v5  ;;  %8391 = vmatprep.subr.mxu0 %v6798_v21  ;;  %8424 = vmatprep.subr.mxu1 %v6831_v43  ;;  %v6052_v27 = vadd.f32 %v9121_v11, %v5924_v17  ;;  %v4514_v11 = vadd.f32 %v9129_v59, %v4386_v55  ;;  %v17126_v43 = vld [vmem:[#allocation53_spill] sm:$0xff]  ;;  %v9131_v55 = vld [vmem:[%s16614_s7 + $0x120] sm:$0xff] }
 0x61d   : > { %4792 = vrot.lane.b32.xlu1 %v4499_v29, %s9621_s17  ;;  %v4481_v29 = vadd.f32 %v9128_v1, %v4353_v44  ;;  %v5875_v17 = vmul.f32 %v9122_v50, %v17125_v30  ;;  %v5908_v20 = vmul.f32 %v9123_v12, %v17126_v43  ;;  %v9130_v50 = vld [vmem:[%s16614_s7 + $0x18] sm:$0xff] }
 0x61e   : > { %v17127_v44 = vld [vmem:[#allocation90_spill] sm:$0xff] }
 0x61f   : > { %v4807_v5 = vpop.permute.xlu1 %4806  ;;  %v4741_v21 = vpop.permute.xlu0 %4740  ;;  %6295 = vrot.lane.b32.xlu0 %v6019_v51, %s9619_s23  ;;  %v4337_v12 = vmul.f32 %v9130_v50, %v17127_v44  ;;  %v17128_v51 = vld [vmem:[#allocation126_spill] sm:$0xff]  ;;  %v6003_v43 = vadd.f32 %v9124_v33, %v5875_v17  ;;  %v17129_v17 = vld [vmem:[#allocation52_spill] sm:$0xff] }
 0x620   : > { %5147 = vst.msk [vmem:[#allocation2 + $0x160] sm:$0xff] %vm5102_vm2, %v4807_v5  ;;  %5114 = vst.msk [vmem:[#allocation2 + $0x58] sm:$0xff] %vm5102_vm2, %v4741_v21  ;;  %v4370_v30 = vmul.f32 %v9131_v55, %v17128_v51  ;;  %v9133_v33 = vld [vmem:[%s16615_s29 + $0x120] sm:$0xff] }
 0x621   : > { %6361 = vrot.lane.b32.xlu1 %v6052_v27, %s9619_s23 }
 0x623   : > { %v6376_v32 = vpop.permute.xlu1 %6375  ;;  %v6310_v5 = vpop.permute.xlu0 %6309  ;;  %v6782_v21 = vld [vmem:[#allocation2 + $0x60] sm:$0xff]  ;;  %v6815_v27 = vld [vmem:[#allocation2 + $0x168] sm:$0xff]  ;;  %4756 = vrot.lane.b32.xlu0 %v4481_v29, %s9621_s17  ;;  %v9132_v29 = vld [vmem:[%s16615_s29 + $0x18] sm:$0xff] }
 0x624   : > { %6700 = vst.msk [vmem:[#allocation2 + $0x1e0] sm:$0xff] %vm6639_vm3, %v6376_v32  ;;  %6667 = vst.msk [vmem:[#allocation2 + $0xd8] sm:$0xff] %vm6639_vm3, %v6310_v5  ;;  %8392 = vmatpush3.msra.mxu0 %v6782_v21  ;;  %8425 = vmatpush3.msra.mxu1 %v6815_v27  ;;  %v6036_v32 = vadd.f32 %v9125_v40, %v5908_v20  ;;  %v4498_v40 = vadd.f32 %v9133_v33, %v4370_v30  ;;  %v17130_v27 = vld [vmem:[#allocation55_spill] sm:$0xff]  ;;  %v9135_v30 = vld [vmem:[%s16614_s7 + $0x198] sm:$0xff] }
 0x625   : > { %4822 = vrot.lane.b32.xlu1 %v4514_v11, %s9621_s17  ;;  %v4465_v11 = vadd.f32 %v9132_v29, %v4337_v12  ;;  %v5890_v20 = vmul.f32 %v9126_v38, %v17129_v17  ;;  %v5923_v44 = vmul.f32 %v9127_v25, %v17130_v27  ;;  %v9134_v38 = vld [vmem:[%s16614_s7 + $0x90] sm:$0xff]  ;;  %v17131_v12 = vld [vmem:[#allocation114_spill] sm:$0xff] }
 0x626   : > { %v4352_v25 = vmul.f32 %v9134_v38, %v17131_v12 }
 0x627   : > { %v4837_v5 = vpop.permute.xlu1 %4836  ;;  %v4771_v21 = vpop.permute.xlu0 %4770  ;;  %6263 = vrot.lane.b32.xlu0 %v6003_v43, %s9619_s23  ;;  %v17132_v43 = vld [vmem:[#allocation134_spill] sm:$0xff]  ;;  %v6018_v27 = vadd.f32 %v9128_v1, %v5890_v20 }
 0x628   : > { %5162 = vst.msk [vmem:[#allocation2 + $0x1d8] sm:$0xff] %vm5102_vm2, %v4837_v5  ;;  %5129 = vst.msk [vmem:[#allocation2 + $0xd0] sm:$0xff] %vm5102_vm2, %v4771_v21  ;;  %v4385_v17 = vmul.f32 %v9135_v30, %v17132_v43  ;;  %v9137_v1 = vld [vmem:[%s16615_s29 + $0x198] sm:$0xff] }
 0x629   : > { %6329 = vrot.lane.b32.xlu1 %v6036_v32, %s9619_s23  ;;  %v17133_v20 = vld [vmem:[#allocation54_spill] sm:$0xff] }
 0x62b   : > { %v6344_v51 = vpop.permute.xlu1 %6343  ;;  %v6278_v5 = vpop.permute.xlu0 %6277  ;;  %v6797_v21 = vld [vmem:[#allocation2 + $0xd8] sm:$0xff]  ;;  %v6830_v32 = vld [vmem:[#allocation2 + $0x1e0] sm:$0xff]  ;;  %4724 = vrot.lane.b32.xlu0 %v4465_v11, %s9621_s17  ;;  %v9136_v11 = vld [vmem:[%s16615_s29 + $0x90] sm:$0xff] }
 0x62c   : > { %6684 = vst.msk [vmem:[#allocation2 + $0x160] sm:$0xff] %vm6639_vm3, %v6344_v51  ;;  %6651 = vst.msk [vmem:[#allocation2 + $0x58] sm:$0xff] %vm6639_vm3, %v6278_v5  ;;  %8393 = vmatprep.subr.mxu0 %v6797_v21  ;;  %8426 = vmatprep.subr.mxu1 %v6830_v32  ;;  %v6051_v51 = vadd.f32 %v9129_v59, %v5923_v44  ;;  %v4513_v59 = vadd.f32 %v9137_v1, %v4385_v17  ;;  %v17134_v32 = vld [vmem:[#allocation57_spill] sm:$0xff] }
 0x62d   : > { %4790 = vrot.lane.b32.xlu1 %v4498_v40, %s9621_s17  ;;  %v4480_v40 = vadd.f32 %v9136_v11, %v4352_v25  ;;  %v5874_v44 = vmul.f32 %v9130_v50, %v17133_v20  ;;  %v5907_v12 = vmul.f32 %v9131_v55, %v17134_v32  ;;  %v9138_v50 = vld [vmem:[%s16614_s7 + $0x10] sm:$0xff]  ;;  %v17135_v25 = vld [vmem:[#allocation95_spill] sm:$0xff]  ;;  %v9139_v17 = vld [vmem:[%s16614_s7 + $0x118] sm:$0xff] }
 0x62e   : > { %v4336_v55 = vmul.f32 %v9138_v50, %v17135_v25 }
 0x62f   : > { %v4805_v5 = vpop.permute.xlu1 %4804  ;;  %v4739_v21 = vpop.permute.xlu0 %4738  ;;  %6293 = vrot.lane.b32.xlu0 %v6018_v27, %s9619_s23  ;;  %v17136_v27 = vld [vmem:[#allocation125_spill] sm:$0xff]  ;;  %v6002_v32 = vadd.f32 %v9132_v29, %v5874_v44  ;;  %v17137_v44 = vld [vmem:[#allocation56_spill] sm:$0xff] }
 0x630   : > { %5146 = vst.msk [vmem:[#allocation2 + $0x158] sm:$0xff] %vm5102_vm2, %v4805_v5  ;;  %5113 = vst.msk [vmem:[#allocation2 + $0x50] sm:$0xff] %vm5102_vm2, %v4739_v21  ;;  %v4369_v20 = vmul.f32 %v9139_v17, %v17136_v27  ;;  %v9141_v29 = vld [vmem:[%s16615_s29 + $0x118] sm:$0xff] }
 0x631   : > { %6359 = vrot.lane.b32.xlu1 %v6051_v51, %s9619_s23 }
 0x633   : > { %v6374_v43 = vpop.permute.xlu1 %6373  ;;  %v6308_v5 = vpop.permute.xlu0 %6307  ;;  %v6781_v21 = vld [vmem:[#allocation2 + $0x58] sm:$0xff]  ;;  %v6814_v51 = vld [vmem:[#allocation2 + $0x160] sm:$0xff]  ;;  %4754 = vrot.lane.b32.xlu0 %v4480_v40, %s9621_s17  ;;  %v9140_v40 = vld [vmem:[%s16615_s29 + $0x10] sm:$0xff] }
 0x634   : > { %6699 = vst.msk [vmem:[#allocation2 + $0x1d8] sm:$0xff] %vm6639_vm3, %v6374_v43  ;;  %6666 = vst.msk [vmem:[#allocation2 + $0xd0] sm:$0xff] %vm6639_vm3, %v6308_v5  ;;  %8394 = vmatpush3.msra.mxu0 %v6781_v21  ;;  %8427 = vmatpush3.msra.mxu1 %v6814_v51  ;;  %v6035_v43 = vadd.f32 %v9133_v33, %v5907_v12  ;;  %v4497_v33 = vadd.f32 %v9141_v29, %v4369_v20  ;;  %v17138_v51 = vld [vmem:[#allocation59_spill] sm:$0xff]  ;;  %v9143_v20 = vld [vmem:[%s16614_s7 + $0x190] sm:$0xff] }
 0x635   : > { %4820 = vrot.lane.b32.xlu1 %v4513_v59, %s9621_s17  ;;  %v4464_v59 = vadd.f32 %v9140_v40, %v4336_v55  ;;  %v5889_v12 = vmul.f32 %v9134_v38, %v17137_v44  ;;  %v5922_v25 = vmul.f32 %v9135_v30, %v17138_v51  ;;  %v9142_v38 = vld [vmem:[%s16614_s7 + $0x88] sm:$0xff] }
 0x636   : > { %v17139_v55 = vld [vmem:[#allocation108_spill] sm:$0xff] }
 0x637   : > { %v4835_v5 = vpop.permute.xlu1 %4834  ;;  %v4769_v21 = vpop.permute.xlu0 %4768  ;;  %6261 = vrot.lane.b32.xlu0 %v6002_v32, %s9619_s23  ;;  %v4351_v30 = vmul.f32 %v9142_v38, %v17139_v55  ;;  %v17140_v32 = vld [vmem:[#allocation139_spill] sm:$0xff]  ;;  %v6017_v51 = vadd.f32 %v9136_v11, %v5889_v12  ;;  %v9145_v11 = vld [vmem:[%s16615_s29 + $0x190] sm:$0xff]  ;;  %v17141_v12 = vld [vmem:[#allocation58_spill] sm:$0xff] }
 0x638   : > { %5161 = vst.msk [vmem:[#allocation2 + $0x1d0] sm:$0xff] %vm5102_vm2, %v4835_v5  ;;  %5128 = vst.msk [vmem:[#allocation2 + $0xc8] sm:$0xff] %vm5102_vm2, %v4769_v21  ;;  %v4384_v44 = vmul.f32 %v9143_v20, %v17140_v32 }
 0x639   : > { %6327 = vrot.lane.b32.xlu1 %v6035_v43, %s9619_s23 }
 0x63b   : > { %v6342_v27 = vpop.permute.xlu1 %6341  ;;  %v6276_v5 = vpop.permute.xlu0 %6275  ;;  %v6796_v21 = vld [vmem:[#allocation2 + $0xd0] sm:$0xff]  ;;  %v6829_v43 = vld [vmem:[#allocation2 + $0x1d8] sm:$0xff]  ;;  %4722 = vrot.lane.b32.xlu0 %v4464_v59, %s9621_s17  ;;  %v9144_v59 = vld [vmem:[%s16615_s29 + $0x88] sm:$0xff] }
 0x63c   : > { %6683 = vst.msk [vmem:[#allocation2 + $0x158] sm:$0xff] %vm6639_vm3, %v6342_v27  ;;  %6650 = vst.msk [vmem:[#allocation2 + $0x50] sm:$0xff] %vm6639_vm3, %v6276_v5  ;;  %8395 = vmatprep.subr.mxu0 %v6796_v21  ;;  %8428 = vmatprep.subr.mxu1 %v6829_v43  ;;  %v6050_v27 = vadd.f32 %v9137_v1, %v5922_v25  ;;  %v4512_v1 = vadd.f32 %v9145_v11, %v4384_v44  ;;  %v17142_v43 = vld [vmem:[#allocation61_spill] sm:$0xff] }
 0x63d   : > { %4788 = vrot.lane.b32.xlu1 %v4497_v33, %s9621_s17  ;;  %v4479_v33 = vadd.f32 %v9144_v59, %v4351_v30  ;;  %v5873_v25 = vmul.f32 %v9138_v50, %v17141_v12  ;;  %v5906_v55 = vmul.f32 %v9139_v17, %v17142_v43  ;;  %v9146_v50 = vld [vmem:[%s16614_s7 + $0x8] sm:$0xff]  ;;  %v9147_v44 = vld [vmem:[%s16614_s7 + $0x110] sm:$0xff] }
 0x63e   : > { %v17143_v30 = vld [vmem:[#allocation88_spill] sm:$0xff] }
 0x63f   : > { %v4803_v5 = vpop.permute.xlu1 %4802  ;;  %v4737_v21 = vpop.permute.xlu0 %4736  ;;  %6291 = vrot.lane.b32.xlu0 %v6017_v51, %s9619_s23  ;;  %v4335_v17 = vmul.f32 %v9146_v50, %v17143_v30  ;;  %v17144_v51 = vld [vmem:[#allocation124_spill] sm:$0xff]  ;;  %v6001_v43 = vadd.f32 %v9140_v40, %v5873_v25 }
 0x640   : > { %5145 = vst.msk [vmem:[#allocation2 + $0x150] sm:$0xff] %vm5102_vm2, %v4803_v5  ;;  %5112 = vst.msk [vmem:[#allocation2 + $0x48] sm:$0xff] %vm5102_vm2, %v4737_v21  ;;  %v4368_v12 = vmul.f32 %v9147_v44, %v17144_v51  ;;  %v9149_v40 = vld [vmem:[%s16615_s29 + $0x110] sm:$0xff] }
 0x641   : > { %6357 = vrot.lane.b32.xlu1 %v6050_v27, %s9619_s23  ;;  %v17145_v25 = vld [vmem:[#allocation60_spill] sm:$0xff] }
 0x643   : > { %v6372_v32 = vpop.permute.xlu1 %6371  ;;  %v6306_v5 = vpop.permute.xlu0 %6305  ;;  %v6780_v21 = vld [vmem:[#allocation2 + $0x50] sm:$0xff]  ;;  %v6813_v27 = vld [vmem:[#allocation2 + $0x158] sm:$0xff]  ;;  %4752 = vrot.lane.b32.xlu0 %v4479_v33, %s9621_s17  ;;  %v9148_v33 = vld [vmem:[%s16615_s29 + $0x8] sm:$0xff] }
 0x644   : > { %6698 = vst.msk [vmem:[#allocation2 + $0x1d0] sm:$0xff] %vm6639_vm3, %v6372_v32  ;;  %6665 = vst.msk [vmem:[#allocation2 + $0xc8] sm:$0xff] %vm6639_vm3, %v6306_v5  ;;  %8396 = vmatpush3.msra.mxu0 %v6780_v21  ;;  %8429 = vmatpush3.msra.mxu1 %v6813_v27  ;;  %v6034_v32 = vadd.f32 %v9141_v29, %v5906_v55  ;;  %v4496_v29 = vadd.f32 %v9149_v40, %v4368_v12  ;;  %v17146_v27 = vld [vmem:[#allocation63_spill] sm:$0xff] }
 0x645   : > { %4818 = vrot.lane.b32.xlu1 %v4512_v1, %s9621_s17  ;;  %v4463_v1 = vadd.f32 %v9148_v33, %v4335_v17  ;;  %v5888_v55 = vmul.f32 %v9142_v38, %v17145_v25  ;;  %v5921_v30 = vmul.f32 %v9143_v20, %v17146_v27  ;;  %v9150_v38 = vld [vmem:[%s16614_s7 + $0x80] sm:$0xff]  ;;  %v9151_v12 = vld [vmem:[%s16614_s7 + $0x188] sm:$0xff] }
 0x646   : > { %v17147_v17 = vld [vmem:[#allocation111_spill] sm:$0xff] }
 0x647   : > { %v4833_v5 = vpop.permute.xlu1 %4832  ;;  %v4767_v21 = vpop.permute.xlu0 %4766  ;;  %6259 = vrot.lane.b32.xlu0 %v6001_v43, %s9619_s23  ;;  %v4350_v20 = vmul.f32 %v9150_v38, %v17147_v17  ;;  %v17148_v43 = vld [vmem:[#allocation130_spill] sm:$0xff]  ;;  %v6016_v27 = vadd.f32 %v9144_v59, %v5888_v55  ;;  %v9153_v59 = vld [vmem:[%s16615_s29 + $0x188] sm:$0xff] }
 0x648   : > { %5160 = vst.msk [vmem:[#allocation2 + $0x1c8] sm:$0xff] %vm5102_vm2, %v4833_v5  ;;  %5127 = vst.msk [vmem:[#allocation2 + $0xc0] sm:$0xff] %vm5102_vm2, %v4767_v21  ;;  %v4383_v25 = vmul.f32 %v9151_v12, %v17148_v43  ;;  %v17149_v55 = vld [vmem:[#allocation62_spill] sm:$0xff] }
 0x649   : > { %6325 = vrot.lane.b32.xlu1 %v6034_v32, %s9619_s23 }
 0x64b   : > { %v6340_v51 = vpop.permute.xlu1 %6339  ;;  %v6274_v5 = vpop.permute.xlu0 %6273  ;;  %v6795_v21 = vld [vmem:[#allocation2 + $0xc8] sm:$0xff]  ;;  %v6828_v32 = vld [vmem:[#allocation2 + $0x1d0] sm:$0xff]  ;;  %4720 = vrot.lane.b32.xlu0 %v4463_v1, %s9621_s17  ;;  %v9152_v1 = vld [vmem:[%s16615_s29 + $0x80] sm:$0xff] }
 0x64c   : > { %6682 = vst.msk [vmem:[#allocation2 + $0x150] sm:$0xff] %vm6639_vm3, %v6340_v51  ;;  %6649 = vst.msk [vmem:[#allocation2 + $0x48] sm:$0xff] %vm6639_vm3, %v6274_v5  ;;  %8397 = vmatprep.subr.mxu0 %v6795_v21  ;;  %8430 = vmatprep.subr.mxu1 %v6828_v32  ;;  %v6049_v51 = vadd.f32 %v9145_v11, %v5921_v30  ;;  %v4511_v11 = vadd.f32 %v9153_v59, %v4383_v25  ;;  %v17150_v32 = vld [vmem:[#allocation65_spill] sm:$0xff]  ;;  %v9155_v25 = vld [vmem:[%s16614_s7 + $0x108] sm:$0xff] }
 0x64d   : > { %4786 = vrot.lane.b32.xlu1 %v4496_v29, %s9621_s17  ;;  %v4478_v29 = vadd.f32 %v9152_v1, %v4350_v20  ;;  %v5872_v30 = vmul.f32 %v9146_v50, %v17149_v55  ;;  %v5905_v17 = vmul.f32 %v9147_v44, %v17150_v32  ;;  %v9154_v50 = vld [vmem:[%s16614_s7] sm:$0xff] }
 0x64e   : > { %v17151_v20 = vld [vmem:[#allocation91_spill] sm:$0xff] }
 0x64f   : > { %v4801_v5 = vpop.permute.xlu1 %4800  ;;  %v4735_v21 = vpop.permute.xlu0 %4734  ;;  %6289 = vrot.lane.b32.xlu0 %v6016_v27, %s9619_s23  ;;  %v4334_v44 = vmul.f32 %v9154_v50, %v17151_v20  ;;  %v17152_v27 = vld [vmem:[#allocation123_spill] sm:$0xff]  ;;  %v6000_v32 = vadd.f32 %v9148_v33, %v5872_v30  ;;  %v17153_v30 = vld [vmem:[#allocation64_spill] sm:$0xff] }
 0x650   : > { %5144 = vst.msk [vmem:[#allocation2 + $0x148] sm:$0xff] %vm5102_vm2, %v4801_v5  ;;  %5111 = vst.msk [vmem:[#allocation2 + $0x40] sm:$0xff] %vm5102_vm2, %v4735_v21  ;;  %v4367_v55 = vmul.f32 %v9155_v25, %v17152_v27  ;;  %v9157_v33 = vld [vmem:[%s16615_s29 + $0x108] sm:$0xff] }
 0x651   : > { %6355 = vrot.lane.b32.xlu1 %v6049_v51, %s9619_s23 }
 0x653   : > { %v6370_v43 = vpop.permute.xlu1 %6369  ;;  %v6304_v5 = vpop.permute.xlu0 %6303  ;;  %v6779_v21 = vld [vmem:[#allocation2 + $0x48] sm:$0xff]  ;;  %v6812_v51 = vld [vmem:[#allocation2 + $0x150] sm:$0xff]  ;;  %4750 = vrot.lane.b32.xlu0 %v4478_v29, %s9621_s17  ;;  %v9156_v29 = vld [vmem:[%s16615_s29] sm:$0xff] }
 0x654   : > { %6697 = vst.msk [vmem:[#allocation2 + $0x1c8] sm:$0xff] %vm6639_vm3, %v6370_v43  ;;  %6664 = vst.msk [vmem:[#allocation2 + $0xc0] sm:$0xff] %vm6639_vm3, %v6304_v5  ;;  %8398 = vmatpush3.msra.mxu0 %v6779_v21  ;;  %8431 = vmatpush3.msra.mxu1 %v6812_v51  ;;  %v6033_v43 = vadd.f32 %v9149_v40, %v5905_v17  ;;  %v4495_v40 = vadd.f32 %v9157_v33, %v4367_v55  ;;  %v17154_v51 = vld [vmem:[#allocation69_spill] sm:$0xff] }
 0x655   : > { %4816 = vrot.lane.b32.xlu1 %v4511_v11, %s9621_s17  ;;  %v4462_v11 = vadd.f32 %v9156_v29, %v4334_v44  ;;  %v5887_v17 = vmul.f32 %v9150_v38, %v17153_v30  ;;  %v5920_v20 = vmul.f32 %v9151_v12, %v17154_v51  ;;  %v9158_v38 = vld [vmem:[%s16614_s7 + $0x180] sm:$0xff]  ;;  %v17156_v30 = vld [vmem:[#allocation68_spill] sm:$0xff] }
 0x656   : > { %v17155_v44 = vld [vmem:[#allocation135_spill] sm:$0xff] }
 0x657   : > { %v4831_v5 = vpop.permute.xlu1 %4830  ;;  %v4765_v21 = vpop.permute.xlu0 %4764  ;;  %6257 = vrot.lane.b32.xlu0 %v6000_v32, %s9619_s23  ;;  %v4382_v12 = vmul.f32 %v9158_v38, %v17155_v44  ;;  %v6015_v55 = vadd.f32 %v9152_v1, %v5887_v17  ;;  %v9159_v32 = vld [vmem:[%s16614_s7 + $0x2f8] sm:$0xff]  ;;  %v9160_v1 = vld [vmem:[%s16615_s29 + $0x180] sm:$0xff] }
 0x658   : > { %5159 = vst.msk [vmem:[#allocation2 + $0x1c0] sm:$0xff] %vm5102_vm2, %v4831_v5  ;;  %5126 = vst.msk [vmem:[#allocation2 + $0xb8] sm:$0xff] %vm5102_vm2, %v4765_v21  ;;  %v4429_v51 = vmul.f32 %v9159_v32, %v17156_v30  ;;  %v17157_v17 = vld [vmem:[#allocation71_spill] sm:$0xff] }
 0x659   : > { %6323 = vrot.lane.b32.xlu1 %v6033_v43, %s9619_s23 }
 0x65b   : > { %v6338_v27 = vpop.permute.xlu1 %6337  ;;  %v6272_v5 = vpop.permute.xlu0 %6271  ;;  %v6794_v21 = vld [vmem:[#allocation2 + $0xc0] sm:$0xff]  ;;  %v6827_v43 = vld [vmem:[#allocation2 + $0x1c8] sm:$0xff]  ;;  %4718 = vrot.lane.b32.xlu0 %v4462_v11, %s9621_s17  ;;  %v4510_v11 = vadd.f32 %v9160_v1, %v4382_v12 }
 0x65c   : > { %6681 = vst.msk [vmem:[#allocation2 + $0x148] sm:$0xff] %vm6639_vm3, %v6338_v27  ;;  %6648 = vst.msk [vmem:[#allocation2 + $0x40] sm:$0xff] %vm6639_vm3, %v6272_v5  ;;  %8399 = vmatprep.subr.mxu0 %v6794_v21  ;;  %8432 = vmatprep.subr.mxu1 %v6827_v43  ;;  %v6048_v27 = vadd.f32 %v9153_v59, %v5920_v20  ;;  %v5904_v20 = vmul.f32 %v9155_v25, %v17157_v17  ;;  %v17158_v43 = vld [vmem:[#allocation72_spill] sm:$0xff]  ;;  %v9162_v25 = vld [vmem:[%s16614_s7 + $0x100] sm:$0xff] }
 0x65d   : > { %4784 = vrot.lane.b32.xlu1 %v4495_v40, %s9621_s17  ;;  %v9161_v40 = vld [vmem:[%s16615_s29 + $0x2f8] sm:$0xff]  ;;  %v5871_v44 = vmul.f32 %v9154_v50, %v17158_v43 }
 0x65e   : > { %v4557_v59 = vadd.f32 %v9161_v40, %v4429_v51  ;;  %v17159_v12 = vld [vmem:[#allocation122_spill] sm:$0xff]  ;;  %v17160_v51 = vld [vmem:[#allocation163_spill] sm:$0xff]  ;;  %v6032_v43 = vadd.f32 %v9157_v33, %v5904_v20  ;;  %v17161_v33 = vld [vmem:[#allocation73_spill] sm:$0xff] }
 0x65f   : > { %v4799_v5 = vpop.permute.xlu1 %4798  ;;  %v4733_v21 = vpop.permute.xlu0 %4732  ;;  %6287 = vrot.lane.b32.xlu0 %v6015_v55, %s9619_s23  ;;  %v4366_v50 = vmul.f32 %v9162_v25, %v17159_v12  ;;  %v9163_v55 = vld [vmem:[%s16614_s7 + $0x278] sm:$0xff]  ;;  %v9164_v12 = vld [vmem:[%s16615_s29 + $0x100] sm:$0xff] }
 0x660   : > { %5143 = vst.msk [vmem:[#allocation2 + $0x140] sm:$0xff] %vm5102_vm2, %v4799_v5  ;;  %5110 = vst.msk [vmem:[#allocation2 + $0x38] sm:$0xff] %vm5102_vm2, %v4733_v21  ;;  %v4413_v17 = vmul.f32 %v9163_v55, %v17160_v51  ;;  %v9165_v20 = vld [vmem:[%s16615_s29 + $0x278] sm:$0xff] }
 0x661   : > { %6353 = vrot.lane.b32.xlu1 %v6048_v27, %s9619_s23  ;;  %v4494_v51 = vadd.f32 %v9164_v12, %v4366_v50  ;;  %v15346_v50 = vld [vmem:[%s17164_s3] sm:$0xff] }
 0x663   : > { %v6368_v30 = vpop.permute.xlu1 %6367  ;;  %v6302_v5 = vpop.permute.xlu0 %6301  ;;  %v6778_v21 = vld [vmem:[#allocation2 + $0x40] sm:$0xff]  ;;  %v6811_v27 = vld [vmem:[#allocation2 + $0x148] sm:$0xff]  ;;  %4814 = vrot.lane.b32.xlu0 %v4510_v11, %s9621_s17  ;;  %v9622_v11 = vmov 1983009808  }
 0x664   : > { %6696 = vst.msk [vmem:[#allocation2 + $0x1c0] sm:$0xff] %vm6639_vm3, %v6368_v30  ;;  %6663 = vst.msk [vmem:[#allocation2 + $0xb8] sm:$0xff] %vm6639_vm3, %v6302_v5  ;;  %8400 = vmatpush3.msra.mxu0 %v6778_v21  ;;  %8433 = vmatpush3.msra.mxu1 %v6811_v27  ;;  %v5999_v30 = vadd.f32 %v9156_v29, %v5871_v44  ;;  %v6904_v27 = vlaneseq  ;;  %v5966_v29 = vmul.f32 %v9159_v32, %v17161_v33 }
 0x665   : > { %4908 = vrot.lane.b32.xlu1 %v4557_v59, %s9621_s17  ;;  %v6902_v59 = vunpack.c.l.s4 %v9622_v11  ;;  %v4541_v44 = vadd.f32 %v9165_v20, %v4413_v17 }
 0x666   : > { %v15334_v58 = vshrl.u32 %v6904_v27, 7  ;;  %v9167_v27 = vld [vmem:[%s16614_s7 + $0x2f0] sm:$0xff] }
 0x667   : > { %v4829_v5 = vpop.permute.xlu1 %4828  ;;  %v4763_v21 = vpop.permute.xlu0 %4762  ;;  %6255 = vrot.lane.b32.xlu0 %v5999_v30, %s9619_s23  ;;  %v6903_v11 = vunpack.c.0.s8 %v6902_v59  ;;  %v17165_v59 = vld [vmem:[#allocation75_spill] sm:$0xff] }
 0x668   : > { %5158 = vst.msk [vmem:[#allocation2 + $0x1b8] sm:$0xff] %vm5102_vm2, %v4829_v5  ;;  %5125 = vst.msk [vmem:[#allocation2 + $0xb0] sm:$0xff] %vm5102_vm2, %v4763_v21  ;;  %v17162_v5 = vld [vmem:[#allocation74_spill] sm:$0xff] }
 0x669   : > { %6321 = vrot.lane.b32.xlu1 %v6032_v43, %s9619_s23  ;;  %v5919_v21 = vmul.f32 %v9158_v38, %v17162_v5  ;;  %17163 = vst [vmem:[#allocation133_spill] sm:$0xff] %v15334_v58  ;;  %v15341_v32 = vsub.s32 %v6903_v11, %v15334_v58  ;;  %v6094_v38 = vadd.f32 %v9161_v40, %v5966_v29  ;;  %v9168_v5 = vld [vmem:[%s16615_s29 + $0x3f8] sm:$0xff] }
 0x66a   : > { %v17167_v11 = vld [vmem:[#allocation81_spill] sm:$0xff] }
 0x66b   : > { %v6336_v43 = vpop.permute.xlu1 %6335  ;;  %v6270_v22 = vpop.permute.xlu0 %6269  ;;  %v6793_v30 = vld [vmem:[#allocation2 + $0xb8] sm:$0xff]  ;;  %v6826_v16 = vld [vmem:[#allocation2 + $0x1c0] sm:$0xff]  ;;  %4782 = vrot.lane.b32.xlu0 %v4494_v51, %s9621_s17  ;;  %v6047_v17 = vadd.f32 %v9160_v1, %v5919_v21  ;;  %v17166_v51 = vld [vmem:[#allocation76_spill] sm:$0xff]  ;;  %v15358_v29 = vrot.slane %v15346_v50, %v15341_v32 }
 0x66c   : > { %6680 = vst.msk [vmem:[#allocation2 + $0x140] sm:$0xff] %vm6639_vm3, %v6336_v43  ;;  %6647 = vst.msk [vmem:[#allocation2 + $0x38] sm:$0xff] %vm6639_vm3, %v6270_v22  ;;  %8401 = vmatprep.subr.mxu0 %v6793_v30  ;;  %8434 = vmatprep.subr.mxu1 %v6826_v16  ;;  %v9166_v22 = vld [vmem:[%s16614_s7 + $0x3f8] sm:$0xff]  ;;  %v4428_v33 = vmul.f32 %v9167_v27, %v17166_v51  ;;  %v9169_v43 = vld [vmem:[%s16615_s29 + $0x2f0] sm:$0xff] }
 0x66d   : > { %4876 = vrot.lane.b32.xlu1 %v4541_v44, %s9621_s17  ;;  %v4461_v16 = vmul.f32 %v9166_v22, %v17165_v59  ;;  %v6915_v1 = vcombine.high %v15358_v29, %v15358_v29  ;;  %v5950_v59 = vmul.f32 %v9163_v55, %v17167_v11  ;;  %v17168_v51 = vld [vmem:[#allocation82_spill] sm:$0xff]  ;;  %v9170_v55 = vld [vmem:[%s16614_s7 + $0x270] sm:$0xff] }
 0x66e   : > { %v4556_v30 = vadd.f32 %v9169_v43, %v4428_v33 }
 0x66f   : > { %v4797_v44 = vpop.permute.xlu1 %4796  ;;  %v4731_v40 = vpop.permute.xlu0 %4730  ;;  %6351 = vrot.lane.b32.xlu0 %v6047_v17, %s9619_s23  ;;  %v4589_v21 = vadd.f32 %v9168_v5, %v4461_v16  ;;  %7006 = vmatprep.mubr.f32.mxu0 %v6915_v1  ;;  %v6078_v33 = vadd.f32 %v9165_v20, %v5950_v59  ;;  %v9171_v1 = vld [vmem:[%s16614_s7 + $0x378] sm:$0xff] }
 0x670   : > { %5142 = vst.msk [vmem:[#allocation2 + $0x138] sm:$0xff] %vm5102_vm2, %v4797_v44  ;;  %5109 = vst.msk [vmem:[#allocation2 + $0x30] sm:$0xff] %vm5102_vm2, %v4731_v40  ;;  %v5903_v44 = vmul.f32 %v9162_v25, %v17168_v51  ;;  %v17169_v25 = vld [vmem:[#allocation162_spill] sm:$0xff]  ;;  %v17170_v51 = vld [vmem:[#allocation85_spill] sm:$0xff] }
 0x671   : > { %6445 = vrot.lane.b32.xlu1 %v6094_v38, %s9619_s23  ;;  %v4412_v16 = vmul.f32 %v9170_v55, %v17169_v25  ;;  %v9173_v59 = vld [vmem:[%s16615_s29 + $0x378] sm:$0xff] }
 0x672   : > { %v6031_v11 = vadd.f32 %v9164_v12, %v5903_v44  ;;  %v9172_v12 = vld [vmem:[%s16615_s29 + $0x270] sm:$0xff] }
 0x673   : > { %v6366_v38 = vpop.permute.xlu1 %6365  ;;  %v6300_v40 = vpop.permute.xlu0 %6299  ;;  %v6777_v17 = vld [vmem:[#allocation2 + $0x38] sm:$0xff]  ;;  %v6810_v58 = vld [vmem:[#allocation2 + $0x140] sm:$0xff]  ;;  %4906 = vrot.lane.b32.xlu0 %v4556_v30, %s9621_s17  ;;  %v4540_v20 = vadd.f32 %v9172_v12, %v4412_v16 }
 0x674   : > { %6695 = vst.msk [vmem:[#allocation2 + $0x1b8] sm:$0xff] %vm6639_vm3, %v6366_v38  ;;  %6662 = vst.msk [vmem:[#allocation2 + $0xb0] sm:$0xff] %vm6639_vm3, %v6300_v40  ;;  %8402 = vmatpush3.msra.mxu0 %v6777_v17  ;;  %8435 = vmatpush3.msra.mxu1 %v6810_v58  ;;  %v4445_v38 = vmul.f32 %v9171_v1, %v17170_v51  ;;  %v17172_v17 = vld [vmem:[#allocation94_spill] sm:$0xff] }
 0x675   : > { %4972 = vrot.lane.b32.xlu1 %v4589_v21, %s9621_s17  ;;  %v17171_v21 = vld [vmem:[#allocation84_spill] sm:$0xff]  ;;  %v5998_v25 = vmul.f32 %v9166_v22, %v17172_v17 }
 0x676   : > { %v5965_v30 = vmul.f32 %v9167_v27, %v17171_v21  ;;  %v4573_v44 = vadd.f32 %v9173_v59, %v4445_v38  ;;  %v6900_v27 = vcombine.high %v15346_v50, %v15346_v50  ;;  %v9174_v22 = vld [vmem:[%s16614_s7 + $0x2e8] sm:$0xff]  ;;  %v9175_v17 = vld [vmem:[%s16614_s7 + $0x3f0] sm:$0xff] }
 0x677   : > { %v4827_v40 = vpop.permute.xlu1 %4826  ;;  %v4761_v58 = vpop.permute.xlu0 %4760  ;;  %6319 = vrot.lane.b32.xlu0 %v6031_v11, %s9619_s23  ;;  %v17173_v11 = vld [vmem:[#allocation93_spill] sm:$0xff]  ;;  %v6126_v21 = vadd.f32 %v9168_v5, %v5998_v25  ;;  %v9176_v5 = vld [vmem:[%s16615_s29 + $0x2e8] sm:$0xff] }
 0x678   : > { %5157 = vst.msk [vmem:[#allocation2 + $0x1b0] sm:$0xff] %vm5102_vm2, %v4827_v40  ;;  %5124 = vst.msk [vmem:[#allocation2 + $0xa8] sm:$0xff] %vm5102_vm2, %v4761_v58  ;;  %v6093_v16 = vadd.f32 %v9169_v43, %v5965_v30  ;;  %v4427_v38 = vmul.f32 %v9174_v22, %v17173_v11  ;;  %v17175_v30 = vld [vmem:[#allocation98_spill] sm:$0xff]  ;;  %v17176_v11 = vld [vmem:[#allocation113_spill] sm:$0xff] }
 0x679   : > { %6413 = vrot.lane.b32.xlu1 %v6078_v33, %s9619_s23  ;;  %v5949_v25 = vmul.f32 %v9170_v55, %v17175_v30  ;;  %v9178_v55 = vld [vmem:[%s16614_s7 + $0x268] sm:$0xff] }
 0x67a   : > { %v4555_v43 = vadd.f32 %v9176_v5, %v4427_v38  ;;  %v17178_v30 = vld [vmem:[#allocation112_spill] sm:$0xff] }
 0x67b   : > { %v6334_v51 = vpop.permute.xlu1 %6333  ;;  %v6268_v40 = vpop.permute.xlu0 %6267  ;;  %v6792_v58 = vld [vmem:[#allocation2 + $0xb0] sm:$0xff]  ;;  %v6825_v33 = vld [vmem:[#allocation2 + $0x1b8] sm:$0xff]  ;;  %4874 = vrot.lane.b32.xlu0 %v4540_v20, %s9621_s17  ;;  %v15413_v20 = vrot.slane %v6900_v27, %v15341_v32 }
 0x67c   : > { %6679 = vst.msk [vmem:[#allocation2 + $0x138] sm:$0xff] %vm6639_vm3, %v6334_v51  ;;  %6646 = vst.msk [vmem:[#allocation2 + $0x30] sm:$0xff] %vm6639_vm3, %v6268_v40  ;;  %8403 = vmatprep.subr.mxu0 %v6792_v58  ;;  %8436 = vmatprep.subr.mxu1 %v6825_v33  ;;  %v17174_v51 = vld [vmem:[#allocation99_spill] sm:$0xff]  ;;  %v9177_v33 = vld [vmem:[%s16615_s29 + $0x3f0] sm:$0xff] }
 0x67d   : > { %4940 = vrot.lane.b32.xlu1 %v4573_v44, %s9621_s17  ;;  %v4460_v40 = vmul.f32 %v9175_v17, %v17174_v51  ;;  %v6916_v50 = vcombine.high %v15413_v20, %v15413_v20  ;;  %v5982_v51 = vmul.f32 %v9171_v1, %v17176_v11  ;;  %v17177_v1 = vld [vmem:[#allocation161_spill] sm:$0xff] }
 0x67e   : > { %v4411_v38 = vmul.f32 %v9178_v55, %v17177_v1 }
 0x67f   : > { %v4795_v44 = vpop.permute.xlu1 %4794  ;;  %v4729_v58 = vpop.permute.xlu0 %4728  ;;  %6443 = vrot.lane.b32.xlu0 %v6093_v16, %s9619_s23  ;;  %v4588_v27 = vadd.f32 %v9177_v33, %v4460_v40  ;;  %7076 = vmatprep.mubr.f32.mxu1 %v6916_v50  ;;  %v6077_v40 = vadd.f32 %v9172_v12, %v5949_v25  ;;  %v9179_v50 = vld [vmem:[%s16614_s7 + $0x370] sm:$0xff]  ;;  %v9180_v12 = vld [vmem:[%s16615_s29 + $0x268] sm:$0xff] }
 0x680   : > { %5141 = vst.msk [vmem:[#allocation2 + $0x130] sm:$0xff] %vm5102_vm2, %v4795_v44  ;;  %5108 = vst.msk [vmem:[#allocation2 + $0x28] sm:$0xff] %vm5102_vm2, %v4729_v58  ;;  %v4444_v11 = vmul.f32 %v9179_v50, %v17178_v30  ;;  %v9181_v25 = vld [vmem:[%s16615_s29 + $0x370] sm:$0xff] }
 0x681   : > { %6509 = vrot.lane.b32.xlu1 %v6126_v21, %s9619_s23 }
 0x683   : > { %v6364_v21 = vpop.permute.xlu1 %6363  ;;  %v6298_v44 = vpop.permute.xlu0 %6297  ;;  %v6776_v16 = vld [vmem:[#allocation2 + $0x30] sm:$0xff]  ;;  %v6809_v58 = vld [vmem:[#allocation2 + $0x138] sm:$0xff]  ;;  %4904 = vrot.lane.b32.xlu0 %v4555_v43, %s9621_s17  ;;  %v4539_v43 = vadd.f32 %v9180_v12, %v4411_v38 }
 0x684   : > { %6694 = vst.msk [vmem:[#allocation2 + $0x1b0] sm:$0xff] %vm6639_vm3, %v6364_v21  ;;  %6661 = vst.msk [vmem:[#allocation2 + $0xa8] sm:$0xff] %vm6639_vm3, %v6298_v44  ;;  %8404 = vmatpush3.msra.mxu0 %v6776_v16  ;;  %8437 = vmatpush3.msra.mxu1 %v6809_v58  ;;  %v6110_v21 = vadd.f32 %v9173_v59, %v5982_v51  ;;  %v4572_v59 = vadd.f32 %v9181_v25, %v4444_v11  ;;  %v17180_v58 = vld [vmem:[#allocation118_spill] sm:$0xff] }
 0x685   : > { %4970 = vrot.lane.b32.xlu1 %v4588_v27, %s9621_s17  ;;  %v17179_v27 = vld [vmem:[#allocation117_spill] sm:$0xff]  ;;  %v5964_v1 = vmul.f32 %v9174_v22, %v17180_v58  ;;  %v9182_v22 = vld [vmem:[%s16614_s7 + $0x3e8] sm:$0xff] }
 0x686   : > { %v5997_v51 = vmul.f32 %v9175_v17, %v17179_v27  ;;  %v17181_v17 = vld [vmem:[#allocation131_spill] sm:$0xff]  ;;  %v17182_v58 = vld [vmem:[#allocation132_spill] sm:$0xff] }
 0x687   : > { %v4825_v44 = vpop.permute.xlu1 %4824  ;;  %v4759_v16 = vpop.permute.xlu0 %4758  ;;  %6411 = vrot.lane.b32.xlu0 %v6077_v40, %s9619_s23  ;;  %v6092_v40 = vadd.f32 %v9176_v5, %v5964_v1  ;;  %v4459_v11 = vmul.f32 %v9182_v22, %v17181_v17  ;;  %v9183_v27 = vld [vmem:[%s16614_s7 + $0x2e0] sm:$0xff]  ;;  %v9184_v5 = vld [vmem:[%s16615_s29 + $0x3e8] sm:$0xff] }
 0x688   : > { %5156 = vst.msk [vmem:[#allocation2 + $0x1a8] sm:$0xff] %vm5102_vm2, %v4825_v44  ;;  %5123 = vst.msk [vmem:[#allocation2 + $0xa0] sm:$0xff] %vm5102_vm2, %v4759_v16  ;;  %v6125_v38 = vadd.f32 %v9177_v33, %v5997_v51  ;;  %v17183_v51 = vld [vmem:[#allocation136_spill] sm:$0xff] }
 0x689   : > { %6477 = vrot.lane.b32.xlu1 %v6110_v21, %s9619_s23  ;;  %v4587_v33 = vadd.f32 %v9184_v5, %v4459_v11  ;;  %v5981_v1 = vmul.f32 %v9179_v50, %v17183_v51  ;;  %v9186_v50 = vld [vmem:[%s16614_s7 + $0x260] sm:$0xff]  ;;  %v9187_v51 = vld [vmem:[%s16614_s7 + $0x368] sm:$0xff] }
 0x68b   : > { %v6332_v30 = vpop.permute.xlu1 %6331  ;;  %v6266_v44 = vpop.permute.xlu0 %6265  ;;  %v6791_v16 = vld [vmem:[#allocation2 + $0xa8] sm:$0xff]  ;;  %v6824_v21 = vld [vmem:[#allocation2 + $0x1b0] sm:$0xff]  ;;  %4872 = vrot.lane.b32.xlu0 %v4539_v43, %s9621_s17  ;;  %v9185_v43 = vld [vmem:[%s16615_s29 + $0x2e0] sm:$0xff]  ;;  %v6109_v11 = vadd.f32 %v9181_v25, %v5981_v1 }
 0x68c   : > { %6678 = vst.msk [vmem:[#allocation2 + $0x130] sm:$0xff] %vm6639_vm3, %v6332_v30  ;;  %6645 = vst.msk [vmem:[#allocation2 + $0x28] sm:$0xff] %vm6639_vm3, %v6266_v44  ;;  %8405 = vmatprep.subr.mxu0 %v6791_v16  ;;  %8438 = vmatprep.subr.mxu1 %v6824_v21  ;;  %v4426_v30 = vmul.f32 %v9183_v27, %v17182_v58  ;;  %v17184_v21 = vld [vmem:[#allocation137_spill] sm:$0xff]  ;;  %v9189_v1 = vld [vmem:[%s16615_s29 + $0x368] sm:$0xff] }
 0x68d   : > { %4938 = vrot.lane.b32.xlu1 %v4572_v59, %s9621_s17  ;;  %v5948_v17 = vmul.f32 %v9178_v55, %v17184_v21  ;;  %v17186_v21 = vld [vmem:[#allocation151_spill] sm:$0xff] }
 0x68e   : > { %v4554_v59 = vadd.f32 %v9185_v43, %v4426_v30 }
 0x68f   : > { %v4793_v44 = vpop.permute.xlu1 %4792  ;;  %v4727_v16 = vpop.permute.xlu0 %4726  ;;  %6441 = vrot.lane.b32.xlu0 %v6092_v40, %s9619_s23  ;;  %v17185_v40 = vld [vmem:[#allocation160_spill] sm:$0xff]  ;;  %v6076_v30 = vadd.f32 %v9180_v12, %v5948_v17  ;;  %v9188_v12 = vld [vmem:[%s16615_s29 + $0x260] sm:$0xff] }
 0x690   : > { %5140 = vst.msk [vmem:[#allocation2 + $0x128] sm:$0xff] %vm5102_vm2, %v4793_v44  ;;  %5107 = vst.msk [vmem:[#allocation2 + $0x20] sm:$0xff] %vm5102_vm2, %v4727_v16  ;;  %v4410_v55 = vmul.f32 %v9186_v50, %v17185_v40 }
 0x691   : > { %6507 = vrot.lane.b32.xlu1 %v6125_v38, %s9619_s23 }
 0x692   : > { %v4538_v25 = vadd.f32 %v9188_v12, %v4410_v55  ;;  %v9190_v55 = vld [vmem:[%s16614_s7 + $0x2d8] sm:$0xff] }
 0x693   : > { %v6362_v58 = vpop.permute.xlu1 %6361  ;;  %v6296_v44 = vpop.permute.xlu0 %6295  ;;  %v6775_v16 = vld [vmem:[#allocation2 + $0x28] sm:$0xff]  ;;  %v6808_v38 = vld [vmem:[#allocation2 + $0x130] sm:$0xff]  ;;  %4902 = vrot.lane.b32.xlu0 %v4554_v59, %s9621_s17 }
 0x694   : > { %6693 = vst.msk [vmem:[#allocation2 + $0x1a8] sm:$0xff] %vm6639_vm3, %v6362_v58  ;;  %6660 = vst.msk [vmem:[#allocation2 + $0xa0] sm:$0xff] %vm6639_vm3, %v6296_v44  ;;  %8406 = vmatpush3.msra.mxu0 %v6775_v16  ;;  %8439 = vmatpush3.msra.mxu1 %v6808_v38  ;;  %v4443_v58 = vmul.f32 %v9187_v51, %v17186_v21  ;;  %v17188_v38 = vld [vmem:[#allocation156_spill] sm:$0xff] }
 0x695   : > { %4968 = vrot.lane.b32.xlu1 %v4587_v33, %s9621_s17  ;;  %v17187_v33 = vld [vmem:[#allocation150_spill] sm:$0xff]  ;;  %v5996_v40 = vmul.f32 %v9182_v22, %v17188_v38  ;;  %v17189_v22 = vld [vmem:[#allocation155_spill] sm:$0xff] }
 0x696   : > { %v5963_v59 = vmul.f32 %v9183_v27, %v17187_v33  ;;  %v4571_v17 = vadd.f32 %v9189_v1, %v4443_v58  ;;  %v9191_v33 = vld [vmem:[%s16614_s7 + $0x3e0] sm:$0xff] }
 0x697   : > { %v4823_v44 = vpop.permute.xlu1 %4822  ;;  %v4757_v16 = vpop.permute.xlu0 %4756  ;;  %6409 = vrot.lane.b32.xlu0 %v6076_v30, %s9619_s23  ;;  %v4425_v30 = vmul.f32 %v9190_v55, %v17189_v22  ;;  %v6124_v58 = vadd.f32 %v9184_v5, %v5996_v40  ;;  %v17190_v38 = vld [vmem:[#allocation170_spill] sm:$0xff] }
 0x698   : > { %5155 = vst.msk [vmem:[#allocation2 + $0x1a0] sm:$0xff] %vm5102_vm2, %v4823_v44  ;;  %5122 = vst.msk [vmem:[#allocation2 + $0x98] sm:$0xff] %vm5102_vm2, %v4757_v16  ;;  %v6091_v27 = vadd.f32 %v9185_v43, %v5963_v59  ;;  %v9192_v5 = vld [vmem:[%s16615_s29 + $0x2d8] sm:$0xff] }
 0x699   : > { %6475 = vrot.lane.b32.xlu1 %v6109_v11, %s9619_s23  ;;  %v4553_v43 = vadd.f32 %v9192_v5, %v4425_v30 }
 0x69b   : > { %v6330_v21 = vpop.permute.xlu1 %6329  ;;  %v6264_v44 = vpop.permute.xlu0 %6263  ;;  %v6790_v16 = vld [vmem:[#allocation2 + $0xa0] sm:$0xff]  ;;  %v6823_v11 = vld [vmem:[#allocation2 + $0x1a8] sm:$0xff]  ;;  %4870 = vrot.lane.b32.xlu0 %v4538_v25, %s9621_s17  ;;  %v17191_v25 = vld [vmem:[#allocation169_spill] sm:$0xff] }
 0x69c   : > { %6677 = vst.msk [vmem:[#allocation2 + $0x128] sm:$0xff] %vm6639_vm3, %v6330_v21  ;;  %6644 = vst.msk [vmem:[#allocation2 + $0x20] sm:$0xff] %vm6639_vm3, %v6264_v44  ;;  %8407 = vmatprep.subr.mxu0 %v6790_v16  ;;  %8440 = vmatprep.subr.mxu1 %v6823_v11  ;;  %v4458_v21 = vmul.f32 %v9191_v33, %v17190_v38  ;;  %v5947_v59 = vmul.f32 %v9186_v50, %v17191_v25  ;;  %v17192_v11 = vld [vmem:[#allocation175_spill] sm:$0xff]  ;;  %v9194_v50 = vld [vmem:[%s16614_s7 + $0x258] sm:$0xff] }
 0x69d   : > { %4936 = vrot.lane.b32.xlu1 %v4571_v17, %s9621_s17  ;;  %v9193_v17 = vld [vmem:[%s16615_s29 + $0x3e0] sm:$0xff]  ;;  %v5980_v22 = vmul.f32 %v9187_v51, %v17192_v11 }
 0x69e   : > { %v4586_v40 = vadd.f32 %v9193_v17, %v4458_v21  ;;  %v6075_v30 = vadd.f32 %v9188_v12, %v5947_v59  ;;  %v9195_v21 = vld [vmem:[%s16614_s7 + $0x360] sm:$0xff]  ;;  %v9196_v12 = vld [vmem:[%s16615_s29 + $0x258] sm:$0xff] }
 0x69f   : > { %v4791_v44 = vpop.permute.xlu1 %4790  ;;  %v4725_v16 = vpop.permute.xlu0 %4724  ;;  %6439 = vrot.lane.b32.xlu0 %v6091_v27, %s9619_s23  ;;  %v17193_v27 = vld [vmem:[#allocation159_spill] sm:$0xff]  ;;  %v17194_v25 = vld [vmem:[#allocation174_spill] sm:$0xff] }
 0x6a0   : > { %5139 = vst.msk [vmem:[#allocation2 + $0x120] sm:$0xff] %vm5102_vm2, %v4791_v44  ;;  %5106 = vst.msk [vmem:[#allocation2 + $0x18] sm:$0xff] %vm5102_vm2, %v4725_v16  ;;  %v4409_v51 = vmul.f32 %v9194_v50, %v17193_v27  ;;  %v4442_v11 = vmul.f32 %v9195_v21, %v17194_v25  ;;  %v9197_v59 = vld [vmem:[%s16615_s29 + $0x360] sm:$0xff] }
 0x6a1   : > { %6505 = vrot.lane.b32.xlu1 %v6124_v58, %s9619_s23 }
 0x6a3   : > { %v6360_v38 = vpop.permute.xlu1 %6359  ;;  %v6294_v44 = vpop.permute.xlu0 %6293  ;;  %v6774_v16 = vld [vmem:[#allocation2 + $0x20] sm:$0xff]  ;;  %v6807_v58 = vld [vmem:[#allocation2 + $0x128] sm:$0xff]  ;;  %4900 = vrot.lane.b32.xlu0 %v4553_v43, %s9621_s17  ;;  %v4537_v43 = vadd.f32 %v9196_v12, %v4409_v51 }
 0x6a4   : > { %6692 = vst.msk [vmem:[#allocation2 + $0x1a0] sm:$0xff] %vm6639_vm3, %v6360_v38  ;;  %6659 = vst.msk [vmem:[#allocation2 + $0x98] sm:$0xff] %vm6639_vm3, %v6294_v44  ;;  %8408 = vmatpush3.msra.mxu0 %v6774_v16  ;;  %8441 = vmatpush3.msra.mxu1 %v6807_v58  ;;  %v6108_v38 = vadd.f32 %v9189_v1, %v5980_v22  ;;  %v4570_v1 = vadd.f32 %v9197_v59, %v4442_v11  ;;  %v17196_v58 = vld [vmem:[#allocation67_spill] sm:$0xff] }
 0x6a5   : > { %4966 = vrot.lane.b32.xlu1 %v4586_v40, %s9621_s17  ;;  %v17195_v40 = vld [vmem:[#allocation66_spill] sm:$0xff]  ;;  %v5962_v27 = vmul.f32 %v9190_v55, %v17196_v58 }
 0x6a6   : > { %v5995_v22 = vmul.f32 %v9191_v33, %v17195_v40  ;;  %v9198_v55 = vld [vmem:[%s16614_s7 + $0x3d8] sm:$0xff]  ;;  %v9199_v40 = vld [vmem:[%s16614_s7 + $0x2d0] sm:$0xff] }
 0x6a7   : > { %v4821_v44 = vpop.permute.xlu1 %4820  ;;  %v4755_v16 = vpop.permute.xlu0 %4754  ;;  %6407 = vrot.lane.b32.xlu0 %v6075_v30, %s9619_s23  ;;  %v6090_v30 = vadd.f32 %v9192_v5, %v5962_v27  ;;  %v17197_v33 = vld [vmem:[#allocation70_spill] sm:$0xff] }
 0x6a8   : > { %5154 = vst.msk [vmem:[#allocation2 + $0x198] sm:$0xff] %vm5102_vm2, %v4821_v44  ;;  %5121 = vst.msk [vmem:[#allocation2 + $0x90] sm:$0xff] %vm5102_vm2, %v4755_v16  ;;  %v6123_v51 = vadd.f32 %v9193_v17, %v5995_v22  ;;  %v4457_v11 = vmul.f32 %v9198_v55, %v17197_v33  ;;  %v17198_v58 = vld [vmem:[#allocation78_spill] sm:$0xff]  ;;  %v17199_v22 = vld [vmem:[#allocation77_spill] sm:$0xff] }
 0x6a9   : > { %6473 = vrot.lane.b32.xlu1 %v6108_v38, %s9619_s23  ;;  %v9200_v5 = vld [vmem:[%s16615_s29 + $0x3d8] sm:$0xff]  ;;  %v5979_v27 = vmul.f32 %v9195_v21, %v17199_v22  ;;  %v9202_v21 = vld [vmem:[%s16614_s7 + $0x250] sm:$0xff] }
 0x6aa   : > { %v4585_v17 = vadd.f32 %v9200_v5, %v4457_v11  ;;  %v9203_v22 = vld [vmem:[%s16614_s7 + $0x358] sm:$0xff] }
 0x6ab   : > { %v6328_v25 = vpop.permute.xlu1 %6327  ;;  %v6262_v44 = vpop.permute.xlu0 %6261  ;;  %v6789_v16 = vld [vmem:[#allocation2 + $0x98] sm:$0xff]  ;;  %v6822_v38 = vld [vmem:[#allocation2 + $0x1a0] sm:$0xff]  ;;  %4868 = vrot.lane.b32.xlu0 %v4537_v43, %s9621_s17  ;;  %v9201_v43 = vld [vmem:[%s16615_s29 + $0x2d0] sm:$0xff]  ;;  %v6107_v11 = vadd.f32 %v9197_v59, %v5979_v27 }
 0x6ac   : > { %6676 = vst.msk [vmem:[#allocation2 + $0x120] sm:$0xff] %vm6639_vm3, %v6328_v25  ;;  %6643 = vst.msk [vmem:[#allocation2 + $0x18] sm:$0xff] %vm6639_vm3, %v6262_v44  ;;  %8409 = vmatprep.subr.mxu0 %v6789_v16  ;;  %8442 = vmatprep.subr.mxu1 %v6822_v38  ;;  %v4424_v25 = vmul.f32 %v9199_v40, %v17198_v58  ;;  %v17200_v38 = vld [vmem:[#allocation80_spill] sm:$0xff]  ;;  %v9205_v27 = vld [vmem:[%s16615_s29 + $0x358] sm:$0xff] }
 0x6ad   : > { %4934 = vrot.lane.b32.xlu1 %v4570_v1, %s9621_s17  ;;  %v5946_v33 = vmul.f32 %v9194_v50, %v17200_v38  ;;  %v17202_v38 = vld [vmem:[#allocation31_spill] sm:$0xff] }
 0x6ae   : > { %v4552_v1 = vadd.f32 %v9201_v43, %v4424_v25 }
 0x6af   : > { %v4789_v44 = vpop.permute.xlu1 %4788  ;;  %v4723_v16 = vpop.permute.xlu0 %4722  ;;  %6437 = vrot.lane.b32.xlu0 %v6090_v30, %s9619_s23  ;;  %v17201_v30 = vld [vmem:[#allocation158_spill] sm:$0xff]  ;;  %v6074_v25 = vadd.f32 %v9196_v12, %v5946_v33  ;;  %v9204_v12 = vld [vmem:[%s16615_s29 + $0x250] sm:$0xff] }
 0x6b0   : > { %5138 = vst.msk [vmem:[#allocation2 + $0x118] sm:$0xff] %vm5102_vm2, %v4789_v44  ;;  %5105 = vst.msk [vmem:[#allocation2 + $0x10] sm:$0xff] %vm5102_vm2, %v4723_v16  ;;  %v4408_v50 = vmul.f32 %v9202_v21, %v17201_v30 }
 0x6b1   : > { %6503 = vrot.lane.b32.xlu1 %v6123_v51, %s9619_s23 }
 0x6b2   : > { %v4536_v59 = vadd.f32 %v9204_v12, %v4408_v50  ;;  %v9206_v50 = vld [vmem:[%s16614_s7 + $0x2c8] sm:$0xff] }
 0x6b3   : > { %v6358_v58 = vpop.permute.xlu1 %6357  ;;  %v6292_v44 = vpop.permute.xlu0 %6291  ;;  %v6773_v16 = vld [vmem:[#allocation2 + $0x18] sm:$0xff]  ;;  %v6806_v51 = vld [vmem:[#allocation2 + $0x120] sm:$0xff]  ;;  %4898 = vrot.lane.b32.xlu0 %v4552_v1, %s9621_s17 }
 0x6b4   : > { %6691 = vst.msk [vmem:[#allocation2 + $0x198] sm:$0xff] %vm6639_vm3, %v6358_v58  ;;  %6658 = vst.msk [vmem:[#allocation2 + $0x90] sm:$0xff] %vm6639_vm3, %v6292_v44  ;;  %8410 = vmatpush3.msra.mxu0 %v6773_v16  ;;  %8443 = vmatpush3.msra.mxu1 %v6806_v51  ;;  %v4441_v58 = vmul.f32 %v9203_v22, %v17202_v38  ;;  %v17204_v51 = vld [vmem:[#allocation33_spill] sm:$0xff] }
 0x6b5   : > { %4964 = vrot.lane.b32.xlu1 %v4585_v17, %s9621_s17  ;;  %v17203_v17 = vld [vmem:[#allocation79_spill] sm:$0xff]  ;;  %v5994_v30 = vmul.f32 %v9198_v55, %v17204_v51  ;;  %v17206_v51 = vld [vmem:[#allocation86_spill] sm:$0xff] }
 0x6b6   : > { %v5961_v1 = vmul.f32 %v9199_v40, %v17203_v17  ;;  %v4569_v33 = vadd.f32 %v9205_v27, %v4441_v58  ;;  %v17205_v55 = vld [vmem:[#allocation83_spill] sm:$0xff]  ;;  %v9207_v17 = vld [vmem:[%s16614_s7 + $0x3d0] sm:$0xff] }
 0x6b7   : > { %v4819_v44 = vpop.permute.xlu1 %4818  ;;  %v4753_v16 = vpop.permute.xlu0 %4752  ;;  %6405 = vrot.lane.b32.xlu0 %v6074_v25, %s9619_s23  ;;  %v4423_v25 = vmul.f32 %v9206_v50, %v17205_v55  ;;  %v6122_v58 = vadd.f32 %v9200_v5, %v5994_v30  ;;  %v9208_v5 = vld [vmem:[%s16615_s29 + $0x2c8] sm:$0xff] }
 0x6b8   : > { %5153 = vst.msk [vmem:[#allocation2 + $0x190] sm:$0xff] %vm5102_vm2, %v4819_v44  ;;  %5120 = vst.msk [vmem:[#allocation2 + $0x88] sm:$0xff] %vm5102_vm2, %v4753_v16  ;;  %v6089_v40 = vadd.f32 %v9201_v43, %v5961_v1 }
 0x6b9   : > { %6471 = vrot.lane.b32.xlu1 %v6107_v11, %s9619_s23  ;;  %v4551_v43 = vadd.f32 %v9208_v5, %v4423_v25 }
 0x6bb   : > { %v6326_v38 = vpop.permute.xlu1 %6325  ;;  %v6260_v44 = vpop.permute.xlu0 %6259  ;;  %v6788_v16 = vld [vmem:[#allocation2 + $0x90] sm:$0xff]  ;;  %v6821_v11 = vld [vmem:[#allocation2 + $0x198] sm:$0xff]  ;;  %4866 = vrot.lane.b32.xlu0 %v4536_v59, %s9621_s17 }
 0x6bc   : > { %6675 = vst.msk [vmem:[#allocation2 + $0x118] sm:$0xff] %vm6639_vm3, %v6326_v38  ;;  %6642 = vst.msk [vmem:[#allocation2 + $0x10] sm:$0xff] %vm6639_vm3, %v6260_v44  ;;  %8411 = vmatprep.subr.mxu0 %v6788_v16  ;;  %8444 = vmatprep.subr.mxu1 %v6821_v11  ;;  %v4456_v38 = vmul.f32 %v9207_v17, %v17206_v51  ;;  %v17207_v59 = vld [vmem:[#allocation32_spill] sm:$0xff]  ;;  %v17208_v11 = vld [vmem:[#allocation87_spill] sm:$0xff] }
 0x6bd   : > { %4932 = vrot.lane.b32.xlu1 %v4569_v33, %s9621_s17  ;;  %v5945_v1 = vmul.f32 %v9202_v21, %v17207_v59  ;;  %v9209_v33 = vld [vmem:[%s16615_s29 + $0x3d0] sm:$0xff]  ;;  %v5978_v55 = vmul.f32 %v9203_v22, %v17208_v11  ;;  %v9210_v21 = vld [vmem:[%s16614_s7 + $0x248] sm:$0xff]  ;;  %v17210_v59 = vld [vmem:[#allocation34_spill] sm:$0xff] }
 0x6be   : > { %v4584_v30 = vadd.f32 %v9209_v33, %v4456_v38  ;;  %v9211_v38 = vld [vmem:[%s16614_s7 + $0x350] sm:$0xff] }
 0x6bf   : > { %v4787_v44 = vpop.permute.xlu1 %4786  ;;  %v4721_v16 = vpop.permute.xlu0 %4720  ;;  %6435 = vrot.lane.b32.xlu0 %v6089_v40, %s9619_s23  ;;  %v17209_v40 = vld [vmem:[#allocation157_spill] sm:$0xff]  ;;  %v6073_v25 = vadd.f32 %v9204_v12, %v5945_v1  ;;  %v4440_v11 = vmul.f32 %v9211_v38, %v17210_v59  ;;  %v9212_v12 = vld [vmem:[%s16615_s29 + $0x248] sm:$0xff] }
 0x6c0   : > { %5137 = vst.msk [vmem:[#allocation2 + $0x110] sm:$0xff] %vm5102_vm2, %v4787_v44  ;;  %5104 = vst.msk [vmem:[#allocation2 + $0x8] sm:$0xff] %vm5102_vm2, %v4721_v16  ;;  %v4407_v22 = vmul.f32 %v9210_v21, %v17209_v40  ;;  %v9213_v1 = vld [vmem:[%s16615_s29 + $0x350] sm:$0xff] }
 0x6c1   : > { %6501 = vrot.lane.b32.xlu1 %v6122_v58, %s9619_s23 }
 0x6c3   : > { %v6356_v51 = vpop.permute.xlu1 %6355  ;;  %v6290_v44 = vpop.permute.xlu0 %6289  ;;  %v6772_v16 = vld [vmem:[#allocation2 + $0x10] sm:$0xff]  ;;  %v6805_v58 = vld [vmem:[#allocation2 + $0x118] sm:$0xff]  ;;  %4896 = vrot.lane.b32.xlu0 %v4551_v43, %s9621_s17  ;;  %v4535_v43 = vadd.f32 %v9212_v12, %v4407_v22 }
 0x6c4   : > { %6690 = vst.msk [vmem:[#allocation2 + $0x190] sm:$0xff] %vm6639_vm3, %v6356_v51  ;;  %6657 = vst.msk [vmem:[#allocation2 + $0x88] sm:$0xff] %vm6639_vm3, %v6290_v44  ;;  %8412 = vmatpush3.msra.mxu0 %v6772_v16  ;;  %8445 = vmatpush3.msra.mxu1 %v6805_v58  ;;  %v6106_v51 = vadd.f32 %v9205_v27, %v5978_v55  ;;  %v4568_v27 = vadd.f32 %v9213_v1, %v4440_v11  ;;  %v17212_v58 = vld [vmem:[#allocation89_spill] sm:$0xff] }
 0x6c5   : > { %4962 = vrot.lane.b32.xlu1 %v4584_v30, %s9621_s17  ;;  %v17211_v30 = vld [vmem:[#allocation35_spill] sm:$0xff]  ;;  %v5960_v40 = vmul.f32 %v9206_v50, %v17212_v58  ;;  %v17214_v58 = vld [vmem:[#allocation106_spill] sm:$0xff] }
 0x6c6   : > { %v5993_v55 = vmul.f32 %v9207_v17, %v17211_v30  ;;  %v9214_v50 = vld [vmem:[%s16614_s7 + $0x3c8] sm:$0xff]  ;;  %v17213_v17 = vld [vmem:[#allocation110_spill] sm:$0xff] }
 0x6c7   : > { %v4817_v44 = vpop.permute.xlu1 %4816  ;;  %v4751_v16 = vpop.permute.xlu0 %4750  ;;  %6403 = vrot.lane.b32.xlu0 %v6073_v25, %s9619_s23  ;;  %v6088_v25 = vadd.f32 %v9208_v5, %v5960_v40  ;;  %v4455_v11 = vmul.f32 %v9214_v50, %v17213_v17  ;;  %v9215_v30 = vld [vmem:[%s16614_s7 + $0x2c0] sm:$0xff]  ;;  %v9216_v5 = vld [vmem:[%s16615_s29 + $0x3c8] sm:$0xff] }
 0x6c8   : > { %5152 = vst.msk [vmem:[#allocation2 + $0x188] sm:$0xff] %vm5102_vm2, %v4817_v44  ;;  %5119 = vst.msk [vmem:[#allocation2 + $0x80] sm:$0xff] %vm5102_vm2, %v4751_v16  ;;  %v6121_v22 = vadd.f32 %v9209_v33, %v5993_v55  ;;  %v17215_v55 = vld [vmem:[#allocation176_spill] sm:$0xff] }
 0x6c9   : > { %6469 = vrot.lane.b32.xlu1 %v6106_v51, %s9619_s23  ;;  %v4583_v33 = vadd.f32 %v9216_v5, %v4455_v11  ;;  %v5977_v40 = vmul.f32 %v9211_v38, %v17215_v55  ;;  %v9218_v38 = vld [vmem:[%s16614_s7 + $0x240] sm:$0xff]  ;;  %v9219_v55 = vld [vmem:[%s16614_s7 + $0x348] sm:$0xff] }
 0x6cb   : > { %v6324_v59 = vpop.permute.xlu1 %6323  ;;  %v6258_v44 = vpop.permute.xlu0 %6257  ;;  %v6787_v16 = vld [vmem:[#allocation2 + $0x88] sm:$0xff]  ;;  %v6820_v51 = vld [vmem:[#allocation2 + $0x190] sm:$0xff]  ;;  %4864 = vrot.lane.b32.xlu0 %v4535_v43, %s9621_s17  ;;  %v9217_v43 = vld [vmem:[%s16615_s29 + $0x2c0] sm:$0xff]  ;;  %v6105_v11 = vadd.f32 %v9213_v1, %v5977_v40 }
 0x6cc   : > { %6674 = vst.msk [vmem:[#allocation2 + $0x110] sm:$0xff] %vm6639_vm3, %v6324_v59  ;;  %6641 = vst.msk [vmem:[#allocation2 + $0x8] sm:$0xff] %vm6639_vm3, %v6258_v44  ;;  %8413 = vmatprep.subr.mxu0 %v6787_v16  ;;  %8446 = vmatprep.subr.mxu1 %v6820_v51  ;;  %v4422_v59 = vmul.f32 %v9215_v30, %v17214_v58  ;;  %v17216_v51 = vld [vmem:[#allocation177_spill] sm:$0xff]  ;;  %v9221_v40 = vld [vmem:[%s16615_s29 + $0x348] sm:$0xff] }
 0x6cd   : > { %4930 = vrot.lane.b32.xlu1 %v4568_v27, %s9621_s17  ;;  %v5944_v17 = vmul.f32 %v9210_v21, %v17216_v51  ;;  %v17218_v51 = vld [vmem:[#allocation179_spill] sm:$0xff] }
 0x6ce   : > { %v4550_v27 = vadd.f32 %v9217_v43, %v4422_v59 }
 0x6cf   : > { %v4785_v44 = vpop.permute.xlu1 %4784  ;;  %v4719_v16 = vpop.permute.xlu0 %4718  ;;  %6433 = vrot.lane.b32.xlu0 %v6088_v25, %s9619_s23  ;;  %v17217_v25 = vld [vmem:[#allocation154_spill] sm:$0xff]  ;;  %v6072_v59 = vadd.f32 %v9212_v12, %v5944_v17 }
 0x6d0   : > { %5136 = vst.msk [vmem:[#allocation2 + $0x108] sm:$0xff] %vm5102_vm2, %v4785_v44  ;;  %5103 = vst.msk [vmem:[#allocation2] sm:$0xff] %vm5102_vm2, %v4719_v16  ;;  %v4406_v21 = vmul.f32 %v9218_v38, %v17217_v25  ;;  %v9220_v12 = vld [vmem:[%s16615_s29 + $0x240] sm:$0xff] }
 0x6d1   : > { %6499 = vrot.lane.b32.xlu1 %v6121_v22, %s9619_s23 }
 0x6d2   : > { %v4534_v1 = vadd.f32 %v9220_v12, %v4406_v21  ;;  %v9222_v21 = vld [vmem:[%s16614_s7 + $0x2b8] sm:$0xff] }
 0x6d3   : > { %v6354_v58 = vpop.permute.xlu1 %6353  ;;  %v6288_v44 = vpop.permute.xlu0 %6287  ;;  %v6771_v16 = vld [vmem:[#allocation2 + $0x8] sm:$0xff]  ;;  %v6804_v22 = vld [vmem:[#allocation2 + $0x110] sm:$0xff]  ;;  %4894 = vrot.lane.b32.xlu0 %v4550_v27, %s9621_s17 }
 0x6d4   : > { %6689 = vst.msk [vmem:[#allocation2 + $0x188] sm:$0xff] %vm6639_vm3, %v6354_v58  ;;  %6656 = vst.msk [vmem:[#allocation2 + $0x80] sm:$0xff] %vm6639_vm3, %v6288_v44  ;;  %8414 = vmatpush3.msra.mxu0 %v6771_v16  ;;  %8447 = vmatpush3.msra.mxu1 %v6804_v22  ;;  %v4439_v58 = vmul.f32 %v9219_v55, %v17218_v51  ;;  %v17220_v22 = vld [vmem:[#allocation180_spill] sm:$0xff] }
 0x6d5   : > { %4960 = vrot.lane.b32.xlu1 %v4583_v33, %s9621_s17  ;;  %v17219_v33 = vld [vmem:[#allocation178_spill] sm:$0xff]  ;;  %v5992_v25 = vmul.f32 %v9214_v50, %v17220_v22  ;;  %v17221_v50 = vld [vmem:[#allocation109_spill] sm:$0xff] }
 0x6d6   : > { %v5959_v27 = vmul.f32 %v9215_v30, %v17219_v33  ;;  %v4567_v17 = vadd.f32 %v9221_v40, %v4439_v58  ;;  %v9223_v33 = vld [vmem:[%s16614_s7 + $0x3c0] sm:$0xff] }
 0x6d7   : > { %v4909_v44 = vpop.permute.xlu1 %4908  ;;  %v4815_v16 = vpop.permute.xlu0 %4814  ;;  %6401 = vrot.lane.b32.xlu0 %v6072_v59, %s9619_s23  ;;  %v4421_v59 = vmul.f32 %v9222_v21, %v17221_v50  ;;  %v6120_v58 = vadd.f32 %v9216_v5, %v5992_v25  ;;  %v4454_v22 = vmul.f32 %v9223_v33, %v14557_v53  ;;  %v9224_v5 = vld [vmem:[%s16615_s29 + $0x2b8] sm:$0xff]  ;;  %v9225_v53 = vld [vmem:[%s16615_s29 + $0x3c0] sm:$0xff] }
 0x6d8   : > { %5198 = vst.msk [vmem:[#allocation2 + $0x2f8] sm:$0xff] %vm5102_vm2, %v4909_v44  ;;  %5151 = vst.msk [vmem:[#allocation2 + $0x180] sm:$0xff] %vm5102_vm2, %v4815_v16  ;;  %v6087_v30 = vadd.f32 %v9217_v43, %v5959_v27 }
 0x6d9   : > { %6467 = vrot.lane.b32.xlu1 %v6105_v11, %s9619_s23  ;;  %v4549_v43 = vadd.f32 %v9224_v5, %v4421_v59  ;;  %v4582_v27 = vadd.f32 %v9225_v53, %v4454_v22  ;;  %v17223_v59 = vld [vmem:[#allocation181_spill] sm:$0xff] }
 0x6db   : > { %v6322_v51 = vpop.permute.xlu1 %6321  ;;  %v6256_v44 = vpop.permute.xlu0 %6255  ;;  %v6786_v16 = vld [vmem:[#allocation2 + $0x80] sm:$0xff]  ;;  %v6819_v11 = vld [vmem:[#allocation2 + $0x188] sm:$0xff]  ;;  %4862 = vrot.lane.b32.xlu0 %v4534_v1, %s9621_s17  ;;  %v5943_v1 = vmul.f32 %v9218_v38, %v14555_v0  ;;  %v9226_v0 = vld [vmem:[%s16614_s7 + $0x238] sm:$0xff] }
 0x6dc   : > { %6673 = vst.msk [vmem:[#allocation2 + $0x108] sm:$0xff] %vm6639_vm3, %v6322_v51  ;;  %6640 = vst.msk [vmem:[#allocation2] sm:$0xff] %vm6639_vm3, %v6256_v44  ;;  %8415 = vmatprep.subr.mxu0 %v6786_v16  ;;  %8448 = vmatprep.subr.mxu1 %v6819_v11 }
 0x6dd   : > { %4928 = vrot.lane.b32.xlu1 %v4567_v17, %s9621_s17  ;;  %v5976_v17 = vmul.f32 %v9219_v55, %v14568_v35  ;;  %v17222_v35 = vld [vmem:[#allocation153_spill] sm:$0xff]  ;;  %v6071_v55 = vadd.f32 %v9220_v12, %v5943_v1  ;;  %v5991_v1 = vmul.f32 %v9223_v33, %v14579_v31 }
 0x6de   : > { %v4405_v38 = vmul.f32 %v9226_v0, %v17222_v35  ;;  %v9230_v31 = vld [vmem:[%s16614_s7 + $0x2b0] sm:$0xff]  ;;  %v9231_v35 = vld [vmem:[%s16614_s7 + $0x3b8] sm:$0xff] }
 0x6df   : > { %v4877_v51 = vpop.permute.xlu1 %4876  ;;  %v4783_v44 = vpop.permute.xlu0 %4782  ;;  %6431 = vrot.lane.b32.xlu0 %v6087_v30, %s9619_s23  ;;  %v9227_v30 = vld [vmem:[%s16614_s7 + $0x340] sm:$0xff]  ;;  %v6104_v22 = vadd.f32 %v9221_v40, %v5976_v17  ;;  %v17224_v33 = vld [vmem:[#allocation173_spill] sm:$0xff] }
 0x6e0   : > { %5182 = vst.msk [vmem:[#allocation2 + $0x278] sm:$0xff] %vm5102_vm2, %v4877_v51  ;;  %5135 = vst.msk [vmem:[#allocation2 + $0x100] sm:$0xff] %vm5102_vm2, %v4783_v44 }
 0x6e1   : > { %6497 = vrot.lane.b32.xlu1 %v6120_v58, %s9619_s23  ;;  %v4438_v58 = vmul.f32 %v9227_v30, %v17223_v59 }
 0x6e3   : > { %v6446_v25 = vpop.permute.xlu1 %6445  ;;  %v6352_v16 = vpop.permute.xlu0 %6351  ;;  %v6770_v11 = vld [vmem:[#allocation2] sm:$0xff]  ;;  %v6803_v50 = vld [vmem:[#allocation2 + $0x108] sm:$0xff]  ;;  %4892 = vrot.lane.b32.xlu0 %v4549_v43, %s9621_s17 }
 0x6e4   : > { %6735 = vst.msk [vmem:[#allocation2 + $0x2f8] sm:$0xff] %vm6639_vm3, %v6446_v25  ;;  %6688 = vst.msk [vmem:[#allocation2 + $0x180] sm:$0xff] %vm6639_vm3, %v6352_v16  ;;  %8416 = vmatpush3.msra.mxu0 %v6770_v11  ;;  %8449 = vmatpush3.msra.mxu1 %v6803_v50  ;;  %v9229_v43 = vld [vmem:[%s16615_s29 + $0x340] sm:$0xff] }
 0x6e5   : > { %4958 = vrot.lane.b32.xlu1 %v4582_v27, %s9621_s17  ;;  %7007 = vmatmul.mubr.f32.vlgmr.msra.gmra.mxu0 %v15358_v29  ;;  %v9228_v29 = vld [vmem:[%s16615_s29 + $0x238] sm:$0xff]  ;;  %v4566_v40 = vadd.f32 %v9229_v43, %v4438_v58  ;;  %v5958_v27 = vmul.f32 %v9222_v21, %v14581_v57  ;;  %v4420_v57 = vmul.f32 %v9230_v31, %v17224_v33 }
 0x6e6   : > { %v4533_v12 = vadd.f32 %v9228_v29, %v4405_v38  ;;  %v6119_v21 = vadd.f32 %v9225_v53, %v5991_v1  ;;  %v4453_v38 = vmul.f32 %v9231_v35, %v14592_v60  ;;  %v5942_v58 = vmul.f32 %v9226_v0, %v14590_v10  ;;  %v9233_v60 = vld [vmem:[%s16615_s29 + $0x3b8] sm:$0xff]  ;;  %v9234_v10 = vld [vmem:[%s16614_s7 + $0x230] sm:$0xff] }
 0x6e7   : > { %v4973_v51 = vpop.permute.xlu1 %4972  ;;  %v4907_v44 = vpop.permute.xlu0 %4906  ;;  %6399 = vrot.lane.b32.xlu0 %v6071_v55, %s9619_s23  ;;  %v6086_v50 = vadd.f32 %v9224_v5, %v5958_v27  ;;  %v9232_v5 = vld [vmem:[%s16615_s29 + $0x2b0] sm:$0xff]  ;;  %v9235_v27 = vld [vmem:[%s16614_s7 + $0x338] sm:$0xff]  ;;  %v5990_v33 = vmul.f32 %v9231_v35, %v14618_v18  ;;  %v9238_v18 = vld [vmem:[%s16614_s7 + $0x2a8] sm:$0xff] }
 0x6e8   : > { %5230 = vst.msk [vmem:[#allocation2 + $0x3f8] sm:$0xff] %vm5102_vm2, %v4973_v51  ;;  %5197 = vst.msk [vmem:[#allocation2 + $0x2f0] sm:$0xff] %vm5102_vm2, %v4907_v44  ;;  %v4548_v53 = vadd.f32 %v9232_v5, %v4420_v57  ;;  %v5975_v51 = vmul.f32 %v9227_v30, %v14606_v46  ;;  %v17225_v46 = vld [vmem:[#allocation152_spill] sm:$0xff]  ;;  %v6070_v30 = vadd.f32 %v9228_v29, %v5942_v58  ;;  %v17226_v35 = vld [vmem:[#allocation171_spill] sm:$0xff] }
 0x6e9   : > { %6465 = vrot.lane.b32.xlu1 %v6104_v22, %s9619_s23  ;;  %v4581_v22 = vadd.f32 %v9233_v60, %v4453_v38  ;;  %v4404_v0 = vmul.f32 %v9234_v10, %v17225_v46  ;;  %v5957_v57 = vmul.f32 %v9230_v31, %v14620_v39  ;;  %v4419_v39 = vmul.f32 %v9238_v18, %v17226_v35 }
 0x6ea   : > { %v6118_v31 = vadd.f32 %v9233_v60, %v5990_v33 }
 0x6eb   : > { %v6414_v17 = vpop.permute.xlu1 %6413  ;;  %v6320_v25 = vpop.permute.xlu0 %6319  ;;  %v6818_v16 = vld [vmem:[#allocation2 + $0x180] sm:$0xff]  ;;  %v6865_v11 = vld [vmem:[#allocation2 + $0x2f8] sm:$0xff]  ;;  %4860 = vrot.lane.b32.xlu0 %v4533_v12, %s9621_s17 }
 0x6ec   : > { %6719 = vst.msk [vmem:[#allocation2 + $0x278] sm:$0xff] %vm6639_vm3, %v6414_v17  ;;  %6672 = vst.msk [vmem:[#allocation2 + $0x100] sm:$0xff] %vm6639_vm3, %v6320_v25  ;;  %8450 = vmatprep.subr.mxu1 %v6818_v16  ;;  %8455 = vmatprep.subr.mxu0 %v6865_v11  ;;  %v4437_v17 = vmul.f32 %v9235_v27, %v14604_v45  ;;  %v6103_v25 = vadd.f32 %v9229_v43, %v5975_v51  ;;  %v9237_v45 = vld [vmem:[%s16615_s29 + $0x338] sm:$0xff] }
 0x6ed   : > { %4926 = vrot.lane.b32.xlu1 %v4566_v40, %s9621_s17 }
 0x6ee   : > { %v4565_v43 = vadd.f32 %v9237_v45, %v4437_v17  ;;  %v9243_v17 = vld [vmem:[%s16614_s7 + $0x330] sm:$0xff] }
 0x6ef   : > { %v4941_v55 = vpop.permute.xlu1 %4940  ;;  %v4875_v59 = vpop.permute.xlu0 %4874  ;;  %6429 = vrot.lane.b32.xlu0 %v6086_v50, %s9619_s23 }
 0x6f0   : > { %5214 = vst.msk [vmem:[#allocation2 + $0x378] sm:$0xff] %vm5102_vm2, %v4941_v55  ;;  %5181 = vst.msk [vmem:[#allocation2 + $0x270] sm:$0xff] %vm5102_vm2, %v4875_v59  ;;  %v6085_v59 = vadd.f32 %v9232_v5, %v5957_v57  ;;  %v9240_v5 = vld [vmem:[%s16615_s29 + $0x2a8] sm:$0xff]  ;;  %v9245_v57 = vld [vmem:[%s16615_s29 + $0x330] sm:$0xff] }
 0x6f1   : > { %6495 = vrot.lane.b32.xlu1 %v6119_v21, %s9619_s23  ;;  %v4547_v60 = vadd.f32 %v9240_v5, %v4419_v39 }
 0x6f3   : > { %v6510_v44 = vpop.permute.xlu1 %6509  ;;  %v6444_v12 = vpop.permute.xlu0 %6443  ;;  %v6802_v40 = vld [vmem:[#allocation2 + $0x100] sm:$0xff]  ;;  %v6849_v1 = vld [vmem:[#allocation2 + $0x278] sm:$0xff]  ;;  %4890 = vrot.lane.b32.xlu0 %v4548_v53, %s9621_s17  ;;  %v9239_v53 = vld [vmem:[%s16614_s7 + $0x3b0] sm:$0xff] }
 0x6f4   : > { %6767 = vst.msk [vmem:[#allocation2 + $0x3f8] sm:$0xff] %vm6639_vm3, %v6510_v44  ;;  %6734 = vst.msk [vmem:[#allocation2 + $0x2f0] sm:$0xff] %vm6639_vm3, %v6444_v12  ;;  %8451 = vmatpush3.msra.mxu1 %v6802_v40  ;;  %8456 = vmatpush3.msra.mxu0 %v6849_v1  ;;  %v4452_v58 = vmul.f32 %v9239_v53, %v14634_v63  ;;  %v5941_v44 = vmul.f32 %v9234_v10, %v14632_v41  ;;  %v9241_v63 = vld [vmem:[%s16615_s29 + $0x3b0] sm:$0xff]  ;;  %v9242_v41 = vld [vmem:[%s16614_s7 + $0x228] sm:$0xff] }
 0x6f5   : > { %4956 = vrot.lane.b32.xlu1 %v4581_v22, %s9621_s17  ;;  %7077 = vmatmul.mubr.f32.vlgmr.msra.gmra.mxu1 %v15413_v20  ;;  %v9236_v20 = vld [vmem:[%s16615_s29 + $0x230] sm:$0xff]  ;;  %v5974_v40 = vmul.f32 %v9235_v27, %v14648_v28 }
 0x6f6   : > { %v4532_v29 = vadd.f32 %v9236_v20, %v4404_v0  ;;  %v4580_v12 = vadd.f32 %v9241_v63, %v4452_v58  ;;  %v17227_v10 = vld [vmem:[#allocation149_spill] sm:$0xff]  ;;  %v6069_v27 = vadd.f32 %v9236_v20, %v5941_v44  ;;  %v9244_v20 = vld [vmem:[%s16615_s29 + $0x228] sm:$0xff]  ;;  %v5940_v44 = vmul.f32 %v9242_v41, %v14674_v2  ;;  %v9250_v2 = vld [vmem:[%s16614_s7 + $0x220] sm:$0xff] }
 0x6f7   : > { %v4971_v16 = vpop.permute.xlu1 %4970  ;;  %v4905_v11 = vpop.permute.xlu0 %4904  ;;  %6397 = vrot.lane.b32.xlu0 %v6070_v30, %s9619_s23  ;;  %v4403_v28 = vmul.f32 %v9242_v41, %v17227_v10  ;;  %v9251_v10 = vld [vmem:[%s16614_s7 + $0x328] sm:$0xff] }
 0x6f8   : > { %5229 = vst.msk [vmem:[#allocation2 + $0x3f0] sm:$0xff] %vm5102_vm2, %v4971_v16  ;;  %5196 = vst.msk [vmem:[#allocation2 + $0x2e8] sm:$0xff] %vm5102_vm2, %v4905_v11  ;;  %v6102_v11 = vadd.f32 %v9237_v45, %v5974_v40  ;;  %v6068_v41 = vadd.f32 %v9244_v20, %v5940_v44 }
 0x6f9   : > { %6463 = vrot.lane.b32.xlu1 %v6103_v25, %s9619_s23  ;;  %v17228_v25 = vld [vmem:[#allocation104_spill] sm:$0xff]  ;;  %v4531_v33 = vadd.f32 %v9244_v20, %v4403_v28  ;;  %v4435_v28 = vmul.f32 %v9251_v10, %v14688_v14  ;;  %v17231_v20 = vld [vmem:[#allocation107_spill] sm:$0xff] }
 0x6fa   : > { %v4436_v16 = vmul.f32 %v9243_v17, %v17228_v25  ;;  %v9253_v14 = vld [vmem:[%s16615_s29 + $0x328] sm:$0xff] }
 0x6fb   : > { %v6478_v21 = vpop.permute.xlu1 %6477  ;;  %v6412_v50 = vpop.permute.xlu0 %6411  ;;  %v6864_v38 = vld [vmem:[#allocation2 + $0x2f0] sm:$0xff]  ;;  %v6897_v55 = vld [vmem:[#allocation2 + $0x3f8] sm:$0xff]  ;;  %4858 = vrot.lane.b32.xlu0 %v4532_v29, %s9621_s17 }
 0x6fc   : > { %6751 = vst.msk [vmem:[#allocation2 + $0x378] sm:$0xff] %vm6639_vm3, %v6478_v21  ;;  %6718 = vst.msk [vmem:[#allocation2 + $0x270] sm:$0xff] %vm6639_vm3, %v6412_v50  ;;  %8457 = vmatprep.subr.mxu0 %v6864_v38  ;;  %8490 = vmatprep.subr.mxu1 %v6897_v55  ;;  %v4564_v45 = vadd.f32 %v9245_v57, %v4436_v16  ;;  %v5989_v21 = vmul.f32 %v9239_v53, %v14660_v15  ;;  %v9246_v15 = vld [vmem:[%s16614_s7 + $0x2a0] sm:$0xff]  ;;  %v9247_v53 = vld [vmem:[%s16614_s7 + $0x3a8] sm:$0xff] }
 0x6fd   : > { %4924 = vrot.lane.b32.xlu1 %v4565_v43, %s9621_s17  ;;  %v5956_v50 = vmul.f32 %v9238_v18, %v14662_v8  ;;  %v4451_v58 = vmul.f32 %v9247_v53, %v14676_v19  ;;  %v9249_v19 = vld [vmem:[%s16615_s29 + $0x3a8] sm:$0xff]  ;;  %v9252_v16 = vld [vmem:[%s16615_s29 + $0x220] sm:$0xff] }
 0x6fe   : > { %v6117_v18 = vadd.f32 %v9241_v63, %v5989_v21 }
 0x6ff   : > { %v4939_v22 = vpop.permute.xlu1 %4938  ;;  %v4873_v51 = vpop.permute.xlu0 %4872  ;;  %6427 = vrot.lane.b32.xlu0 %v6085_v59, %s9619_s23  ;;  %v6084_v59 = vadd.f32 %v9240_v5, %v5956_v50  ;;  %v9248_v5 = vld [vmem:[%s16615_s29 + $0x2a0] sm:$0xff]  ;;  %v4579_v63 = vadd.f32 %v9249_v19, %v4451_v58  ;;  %v5939_v58 = vmul.f32 %v9250_v2, %v14716_v34  ;;  %v9258_v34 = vld [vmem:[%s16614_s7 + $0x218] sm:$0xff] }
 0x700   : > { %5213 = vst.msk [vmem:[#allocation2 + $0x370] sm:$0xff] %vm5102_vm2, %v4939_v22  ;;  %5180 = vst.msk [vmem:[#allocation2 + $0x268] sm:$0xff] %vm5102_vm2, %v4873_v51 }
 0x701   : > { %6493 = vrot.lane.b32.xlu1 %v6118_v31, %s9619_s23  ;;  %v17229_v31 = vld [vmem:[#allocation168_spill] sm:$0xff] }
 0x702   : > { %v4418_v8 = vmul.f32 %v9246_v15, %v17229_v31 }
 0x703   : > { %v6508_v1 = vpop.permute.xlu1 %6507  ;;  %v6442_v46 = vpop.permute.xlu0 %6441  ;;  %v6848_v0 = vld [vmem:[#allocation2 + $0x270] sm:$0xff]  ;;  %v6881_v30 = vld [vmem:[#allocation2 + $0x378] sm:$0xff]  ;;  %4888 = vrot.lane.b32.xlu0 %v4547_v60, %s9621_s17 }
 0x704   : > { %6766 = vst.msk [vmem:[#allocation2 + $0x3f0] sm:$0xff] %vm6639_vm3, %v6508_v1  ;;  %6733 = vst.msk [vmem:[#allocation2 + $0x2e8] sm:$0xff] %vm6639_vm3, %v6442_v46  ;;  %8458 = vmatpush3.msra.mxu0 %v6848_v0  ;;  %8491 = vmatpush3.msra.mxu1 %v6881_v30  ;;  %v4546_v60 = vadd.f32 %v9248_v5, %v4418_v8  ;;  %v17230_v30 = vld [vmem:[#allocation148_spill] sm:$0xff] }
 0x705   : > { %4954 = vrot.lane.b32.xlu1 %v4580_v12, %s9621_s17  ;;  %v5973_v12 = vmul.f32 %v9243_v17, %v14690_v4  ;;  %v4402_v4 = vmul.f32 %v9250_v2, %v17230_v30  ;;  %v9260_v30 = vld [vmem:[%s16615_s29 + $0x218] sm:$0xff] }
 0x707   : > { %v4969_v29 = vpop.permute.xlu1 %4968  ;;  %v4903_v43 = vpop.permute.xlu0 %4902  ;;  %6395 = vrot.lane.b32.xlu0 %v6069_v27, %s9619_s23  ;;  %v6101_v27 = vadd.f32 %v9245_v57, %v5973_v12  ;;  %v6067_v12 = vadd.f32 %v9252_v16, %v5939_v58 }
 0x708   : > { %5228 = vst.msk [vmem:[#allocation2 + $0x3e8] sm:$0xff] %vm5102_vm2, %v4969_v29  ;;  %5195 = vst.msk [vmem:[#allocation2 + $0x2e0] sm:$0xff] %vm5102_vm2, %v4903_v43  ;;  %v4563_v29 = vadd.f32 %v9253_v14, %v4435_v28  ;;  %v5988_v43 = vmul.f32 %v9247_v53, %v14702_v23  ;;  %v9254_v23 = vld [vmem:[%s16614_s7 + $0x298] sm:$0xff] }
 0x709   : > { %6461 = vrot.lane.b32.xlu1 %v6102_v11, %s9619_s23  ;;  %v4530_v11 = vadd.f32 %v9252_v16, %v4402_v4  ;;  %v5954_v28 = vmul.f32 %v9254_v23, %v14746_v42 }
 0x70b   : > { %v6476_v38 = vpop.permute.xlu1 %6475  ;;  %v6410_v55 = vpop.permute.xlu0 %6409  ;;  %v6863_v35 = vld [vmem:[#allocation2 + $0x2e8] sm:$0xff]  ;;  %v6896_v39 = vld [vmem:[#allocation2 + $0x3f0] sm:$0xff]  ;;  %4856 = vrot.lane.b32.xlu0 %v4531_v33, %s9621_s17  ;;  %v5955_v33 = vmul.f32 %v9246_v15, %v17231_v20  ;;  %v9255_v15 = vld [vmem:[%s16614_s7 + $0x3a0] sm:$0xff] }
 0x70c   : > { %6750 = vst.msk [vmem:[#allocation2 + $0x370] sm:$0xff] %vm6639_vm3, %v6476_v38  ;;  %6717 = vst.msk [vmem:[#allocation2 + $0x268] sm:$0xff] %vm6639_vm3, %v6410_v55  ;;  %8459 = vmatprep.subr.mxu0 %v6863_v35  ;;  %8492 = vmatprep.subr.mxu1 %v6896_v39  ;;  %v17232_v38 = vld [vmem:[#allocation167_spill] sm:$0xff]  ;;  %v6116_v35 = vadd.f32 %v9249_v19, %v5988_v43  ;;  %v4450_v31 = vmul.f32 %v9255_v15, %v14718_v24  ;;  %v9263_v43 = vld [vmem:[%s16614_s7 + $0x398] sm:$0xff] }
 0x70d   : > { %4922 = vrot.lane.b32.xlu1 %v4564_v45, %s9621_s17  ;;  %v4417_v55 = vmul.f32 %v9254_v23, %v17232_v38  ;;  %v6083_v39 = vadd.f32 %v9248_v5, %v5955_v33  ;;  %v9257_v24 = vld [vmem:[%s16615_s29 + $0x3a0] sm:$0xff]  ;;  %v4449_v20 = vmul.f32 %v9263_v43, %v14760_v3  ;;  %v9265_v3 = vld [vmem:[%s16615_s29 + $0x398] sm:$0xff] }
 0x70f   : > { %v4937_v22 = vpop.permute.xlu1 %4936  ;;  %v4871_v51 = vpop.permute.xlu0 %4870  ;;  %6425 = vrot.lane.b32.xlu0 %v6084_v59, %s9619_s23  ;;  %v9256_v59 = vld [vmem:[%s16615_s29 + $0x298] sm:$0xff]  ;;  %v4577_v38 = vadd.f32 %v9265_v3, %v4449_v20 }
 0x710   : > { %5212 = vst.msk [vmem:[#allocation2 + $0x368] sm:$0xff] %vm5102_vm2, %v4937_v22  ;;  %5179 = vst.msk [vmem:[#allocation2 + $0x260] sm:$0xff] %vm5102_vm2, %v4871_v51  ;;  %v4545_v53 = vadd.f32 %v9256_v59, %v4417_v55  ;;  %v4578_v22 = vadd.f32 %v9257_v24, %v4450_v31  ;;  %v5972_v51 = vmul.f32 %v9251_v10, %v14732_v48 }
 0x711   : > { %6491 = vrot.lane.b32.xlu1 %v6117_v18, %s9619_s23  ;;  %v5987_v10 = vmul.f32 %v9255_v15, %v14744_v62  ;;  %v9262_v62 = vld [vmem:[%s16614_s7 + $0x290] sm:$0xff] }
 0x713   : > { %v6506_v40 = vpop.permute.xlu1 %6505  ;;  %v6440_v1 = vpop.permute.xlu0 %6439  ;;  %v6847_v46 = vld [vmem:[#allocation2 + $0x268] sm:$0xff]  ;;  %v6880_v0 = vld [vmem:[#allocation2 + $0x370] sm:$0xff]  ;;  %4886 = vrot.lane.b32.xlu0 %v4546_v60, %s9621_s17 }
 0x714   : > { %6765 = vst.msk [vmem:[#allocation2 + $0x3e8] sm:$0xff] %vm6639_vm3, %v6506_v40  ;;  %6732 = vst.msk [vmem:[#allocation2 + $0x2e0] sm:$0xff] %vm6639_vm3, %v6440_v1  ;;  %8460 = vmatpush3.msra.mxu0 %v6847_v46  ;;  %8493 = vmatpush3.msra.mxu1 %v6880_v0  ;;  %v9259_v40 = vld [vmem:[%s16614_s7 + $0x320] sm:$0xff]  ;;  %v6100_v46 = vadd.f32 %v9253_v14, %v5972_v51  ;;  %v6115_v14 = vadd.f32 %v9257_v24, %v5987_v10 }
 0x715   : > { %4952 = vrot.lane.b32.xlu1 %v4579_v63, %s9621_s17  ;;  %v17233_v63 = vld [vmem:[#allocation147_spill] sm:$0xff]  ;;  %v4434_v1 = vmul.f32 %v9259_v40, %v14730_v9  ;;  %v5971_v55 = vmul.f32 %v9259_v40, %v14774_v49 }
 0x716   : > { %v4401_v48 = vmul.f32 %v9258_v34, %v17233_v63  ;;  %v9261_v9 = vld [vmem:[%s16615_s29 + $0x320] sm:$0xff] }
 0x717   : > { %v4967_v17 = vpop.permute.xlu1 %4966  ;;  %v4901_v25 = vpop.permute.xlu0 %4900  ;;  %6393 = vrot.lane.b32.xlu0 %v6068_v41, %s9619_s23  ;;  %v4562_v41 = vadd.f32 %v9261_v9, %v4434_v1  ;;  %v6099_v24 = vadd.f32 %v9261_v9, %v5971_v55  ;;  %v17237_v1 = vld [vmem:[#allocation165_spill] sm:$0xff] }
 0x718   : > { %5227 = vst.msk [vmem:[#allocation2 + $0x3e0] sm:$0xff] %vm5102_vm2, %v4967_v17  ;;  %5194 = vst.msk [vmem:[#allocation2 + $0x2d8] sm:$0xff] %vm5102_vm2, %v4901_v25  ;;  %v4529_v4 = vadd.f32 %v9260_v30, %v4401_v48 }
 0x719   : > { %6459 = vrot.lane.b32.xlu1 %v6101_v27, %s9619_s23 }
 0x71b   : > { %v6474_v57 = vpop.permute.xlu1 %6473  ;;  %v6408_v45 = vpop.permute.xlu0 %6407  ;;  %v6862_v21 = vld [vmem:[#allocation2 + $0x2e0] sm:$0xff]  ;;  %v6895_v50 = vld [vmem:[#allocation2 + $0x3e8] sm:$0xff]  ;;  %4854 = vrot.lane.b32.xlu0 %v4530_v11, %s9621_s17 }
 0x71c   : > { %6749 = vst.msk [vmem:[#allocation2 + $0x368] sm:$0xff] %vm6639_vm3, %v6474_v57  ;;  %6716 = vst.msk [vmem:[#allocation2 + $0x260] sm:$0xff] %vm6639_vm3, %v6408_v45  ;;  %8461 = vmatprep.subr.mxu0 %v6862_v21  ;;  %8494 = vmatprep.subr.mxu1 %v6895_v50  ;;  %v17234_v11 = vld [vmem:[#allocation166_spill] sm:$0xff]  ;;  %v9264_v45 = vld [vmem:[%s16615_s29 + $0x290] sm:$0xff] }
 0x71d   : > { %4920 = vrot.lane.b32.xlu1 %v4563_v29, %s9621_s17  ;;  %v4416_v42 = vmul.f32 %v9262_v62, %v17234_v11  ;;  %v6082_v29 = vadd.f32 %v9256_v59, %v5954_v28  ;;  %v17235_v50 = vld [vmem:[#allocation102_spill] sm:$0xff] }
 0x71e   : > { %v5938_v23 = vmul.f32 %v9258_v34, %v17235_v50  ;;  %v5953_v34 = vmul.f32 %v9262_v62, %v14788_v26 }
 0x71f   : > { %v4935_v8 = vpop.permute.xlu1 %4934  ;;  %v4869_v18 = vpop.permute.xlu0 %4868  ;;  %6423 = vrot.lane.b32.xlu0 %v6083_v39, %s9619_s23  ;;  %v4544_v21 = vadd.f32 %v9264_v45, %v4416_v42  ;;  %v17238_v42 = vld [vmem:[#allocation145_spill] sm:$0xff] }
 0x720   : > { %5211 = vst.msk [vmem:[#allocation2 + $0x360] sm:$0xff] %vm5102_vm2, %v4935_v8  ;;  %5178 = vst.msk [vmem:[#allocation2 + $0x258] sm:$0xff] %vm5102_vm2, %v4869_v18  ;;  %v9266_v8 = vld [vmem:[%s16614_s7 + $0x210] sm:$0xff]  ;;  %v17236_v18 = vld [vmem:[#allocation146_spill] sm:$0xff]  ;;  %v6066_v59 = vadd.f32 %v9260_v30, %v5938_v23 }
 0x721   : > { %6489 = vrot.lane.b32.xlu1 %v6116_v35, %s9619_s23  ;;  %v4400_v49 = vmul.f32 %v9266_v8, %v17236_v18  ;;  %v5937_v28 = vmul.f32 %v9266_v8, %v14800_v6  ;;  %v9274_v6 = vld [vmem:[%s16614_s7 + $0x208] sm:$0xff]  ;;  %v9277_v23 = vld [vmem:[%s16615_s29 + $0x310] sm:$0xff] }
 0x722   : > { %v17240_v8 = vld [vmem:[#allocation164_spill] sm:$0xff] }
 0x723   : > { %v6504_v5 = vpop.permute.xlu1 %6503  ;;  %v6438_v60 = vpop.permute.xlu0 %6437  ;;  %v6846_v44 = vld [vmem:[#allocation2 + $0x260] sm:$0xff]  ;;  %v6879_v19 = vld [vmem:[#allocation2 + $0x368] sm:$0xff]  ;;  %4884 = vrot.lane.b32.xlu0 %v4545_v53, %s9621_s17  ;;  %v9267_v53 = vld [vmem:[%s16614_s7 + $0x318] sm:$0xff] }
 0x724   : > { %6764 = vst.msk [vmem:[#allocation2 + $0x3e0] sm:$0xff] %vm6639_vm3, %v6504_v5  ;;  %6731 = vst.msk [vmem:[#allocation2 + $0x2d8] sm:$0xff] %vm6639_vm3, %v6438_v60  ;;  %8462 = vmatpush3.msra.mxu0 %v6846_v44  ;;  %8495 = vmatpush3.msra.mxu1 %v6879_v19  ;;  %v4433_v58 = vmul.f32 %v9267_v53, %v14772_v7  ;;  %v9268_v5 = vld [vmem:[%s16615_s29 + $0x210] sm:$0xff]  ;;  %v9269_v7 = vld [vmem:[%s16615_s29 + $0x318] sm:$0xff]  ;;  %v5986_v19 = vmul.f32 %v9263_v43, %v14786_v36 }
 0x725   : > { %4950 = vrot.lane.b32.xlu1 %v4578_v22, %s9621_s17  ;;  %v4528_v60 = vadd.f32 %v9268_v5, %v4400_v49  ;;  %v9270_v36 = vld [vmem:[%s16614_s7 + $0x288] sm:$0xff]  ;;  %v17239_v43 = vld [vmem:[#allocation105_spill] sm:$0xff] }
 0x726   : > { %v4561_v44 = vadd.f32 %v9269_v7, %v4433_v58  ;;  %v4415_v26 = vmul.f32 %v9270_v36, %v17237_v1  ;;  %v5952_v55 = vmul.f32 %v9270_v36, %v14830_v37  ;;  %v9283_v36 = vld [vmem:[%s16614_s7 + $0x308] sm:$0xff] }
 0x727   : > { %v4965_v0 = vpop.permute.xlu1 %4964  ;;  %v4899_v2 = vpop.permute.xlu0 %4898  ;;  %6391 = vrot.lane.b32.xlu0 %v6067_v12, %s9619_s23  ;;  %v17242_v1 = vld [vmem:[#allocation100_spill] sm:$0xff] }
 0x728   : > { %5226 = vst.msk [vmem:[#allocation2 + $0x3d8] sm:$0xff] %vm5102_vm2, %v4965_v0  ;;  %5193 = vst.msk [vmem:[#allocation2 + $0x2d0] sm:$0xff] %vm5102_vm2, %v4899_v2  ;;  %v6081_v0 = vadd.f32 %v9264_v45, %v5953_v34  ;;  %v9271_v2 = vld [vmem:[%s16614_s7 + $0x390] sm:$0xff] }
 0x729   : > { %6457 = vrot.lane.b32.xlu1 %v6100_v46, %s9619_s23  ;;  %v6114_v46 = vadd.f32 %v9265_v3, %v5986_v19  ;;  %v4448_v30 = vmul.f32 %v9271_v2, %v14802_v56  ;;  %v9273_v56 = vld [vmem:[%s16615_s29 + $0x390] sm:$0xff] }
 0x72b   : > { %v6472_v27 = vpop.permute.xlu1 %6471  ;;  %v6406_v17 = vpop.permute.xlu0 %6405  ;;  %v6861_v25 = vld [vmem:[#allocation2 + $0x2d8] sm:$0xff]  ;;  %v6894_v16 = vld [vmem:[#allocation2 + $0x3e0] sm:$0xff]  ;;  %4852 = vrot.lane.b32.xlu0 %v4529_v4, %s9621_s17 }
 0x72c   : > { %6748 = vst.msk [vmem:[#allocation2 + $0x360] sm:$0xff] %vm6639_vm3, %v6472_v27  ;;  %6715 = vst.msk [vmem:[#allocation2 + $0x258] sm:$0xff] %vm6639_vm3, %v6406_v17  ;;  %8463 = vmatprep.subr.mxu0 %v6861_v25  ;;  %8496 = vmatprep.subr.mxu1 %v6894_v16  ;;  %v4576_v27 = vadd.f32 %v9273_v56, %v4448_v30  ;;  %v5970_v17 = vmul.f32 %v9267_v53, %v14816_v13 }
 0x72d   : > { %4918 = vrot.lane.b32.xlu1 %v4562_v41, %s9621_s17  ;;  %v9272_v41 = vld [vmem:[%s16615_s29 + $0x288] sm:$0xff]  ;;  %v4399_v13 = vmul.f32 %v9274_v6, %v17238_v42 }
 0x72e   : > { %v4543_v10 = vadd.f32 %v9272_v41, %v4415_v26  ;;  %v6080_v49 = vadd.f32 %v9272_v41, %v5952_v55  ;;  %v4431_v26 = vmul.f32 %v9283_v36, %v17242_v1  ;;  %v17243_v41 = vld [vmem:[#allocation103_spill] sm:$0xff] }
 0x72f   : > { %v4933_v33 = vpop.permute.xlu1 %4932  ;;  %v4867_v57 = vpop.permute.xlu0 %4866  ;;  %6421 = vrot.lane.b32.xlu0 %v6082_v29, %s9619_s23  ;;  %v9275_v29 = vld [vmem:[%s16614_s7 + $0x310] sm:$0xff]  ;;  %v9288_v55 = vld [vmem:[%s16614_s7 + $0x300] sm:$0xff]  ;;  %v8351_v1 = vld [vmem:[%s10232_s24 + $0x2] sm:$0x1] }
 0x730   : > { %5210 = vst.msk [vmem:[#allocation2 + $0x358] sm:$0xff] %vm5102_vm2, %v4933_v33  ;;  %5177 = vst.msk [vmem:[#allocation2 + $0x250] sm:$0xff] %vm5102_vm2, %v4867_v57  ;;  %v4432_v20 = vmul.f32 %v9275_v29, %v17239_v43  ;;  %v6098_v33 = vadd.f32 %v9269_v7, %v5970_v17  ;;  %v5936_v7 = vmul.f32 %v9274_v6, %v14857_v52 }
 0x731   : > { %6487 = vrot.lane.b32.xlu1 %v6115_v14, %s9619_s23  ;;  %v6065_v14 = vadd.f32 %v9268_v5, %v5937_v28  ;;  %v9281_v5 = vld [vmem:[%s16615_s29 + $0x388] sm:$0xff]  ;;  %v17244_v28 = vld [vmem:[#allocation182_spill] sm:$0xff] }
 0x732   : > { %v4560_v3 = vadd.f32 %v9277_v23, %v4432_v20  ;;  %v17246_v20 = vld [vmem:[#allocation142_spill] sm:$0xff] }
 0x733   : > { %v6502_v35 = vpop.permute.xlu1 %6501  ;;  %v6436_v39 = vpop.permute.xlu0 %6435  ;;  %v6845_v15 = vld [vmem:[#allocation2 + $0x258] sm:$0xff]  ;;  %v6878_v31 = vld [vmem:[#allocation2 + $0x360] sm:$0xff]  ;;  %4882 = vrot.lane.b32.xlu0 %v4544_v21, %s9621_s17  ;;  %v9276_v21 = vld [vmem:[%s16615_s29 + $0x208] sm:$0xff] }
 0x734   : > { %6763 = vst.msk [vmem:[#allocation2 + $0x3d8] sm:$0xff] %vm6639_vm3, %v6502_v35  ;;  %6730 = vst.msk [vmem:[#allocation2 + $0x2d0] sm:$0xff] %vm6639_vm3, %v6436_v39  ;;  %8464 = vmatpush3.msra.mxu0 %v6845_v15  ;;  %8497 = vmatpush3.msra.mxu1 %v6878_v31  ;;  %v4527_v50 = vadd.f32 %v9276_v21, %v4399_v13 }
 0x735   : > { %4948 = vrot.lane.b32.xlu1 %v4577_v38, %s9621_s17  ;;  %v5985_v38 = vmul.f32 %v9271_v2, %v14828_v47  ;;  %v9278_v47 = vld [vmem:[%s16614_s7 + $0x280] sm:$0xff] }
 0x736   : > { %v4414_v37 = vmul.f32 %v9278_v47, %v17240_v8  ;;  %v9284_v2 = vld [vmem:[%s16615_s29 + $0x200] sm:$0xff] }
 0x737   : > { %v4963_v22 = vpop.permute.xlu1 %4962  ;;  %v4897_v51 = vpop.permute.xlu0 %4896  ;;  %6389 = vrot.lane.b32.xlu0 %v6066_v59, %s9619_s23  ;;  %v6113_v18 = vadd.f32 %v9273_v56, %v5985_v38  ;;  %v9279_v59 = vld [vmem:[%s16614_s7 + $0x388] sm:$0xff]  ;;  %v5951_v56 = vmul.f32 %v9278_v47, %v17244_v28 }
 0x738   : > { %5225 = vst.msk [vmem:[#allocation2 + $0x3d0] sm:$0xff] %vm5102_vm2, %v4963_v22  ;;  %5192 = vst.msk [vmem:[#allocation2 + $0x2c8] sm:$0xff] %vm5102_vm2, %v4897_v51  ;;  %v4447_v53 = vmul.f32 %v9279_v59, %v14842_v54  ;;  %v9280_v22 = vld [vmem:[%s16615_s29 + $0x280] sm:$0xff] }
 0x739   : > { %6455 = vrot.lane.b32.xlu1 %v6099_v24, %s9619_s23  ;;  %v4542_v51 = vadd.f32 %v9280_v22, %v4414_v37  ;;  %v6079_v13 = vadd.f32 %v9280_v22, %v5951_v56  ;;  %v17250_v22 = vld [vmem:[#allocation96_spill] sm:$0xff] }
 0x73a   : > { %v4575_v54 = vadd.f32 %v9281_v5, %v4447_v53 }
 0x73b   : > { %v6470_v63 = vpop.permute.xlu1 %6469  ;;  %v6404_v48 = vpop.permute.xlu0 %6403  ;;  %v6860_v12 = vld [vmem:[#allocation2 + $0x2d0] sm:$0xff]  ;;  %v6893_v40 = vld [vmem:[#allocation2 + $0x3d8] sm:$0xff]  ;;  %4850 = vrot.lane.b32.xlu0 %v4528_v60, %s9621_s17  ;;  %v5969_v60 = vmul.f32 %v9275_v29, %v14855_v61  ;;  %v9282_v61 = vld [vmem:[%s16614_s7 + $0x200] sm:$0xff] }
 0x73c   : > { %6747 = vst.msk [vmem:[#allocation2 + $0x358] sm:$0xff] %vm6639_vm3, %v6470_v63  ;;  %6714 = vst.msk [vmem:[#allocation2 + $0x250] sm:$0xff] %vm6639_vm3, %v6404_v48  ;;  %8465 = vmatprep.subr.mxu0 %v6860_v12  ;;  %8498 = vmatprep.subr.mxu1 %v6893_v40  ;;  %v17241_v48 = vld [vmem:[#allocation144_spill] sm:$0xff]  ;;  %v6064_v40 = vadd.f32 %v9276_v21, %v5936_v7  ;;  %v17245_v29 = vld [vmem:[#allocation183_spill] sm:$0xff] }
 0x73d   : > { %4916 = vrot.lane.b32.xlu1 %v4561_v44, %s9621_s17  ;;  %v4398_v52 = vmul.f32 %v9282_v61, %v17241_v48  ;;  %v6097_v12 = vadd.f32 %v9277_v23, %v5969_v60  ;;  %v17247_v21 = vld [vmem:[#allocation121_spill] sm:$0xff]  ;;  %v9287_v23 = vld [vmem:[%s16615_s29 + $0x380] sm:$0xff] }
 0x73e   : > { %v16134_v7 = vld [vmem:[%s16502_s4] sm:$0x1] }
 0x73f   : > { %v4931_v4 = vpop.permute.xlu1 %4930  ;;  %v4865_v9 = vpop.permute.xlu0 %4864  ;;  %6419 = vrot.lane.b32.xlu0 %v6081_v0, %s9619_s23  ;;  %v4526_v30 = vadd.f32 %v9284_v2, %v4398_v52 }
 0x740   : > { %5209 = vst.msk [vmem:[#allocation2 + $0x350] sm:$0xff] %vm5102_vm2, %v4931_v4  ;;  %5176 = vst.msk [vmem:[#allocation2 + $0x248] sm:$0xff] %vm5102_vm2, %v4865_v9  ;;  %v9285_v4 = vld [vmem:[%s16615_s29 + $0x308] sm:$0xff] }
 0x741   : > { %6485 = vrot.lane.b32.xlu1 %v6114_v46, %s9619_s23  ;;  %v4559_v9 = vadd.f32 %v9285_v4, %v4431_v26  ;;  %v7657_v26 = vmul.f32 %v8351_v1, %v16134_v7 }
 0x743   : > { %v6500_v25 = vpop.permute.xlu1 %6499  ;;  %v6434_v16 = vpop.permute.xlu0 %6433  ;;  %v6844_v62 = vld [vmem:[#allocation2 + $0x250] sm:$0xff]  ;;  %v6877_v11 = vld [vmem:[#allocation2 + $0x358] sm:$0xff]  ;;  %4880 = vrot.lane.b32.xlu0 %v4543_v10, %s9621_s17  ;;  %v5984_v10 = vmul.f32 %v9279_v59, %v17243_v41  ;;  %v9289_v59 = vld [vmem:[%s16615_s29 + $0x300] sm:$0xff] }
 0x744   : > { %6762 = vst.msk [vmem:[#allocation2 + $0x3d0] sm:$0xff] %vm6639_vm3, %v6500_v25  ;;  %6729 = vst.msk [vmem:[#allocation2 + $0x2c8] sm:$0xff] %vm6639_vm3, %v6434_v16  ;;  %8466 = vmatpush3.msra.mxu0 %v6844_v62  ;;  %8499 = vmatpush3.msra.mxu1 %v6877_v11  ;;  %v6769_v62 = vld [vmem:[%s17164_s3 + $0x8] sm:$0xff] }
 0x745   : > { %4946 = vrot.lane.b32.xlu1 %v4576_v27, %s9621_s17  ;;  %v16085_v11 = vrot.slane %v6769_v62, %v15341_v32  ;;  %v6112_v42 = vadd.f32 %v9281_v5, %v5984_v10  ;;  %v6917_v37 = vcombine.high %v6769_v62, %v6769_v62 }
 0x747   : > { %v4961_v57 = vpop.permute.xlu1 %4960  ;;  %v4895_v45 = vpop.permute.xlu0 %4894  ;;  %6387 = vrot.lane.b32.xlu0 %v6065_v14, %s9619_s23  ;;  %v6932_v6 = vcombine.high %v16085_v11, %v16085_v11  ;;  %v9286_v14 = vld [vmem:[%s16614_s7 + $0x380] sm:$0xff] }
 0x748   : > { %5224 = vst.msk [vmem:[#allocation2 + $0x3c8] sm:$0xff] %vm5102_vm2, %v4961_v57  ;;  %5191 = vst.msk [vmem:[#allocation2 + $0x2c0] sm:$0xff] %vm5102_vm2, %v4895_v45  ;;  %v4446_v43 = vmul.f32 %v9286_v14, %v17245_v29 }
 0x749   : > { %6453 = vrot.lane.b32.xlu1 %v6098_v33, %s9619_s23  ;;  %v5935_v33 = vmul.f32 %v9282_v61, %v17246_v20  ;;  %7146 = vmatprep.mubr.f32.mxu0 %v6932_v6 }
 0x74b   : > { %v6468_v35 = vpop.permute.xlu1 %6467  ;;  %v6402_v39 = vpop.permute.xlu0 %6401  ;;  %v6859_v15 = vld [vmem:[#allocation2 + $0x2c8] sm:$0xff]  ;;  %v6892_v31 = vld [vmem:[#allocation2 + $0x3d0] sm:$0xff]  ;;  %4848 = vrot.lane.b32.xlu0 %v4527_v50, %s9621_s17  ;;  %v5968_v50 = vmul.f32 %v9283_v36, %v17247_v21  ;;  %v6063_v38 = vadd.f32 %v9284_v2, %v5935_v33 }
 0x74c   : > { %6746 = vst.msk [vmem:[#allocation2 + $0x350] sm:$0xff] %vm6639_vm3, %v6468_v35  ;;  %6713 = vst.msk [vmem:[#allocation2 + $0x248] sm:$0xff] %vm6639_vm3, %v6402_v39  ;;  %8467 = vmatprep.subr.mxu0 %v6859_v15  ;;  %8500 = vmatprep.subr.mxu1 %v6892_v31  ;;  %v17248_v35 = vld [vmem:[#allocation172_spill] sm:$0xff] }
 0x74d   : > { %4914 = vrot.lane.b32.xlu1 %v4560_v3, %s9621_s17  ;;  %v4574_v3 = vadd.f32 %v9287_v23, %v4446_v43  ;;  %v4430_v39 = vmul.f32 %v9288_v55, %v17248_v35 }
 0x74f   : > { %v4929_v58 = vpop.permute.xlu1 %4928  ;;  %v4863_v24 = vpop.permute.xlu0 %4862  ;;  %6417 = vrot.lane.b32.xlu0 %v6080_v49, %s9619_s23  ;;  %v6096_v49 = vadd.f32 %v9285_v4, %v5968_v50  ;;  %v4558_v53 = vadd.f32 %v9289_v59, %v4430_v39 }
 0x750   : > { %5208 = vst.msk [vmem:[#allocation2 + $0x348] sm:$0xff] %vm5102_vm2, %v4929_v58  ;;  %5175 = vst.msk [vmem:[#allocation2 + $0x240] sm:$0xff] %vm5102_vm2, %v4863_v24  ;;  %v17249_v58 = vld [vmem:[#allocation39_spill] sm:$0xff] }
 0x751   : > { %6483 = vrot.lane.b32.xlu1 %v6113_v18, %s9619_s23  ;;  %v16113_v18 = vrot.slane %v6917_v37, %v15341_v32  ;;  %v5983_v24 = vmul.f32 %v9286_v14, %v17249_v58  ;;  %v16129_v32 = vld [vmem:[%s17251_s22] sm:$0x1]  ;;  %s17254_s22 = sld [smem:[#allocation192_spill]] }
 0x753   : > { %v6498_v44 = vpop.permute.xlu1 %6497  ;;  %v6432_v19 = vpop.permute.xlu0 %6431  ;;  %v6843_v34 = vld [vmem:[#allocation2 + $0x248] sm:$0xff]  ;;  %v6876_v63 = vld [vmem:[#allocation2 + $0x350] sm:$0xff]  ;;  %4878 = vrot.lane.b32.xlu0 %v4542_v51, %s9621_s17  ;;  %v5967_v51 = vmul.f32 %v9288_v55, %v17250_v22  ;;  %v6933_v60 = vcombine.high %v16113_v18, %v16113_v18 }
 0x754   : > { %6761 = vst.msk [vmem:[#allocation2 + $0x3c8] sm:$0xff] %vm6639_vm3, %v6498_v44  ;;  %6728 = vst.msk [vmem:[#allocation2 + $0x2c0] sm:$0xff] %vm6639_vm3, %v6432_v19  ;;  %8468 = vmatpush3.msra.mxu0 %v6843_v34  ;;  %8501 = vmatpush3.msra.mxu1 %v6876_v63  ;;  %v8338_v44 = vld [vmem:[%s10232_s24 + $0x1] sm:$0x1]  ;;  %v6111_v19 = vadd.f32 %v9287_v23, %v5983_v24  ;;  %v17252_v63 = vld [vmem:[#allocation133_spill] sm:$0xff] }
 0x755   : > { %4944 = vrot.lane.b32.xlu1 %v4575_v54, %s9621_s17  ;;  %7216 = vmatprep.mubr.f32.mxu1 %v6933_v60  ;;  %v6095_v34 = vadd.f32 %v9289_v59, %v5967_v51  ;;  %v16138_v61 = vsub.s32 0, %v17252_v63  ;;  %v7447_v36 = vmul.f32 %v8338_v44, %v16134_v7 }
 0x757   : > { %v4959_v46 = vpop.permute.xlu1 %4958  ;;  %v4893_v0 = vpop.permute.xlu0 %4892  ;;  %6385 = vrot.lane.b32.xlu0 %v6064_v40, %s9619_s23  ;;  %s16374_s28 = scalar_lea.vmem %s17254_s22, %s17269_s0  ;;  %s17256_s0 = sshll.u32 %s10223_s8, 2 }
 0x758   : > { %5223 = vst.msk [vmem:[#allocation2 + $0x3c0] sm:$0xff] %vm5102_vm2, %v4959_v46  ;;  %5190 = vst.msk [vmem:[#allocation2 + $0x2b8] sm:$0xff] %vm5102_vm2, %v4893_v0  ;;  %v8364_v46 = vld [vmem:[%s10232_s24 + $0x3] sm:$0x1]  ;;  %v7448_v0 = vadd.f32 %v7447_v36, %v16129_v32  ;;  %s1287_s19 = scalar_lea.vmem [#allocation18], %s17256_s0  ;;  %s17258_s22 = sld [smem:[#allocation194_spill]] }
 0x759   : > { %6451 = vrot.lane.b32.xlu1 %v6097_v12, %s9619_s23  ;;  %v7867_v2 = vmul.f32 %v8364_v46, %v16134_v7 }
 0x75a   : > { %v7453_v41 = vrot.slane %v7448_v0, %v16138_v61 }
 0x75b   : > { %v6466_v27 = vpop.permute.xlu1 %6465  ;;  %v6400_v17 = vpop.permute.xlu0 %6399  ;;  %v6858_v25 = vld [vmem:[#allocation2 + $0x2c0] sm:$0xff]  ;;  %v6891_v16 = vld [vmem:[#allocation2 + $0x3c8] sm:$0xff]  ;;  %4846 = vrot.lane.b32.xlu0 %v4526_v30, %s9621_s17  ;;  %v7658_v30 = vadd.f32 %v7657_v26, %v16129_v32  ;;  %v7868_v10 = vadd.f32 %v7867_v2, %v16129_v32 }
 0x75c   : > { %6745 = vst.msk [vmem:[#allocation2 + $0x348] sm:$0xff] %vm6639_vm3, %v6466_v27  ;;  %6712 = vst.msk [vmem:[#allocation2 + $0x240] sm:$0xff] %vm6639_vm3, %v6400_v17  ;;  %8469 = vmatprep.subr.mxu0 %v6858_v25  ;;  %8502 = vmatprep.subr.mxu1 %v6891_v16 }
 0x75d   : > { %4912 = vrot.lane.b32.xlu1 %v4559_v9, %s9621_s17  ;;  %v7663_v28 = vrot.slane %v7658_v30, %v16138_v61  ;;  %v7873_v56 = vrot.slane %v7868_v10, %v16138_v61 }
 0x75f   : > { %v4927_v57 = vpop.permute.xlu1 %4926  ;;  %v4861_v45 = vpop.permute.xlu0 %4860  ;;  %6415 = vrot.lane.b32.xlu0 %v6079_v13, %s9619_s23 }
 0x760   : > { %5207 = vst.msk [vmem:[#allocation2 + $0x340] sm:$0xff] %vm5102_vm2, %v4927_v57  ;;  %5174 = vst.msk [vmem:[#allocation2 + $0x238] sm:$0xff] %vm5102_vm2, %v4861_v45 }
 0x761   : > { %6481 = vrot.lane.b32.xlu1 %v6112_v42, %s9619_s23 }
 0x763   : > { %v6496_v15 = vpop.permute.xlu1 %6495  ;;  %v6430_v31 = vpop.permute.xlu0 %6429  ;;  %v6842_v47 = vld [vmem:[#allocation2 + $0x240] sm:$0xff]  ;;  %v6875_v8 = vld [vmem:[#allocation2 + $0x348] sm:$0xff]  ;;  %4942 = vrot.lane.b32.xlu0 %v4574_v3, %s9621_s17 }
 0x764   : > { %6760 = vst.msk [vmem:[#allocation2 + $0x3c0] sm:$0xff] %vm6639_vm3, %v6496_v15  ;;  %6727 = vst.msk [vmem:[#allocation2 + $0x2b8] sm:$0xff] %vm6639_vm3, %v6430_v31  ;;  %8470 = vmatpush3.msra.mxu0 %v6842_v47  ;;  %8503 = vmatpush3.msra.mxu1 %v6875_v8 }
 0x765   : > { %6383 = vrot.lane.b32.xlu1 %v6063_v38, %s9619_s23 }
 0x767   : > { %v4957_v5 = vpop.permute.xlu1 %4956  ;;  %v4891_v54 = vpop.permute.xlu0 %4890  ;;  %6449 = vrot.lane.b32.xlu0 %v6096_v49, %s9619_s23 }
 0x768   : > { %5222 = vst.msk [vmem:[#allocation2 + $0x3b8] sm:$0xff] %vm5102_vm2, %v4957_v5  ;;  %5189 = vst.msk [vmem:[#allocation2 + $0x2b0] sm:$0xff] %vm5102_vm2, %v4891_v54 }
 0x769   : > { %4910 = vrot.lane.b32.xlu1 %v4558_v53, %s9621_s17 }
 0x76b   : > { %v6464_v48 = vpop.permute.xlu1 %6463  ;;  %v6398_v52 = vpop.permute.xlu0 %6397  ;;  %v6857_v12 = vld [vmem:[#allocation2 + $0x2b8] sm:$0xff]  ;;  %v6890_v40 = vld [vmem:[#allocation2 + $0x3c0] sm:$0xff]  ;;  %6479 = vrot.lane.b32.xlu0 %v6111_v19, %s9619_s23 }
 0x76c   : > { %6744 = vst.msk [vmem:[#allocation2 + $0x340] sm:$0xff] %vm6639_vm3, %v6464_v48  ;;  %6711 = vst.msk [vmem:[#allocation2 + $0x238] sm:$0xff] %vm6639_vm3, %v6398_v52  ;;  %8471 = vmatprep.subr.mxu0 %v6857_v12  ;;  %8504 = vmatprep.subr.mxu1 %v6890_v40 }
 0x76d   : > { %6447 = vrot.lane.b32.xlu1 %v6095_v34, %s9619_s23 }
 0x76f   : > { %v4925_v4 = vpop.permute.xlu1 %4924  ;;  %v4859_v9 = vpop.permute.xlu0 %4858  ;;  %7454 = vrot.lane.b32.xlu0 %v7453_v41, %s9620_s16 }
 0x770   : > { %5206 = vst.msk [vmem:[#allocation2 + $0x338] sm:$0xff] %vm5102_vm2, %v4925_v4  ;;  %5173 = vst.msk [vmem:[#allocation2 + $0x230] sm:$0xff] %vm5102_vm2, %v4859_v9 }
 0x771   : > { %7664 = vrot.lane.b32.xlu1 %v7663_v28, %s9621_s17 }
 0x773   : > { %v6494_v27 = vpop.permute.xlu1 %6493  ;;  %v6428_v17 = vpop.permute.xlu0 %6427  ;;  %v6841_v25 = vld [vmem:[#allocation2 + $0x238] sm:$0xff]  ;;  %v6874_v16 = vld [vmem:[#allocation2 + $0x340] sm:$0xff]  ;;  %7874 = vrot.lane.b32.xlu0 %v7873_v56, %s9619_s23 }
 0x774   : > { %6759 = vst.msk [vmem:[#allocation2 + $0x3b8] sm:$0xff] %vm6639_vm3, %v6494_v27  ;;  %6726 = vst.msk [vmem:[#allocation2 + $0x2b0] sm:$0xff] %vm6639_vm3, %v6428_v17  ;;  %8472 = vmatpush3.msra.mxu0 %v6841_v25  ;;  %8505 = vmatpush3.msra.mxu1 %v6874_v16 }
 0x777   : > { %v4955_v62 = vpop.permute.xlu1 %4954  ;;  %v4889_v6 = vpop.permute.xlu0 %4888 }
 0x778   : > { %5221 = vst.msk [vmem:[#allocation2 + $0x3b0] sm:$0xff] %vm5102_vm2, %v4955_v62  ;;  %5188 = vst.msk [vmem:[#allocation2 + $0x2a8] sm:$0xff] %vm5102_vm2, %v4889_v6 }
 0x77b   : > { %v6462_v42 = vpop.permute.xlu1 %6461  ;;  %v6396_v13 = vpop.permute.xlu0 %6395  ;;  %v6856_v14 = vld [vmem:[#allocation2 + $0x2b0] sm:$0xff]  ;;  %v6889_v29 = vld [vmem:[#allocation2 + $0x3b8] sm:$0xff] }
 0x77c   : > { %6743 = vst.msk [vmem:[#allocation2 + $0x338] sm:$0xff] %vm6639_vm3, %v6462_v42  ;;  %6710 = vst.msk [vmem:[#allocation2 + $0x230] sm:$0xff] %vm6639_vm3, %v6396_v13  ;;  %8473 = vmatprep.subr.mxu0 %v6856_v14  ;;  %8506 = vmatprep.subr.mxu1 %v6889_v29 }
 0x77f   : > { %v4923_v43 = vpop.permute.xlu1 %4922  ;;  %v4857_v20 = vpop.permute.xlu0 %4856 }
 0x780   : > { %5205 = vst.msk [vmem:[#allocation2 + $0x330] sm:$0xff] %vm5102_vm2, %v4923_v43  ;;  %5172 = vst.msk [vmem:[#allocation2 + $0x228] sm:$0xff] %vm5102_vm2, %v4857_v20 }
 0x783   : > { %v6492_v33 = vpop.permute.xlu1 %6491  ;;  %v6426_v57 = vpop.permute.xlu0 %6425  ;;  %v6840_v45 = vld [vmem:[#allocation2 + $0x230] sm:$0xff]  ;;  %v6873_v21 = vld [vmem:[#allocation2 + $0x338] sm:$0xff] }
 0x784   : > { %6758 = vst.msk [vmem:[#allocation2 + $0x3b0] sm:$0xff] %vm6639_vm3, %v6492_v33  ;;  %6725 = vst.msk [vmem:[#allocation2 + $0x2a8] sm:$0xff] %vm6639_vm3, %v6426_v57  ;;  %8474 = vmatpush3.msra.mxu0 %v6840_v45  ;;  %8507 = vmatpush3.msra.mxu1 %v6873_v21 }
 0x787   : > { %v4953_v50 = vpop.permute.xlu1 %4952  ;;  %v4887_v23 = vpop.permute.xlu0 %4886 }
 0x788   : > { %5220 = vst.msk [vmem:[#allocation2 + $0x3a8] sm:$0xff] %vm5102_vm2, %v4953_v50  ;;  %5187 = vst.msk [vmem:[#allocation2 + $0x2a0] sm:$0xff] %vm5102_vm2, %v4887_v23 }
 0x78b   : > { %v6460_v3 = vpop.permute.xlu1 %6459  ;;  %v6394_v38 = vpop.permute.xlu0 %6393  ;;  %v6855_v55 = vld [vmem:[#allocation2 + $0x2a8] sm:$0xff]  ;;  %v6888_v35 = vld [vmem:[#allocation2 + $0x3b0] sm:$0xff] }
 0x78c   : > { %6742 = vst.msk [vmem:[#allocation2 + $0x330] sm:$0xff] %vm6639_vm3, %v6460_v3  ;;  %6709 = vst.msk [vmem:[#allocation2 + $0x228] sm:$0xff] %vm6639_vm3, %v6394_v38  ;;  %8475 = vmatprep.subr.mxu0 %v6855_v55  ;;  %8508 = vmatprep.subr.mxu1 %v6888_v35 }
 0x78f   : > { %v4921_v39 = vpop.permute.xlu1 %4920  ;;  %v4855_v15 = vpop.permute.xlu0 %4854 }
 0x790   : > { %5204 = vst.msk [vmem:[#allocation2 + $0x328] sm:$0xff] %vm5102_vm2, %v4921_v39  ;;  %5171 = vst.msk [vmem:[#allocation2 + $0x220] sm:$0xff] %vm5102_vm2, %v4855_v15 }
 0x793   : > { %v6490_v31 = vpop.permute.xlu1 %6489  ;;  %v6424_v47 = vpop.permute.xlu0 %6423  ;;  %v6839_v8 = vld [vmem:[#allocation2 + $0x228] sm:$0xff]  ;;  %v6872_v37 = vld [vmem:[#allocation2 + $0x330] sm:$0xff] }
 0x794   : > { %6757 = vst.msk [vmem:[#allocation2 + $0x3a8] sm:$0xff] %vm6639_vm3, %v6490_v31  ;;  %6724 = vst.msk [vmem:[#allocation2 + $0x2a0] sm:$0xff] %vm6639_vm3, %v6424_v47  ;;  %8476 = vmatpush3.msra.mxu0 %v6839_v8  ;;  %8509 = vmatpush3.msra.mxu1 %v6872_v37 }
 0x797   : > { %v4951_v49 = vpop.permute.xlu1 %4950  ;;  %v4885_v59 = vpop.permute.xlu0 %4884 }
 0x798   : > { %5219 = vst.msk [vmem:[#allocation2 + $0x3a0] sm:$0xff] %vm5102_vm2, %v4951_v49  ;;  %5186 = vst.msk [vmem:[#allocation2 + $0x298] sm:$0xff] %vm5102_vm2, %v4885_v59  ;;  %v7258_v59 = vld [vmem:[%s16227_s5 + $0x18] sm:$0xff] }
 0x79b   : > { %v6458_v53 = vpop.permute.xlu1 %6457  ;;  %v6392_v58 = vpop.permute.xlu0 %6391  ;;  %v6854_v24 = vld [vmem:[#allocation2 + $0x2a0] sm:$0xff]  ;;  %v6887_v22 = vld [vmem:[#allocation2 + $0x3a8] sm:$0xff] }
 0x79c   : > { %6741 = vst.msk [vmem:[#allocation2 + $0x328] sm:$0xff] %vm6639_vm3, %v6458_v53  ;;  %6708 = vst.msk [vmem:[#allocation2 + $0x220] sm:$0xff] %vm6639_vm3, %v6392_v58  ;;  %8477 = vmatprep.subr.mxu0 %v6854_v24  ;;  %8510 = vmatprep.subr.mxu1 %v6887_v22  ;;  %v16233_v53 = vld [vmem:[#allocation3 + $0x18] sm:$0xff]  ;;  %v16235_v58 = vld [vmem:[#allocation6 + $0x10] sm:$0xff] }
 0x79d   : > { %v7257_v24 = vld [vmem:[%s16227_s5 + $0x10] sm:$0xff] }
 0x79f   : > { %v4919_v51 = vpop.permute.xlu1 %4918  ;;  %v4853_v5 = vpop.permute.xlu0 %4852 }
 0x7a0   : > { %5203 = vst.msk [vmem:[#allocation2 + $0x320] sm:$0xff] %vm5102_vm2, %v4919_v51  ;;  %5170 = vst.msk [vmem:[#allocation2 + $0x218] sm:$0xff] %vm5102_vm2, %v4853_v5  ;;  %v7261_v51 = vmul.f32 %v7257_v24, %v16235_v58  ;;  %v9623_v5 = vmov 0.0  }
 0x7a3   : > { %v6488_v54 = vpop.permute.xlu1 %6487  ;;  %v6422_v60 = vpop.permute.xlu0 %6421  ;;  %v6838_v44 = vld [vmem:[#allocation2 + $0x220] sm:$0xff]  ;;  %v6871_v19 = vld [vmem:[#allocation2 + $0x328] sm:$0xff] }
 0x7a4   : > { %6756 = vst.msk [vmem:[#allocation2 + $0x3a0] sm:$0xff] %vm6639_vm3, %v6488_v54  ;;  %6723 = vst.msk [vmem:[#allocation2 + $0x298] sm:$0xff] %vm6639_vm3, %v6422_v60  ;;  %8478 = vmatpush3.msra.mxu0 %v6838_v44  ;;  %8511 = vmatpush3.msra.mxu1 %v6871_v19  ;;  %v16241_v54 = vld [vmem:[#allocation3 + $0x10] sm:$0xff]  ;;  %v16243_v60 = vld [vmem:[#allocation6 + $0x8] sm:$0xff] }
 0x7a5   : > { %v7256_v44 = vld [vmem:[%s16227_s5 + $0x8] sm:$0xff]  ;;  %v7265_v19 = vadd.f32 %v7261_v51, %v16241_v54 }
 0x7a7   : > { %v4949_v34 = vpop.permute.xlu1 %4948  ;;  %v4883_v63 = vpop.permute.xlu0 %4882 }
 0x7a8   : > { %5218 = vst.msk [vmem:[#allocation2 + $0x398] sm:$0xff] %vm5102_vm2, %v4949_v34  ;;  %5185 = vst.msk [vmem:[#allocation2 + $0x290] sm:$0xff] %vm5102_vm2, %v4883_v63  ;;  %v7260_v34 = vmul.f32 %v7256_v44, %v16243_v60  ;;  %v16250_v63 = vld [vmem:[#allocation3 + $0x8] sm:$0xff]  ;;  %v16308_v44 = vld [vmem:[#allocation11 + $0x10] sm:$0xff] }
 0x7ab   : > { %v6456_v48 = vpop.permute.xlu1 %6455  ;;  %v6390_v52 = vpop.permute.xlu0 %6389  ;;  %v6853_v12 = vld [vmem:[#allocation2 + $0x298] sm:$0xff]  ;;  %v6886_v40 = vld [vmem:[#allocation2 + $0x3a0] sm:$0xff] }
 0x7ac   : > { %6740 = vst.msk [vmem:[#allocation2 + $0x320] sm:$0xff] %vm6639_vm3, %v6456_v48  ;;  %6707 = vst.msk [vmem:[#allocation2 + $0x218] sm:$0xff] %vm6639_vm3, %v6390_v52  ;;  %8479 = vmatprep.subr.mxu0 %v6853_v12  ;;  %8512 = vmatprep.subr.mxu1 %v6886_v40  ;;  %v16252_v48 = vld [vmem:[#allocation6] sm:$0xff]  ;;  %v7264_v12 = vadd.f32 %v7260_v34, %v16250_v63 }
 0x7ad   : > { %v7255_v52 = vld [vmem:[%s16227_s5] sm:$0xff] }
 0x7ae   : > { %v7259_v40 = vmul.f32 %v7255_v52, %v16252_v48  ;;  %v16312_v52 = vld [vmem:[#allocation9 + $0x10] sm:$0xff] }
 0x7af   : > { %v4917_v36 = vpop.permute.xlu1 %4916  ;;  %v4851_v1 = vpop.permute.xlu0 %4850 }
 0x7b0   : > { %5202 = vst.msk [vmem:[#allocation2 + $0x318] sm:$0xff] %vm5102_vm2, %v4917_v36  ;;  %5169 = vst.msk [vmem:[#allocation2 + $0x210] sm:$0xff] %vm5102_vm2, %v4851_v1  ;;  %v16258_v36 = vld [vmem:[#allocation3] sm:$0xff] }
 0x7b1   : > { %v7263_v1 = vadd.f32 %v7259_v40, %v16258_v36 }
 0x7b3   : > { %v6486_v26 = vpop.permute.xlu1 %6485  ;;  %v6420_v46 = vpop.permute.xlu0 %6419  ;;  %v6837_v0 = vld [vmem:[#allocation2 + $0x218] sm:$0xff]  ;;  %v6870_v2 = vld [vmem:[#allocation2 + $0x320] sm:$0xff] }
 0x7b4   : > { %6755 = vst.msk [vmem:[#allocation2 + $0x398] sm:$0xff] %vm6639_vm3, %v6486_v26  ;;  %6722 = vst.msk [vmem:[#allocation2 + $0x290] sm:$0xff] %vm6639_vm3, %v6420_v46  ;;  %8480 = vmatpush3.msra.mxu0 %v6837_v0  ;;  %8513 = vmatpush3.msra.mxu1 %v6870_v2  ;;  %v8417_v26 = vpop.f32.mrf.mxu0 }
 0x7b5   : > { %v8452_v46 = vpop.f32.mrf.mxu1 }
 0x7b6   : > { %v8418_v0 = vpop.f32.mrf.mxu0 }
 0x7b7   : > { %v4947_v30 = vpop.permute.xlu1 %4946  ;;  %v4881_v4 = vpop.permute.xlu0 %4880 }
 0x7b8   : > { %5217 = vst.msk [vmem:[#allocation2 + $0x390] sm:$0xff] %vm5102_vm2, %v4947_v30  ;;  %5184 = vst.msk [vmem:[#allocation2 + $0x288] sm:$0xff] %vm5102_vm2, %v4881_v4  ;;  %v7244_v30 = vld [vmem:[%s10232_s24] sm:$0x1]  ;;  %v8453_v4 = vpop.f32.mrf.mxu1 }
 0x7bb   : > { %v6454_v9 = vpop.permute.xlu1 %6453  ;;  %v6388_v41 = vpop.permute.xlu0 %6387  ;;  %v6852_v10 = vld [vmem:[#allocation2 + $0x290] sm:$0xff]  ;;  %v6885_v28 = vld [vmem:[#allocation2 + $0x398] sm:$0xff] }
 0x7bc   : > { %6739 = vst.msk [vmem:[#allocation2 + $0x318] sm:$0xff] %vm6639_vm3, %v6454_v9  ;;  %6706 = vst.msk [vmem:[#allocation2 + $0x210] sm:$0xff] %vm6639_vm3, %v6388_v41  ;;  %8481 = vmatprep.subr.mxu0 %v6852_v10  ;;  %8514 = vmatprep.subr.mxu1 %v6885_v28  ;;  %v7245_v9 = vmul.f32 %v7244_v30, %v16134_v7  ;;  %v8419_v10 = vadd.f32 %v8418_v0, %v8417_v26  ;;  %v16321_v0 = vld [vmem:[#allocation11] sm:$0xff] }
 0x7bd   : > { %v8454_v28 = vadd.f32 %v8453_v4, %v8452_v46  ;;  %v16319_v46 = vld [vmem:[#allocation9 + $0x8] sm:$0xff] }
 0x7bf   : > { %v4915_v56 = vpop.permute.xlu1 %4914  ;;  %v4849_v27 = vpop.permute.xlu0 %4848 }
 0x7c0   : > { %5201 = vst.msk [vmem:[#allocation2 + $0x310] sm:$0xff] %vm5102_vm2, %v4915_v56  ;;  %5168 = vst.msk [vmem:[#allocation2 + $0x208] sm:$0xff] %vm5102_vm2, %v4849_v27  ;;  %v7246_v27 = vadd.f32 %v7245_v9, %v16129_v32  ;;  %v16327_v9 = vld [vmem:[#allocation9] sm:$0xff] }
 0x7c3   : > { %v6484_v17 = vpop.permute.xlu1 %6483  ;;  %v6418_v25 = vpop.permute.xlu0 %6417  ;;  %v6836_v16 = vld [vmem:[#allocation2 + $0x210] sm:$0xff]  ;;  %v6869_v62 = vld [vmem:[#allocation2 + $0x318] sm:$0xff] }
 0x7c4   : > { %6754 = vst.msk [vmem:[#allocation2 + $0x390] sm:$0xff] %vm6639_vm3, %v6484_v17  ;;  %6721 = vst.msk [vmem:[#allocation2 + $0x288] sm:$0xff] %vm6639_vm3, %v6418_v25  ;;  %8482 = vmatpush3.msra.mxu0 %v6836_v16  ;;  %8515 = vmatpush3.msra.mxu1 %v6869_v62  ;;  %v7079_v16 = vadd.f32 %v8454_v28, %v8419_v10  ;;  %v8342_v62 = vld [vmem:[%s16227_s5 + $0x38] sm:$0xff]  ;;  %v8354_v28 = vld [vmem:[%s16227_s5 + $0x50] sm:$0xff] }
 0x7c5   : > { %v8355_v10 = vld [vmem:[%s16227_s5 + $0x58] sm:$0xff] }
 0x7c7   : > { %v4945_v6 = vpop.permute.xlu1 %4944  ;;  %v4879_v42 = vpop.permute.xlu0 %4878 }
 0x7c8   : > { %5216 = vst.msk [vmem:[#allocation2 + $0x388] sm:$0xff] %vm5102_vm2, %v4945_v6  ;;  %5183 = vst.msk [vmem:[#allocation2 + $0x280] sm:$0xff] %vm5102_vm2, %v4879_v42 }
 0x7cb   : > { %v6452_v13 = vpop.permute.xlu1 %6451  ;;  %v6386_v14 = vpop.permute.xlu0 %6385  ;;  %v6851_v29 = vld [vmem:[#allocation2 + $0x288] sm:$0xff]  ;;  %v6884_v43 = vld [vmem:[#allocation2 + $0x390] sm:$0xff] }
 0x7cc   : > { %6738 = vst.msk [vmem:[#allocation2 + $0x310] sm:$0xff] %vm6639_vm3, %v6452_v13  ;;  %6705 = vst.msk [vmem:[#allocation2 + $0x208] sm:$0xff] %vm6639_vm3, %v6386_v14  ;;  %8483 = vmatprep.subr.mxu0 %v6851_v29  ;;  %8516 = vmatprep.subr.mxu1 %v6884_v43  ;;  %v7251_v14 = vrot.slane %v7246_v27, %v16138_v61  ;;  %v8341_v43 = vld [vmem:[%s16227_s5 + $0x30] sm:$0xff]  ;;  %v8353_v27 = vld [vmem:[%s16227_s5 + $0x48] sm:$0xff] }
 0x7cf   : > { %v4913_v20 = vpop.permute.xlu1 %4912  ;;  %v4847_v33 = vpop.permute.xlu0 %4846 }
 0x7d0   : > { %5200 = vst.msk [vmem:[#allocation2 + $0x308] sm:$0xff] %vm5102_vm2, %v4913_v20  ;;  %5167 = vst.msk [vmem:[#allocation2 + $0x200] sm:$0xff] %vm5102_vm2, %v4847_v33  ;;  %v8340_v33 = vld [vmem:[%s16227_s5 + $0x28] sm:$0xff] }
 0x7d3   : > { %v6482_v57 = vpop.permute.xlu1 %6481  ;;  %v6416_v45 = vpop.permute.xlu0 %6415  ;;  %v6835_v21 = vld [vmem:[#allocation2 + $0x208] sm:$0xff]  ;;  %v6868_v50 = vld [vmem:[#allocation2 + $0x310] sm:$0xff] }
 0x7d4   : > { %6753 = vst.msk [vmem:[#allocation2 + $0x388] sm:$0xff] %vm6639_vm3, %v6482_v57  ;;  %6720 = vst.msk [vmem:[#allocation2 + $0x280] sm:$0xff] %vm6639_vm3, %v6416_v45  ;;  %8484 = vmatpush3.msra.mxu0 %v6835_v21  ;;  %8517 = vmatpush3.msra.mxu1 %v6868_v50  ;;  %v7466_v50 = vmul.f32 %v8341_v43, %v16235_v58 }
 0x7d7   : > { %v6384_v23 = vpop.permute.xlu1 %6383  ;;  %v4943_v3 = vpop.permute.xlu0 %4942 }
 0x7d8   : > { %6704 = vst.msk [vmem:[#allocation2 + $0x200] sm:$0xff] %vm6639_vm3, %v6384_v23 }
 0x7d9   : > { %5215 = vst.msk [vmem:[#allocation2 + $0x380] sm:$0xff] %vm5102_vm2, %v4943_v3  ;;  %v7465_v3 = vmul.f32 %v8340_v33, %v16243_v60 }
 0x7db   : > { %v4911_v38 = vpop.permute.xlu1 %4910  ;;  %v6450_v55 = vpop.permute.xlu0 %6449  ;;  %v6850_v35 = vld [vmem:[#allocation2 + $0x280] sm:$0xff]  ;;  %v6883_v39 = vld [vmem:[#allocation2 + $0x388] sm:$0xff] }
 0x7dc   : > { %5199 = vst.msk [vmem:[#allocation2 + $0x300] sm:$0xff] %vm5102_vm2, %v4911_v38  ;;  %8485 = vmatprep.subr.mxu0 %v6850_v35  ;;  %8518 = vmatprep.subr.mxu1 %v6883_v39  ;;  %v8339_v38 = vld [vmem:[%s16227_s5 + $0x20] sm:$0xff] }
 0x7dd   : > { %6737 = vst.msk [vmem:[#allocation2 + $0x308] sm:$0xff] %vm6639_vm3, %v6450_v55 }
 0x7df   : > { %v6448_v15 = vpop.permute.xlu1 %6447  ;;  %v6480_v31 = vpop.permute.xlu0 %6479  ;;  %v6834_v47 = vld [vmem:[#allocation2 + $0x200] sm:$0xff] }
 0x7e0   : > { %6736 = vst.msk [vmem:[#allocation2 + $0x300] sm:$0xff] %vm6639_vm3, %v6448_v15  ;;  %6752 = vst.msk [vmem:[#allocation2 + $0x380] sm:$0xff] %vm6639_vm3, %v6480_v31  ;;  %8486 = vmatpush3.msra.mxu0 %v6834_v47  ;;  %v7470_v31 = vadd.f32 %v7466_v50, %v16241_v54  ;;  %v7464_v47 = vmul.f32 %v8339_v38, %v16252_v48 }
 0x7e1   : > { %7147 = vmatmul.mubr.f32.vlgmr.msra.gmra.mxu0 %v16085_v11  ;;  %v16229_v11 = vld [vmem:[#allocation6 + $0x18] sm:$0xff]  ;;  %8565 = vmatprep.subr.mxu0 %v9623_v5 }
 0x7e2   : > { %8573 = vmatprep.mubr.msk.f32.mxu0 %vm9624_vm4, %v9623_v5  ;;  %v7467_v7 = vmul.f32 %v8342_v62, %v16229_v11  ;;  %v7675_v62 = vmul.f32 %v8353_v27, %v16243_v60 }
 0x7e3   : > { %v7455_v25 = vpop.permute.xlu0 %7454  ;;  %v7665_v29 = vpop.permute.xlu1 %7664 }
 0x7e4   : > { %v6867_v8 = vld [vmem:[#allocation2 + $0x308] sm:$0xff]  ;;  %v7471_v23 = vadd.f32 %v7467_v7, %v16233_v53  ;;  %v7679_v7 = vadd.f32 %v7675_v62, %v16250_v63 }
 0x7e5   : > { %8519 = vmatpush3.msra.mxu1 %v6867_v8 }
 0x7e7   : > { %v6882_v37 = vld [vmem:[#allocation2 + $0x380] sm:$0xff]  ;;  %v7875_v57 = vpop.permute.xlu0 %7874 }
 0x7e8   : > { %v6866_v49 = vld [vmem:[#allocation2 + $0x300] sm:$0xff]  ;;  %8520 = vmatprep.subr.mxu1 %v6882_v37  ;;  %v7469_v37 = vadd.f32 %v7465_v3, %v16250_v63 }
 0x7e9   : > { %8521 = vmatpush3.msra.mxu1 %v6866_v49  ;;  %v16295_v49 = vld [vmem:[#allocation11 + $0x18] sm:$0xff] }
 0x7ea   : > { %7217 = vmatmul.mubr.f32.vlgmr.msra.gmra.mxu1 %v16113_v18  ;;  %v7262_v18 = vmul.f32 %v7258_v59, %v16229_v11  ;;  %8576 = vmatprep.subr.mxu1 %v9623_v5  ;;  %v7468_v59 = vadd.f32 %v7464_v47, %v16258_v36 }
 0x7eb   : > { %8584 = vmatprep.mubr.msk.f32.mxu1 %vm9624_vm4, %v9623_v5 }
 0x7ec   : > { %v7266_v22 = vadd.f32 %v7262_v18, %v16233_v53  ;;  %v16299_v18 = vld [vmem:[#allocation9 + $0x18] sm:$0xff] }
 0x7ee   : > { %8566 = vmatpush3.msra.mxu0 %v7266_v22 }
 0x7ef   : > { %8567 = vmatprep.subr.mxu0 %v9623_v5 }
 0x7f0   : > { %8568 = vmatpush3.msra.mxu0 %v7265_v19 }
 0x7f1   : > { %8569 = vmatprep.subr.mxu0 %v9623_v5 }
 0x7f2   : > { %8570 = vmatpush3.msra.mxu0 %v7264_v12  ;;  %v16314_v12 = vld [vmem:[#allocation11 + $0x8] sm:$0xff] }
 0x7f3   : > { %8571 = vmatprep.subr.mxu0 %v9623_v5 }
 0x7f4   : > { %8572 = vmatpush3.msra.mxu0 %v7263_v1 }
 0x7f5   : > { %8587 = vmatprep.subr.mxu0 %v9623_v5 }
 0x8a1   : > { %v8487_v2 = vpop.f32.mrf.mxu0 }
 0x8a3   : > { %v8488_v41 = vpop.f32.mrf.mxu0 }
 0x8a4   : > { %v8489_v56 = vadd.f32 %v8488_v41, %v8487_v2 }
 0x8a6   : > { %v7149_v42 = vadd.f32 %v8489_v56, %v7079_v16  ;;  %v7677_v56 = vmul.f32 %v8355_v10, %v16229_v11 }
 0x8a8   : > { %v7681_v16 = vadd.f32 %v7677_v56, %v16233_v53 }
 0x8aa   : > { %v8522_v17 = vpop.f32.mrf.mxu1 }
 0x8ac   : > { %v8523_v6 = vpop.f32.mrf.mxu1 }
 0x8ad   : > { %v8524_v13 = vadd.f32 %v8523_v6, %v8522_v17  ;;  %v7676_v17 = vmul.f32 %v8354_v28, %v16235_v58  ;;  %v8368_v6 = vld [vmem:[%s16227_s5 + $0x78] sm:$0xff] }
 0x8ae   : > { %v7887_v43 = vmul.f32 %v8368_v6, %v16229_v11 }
 0x8af   : > { %v7219_v20 = vadd.f32 %v8524_v13, %v7149_v42  ;;  %v7680_v13 = vadd.f32 %v7676_v17, %v16241_v54 }
 0x8b1   : > { %v7253_v45 = vadd.f32 %v7251_v14, %v7219_v20  ;;  %v7457_v21 = vadd.f32 %v7455_v25, %v7219_v20  ;;  %v7667_v32 = vadd.f32 %v7665_v29, %v7219_v20  ;;  %v7877_v15 = vadd.f32 %v7875_v57, %v7219_v20  ;;  %v8352_v25 = vld [vmem:[%s16227_s5 + $0x40] sm:$0xff]  ;;  %v8367_v29 = vld [vmem:[%s16227_s5 + $0x70] sm:$0xff]  ;;  %v8366_v20 = vld [vmem:[%s16227_s5 + $0x68] sm:$0xff] }
 0x8b2   : > { %v7674_v14 = vmul.f32 %v8352_v25, %v16252_v48  ;;  %v7886_v57 = vmul.f32 %v8367_v29, %v16235_v58 }
 0x8b3   : > { %v7254_v55 = vmax.f32 %v7253_v45, 0.0  ;;  %v7458_v35 = vmax.f32 %v7457_v21, 0.0  ;;  %v7668_v39 = vmax.f32 %v7667_v32, 0.0  ;;  %v7878_v8 = vmax.f32 %v7877_v15, 0.0  ;;  %v8365_v45 = vld [vmem:[%s16227_s5 + $0x60] sm:$0xff]  ;;  %s8328_s5 = sshll.u32 %s10223_s8, 3 }
 0x8b4   : > { %v7678_v33 = vadd.f32 %v7674_v14, %v16258_v36  ;;  %v7891_v21 = vadd.f32 %v7887_v43, %v16233_v53  ;;  %v7885_v32 = vmul.f32 %v8366_v20, %v16243_v60  ;;  %v7890_v11 = vadd.f32 %v7886_v57, %v16241_v54  ;;  %v7233_v60 = vld [vmem:[#allocation8] sm:$0x1]  ;;  %s1366_s24 = scalar_lea.vmem [#allocation19], %s8328_s5 }
 0x8b5   : > { %7693 = vrot.lane.b32.xlu0 %v7668_v39, %s9621_s17  ;;  %7483 = vrot.lane.b32.xlu1 %v7458_v35, %s9619_s23  ;;  %s16293_s23 = scalar_lea.vmem %s17253_s2, %s8383_s27  ;;  %s17257_s17 = sld [smem:[#allocation29_spill]] }
 0x8b6   : > { %8574 = vmatmul.mubr.msk.f32.vlgmr.msra.gmra.mxu0 %vm2028_vm0, %v7254_v55  ;;  %v7353_v24 = vld [vmem:[%s16293_s23 + $0x18] sm:$0xff]  ;;  %v7352_v19 = vld [vmem:[%s16293_s23 + $0x10] sm:$0xff]  ;;  %v7351_v40 = vld [vmem:[%s16293_s23 + $0x8] sm:$0xff]  ;;  %v7889_v58 = vadd.f32 %v7885_v32, %v16250_v63  ;;  %s8378_s2 = sshll.u32 %s9747_s1, 7 }
 0x8b7   : > { %8588 = vmatpush3.msra.mxu0 %v7471_v23  ;;  %8595 = vmatprep.mubr.msk.f32.mxu0 %vm9624_vm4, %v9623_v5  ;;  %v7357_v22 = vmul.f32 %v7353_v24, %v16295_v49  ;;  %v7356_v34 = vmul.f32 %v7352_v19, %v16308_v44  ;;  %v7355_v26 = vmul.f32 %v7351_v40, %v16314_v12  ;;  %v7350_v2 = vld [vmem:[%s16293_s23] sm:$0xff]  ;;  %v8348_v38 = vld [vmem:[%s16293_s23 + $0x38] sm:$0xff]  ;;  %v8347_v35 = vld [vmem:[%s16293_s23 + $0x30] sm:$0xff] }
 0x8b8   : > { %8589 = vmatprep.subr.mxu0 %v9623_v5  ;;  %v7354_v4 = vmul.f32 %v7350_v2, %v16321_v0  ;;  %v7884_v23 = vmul.f32 %v8365_v45, %v16252_v48  ;;  %v7267_v63 = vld [vmem:[%s16374_s28] sm:$0x1]  ;;  %v7566_v39 = vmul.f32 %v8348_v38, %v16295_v49  ;;  %v8346_v15 = vld [vmem:[%s16293_s23 + $0x28] sm:$0xff]  ;;  %v7565_v47 = vmul.f32 %v8347_v35, %v16308_v44  ;;  %v8360_v56 = vld [vmem:[%s16293_s23 + $0x50] sm:$0xff] }
 0x8b9   : > { %7903 = vrot.lane.b32.xlu1 %v7878_v8, %s9620_s16  ;;  %8590 = vmatpush3.msra.mxu0 %v7470_v31  ;;  %v7361_v51 = vadd.f32 %v7357_v22, %v16299_v18  ;;  %v7360_v1 = vadd.f32 %v7356_v34, %v16312_v52  ;;  %v7359_v30 = vadd.f32 %v7355_v26, %v16319_v46  ;;  %v8343_v26 = vld [vmem:[%s16374_s28 + $0x1] sm:$0x1]  ;;  %v8359_v17 = vld [vmem:[%s16293_s23 + $0x48] sm:$0xff]  ;;  %v8374_v20 = vld [vmem:[%s16293_s23 + $0x78] sm:$0xff] }
 0x8ba   : > { %8591 = vmatprep.subr.mxu0 %v9623_v5  ;;  %v7358_v41 = vadd.f32 %v7354_v4, %v16327_v9  ;;  %v7888_v53 = vadd.f32 %v7884_v23, %v16258_v36  ;;  %v7268_v48 = vmul.f32 %v7267_v63, %v7233_v60  ;;  %v16380_v36 = vld [vmem:[%s17255_s6] sm:$0x1]  ;;  %v7570_v24 = vadd.f32 %v7566_v39, %v16299_v18  ;;  %v8356_v4 = vld [vmem:[%s16374_s28 + $0x2] sm:$0x1]  ;;  %v8373_v32 = vld [vmem:[%s16293_s23 + $0x70] sm:$0xff]  ;;  %s9625_s6 = smov [#allocation19]  }
 0x8bb   : > { %8592 = vmatpush3.msra.mxu0 %v7469_v37  ;;  %8577 = vmatpush3.msra.mxu1 %v7361_v51  ;;  %v8345_v37 = vld [vmem:[%s16293_s23 + $0x20] sm:$0xff]  ;;  %v7564_v22 = vmul.f32 %v8346_v15, %v16314_v12  ;;  %v7569_v19 = vadd.f32 %v7565_v47, %v16312_v52  ;;  %v7474_v2 = vmul.f32 %v8343_v26, %v7233_v60  ;;  %v8372_v23 = vld [vmem:[%s16293_s23 + $0x68] sm:$0xff]  ;;  %p17259_p6 = scmp.ne.s32.totalorder %s17257_s17, 0  ;;  %s9528_s0 = sshll.u32 %s9625_s6, 4  ;;  %s9529_s0 = int_to_ptr.vmem [resolvable:$false] %s9528_s0 }
 0x8bc   : > { %8593 = vmatprep.subr.mxu0 %v9623_v5  ;;  %8578 = vmatprep.subr.mxu1 %v9623_v5  ;;  %v7269_v3 = vadd.f32 %v7268_v48, %v16380_v36  ;;  %v7563_v34 = vmul.f32 %v8345_v37, %v16321_v0  ;;  %v7684_v28 = vmul.f32 %v8356_v4, %v7233_v60  ;;  %v8371_v48 = vld [vmem:[%s16293_s23 + $0x60] sm:$0xff]  ;;  %s9530_s1 = scalar_lea.vmem %s9529_s0, 256 }
 0x8bd   : > { %8594 = vmatpush3.msra.mxu0 %v7468_v59  ;;  %8579 = vmatpush3.msra.mxu1 %v7360_v1  ;;  %v7568_v40 = vadd.f32 %v7564_v22, %v16319_v46  ;;  %v7774_v29 = vmul.f32 %v8359_v17, %v16314_v12 }
 0x8be   : > { %8609 = vmatprep.subr.mxu0 %v9623_v5  ;;  %8580 = vmatprep.subr.mxu1 %v9623_v5  ;;  %v7274_v55 = vrot.slane %v7269_v3, %v16138_v61  ;;  %v7567_v1 = vadd.f32 %v7563_v34, %v16327_v9  ;;  %v7685_v6 = vadd.f32 %v7684_v28, %v16380_v36  ;;  %v8362_v34 = vld [vmem:[%s1287_s19 + $0x2] sm:$0x1] }
 0x8bf   : > { %8581 = vmatpush3.msra.mxu1 %v7359_v30  ;;  %v7475_v30 = vadd.f32 %v7474_v2, %v16380_v36 }
 0x8c0   : > { %8582 = vmatprep.subr.mxu1 %v9623_v5  ;;  %v7690_v45 = vrot.slane %v7685_v6, %v16138_v61 }
 0x8c1   : > { %8583 = vmatpush3.msra.mxu1 %v7358_v41  ;;  %v8361_v41 = vld [vmem:[%s16293_s23 + $0x58] sm:$0xff]  ;;  %v7480_v10 = vrot.slane %v7475_v30, %v16138_v61 }
 0x8c2   : > { %8598 = vmatprep.subr.mxu1 %v9623_v5  ;;  %v7776_v27 = vmul.f32 %v8361_v41, %v16295_v49  ;;  %v8375_v41 = vld [vmem:[%s1287_s19 + $0x3] sm:$0x1] }
 0x8c4   : > { %v7780_v14 = vadd.f32 %v7776_v27, %v16299_v18 }
 0x927   : > { %v7484_v42 = vpop.permute.xlu1 %7483  ;;  %v7694_v50 = vpop.permute.xlu0 %7693 }
 0x928   : > { %8596 = vmatmul.mubr.msk.f32.vlgmr.msra.gmra.mxu0 %vm2028_vm0, %v7484_v42  ;;  %v8358_v42 = vld [vmem:[%s16293_s23 + $0x40] sm:$0xff]  ;;  %s8089_s23 = sshll.u32 %s1366_s24, 4  ;;  %s8090_s23 = int_to_ptr.vmem [resolvable:$true] %s8089_s23 }
 0x929   : > { %8610 = vmatpush3.msra.mxu0 %v7681_v16  ;;  %8617 = vmatprep.mubr.msk.f32.mxu0 %vm9624_vm4, %v9623_v5  ;;  %v7775_v16 = vmul.f32 %v8360_v56, %v16308_v44  ;;  %v7773_v57 = vmul.f32 %v8358_v42, %v16321_v0  ;;  %s9524_s27 = scalar_lea.vmem %s8090_s23, 128  ;;  %p9531_p3 = scmp.lt.s32.totalorder %s8090_s23, %s9529_s0 }
 0x92a   : > { %8611 = vmatprep.subr.mxu0 %v9623_v5  ;;  %p9525_p11 = scmp.ne.s32.totalorder %s8090_s23, %s9524_s27  ;;  %p9532_p7 = scmp.lt.s32.totalorder %s9530_s1, %s9524_s27 }
 0x92b   : > { %8612 = vmatpush3.msra.mxu0 %v7680_v13  ;;  %v7904_v54 = vpop.permute.xlu1 %7903 }
 0x92c   : > { %8613 = vmatprep.subr.mxu0 %v9623_v5  ;;  %p9526_p5 = pnand %p9525_p11, %p17259_p6  ;;  %p9533_p9 = por %p9532_p7, %p9531_p3 }
 0x92d   : > { %8614 = vmatpush3.msra.mxu0 %v7679_v7  ;;  %v8369_v7 = vld [vmem:[%s16374_s28 + $0x3] sm:$0x1]  ;;  %s16461_s28 = scalar_lea.hbm %s17258_s22, %s8378_s2 }
 0x92e   : > { %8615 = vmatprep.subr.mxu0 %v9623_v5  ;;  %p9527_p13 = pneg %p9526_p5 }
 0x92f   : > { %8616 = vmatpush3.msra.mxu0 %v7678_v33  ;;  %v7779_v33 = vadd.f32 %v7775_v16, %v16312_v52 }
 0x930   : > { %8618 = vmatmul.mubr.msk.f32.vlgmr.msra.gmra.mxu0 %vm2028_vm0, %v7694_v50  ;;  %8631 = vmatprep.subr.mxu0 %v9623_v5  ;;  %v7778_v50 = vadd.f32 %v7774_v29, %v16319_v46  ;;  %p9534_p8 = pnand %p9533_p9, %p9527_p13 }
 0x931   : > { %8632 = vmatpush3.msra.mxu0 %v7891_v21  ;;  %8639 = vmatprep.mubr.msk.f32.mxu0 %vm9624_vm4, %v9623_v5  ;;  %v7894_v21 = vmul.f32 %v8369_v7, %v7233_v60 }
 0x932   : > { %8633 = vmatprep.subr.mxu0 %v9623_v5 }
 0x933   : > { %8634 = vmatpush3.msra.mxu0 %v7890_v11  ;;  %v7986_v11 = vmul.f32 %v8374_v20, %v16295_v49  ;;  %v7895_v60 = vadd.f32 %v7894_v21, %v16380_v36  ;;  %v7984_v49 = vmul.f32 %v8372_v23, %v16314_v12 }
 0x934   : > { %8635 = vmatprep.subr.mxu0 %v9623_v5 }
 0x935   : > { %8636 = vmatpush3.msra.mxu0 %v7889_v58  ;;  %v7990_v38 = vadd.f32 %v7986_v11, %v16299_v18  ;;  %v7900_v36 = vrot.slane %v7895_v60, %v16138_v61  ;;  %v7988_v18 = vadd.f32 %v7984_v49, %v16319_v46  ;;  %v7243_v46 = vld [vmem:[#allocation14] sm:$0x1] }
 0x936   : > { %8637 = vmatprep.subr.mxu0 %v9623_v5  ;;  %v7993_v28 = vmul.f32 %v8375_v41, %v7243_v46 }
 0x937   : > { %8638 = vmatpush3.msra.mxu0 %v7888_v53  ;;  %v7777_v53 = vadd.f32 %v7773_v57, %v16327_v9 }
 0x938   : > { %8640 = vmatmul.mubr.msk.f32.vlgmr.msra.gmra.mxu0 %vm2028_vm0, %v7904_v54  ;;  %v7985_v54 = vmul.f32 %v8373_v32, %v16308_v44  ;;  %v7983_v44 = vmul.f32 %v8371_v48, %v16321_v0 }
 0x93a   : > { %v7989_v35 = vadd.f32 %v7985_v54, %v16312_v52  ;;  %v7987_v52 = vadd.f32 %v7983_v44, %v16327_v9 }
 0x976   : > { %v7345_v31 = vpop.f32.mrf.mxu0 }
 0x977   : > { %v7346_v8 = vadd.f32 %v7345_v31, %v7274_v55  ;;  %v7362_v31 = vld [vmem:[%s1287_s19] sm:$0x1] }
 0x978   : > { %v8575_v59 = vpop.f32.mrf.mxu0  ;;  %v7363_v47 = vmul.f32 %v7362_v31, %v7243_v46 }
 0x979   : > { %v7349_v51 = vmax.f32 %v7346_v8, 0.0  ;;  %v7242_v8 = vld [vmem:[#allocation12] sm:$0x1] }
 0x97a   : > { %v7364_v37 = vadd.f32 %v7363_v47, %v7242_v8  ;;  %v7994_v17 = vadd.f32 %v7993_v28, %v7242_v8 }
 0x97b   : > { %8585 = vmatmul.mubr.msk.f32.vlgmr.msra.gmra.mxu1 %vm2028_vm0, %v7349_v51  ;;  %v8349_v51 = vld [vmem:[%s1287_s19 + $0x1] sm:$0x1] }
 0x97c   : > { %8599 = vmatpush3.msra.mxu1 %v7570_v24  ;;  %8606 = vmatprep.mubr.msk.f32.mxu1 %vm9624_vm4, %v9623_v5  ;;  %v7369_v9 = vrot.slane %v7364_v37, %v16138_v61  ;;  %v7999_v16 = vrot.slane %v7994_v17, %v16138_v61 }
 0x97d   : > { %8600 = vmatprep.subr.mxu1 %v9623_v5 }
 0x97e   : > { %8601 = vmatpush3.msra.mxu1 %v7569_v19 }
 0x97f   : > { %8602 = vmatprep.subr.mxu1 %v9623_v5 }
 0x980   : > { %8603 = vmatpush3.msra.mxu1 %v7568_v40 }
 0x981   : > { %8604 = vmatprep.subr.mxu1 %v9623_v5 }
 0x982   : > { %8605 = vmatpush3.msra.mxu1 %v7567_v1  ;;  %v7783_v1 = vmul.f32 %v8362_v34, %v7243_v46 }
 0x983   : > { %8620 = vmatprep.subr.mxu1 %v9623_v5 }
 0x984   : > { %v7784_v30 = vadd.f32 %v7783_v1, %v7242_v8 }
 0x9e8   : > { %v7553_v25 = vpop.f32.mrf.mxu0 }
 0x9e9   : > { %v7554_v62 = vadd.f32 %v7553_v25, %v7480_v10  ;;  %v7789_v10 = vrot.slane %v7784_v30, %v16138_v61 }
 0x9ea   : > { %v8597_v13 = vpop.f32.mrf.mxu0 }
 0x9eb   : > { %v7557_v43 = vmax.f32 %v7554_v62, 0.0 }
 0x9ed   : > { %8607 = vmatmul.mubr.msk.f32.vlgmr.msra.gmra.mxu1 %vm2028_vm0, %v7557_v43 }
 0x9ee   : > { %8621 = vmatpush3.msra.mxu1 %v7780_v14  ;;  %8628 = vmatprep.mubr.msk.f32.mxu1 %vm9624_vm4, %v9623_v5 }
 0x9ef   : > { %8622 = vmatprep.subr.mxu1 %v9623_v5 }
 0x9f0   : > { %v7763_v58 = vpop.f32.mrf.mxu0  ;;  %8623 = vmatpush3.msra.mxu1 %v7779_v33 }
 0x9f1   : > { %v7764_v63 = vadd.f32 %v7763_v58, %v7690_v45  ;;  %8624 = vmatprep.subr.mxu1 %v9623_v5 }
 0x9f2   : > { %v8619_v3 = vpop.f32.mrf.mxu0  ;;  %8625 = vmatpush3.msra.mxu1 %v7778_v50 }
 0x9f3   : > { %v7767_v55 = vmax.f32 %v7764_v63, 0.0  ;;  %8626 = vmatprep.subr.mxu1 %v9623_v5 }
 0x9f4   : > { %8627 = vmatpush3.msra.mxu1 %v7777_v53 }
 0x9f5   : > { %8629 = vmatmul.mubr.msk.f32.vlgmr.msra.gmra.mxu1 %vm2028_vm0, %v7767_v55  ;;  %8642 = vmatprep.subr.mxu1 %v9623_v5 }
 0x9f6   : > { %8643 = vmatpush3.msra.mxu1 %v7990_v38  ;;  %8650 = vmatprep.mubr.msk.f32.mxu1 %vm9624_vm4, %v9623_v5 }
 0x9f7   : > { %8644 = vmatprep.subr.mxu1 %v9623_v5 }
 0x9f8   : > { %v7973_v12 = vpop.f32.mrf.mxu0  ;;  %8645 = vmatpush3.msra.mxu1 %v7989_v35 }
 0x9f9   : > { %v7974_v0 = vadd.f32 %v7973_v12, %v7900_v36  ;;  %8646 = vmatprep.subr.mxu1 %v9623_v5 }
 0x9fa   : > { %v8641_v39 = vpop.f32.mrf.mxu0  ;;  %8647 = vmatpush3.msra.mxu1 %v7988_v18 }
 0x9fb   : > { %v7977_v15 = vmax.f32 %v7974_v0, 0.0  ;;  %8648 = vmatprep.subr.mxu1 %v9623_v5  ;;  %v7573_v5 = vmul.f32 %v8349_v51, %v7243_v46 }
 0x9fc   : > { %8649 = vmatpush3.msra.mxu1 %v7987_v52 }
 0x9fd   : > { %8651 = vmatmul.mubr.msk.f32.vlgmr.msra.gmra.mxu1 %vm2028_vm0, %v7977_v15  ;;  %v7574_v19 = vadd.f32 %v7573_v5, %v7242_v8 }
 0x9ff   : > { %v7579_v40 = vrot.slane %v7574_v19, %v16138_v61 }
 0xa3b   : > { %v7440_v59 = vpop.f32.mrf.mxu1 }
 0xa3c   : > { %v7441_v24 = vadd.f32 %v7440_v59, %v7369_v9 }
 0xa3d   : > { %v8586_v22 = vpop.f32.mrf.mxu1 }
 0xa3e   : > { %7444 = vst [vmem:[%s1366_s24] sm:$0x3] %v7441_v24 }
 0xaad   : > { %v7650_v26 = vpop.f32.mrf.mxu1 }
 0xaae   : > { %v7651_v2 = vadd.f32 %v7650_v26, %v7579_v40 }
 0xaaf   : > { %v8608_v4 = vpop.f32.mrf.mxu1 }
 0xab0   : > { %7654 = vst [vmem:[%s1366_s24 + $0x2] sm:$0x3] %v7651_v2 }
 0xab5   : > { %v7860_v56 = vpop.f32.mrf.mxu1 }
 0xab6   : > { %v7861_v27 = vadd.f32 %v7860_v56, %v7789_v10 }
 0xab7   : > { %v8630_v25 = vpop.f32.mrf.mxu1 }
 0xab8   : > { %7864 = vst [vmem:[%s1366_s24 + $0x4] sm:$0x3] %v7861_v27 }
 0xabd   : > { %v8070_v62 = vpop.f32.mrf.mxu1 }
 0xabe   : > { %v8071_v6 = vadd.f32 %v8070_v62, %v7999_v16 }
 0xabf   : > { %v8652_v42 = vpop.f32.mrf.mxu1 }
 0xac0   : > { %8074 = vst [vmem:[%s1366_s24 + $0x6] sm:$0x3] %v8071_v6 }
 0xac1   : > { %9537 = shalt.err (!%p9534_p8)
}
 0xac2   : > { %s9538_s19 = scalar_lea.hbm %s16461_s28, 128  ;;  %s9542_s24 = scalar_lea.hbm %s17258_s22, 256 }
 0xac3   : > { %p9539_p1 = scmp.ne.s32.totalorder %s16461_s28, %s9538_s19  ;;  %p9543_p2 = scmp.lt.s32.totalorder %s16461_s28, %s17258_s22 }
 0xac4   : > { %p9544_p12 = scmp.lt.s32.totalorder %s9542_s24, %s9538_s19 }
 0xac5   : > { %p9540_p4 = pnand %p9539_p1, %p17259_p6 }
 0xac6   : > { %p9545_p11 = por %p9544_p12, %p9543_p2 }
 0xac7   : > { %p9541_p0 = pneg %p9540_p4 }
 0xac9   : > { %p9546_p5 = pnand %p9545_p11, %p9541_p0 }
 0xacb   : > { %9549 = shalt.err (!%p9546_p5)
}
 0xacc   : > { %8685 = dma.vmem_to_hbm [thread:$0]  (%p17259_p6), %s8090_s23, 128, %s16461_s28, %s8076_s25  }
 0xacd PF: > { %s17260_s26 = sld [smem:[#allocation26_spill]] }
 0xace   : > { %s17261_s27 = sld [smem:[#allocation30_spill]] }
 0xad3   : > { %s8101_s6 = sand.u32 1, %s17260_s26  }
 0xad4   : > { %p17262_p13 = scmp.ne.s32.totalorder %s17261_s27, 0  ;;  %s8102_s0 = scalar_lea.sflag [#allocation5], %s8101_s6 }
 0xad6   : > { %p8710_p3 = pnand %p8308_p10, %p17262_p13 }
 0xad8   : > { %p8711_p7 = pneg %p8710_p3 }
 0xada   : > { %9587 = dma.done.wait (%p8711_p7), %s8102_s0, 128  }
 0xadb   : > { %9589 = vsyncadd (%p8711_p7), %s8102_s0, 4294967168  ;;  %s17263_s21 = sld [smem:[#allocation27_spill]]  ;;  %s17265_s0 = smov %s9596_s30 }
 0xadc   : > { %s17264_s1 = sld [smem:[#allocation28_spill]]  ;;  %s17266_s30 = smov %s9600_s20 }
 0xae1   : > { %p36_p9 = scmp.ge.s32.totalorder %s17263_s21, 4  }
 0xae2   : > { %s17267_s20 = smov %s17264_s1 }
 0xae3   :  { %38 = sbr.rel (!%p36_p9) target bundleno = 21 (0x15), region = 251 }
 0xae8   :  { %8107 = vsyncpa [#allocation4], 1 }
 0xae9   :  { %8109 = vsyncpa [#allocation4 + $0x1], 1 }
 0xaea   :  { %8110 = vsyncpa [#allocation7], 1 }
 0xaeb   :  { %8111 = vsyncpa [#allocation10], 1 }
 0xaec   :  { %8112 = vsyncpa [#allocation13], 1 }
 0xaed   :  { %8113 = vsyncpa [#allocation17], 1 }
 0xaee   :  { %8115 = vsyncpa [#allocation17 + $0x1], 1 }
 0xaef   :  { %8116 = vsyncpa [#allocation5], 1 }
 0xaf0   :  { %8118 = vsyncpa [#allocation5 + $0x1], 1 }

</bundles_post_ra>
